<compile_context>
chip_gen: v7x
topology: tpu7x:2x2x1
jax: 0.10.0
libtpu: 0.0.40
codegen_flags: <defaults>
</compile_context>

<pallas_src>
import functools

import jax
import jax.numpy as jnp
from jax.experimental import pallas as pl
from jax.experimental.pallas import tpu as pltpu


_LANE_TILE = 512  # lane tile (multiple of 128); comfortably inside v7x's 64 MiB VMEM.


def _lane_tile(m):
    return _LANE_TILE if m > _LANE_TILE else m


# ----------------------------------------------------------------------------
# Pallas kernels
# ----------------------------------------------------------------------------

def _conv_bn_kernel(xt_ref, w_ref, scale_ref, bias_ref, *rest, n_taps, relu, fuse_res):
    # xt_ref: (T, Cin, TM) bf16 shifted taps; w_ref: (T, Cout, Cin) bf16
    # scale/bias: (Cout, 1) f32; optional res_ref: (Cout, TM); o_ref: (Cout, TM)
    if fuse_res:
        res_ref, o_ref = rest
    else:
        (o_ref,) = rest
    acc = jnp.dot(w_ref[0], xt_ref[0], preferred_element_type=jnp.float32)
    for t in range(1, n_taps):
        acc = acc + jnp.dot(w_ref[t], xt_ref[t], preferred_element_type=jnp.float32)
    y = acc * scale_ref[...] + bias_ref[...]          # folded BN (f32 epilogue)
    if fuse_res:
        y = y + res_ref[...].astype(jnp.float32)      # fused residual add
    if relu:
        y = jnp.maximum(y, 0.0)
    o_ref[...] = y.astype(o_ref.dtype)


def _maxpool_kernel(xt_ref, o_ref, *, n_taps):
    # xt_ref: (9, C, TM) -> elementwise max over the 9 window taps (3x3 max-pool).
    r = xt_ref[0]
    for t in range(1, n_taps):
        r = jnp.maximum(r, xt_ref[t])
    o_ref[...] = r


def _se_tail_kernel(y_ref, id_ref, w1_ref, b1_ref, w2_ref, b2_ref, o_ref):
    # y/id/o: (C, N, HW) — channels on sublanes, HW on lanes.
    # Fused: global-avg-pool -> fc1 -> relu -> fc2 -> sigmoid -> y*gate + identity -> relu.
    y = y_ref[...].astype(jnp.float32)
    pooled = jnp.mean(y, axis=2)                                              # (C, N)
    h = jnp.dot(w1_ref[...], pooled, preferred_element_type=jnp.float32) + b1_ref[...]
    h = jnp.maximum(h, 0.0)
    g = jax.nn.sigmoid(
        jnp.dot(w2_ref[...], h, preferred_element_type=jnp.float32) + b2_ref[...])
    out = y * g[:, :, None] + id_ref[...].astype(jnp.float32)
    o_ref[...] = jnp.maximum(out, 0.0).astype(o_ref.dtype)


def _head_kernel(x_ref, w_ref, b_ref, o_ref):
    # x_ref: (C, N, 49) -> 7x7 average pool (mean over HW) + Linear; output (nc, N).
    pooled = jnp.mean(x_ref[...].astype(jnp.float32), axis=2)                 # (C, N)
    o_ref[...] = jnp.dot(w_ref[...], pooled, preferred_element_type=jnp.float32) + b_ref[...]


# ----------------------------------------------------------------------------
# pallas_call wrappers
# ----------------------------------------------------------------------------

def _window_taps(x, kh, kw, stride, pad, pad_value=0.0):
    """x: (C, N, H, W). Returns (kh*kw, C, N*OH*OW) shifted views + (OH, OW). XLA glue."""
    C, N, H, W = x.shape
    OH = (H + 2 * pad - kh) // stride + 1
    OW = (W + 2 * pad - kw) // stride + 1
    if kh == 1 and kw == 1 and pad == 0:
        if stride == 1:
            return x.reshape(1, C, N * H * W), OH, OW                         # free reshape
        return x[:, :, ::stride, ::stride].reshape(1, C, N * OH * OW), OH, OW
    xp = jnp.pad(x, ((0, 0), (0, 0), (pad, pad), (pad, pad)), constant_values=pad_value)
    taps = []
    for i in range(kh):
        for j in range(kw):
            taps.append(xp[:, :, i:i + stride * OH:stride, j:j + stride * OW:stride])
    return jnp.stack(taps, axis=0).reshape(kh * kw, C, N * OH * OW), OH, OW


def _conv_call(xt, w, scale, bias, res, relu):
    T, cin, M = xt.shape
    cout = w.shape[1]
    TM = _lane_tile(M)
    in_specs = [
        pl.BlockSpec((T, cin, TM), lambda m: (0, 0, m)),
        pl.BlockSpec((T, cout, cin), lambda m: (0, 0, 0)),
        pl.BlockSpec((cout, 1), lambda m: (0, 0)),
        pl.BlockSpec((cout, 1), lambda m: (0, 0)),
    ]
    args = [xt, w, scale, bias]
    if res is not None:
        in_specs.append(pl.BlockSpec((cout, TM), lambda m: (0, m)))
        args.append(res)
    return pl.pallas_call(
        functools.partial(_conv_bn_kernel, n_taps=T, relu=relu, fuse_res=res is not None),
        grid=(pl.cdiv(M, TM),),
        in_specs=in_specs,
        out_specs=pl.BlockSpec((cout, TM), lambda m: (0, m)),
        out_shape=jax.ShapeDtypeStruct((cout, M), jnp.bfloat16),
        compiler_params=pltpu.CompilerParams(dimension_semantics=("parallel",)),
    )(*args)


def conv_bn(x, p, stride, pad, relu, res=None):
    """conv(bias=False) + folded BN (+ fused residual add) (+ ReLU). x: (C, N, H, W)."""
    C, N, H, W = x.shape
    kh, kw = p['ksize']
    xt, OH, OW = _window_taps(x, kh, kw, stride, pad)
    cout = p['w'].shape[1]
    M = N * OH * OW
    res2 = None if res is None else res.reshape(cout, M)
    y = _conv_call(xt, p['w'], p['scale'], p['bias'], res2, relu)
    return y.reshape(cout, N, OH, OW)


def maxpool3x3_s2(x):
    C, N, H, W = x.shape
    xt, OH, OW = _window_taps(x, 3, 3, 2, 1, pad_value=-jnp.inf)
    M = N * OH * OW
    TM = _lane_tile(M)
    y = pl.pallas_call(
        functools.partial(_maxpool_kernel, n_taps=9),
        grid=(pl.cdiv(M, TM),),
        in_specs=[pl.BlockSpec((9, C, TM), lambda m: (0, 0, m))],
        out_specs=pl.BlockSpec((C, TM), lambda m: (0, m)),
        out_shape=jax.ShapeDtypeStruct((C, M), x.dtype),
        compiler_params=pltpu.CompilerParams(dimension_semantics=("parallel",)),
    )(xt)
    return y.reshape(C, N, OH, OW)


def se_res_tail(y, identity, p):
    # Fused SE gate + SE scale + residual add + unit ReLU (one read of y/identity, one write).
    C, N, H, W = y.shape
    HW = H * W
    out = pl.pallas_call(
        _se_tail_kernel,
        grid=(1,),
        in_specs=[pl.BlockSpec((C, N, HW), lambda i: (0, 0, 0)),
                  pl.BlockSpec((C, N, HW), lambda i: (0, 0, 0)),
                  pl.BlockSpec((C, C), lambda i: (0, 0)),
                  pl.BlockSpec((C, 1), lambda i: (0, 0)),
                  pl.BlockSpec((C, C), lambda i: (0, 0)),
                  pl.BlockSpec((C, 1), lambda i: (0, 0))],
        out_specs=pl.BlockSpec((C, N, HW), lambda i: (0, 0, 0)),
        out_shape=jax.ShapeDtypeStruct((C, N, HW), y.dtype),
    )(y.reshape(C, N, HW), identity.reshape(C, N, HW),
      p['w1'], p['b1'], p['w2'], p['b2'])
    return out.reshape(C, N, H, W)


def head(x, p):
    # AvgPool2d(kernel=7, stride=1) on a 7x7 map (-> 1x1), flatten, Linear.
    C, N, H, W = x.shape
    assert H == 7 and W == 7, "final_pool expects a 7x7 feature map"
    nc = p['w'].shape[0]
    out = pl.pallas_call(
        _head_kernel,
        grid=(1,),
        in_specs=[pl.BlockSpec((C, N, H * W), lambda i: (0, 0, 0)),
                  pl.BlockSpec((nc, C), lambda i: (0, 0)),
                  pl.BlockSpec((nc, 1), lambda i: (0, 0))],
        out_specs=pl.BlockSpec((nc, N), lambda i: (0, 0)),
        out_shape=jax.ShapeDtypeStruct((nc, N), jnp.float32),
    )(x.reshape(C, N, H * W), p['w'], p['b'])
    return out.T                                                     # (N, num_classes)


# ----------------------------------------------------------------------------
# Parameter construction (deterministic, synthetic)
# ----------------------------------------------------------------------------

def make_conv_bn_params(key, kh, kw, cin, cout):
    k1, k2, k3, k4, k5 = jax.random.split(key, 5)
    bound = (6.0 / (cin * kh * kw)) ** 0.5                           # kaiming_uniform_
    w = jax.random.uniform(k1, (kh, kw, cin, cout), jnp.float32, -bound, bound)
    gamma = jax.random.uniform(k2, (cout,), jnp.float32, 0.5, 1.5)
    beta = jax.random.uniform(k3, (cout,), jnp.float32, -0.1, 0.1)
    mean = jax.random.uniform(k4, (cout,), jnp.float32, -0.1, 0.1)
    var = jax.random.uniform(k5, (cout,), jnp.float32, 0.5, 1.5)
    eps = 1e-5
    scale = gamma / jnp.sqrt(var + eps)
    bias = beta - mean * scale
    # (kh, kw, cin, cout) -> (taps, cout, cin), bf16 for the MXU.
    wt = jnp.transpose(w, (0, 1, 3, 2)).reshape(kh * kw, cout, cin).astype(jnp.bfloat16)
    return {'w': wt, 'scale': scale.reshape(cout, 1), 'bias': bias.reshape(cout, 1),
            'ksize': (kh, kw)}


def make_linear(key, fin, fout):
    k1, k2 = jax.random.split(key)
    bound = 1.0 / (fin ** 0.5)
    w = jax.random.uniform(k1, (fout, fin), jnp.float32, -bound, bound)   # (out, in)
    b = jax.random.uniform(k2, (fout, 1), jnp.float32, -bound, bound)
    return w, b


def build_params(key, channels, init_block_channels, bottleneck, conv1_stride,
                 in_channels=3, num_classes=10):
    params = {}
    key, k = jax.random.split(key)
    params['init_conv'] = make_conv_bn_params(k, 7, 7, in_channels, init_block_channels)
    in_c = init_block_channels
    stages = []
    for i, channels_per_stage in enumerate(channels):
        stage = []
        for j, out_c in enumerate(channels_per_stage):
            stride = 2 if (j == 0 and i != 0) else 1
            use_se = (j == 0)
            key, ka, kb, kc, kd, ke, kf = jax.random.split(key, 7)
            unit = {'use_se': use_se}
            if bottleneck:
                mid = out_c // 4
                unit['convs'] = [                      # (conv_params, stride, pad, relu)
                    (make_conv_bn_params(ka, 1, 1, in_c, mid),
                     stride if conv1_stride else 1, 0, True),
                    (make_conv_bn_params(kb, 3, 3, mid, mid),
                     1 if conv1_stride else stride, 1, True),
                    (make_conv_bn_params(kc, 1, 1, mid, out_c), 1, 0, False),
                ]
            else:
                unit['convs'] = [
                    (make_conv_bn_params(ka, 3, 3, in_c, out_c), stride, 1, True),
                    (make_conv_bn_params(kb, 3, 3, out_c, out_c), 1, 1, False),
                ]
            if in_c != out_c or stride != 1:
                unit['identity_conv'] = (make_conv_bn_params(kd, 1, 1, in_c, out_c), stride)
            if use_se:
                w1, b1 = make_linear(ke, out_c, out_c)   # SEBlock(reduction=1, use_conv=False)
                w2, b2 = make_linear(kf, out_c, out_c)
                unit['se'] = {'w1': w1, 'b1': b1, 'w2': w2, 'b2': b2}
            stage.append(unit)
            in_c = out_c
        stages.append(stage)
    params['stages'] = stages
    key, k = jax.random.split(key)
    wo, bo = make_linear(k, in_c, num_classes)
    params['output'] = {'w': wo, 'b': bo}
    return params


# ----------------------------------------------------------------------------
# Forward pass
# ----------------------------------------------------------------------------

def fast_se_res_unit(x, unit):
    if 'identity_conv' in unit:
        id_p, id_stride = unit['identity_conv']
        identity = conv_bn(x, id_p, id_stride, 0, relu=False)
    else:
        identity = x
    convs = unit['convs']
    y = x
    if unit['use_se']:
        for conv_p, stride, pad, relu in convs:
            y = conv_bn(y, conv_p, stride, pad, relu)
        # SE gate + scale + residual add + ReLU in one fused kernel.
        return se_res_tail(y, identity, unit['se'])
    for conv_p, stride, pad, relu in convs[:-1]:
        y = conv_bn(y, conv_p, stride, pad, relu)
    conv_p, stride, pad, _ = convs[-1]
    # Residual add + final unit ReLU fused into the last conv's epilogue.
    return conv_bn(y, conv_p, stride, pad, relu=True, res=identity)


def fast_se_resnet_forward(x_nchw, params):
    # NCHW -> canonical channels-first lane-dense layout (C, N, H, W), bf16 storage.
    x = jnp.transpose(x_nchw, (1, 0, 2, 3)).astype(jnp.bfloat16)
    # ResInitBlock: conv7x7 stride2 pad3 + BN + ReLU, then MaxPool 3x3 stride2 pad1.
    x = conv_bn(x, params['init_conv'], stride=2, pad=3, relu=True)
    x = maxpool3x3_s2(x)
    for stage in params['stages']:
        for unit in stage:
            x = fast_se_res_unit(x, unit)
    return head(x, params['output'])


# ----------------------------------------------------------------------------
# Main
# ----------------------------------------------------------------------------

if __name__ == "__main__":
    key = jax.random.PRNGKey(0)
    key, kx, kp = jax.random.split(key, 3)

    # Small FastSEResNet config: 2 stages, non-bottleneck (ResBlock) units, SE on the
    # first unit of each stage, 56x56 input so the final feature map is exactly 7x7.
    channels = [[8, 8], [16, 16]]
    init_block_channels = 8
    num_classes = 10

    params = build_params(kp, channels, init_block_channels,
                          bottleneck=False, conv1_stride=True,
                          in_channels=3, num_classes=num_classes)

    x = jax.random.normal(kx, (2, 3, 56, 56), dtype=jnp.float32)   # NCHW like PyTorch

    fwd = jax.jit(lambda inp: fast_se_resnet_forward(inp, params))
    out = jax.block_until_ready(fwd(x))
    assert out.shape == (2, num_classes), out.shape
    assert bool(jnp.all(jnp.isfinite(out)))
    print("KERNEL_OK")
</pallas_src>

<mosaic_0001>
module attributes {stable_mosaic.version = 11 : i64} {
  func.func @_conv_bn_kernel(%arg0: i32, %arg1: memref<49x3x512xbf16, #tpu.memory_space<vmem>>, %arg2: memref<49x8x3xbf16, #tpu.memory_space<vmem>>, %arg3: memref<8x1xf32, #tpu.memory_space<vmem>>, %arg4: memref<8x1xf32, #tpu.memory_space<vmem>>, %arg5: memref<8x512xbf16, #tpu.memory_space<vmem>>) attributes {dimension_semantics = [#tpu.dimension_semantics<parallel>], iteration_bounds = array<i64: 4>, scalar_prefetch = 0 : i64, scratch_operands = 0 : i64, tpu.core_type = #tpu.core_type<tc>, window_params = [{transform_indices = @transform_0, window_bounds = array<i64: 49, 3, 512>}, {pipeline_mode = #tpu.pipeline_mode<synchronous>, transform_indices = @transform_1, window_bounds = array<i64: 49, 8, 3>}, {pipeline_mode = #tpu.pipeline_mode<synchronous>, transform_indices = @transform_2, window_bounds = array<i64: 8, 1>}, {pipeline_mode = #tpu.pipeline_mode<synchronous>, transform_indices = @transform_3, window_bounds = array<i64: 8, 1>}, {transform_indices = @transform_4, window_bounds = array<i64: 8, 512>}]} {
    %c0 = arith.constant 0 : index
    %c0_0 = arith.constant 0 : index
    %c0_1 = arith.constant 0 : index
    %0 = vector.load %arg2[%c0, %c0_0, %c0_1] : memref<49x8x3xbf16, #tpu.memory_space<vmem>>, vector<1x8x3xbf16>
    %1 = vector.shape_cast %0 : vector<1x8x3xbf16> to vector<8x3xbf16>
    %c0_2 = arith.constant 0 : index
    %c0_3 = arith.constant 0 : index
    %c0_4 = arith.constant 0 : index
    %2 = vector.load %arg1[%c0_2, %c0_3, %c0_4] : memref<49x3x512xbf16, #tpu.memory_space<vmem>>, vector<1x3x512xbf16>
    %3 = vector.shape_cast %2 : vector<1x3x512xbf16> to vector<3x512xbf16>
    %cst = arith.constant dense<0.000000e+00> : vector<8x512xf32>
    %4 = tpu.matmul %1, %3, %cst {dimension_numbers = #tpu.dot_dimension_numbers<[1], [0], [0], [1], [0, 0, 1, 1], [], []>} : vector<8x3xbf16>, vector<3x512xbf16>, vector<8x512xf32> -> vector<8x512xf32>
    %c1 = arith.constant 1 : index
    %c0_5 = arith.constant 0 : index
    %c0_6 = arith.constant 0 : index
    %5 = vector.load %arg2[%c1, %c0_5, %c0_6] : memref<49x8x3xbf16, #tpu.memory_space<vmem>>, vector<1x8x3xbf16>
    %6 = vector.shape_cast %5 : vector<1x8x3xbf16> to vector<8x3xbf16>
    %c1_7 = arith.constant 1 : index
    %c0_8 = arith.constant 0 : index
    %c0_9 = arith.constant 0 : index
    %7 = vector.load %arg1[%c1_7, %c0_8, %c0_9] : memref<49x3x512xbf16, #tpu.memory_space<vmem>>, vector<1x3x512xbf16>
    %8 = vector.shape_cast %7 : vector<1x3x512xbf16> to vector<3x512xbf16>
    %cst_10 = arith.constant dense<0.000000e+00> : vector<8x512xf32>
    %9 = tpu.matmul %6, %8, %cst_10 {dimension_numbers = #tpu.dot_dimension_numbers<[1], [0], [0], [1], [0, 0, 1, 1], [], []>} : vector<8x3xbf16>, vector<3x512xbf16>, vector<8x512xf32> -> vector<8x512xf32>
    %10 = arith.addf %4, %9 : vector<8x512xf32>
    %c2 = arith.constant 2 : index
    %c0_11 = arith.constant 0 : index
    %c0_12 = arith.constant 0 : index
    %11 = vector.load %arg2[%c2, %c0_11, %c0_12] : memref<49x8x3xbf16, #tpu.memory_space<vmem>>, vector<1x8x3xbf16>
    %12 = vector.shape_cast %11 : vector<1x8x3xbf16> to vector<8x3xbf16>
    %c2_13 = arith.constant 2 : index
    %c0_14 = arith.constant 0 : index
    %c0_15 = arith.constant 0 : index
    %13 = vector.load %arg1[%c2_13, %c0_14, %c0_15] : memref<49x3x512xbf16, #tpu.memory_space<vmem>>, vector<1x3x512xbf16>
    %14 = vector.shape_cast %13 : vector<1x3x512xbf16> to vector<3x512xbf16>
    %cst_16 = arith.constant dense<0.000000e+00> : vector<8x512xf32>
    %15 = tpu.matmul %12, %14, %cst_16 {dimension_numbers = #tpu.dot_dimension_numbers<[1], [0], [0], [1], [0, 0, 1, 1], [], []>} : vector<8x3xbf16>, vector<3x512xbf16>, vector<8x512xf32> -> vector<8x512xf32>
    %16 = arith.addf %10, %15 : vector<8x512xf32>
    %c3 = arith.constant 3 : index
    %c0_17 = arith.constant 0 : index
    %c0_18 = arith.constant 0 : index
    %17 = vector.load %arg2[%c3, %c0_17, %c0_18] : memref<49x8x3xbf16, #tpu.memory_space<vmem>>, vector<1x8x3xbf16>
    %18 = vector.shape_cast %17 : vector<1x8x3xbf16> to vector<8x3xbf16>
    %c3_19 = arith.constant 3 : index
    %c0_20 = arith.constant 0 : index
    %c0_21 = arith.constant 0 : index
    %19 = vector.load %arg1[%c3_19, %c0_20, %c0_21] : memref<49x3x512xbf16, #tpu.memory_space<vmem>>, vector<1x3x512xbf16>
    %20 = vector.shape_cast %19 : vector<1x3x512xbf16> to vector<3x512xbf16>
    %cst_22 = arith.constant dense<0.000000e+00> : vector<8x512xf32>
    %21 = tpu.matmul %18, %20, %cst_22 {dimension_numbers = #tpu.dot_dimension_numbers<[1], [0], [0], [1], [0, 0, 1, 1], [], []>} : vector<8x3xbf16>, vector<3x512xbf16>, vector<8x512xf32> -> vector<8x512xf32>
    %22 = arith.addf %16, %21 : vector<8x512xf32>
    %c4 = arith.constant 4 : index
    %c0_23 = arith.constant 0 : index
    %c0_24 = arith.constant 0 : index
    %23 = vector.load %arg2[%c4, %c0_23, %c0_24] : memref<49x8x3xbf16, #tpu.memory_space<vmem>>, vector<1x8x3xbf16>
    %24 = vector.shape_cast %23 : vector<1x8x3xbf16> to vector<8x3xbf16>
    %c4_25 = arith.constant 4 : index
    %c0_26 = arith.constant 0 : index
    %c0_27 = arith.constant 0 : index
    %25 = vector.load %arg1[%c4_25, %c0_26, %c0_27] : memref<49x3x512xbf16, #tpu.memory_space<vmem>>, vector<1x3x512xbf16>
    %26 = vector.shape_cast %25 : vector<1x3x512xbf16> to vector<3x512xbf16>
    %cst_28 = arith.constant dense<0.000000e+00> : vector<8x512xf32>
    %27 = tpu.matmul %24, %26, %cst_28 {dimension_numbers = #tpu.dot_dimension_numbers<[1], [0], [0], [1], [0, 0, 1, 1], [], []>} : vector<8x3xbf16>, vector<3x512xbf16>, vector<8x512xf32> -> vector<8x512xf32>
    %28 = arith.addf %22, %27 : vector<8x512xf32>
    %c5 = arith.constant 5 : index
    %c0_29 = arith.constant 0 : index
    %c0_30 = arith.constant 0 : index
    %29 = vector.load %arg2[%c5, %c0_29, %c0_30] : memref<49x8x3xbf16, #tpu.memory_space<vmem>>, vector<1x8x3xbf16>
    %30 = vector.shape_cast %29 : vector<1x8x3xbf16> to vector<8x3xbf16>
    %c5_31 = arith.constant 5 : index
    %c0_32 = arith.constant 0 : index
    %c0_33 = arith.constant 0 : index
    %31 = vector.load %arg1[%c5_31, %c0_32, %c0_33] : memref<49x3x512xbf16, #tpu.memory_space<vmem>>, vector<1x3x512xbf16>
    %32 = vector.shape_cast %31 : vector<1x3x512xbf16> to vector<3x512xbf16>
    %cst_34 = arith.constant dense<0.000000e+00> : vector<8x512xf32>
    %33 = tpu.matmul %30, %32, %cst_34 {dimension_numbers = #tpu.dot_dimension_numbers<[1], [0], [0], [1], [0, 0, 1, 1], [], []>} : vector<8x3xbf16>, vector<3x512xbf16>, vector<8x512xf32> -> vector<8x512xf32>
    %34 = arith.addf %28, %33 : vector<8x512xf32>
    %c6 = arith.constant 6 : index
    %c0_35 = arith.constant 0 : index
    %c0_36 = arith.constant 0 : index
    %35 = vector.load %arg2[%c6, %c0_35, %c0_36] : memref<49x8x3xbf16, #tpu.memory_space<vmem>>, vector<1x8x3xbf16>
    %36 = vector.shape_cast %35 : vector<1x8x3xbf16> to vector<8x3xbf16>
    %c6_37 = arith.constant 6 : index
    %c0_38 = arith.constant 0 : index
    %c0_39 = arith.constant 0 : index
    %37 = vector.load %arg1[%c6_37, %c0_38, %c0_39] : memref<49x3x512xbf16, #tpu.memory_space<vmem>>, vector<1x3x512xbf16>
    %38 = vector.shape_cast %37 : vector<1x3x512xbf16> to vector<3x512xbf16>
    %cst_40 = arith.constant dense<0.000000e+00> : vector<8x512xf32>
    %39 = tpu.matmul %36, %38, %cst_40 {dimension_numbers = #tpu.dot_dimension_numbers<[1], [0], [0], [1], [0, 0, 1, 1], [], []>} : vector<8x3xbf16>, vector<3x512xbf16>, vector<8x512xf32> -> vector<8x512xf32>
    %40 = arith.addf %34, %39 : vector<8x512xf32>
    %c7 = arith.constant 7 : index
    %c0_41 = arith.constant 0 : index
    %c0_42 = arith.constant 0 : index
    %41 = vector.load %arg2[%c7, %c0_41, %c0_42] : memref<49x8x3xbf16, #tpu.memory_space<vmem>>, vector<1x8x3xbf16>
    %42 = vector.shape_cast %41 : vector<1x8x3xbf16> to vector<8x3xbf16>
    %c7_43 = arith.constant 7 : index
    %c0_44 = arith.constant 0 : index
    %c0_45 = arith.constant 0 : index
    %43 = vector.load %arg1[%c7_43, %c0_44, %c0_45] : memref<49x3x512xbf16, #tpu.memory_space<vmem>>, vector<1x3x512xbf16>
    %44 = vector.shape_cast %43 : vector<1x3x512xbf16> to vector<3x512xbf16>
    %cst_46 = arith.constant dense<0.000000e+00> : vector<8x512xf32>
    %45 = tpu.matmul %42, %44, %cst_46 {dimension_numbers = #tpu.dot_dimension_numbers<[1], [0], [0], [1], [0, 0, 1, 1], [], []>} : vector<8x3xbf16>, vector<3x512xbf16>, vector<8x512xf32> -> vector<8x512xf32>
    %46 = arith.addf %40, %45 : vector<8x512xf32>
    %c8 = arith.constant 8 : index
    %c0_47 = arith.constant 0 : index
    %c0_48 = arith.constant 0 : index
    %47 = vector.load %arg2[%c8, %c0_47, %c0_48] : memref<49x8x3xbf16, #tpu.memory_space<vmem>>, vector<1x8x3xbf16>
    %48 = vector.shape_cast %47 : vector<1x8x3xbf16> to vector<8x3xbf16>
    %c8_49 = arith.constant 8 : index
    %c0_50 = arith.constant 0 : index
    %c0_51 = arith.constant 0 : index
    %49 = vector.load %arg1[%c8_49, %c0_50, %c0_51] : memref<49x3x512xbf16, #tpu.memory_space<vmem>>, vector<1x3x512xbf16>
    %50 = vector.shape_cast %49 : vector<1x3x512xbf16> to vector<3x512xbf16>
    %cst_52 = arith.constant dense<0.000000e+00> : vector<8x512xf32>
    %51 = tpu.matmul %48, %50, %cst_52 {dimension_numbers = #tpu.dot_dimension_numbers<[1], [0], [0], [1], [0, 0, 1, 1], [], []>} : vector<8x3xbf16>, vector<3x512xbf16>, vector<8x512xf32> -> vector<8x512xf32>
    %52 = arith.addf %46, %51 : vector<8x512xf32>
    %c9 = arith.constant 9 : index
    %c0_53 = arith.constant 0 : index
    %c0_54 = arith.constant 0 : index
    %53 = vector.load %arg2[%c9, %c0_53, %c0_54] : memref<49x8x3xbf16, #tpu.memory_space<vmem>>, vector<1x8x3xbf16>
    %54 = vector.shape_cast %53 : vector<1x8x3xbf16> to vector<8x3xbf16>
    %c9_55 = arith.constant 9 : index
    %c0_56 = arith.constant 0 : index
    %c0_57 = arith.constant 0 : index
    %55 = vector.load %arg1[%c9_55, %c0_56, %c0_57] : memref<49x3x512xbf16, #tpu.memory_space<vmem>>, vector<1x3x512xbf16>
    %56 = vector.shape_cast %55 : vector<1x3x512xbf16> to vector<3x512xbf16>
    %cst_58 = arith.constant dense<0.000000e+00> : vector<8x512xf32>
    %57 = tpu.matmul %54, %56, %cst_58 {dimension_numbers = #tpu.dot_dimension_numbers<[1], [0], [0], [1], [0, 0, 1, 1], [], []>} : vector<8x3xbf16>, vector<3x512xbf16>, vector<8x512xf32> -> vector<8x512xf32>
    %58 = arith.addf %52, %57 : vector<8x512xf32>
    %c10 = arith.constant 10 : index
    %c0_59 = arith.constant 0 : index
    %c0_60 = arith.constant 0 : index
    %59 = vector.load %arg2[%c10, %c0_59, %c0_60] : memref<49x8x3xbf16, #tpu.memory_space<vmem>>, vector<1x8x3xbf16>
    %60 = vector.shape_cast %59 : vector<1x8x3xbf16> to vector<8x3xbf16>
    %c10_61 = arith.constant 10 : index
    %c0_62 = arith.constant 0 : index
    %c0_63 = arith.constant 0 : index
    %61 = vector.load %arg1[%c10_61, %c0_62, %c0_63] : memref<49x3x512xbf16, #tpu.memory_space<vmem>>, vector<1x3x512xbf16>
    %62 = vector.shape_cast %61 : vector<1x3x512xbf16> to vector<3x512xbf16>
    %cst_64 = arith.constant dense<0.000000e+00> : vector<8x512xf32>
    %63 = tpu.matmul %60, %62, %cst_64 {dimension_numbers = #tpu.dot_dimension_numbers<[1], [0], [0], [1], [0, 0, 1, 1], [], []>} : vector<8x3xbf16>, vector<3x512xbf16>, vector<8x512xf32> -> vector<8x512xf32>
    %64 = arith.addf %58, %63 : vector<8x512xf32>
    %c11 = arith.constant 11 : index
    %c0_65 = arith.constant 0 : index
    %c0_66 = arith.constant 0 : index
    %65 = vector.load %arg2[%c11, %c0_65, %c0_66] : memref<49x8x3xbf16, #tpu.memory_space<vmem>>, vector<1x8x3xbf16>
    %66 = vector.shape_cast %65 : vector<1x8x3xbf16> to vector<8x3xbf16>
    %c11_67 = arith.constant 11 : index
    %c0_68 = arith.constant 0 : index
    %c0_69 = arith.constant 0 : index
    %67 = vector.load %arg1[%c11_67, %c0_68, %c0_69] : memref<49x3x512xbf16, #tpu.memory_space<vmem>>, vector<1x3x512xbf16>
    %68 = vector.shape_cast %67 : vector<1x3x512xbf16> to vector<3x512xbf16>
    %cst_70 = arith.constant dense<0.000000e+00> : vector<8x512xf32>
    %69 = tpu.matmul %66, %68, %cst_70 {dimension_numbers = #tpu.dot_dimension_numbers<[1], [0], [0], [1], [0, 0, 1, 1], [], []>} : vector<8x3xbf16>, vector<3x512xbf16>, vector<8x512xf32> -> vector<8x512xf32>
    %70 = arith.addf %64, %69 : vector<8x512xf32>
    %c12 = arith.constant 12 : index
    %c0_71 = arith.constant 0 : index
    %c0_72 = arith.constant 0 : index
    %71 = vector.load %arg2[%c12, %c0_71, %c0_72] : memref<49x8x3xbf16, #tpu.memory_space<vmem>>, vector<1x8x3xbf16>
    %72 = vector.shape_cast %71 : vector<1x8x3xbf16> to vector<8x3xbf16>
    %c12_73 = arith.constant 12 : index
    %c0_74 = arith.constant 0 : index
    %c0_75 = arith.constant 0 : index
    %73 = vector.load %arg1[%c12_73, %c0_74, %c0_75] : memref<49x3x512xbf16, #tpu.memory_space<vmem>>, vector<1x3x512xbf16>
    %74 = vector.shape_cast %73 : vector<1x3x512xbf16> to vector<3x512xbf16>
    %cst_76 = arith.constant dense<0.000000e+00> : vector<8x512xf32>
    %75 = tpu.matmul %72, %74, %cst_76 {dimension_numbers = #tpu.dot_dimension_numbers<[1], [0], [0], [1], [0, 0, 1, 1], [], []>} : vector<8x3xbf16>, vector<3x512xbf16>, vector<8x512xf32> -> vector<8x512xf32>
    %76 = arith.addf %70, %75 : vector<8x512xf32>
    %c13 = arith.constant 13 : index
    %c0_77 = arith.constant 0 : index
    %c0_78 = arith.constant 0 : index
    %77 = vector.load %arg2[%c13, %c0_77, %c0_78] : memref<49x8x3xbf16, #tpu.memory_space<vmem>>, vector<1x8x3xbf16>
    %78 = vector.shape_cast %77 : vector<1x8x3xbf16> to vector<8x3xbf16>
    %c13_79 = arith.constant 13 : index
    %c0_80 = arith.constant 0 : index
    %c0_81 = arith.constant 0 : index
    %79 = vector.load %arg1[%c13_79, %c0_80, %c0_81] : memref<49x3x512xbf16, #tpu.memory_space<vmem>>, vector<1x3x512xbf16>
    %80 = vector.shape_cast %79 : vector<1x3x512xbf16> to vector<3x512xbf16>
    %cst_82 = arith.constant dense<0.000000e+00> : vector<8x512xf32>
    %81 = tpu.matmul %78, %80, %cst_82 {dimension_numbers = #tpu.dot_dimension_numbers<[1], [0], [0], [1], [0, 0, 1, 1], [], []>} : vector<8x3xbf16>, vector<3x512xbf16>, vector<8x512xf32> -> vector<8x512xf32>
    %82 = arith.addf %76, %81 : vector<8x512xf32>
    %c14 = arith.constant 14 : index
    %c0_83 = arith.constant 0 : index
    %c0_84 = arith.constant 0 : index
    %83 = vector.load %arg2[%c14, %c0_83, %c0_84] : memref<49x8x3xbf16, #tpu.memory_space<vmem>>, vector<1x8x3xbf16>
    %84 = vector.shape_cast %83 : vector<1x8x3xbf16> to vector<8x3xbf16>
    %c14_85 = arith.constant 14 : index
    %c0_86 = arith.constant 0 : index
    %c0_87 = arith.constant 0 : index
    %85 = vector.load %arg1[%c14_85, %c0_86, %c0_87] : memref<49x3x512xbf16, #tpu.memory_space<vmem>>, vector<1x3x512xbf16>
    %86 = vector.shape_cast %85 : vector<1x3x512xbf16> to vector<3x512xbf16>
    %cst_88 = arith.constant dense<0.000000e+00> : vector<8x512xf32>
    %87 = tpu.matmul %84, %86, %cst_88 {dimension_numbers = #tpu.dot_dimension_numbers<[1], [0], [0], [1], [0, 0, 1, 1], [], []>} : vector<8x3xbf16>, vector<3x512xbf16>, vector<8x512xf32> -> vector<8x512xf32>
    %88 = arith.addf %82, %87 : vector<8x512xf32>
    %c15 = arith.constant 15 : index
    %c0_89 = arith.constant 0 : index
    %c0_90 = arith.constant 0 : index
    %89 = vector.load %arg2[%c15, %c0_89, %c0_90] : memref<49x8x3xbf16, #tpu.memory_space<vmem>>, vector<1x8x3xbf16>
    %90 = vector.shape_cast %89 : vector<1x8x3xbf16> to vector<8x3xbf16>
    %c15_91 = arith.constant 15 : index
    %c0_92 = arith.constant 0 : index
    %c0_93 = arith.constant 0 : index
    %91 = vector.load %arg1[%c15_91, %c0_92, %c0_93] : memref<49x3x512xbf16, #tpu.memory_space<vmem>>, vector<1x3x512xbf16>
    %92 = vector.shape_cast %91 : vector<1x3x512xbf16> to vector<3x512xbf16>
    %cst_94 = arith.constant dense<0.000000e+00> : vector<8x512xf32>
    %93 = tpu.matmul %90, %92, %cst_94 {dimension_numbers = #tpu.dot_dimension_numbers<[1], [0], [0], [1], [0, 0, 1, 1], [], []>} : vector<8x3xbf16>, vector<3x512xbf16>, vector<8x512xf32> -> vector<8x512xf32>
    %94 = arith.addf %88, %93 : vector<8x512xf32>
    %c16 = arith.constant 16 : index
    %c0_95 = arith.constant 0 : index
    %c0_96 = arith.constant 0 : index
    %95 = vector.load %arg2[%c16, %c0_95, %c0_96] : memref<49x8x3xbf16, #tpu.memory_space<vmem>>, vector<1x8x3xbf16>
    %96 = vector.shape_cast %95 : vector<1x8x3xbf16> to vector<8x3xbf16>
    %c16_97 = arith.constant 16 : index
    %c0_98 = arith.constant 0 : index
    %c0_99 = arith.constant 0 : index
    %97 = vector.load %arg1[%c16_97, %c0_98, %c0_99] : memref<49x3x512xbf16, #tpu.memory_space<vmem>>, vector<1x3x512xbf16>
    %98 = vector.shape_cast %97 : vector<1x3x512xbf16> to vector<3x512xbf16>
    %cst_100 = arith.constant dense<0.000000e+00> : vector<8x512xf32>
    %99 = tpu.matmul %96, %98, %cst_100 {dimension_numbers = #tpu.dot_dimension_numbers<[1], [0], [0], [1], [0, 0, 1, 1], [], []>} : vector<8x3xbf16>, vector<3x512xbf16>, vector<8x512xf32> -> vector<8x512xf32>
    %100 = arith.addf %94, %99 : vector<8x512xf32>
    %c17 = arith.constant 17 : index
    %c0_101 = arith.constant 0 : index
    %c0_102 = arith.constant 0 : index
    %101 = vector.load %arg2[%c17, %c0_101, %c0_102] : memref<49x8x3xbf16, #tpu.memory_space<vmem>>, vector<1x8x3xbf16>
    %102 = vector.shape_cast %101 : vector<1x8x3xbf16> to vector<8x3xbf16>
    %c17_103 = arith.constant 17 : index
    %c0_104 = arith.constant 0 : index
    %c0_105 = arith.constant 0 : index
    %103 = vector.load %arg1[%c17_103, %c0_104, %c0_105] : memref<49x3x512xbf16, #tpu.memory_space<vmem>>, vector<1x3x512xbf16>
    %104 = vector.shape_cast %103 : vector<1x3x512xbf16> to vector<3x512xbf16>
    %cst_106 = arith.constant dense<0.000000e+00> : vector<8x512xf32>
    %105 = tpu.matmul %102, %104, %cst_106 {dimension_numbers = #tpu.dot_dimension_numbers<[1], [0], [0], [1], [0, 0, 1, 1], [], []>} : vector<8x3xbf16>, vector<3x512xbf16>, vector<8x512xf32> -> vector<8x512xf32>
    %106 = arith.addf %100, %105 : vector<8x512xf32>
    %c18 = arith.constant 18 : index
    %c0_107 = arith.constant 0 : index
    %c0_108 = arith.constant 0 : index
    %107 = vector.load %arg2[%c18, %c0_107, %c0_108] : memref<49x8x3xbf16, #tpu.memory_space<vmem>>, vector<1x8x3xbf16>
    %108 = vector.shape_cast %107 : vector<1x8x3xbf16> to vector<8x3xbf16>
    %c18_109 = arith.constant 18 : index
    %c0_110 = arith.constant 0 : index
    %c0_111 = arith.constant 0 : index
    %109 = vector.load %arg1[%c18_109, %c0_110, %c0_111] : memref<49x3x512xbf16, #tpu.memory_space<vmem>>, vector<1x3x512xbf16>
    %110 = vector.shape_cast %109 : vector<1x3x512xbf16> to vector<3x512xbf16>
    %cst_112 = arith.constant dense<0.000000e+00> : vector<8x512xf32>
    %111 = tpu.matmul %108, %110, %cst_112 {dimension_numbers = #tpu.dot_dimension_numbers<[1], [0], [0], [1], [0, 0, 1, 1], [], []>} : vector<8x3xbf16>, vector<3x512xbf16>, vector<8x512xf32> -> vector<8x512xf32>
    %112 = arith.addf %106, %111 : vector<8x512xf32>
    %c19 = arith.constant 19 : index
    %c0_113 = arith.constant 0 : index
    %c0_114 = arith.constant 0 : index
    %113 = vector.load %arg2[%c19, %c0_113, %c0_114] : memref<49x8x3xbf16, #tpu.memory_space<vmem>>, vector<1x8x3xbf16>
    %114 = vector.shape_cast %113 : vector<1x8x3xbf16> to vector<8x3xbf16>
    %c19_115 = arith.constant 19 : index
    %c0_116 = arith.constant 0 : index
    %c0_117 = arith.constant 0 : index
    %115 = vector.load %arg1[%c19_115, %c0_116, %c0_117] : memref<49x3x512xbf16, #tpu.memory_space<vmem>>, vector<1x3x512xbf16>
    %116 = vector.shape_cast %115 : vector<1x3x512xbf16> to vector<3x512xbf16>
    %cst_118 = arith.constant dense<0.000000e+00> : vector<8x512xf32>
    %117 = tpu.matmul %114, %116, %cst_118 {dimension_numbers = #tpu.dot_dimension_numbers<[1], [0], [0], [1], [0, 0, 1, 1], [], []>} : vector<8x3xbf16>, vector<3x512xbf16>, vector<8x512xf32> -> vector<8x512xf32>
    %118 = arith.addf %112, %117 : vector<8x512xf32>
    %c20 = arith.constant 20 : index
    %c0_119 = arith.constant 0 : index
    %c0_120 = arith.constant 0 : index
    %119 = vector.load %arg2[%c20, %c0_119, %c0_120] : memref<49x8x3xbf16, #tpu.memory_space<vmem>>, vector<1x8x3xbf16>
    %120 = vector.shape_cast %119 : vector<1x8x3xbf16> to vector<8x3xbf16>
    %c20_121 = arith.constant 20 : index
    %c0_122 = arith.constant 0 : index
    %c0_123 = arith.constant 0 : index
    %121 = vector.load %arg1[%c20_121, %c0_122, %c0_123] : memref<49x3x512xbf16, #tpu.memory_space<vmem>>, vector<1x3x512xbf16>
    %122 = vector.shape_cast %121 : vector<1x3x512xbf16> to vector<3x512xbf16>
    %cst_124 = arith.constant dense<0.000000e+00> : vector<8x512xf32>
    %123 = tpu.matmul %120, %122, %cst_124 {dimension_numbers = #tpu.dot_dimension_numbers<[1], [0], [0], [1], [0, 0, 1, 1], [], []>} : vector<8x3xbf16>, vector<3x512xbf16>, vector<8x512xf32> -> vector<8x512xf32>
    %124 = arith.addf %118, %123 : vector<8x512xf32>
    %c21 = arith.constant 21 : index
    %c0_125 = arith.constant 0 : index
    %c0_126 = arith.constant 0 : index
    %125 = vector.load %arg2[%c21, %c0_125, %c0_126] : memref<49x8x3xbf16, #tpu.memory_space<vmem>>, vector<1x8x3xbf16>
    %126 = vector.shape_cast %125 : vector<1x8x3xbf16> to vector<8x3xbf16>
    %c21_127 = arith.constant 21 : index
    %c0_128 = arith.constant 0 : index
    %c0_129 = arith.constant 0 : index
    %127 = vector.load %arg1[%c21_127, %c0_128, %c0_129] : memref<49x3x512xbf16, #tpu.memory_space<vmem>>, vector<1x3x512xbf16>
    %128 = vector.shape_cast %127 : vector<1x3x512xbf16> to vector<3x512xbf16>
    %cst_130 = arith.constant dense<0.000000e+00> : vector<8x512xf32>
    %129 = tpu.matmul %126, %128, %cst_130 {dimension_numbers = #tpu.dot_dimension_numbers<[1], [0], [0], [1], [0, 0, 1, 1], [], []>} : vector<8x3xbf16>, vector<3x512xbf16>, vector<8x512xf32> -> vector<8x512xf32>
    %130 = arith.addf %124, %129 : vector<8x512xf32>
    %c22 = arith.constant 22 : index
    %c0_131 = arith.constant 0 : index
    %c0_132 = arith.constant 0 : index
    %131 = vector.load %arg2[%c22, %c0_131, %c0_132] : memref<49x8x3xbf16, #tpu.memory_space<vmem>>, vector<1x8x3xbf16>
    %132 = vector.shape_cast %131 : vector<1x8x3xbf16> to vector<8x3xbf16>
    %c22_133 = arith.constant 22 : index
    %c0_134 = arith.constant 0 : index
    %c0_135 = arith.constant 0 : index
    %133 = vector.load %arg1[%c22_133, %c0_134, %c0_135] : memref<49x3x512xbf16, #tpu.memory_space<vmem>>, vector<1x3x512xbf16>
    %134 = vector.shape_cast %133 : vector<1x3x512xbf16> to vector<3x512xbf16>
    %cst_136 = arith.constant dense<0.000000e+00> : vector<8x512xf32>
    %135 = tpu.matmul %132, %134, %cst_136 {dimension_numbers = #tpu.dot_dimension_numbers<[1], [0], [0], [1], [0, 0, 1, 1], [], []>} : vector<8x3xbf16>, vector<3x512xbf16>, vector<8x512xf32> -> vector<8x512xf32>
    %136 = arith.addf %130, %135 : vector<8x512xf32>
    %c23 = arith.constant 23 : index
    %c0_137 = arith.constant 0 : index
    %c0_138 = arith.constant 0 : index
    %137 = vector.load %arg2[%c23, %c0_137, %c0_138] : memref<49x8x3xbf16, #tpu.memory_space<vmem>>, vector<1x8x3xbf16>
    %138 = vector.shape_cast %137 : vector<1x8x3xbf16> to vector<8x3xbf16>
    %c23_139 = arith.constant 23 : index
    %c0_140 = arith.constant 0 : index
    %c0_141 = arith.constant 0 : index
    %139 = vector.load %arg1[%c23_139, %c0_140, %c0_141] : memref<49x3x512xbf16, #tpu.memory_space<vmem>>, vector<1x3x512xbf16>
    %140 = vector.shape_cast %139 : vector<1x3x512xbf16> to vector<3x512xbf16>
    %cst_142 = arith.constant dense<0.000000e+00> : vector<8x512xf32>
    %141 = tpu.matmul %138, %140, %cst_142 {dimension_numbers = #tpu.dot_dimension_numbers<[1], [0], [0], [1], [0, 0, 1, 1], [], []>} : vector<8x3xbf16>, vector<3x512xbf16>, vector<8x512xf32> -> vector<8x512xf32>
    %142 = arith.addf %136, %141 : vector<8x512xf32>
    %c24 = arith.constant 24 : index
    %c0_143 = arith.constant 0 : index
    %c0_144 = arith.constant 0 : index
    %143 = vector.load %arg2[%c24, %c0_143, %c0_144] : memref<49x8x3xbf16, #tpu.memory_space<vmem>>, vector<1x8x3xbf16>
    %144 = vector.shape_cast %143 : vector<1x8x3xbf16> to vector<8x3xbf16>
    %c24_145 = arith.constant 24 : index
    %c0_146 = arith.constant 0 : index
    %c0_147 = arith.constant 0 : index
    %145 = vector.load %arg1[%c24_145, %c0_146, %c0_147] : memref<49x3x512xbf16, #tpu.memory_space<vmem>>, vector<1x3x512xbf16>
    %146 = vector.shape_cast %145 : vector<1x3x512xbf16> to vector<3x512xbf16>
    %cst_148 = arith.constant dense<0.000000e+00> : vector<8x512xf32>
    %147 = tpu.matmul %144, %146, %cst_148 {dimension_numbers = #tpu.dot_dimension_numbers<[1], [0], [0], [1], [0, 0, 1, 1], [], []>} : vector<8x3xbf16>, vector<3x512xbf16>, vector<8x512xf32> -> vector<8x512xf32>
    %148 = arith.addf %142, %147 : vector<8x512xf32>
    %c25 = arith.constant 25 : index
    %c0_149 = arith.constant 0 : index
    %c0_150 = arith.constant 0 : index
    %149 = vector.load %arg2[%c25, %c0_149, %c0_150] : memref<49x8x3xbf16, #tpu.memory_space<vmem>>, vector<1x8x3xbf16>
    %150 = vector.shape_cast %149 : vector<1x8x3xbf16> to vector<8x3xbf16>
    %c25_151 = arith.constant 25 : index
    %c0_152 = arith.constant 0 : index
    %c0_153 = arith.constant 0 : index
    %151 = vector.load %arg1[%c25_151, %c0_152, %c0_153] : memref<49x3x512xbf16, #tpu.memory_space<vmem>>, vector<1x3x512xbf16>
    %152 = vector.shape_cast %151 : vector<1x3x512xbf16> to vector<3x512xbf16>
    %cst_154 = arith.constant dense<0.000000e+00> : vector<8x512xf32>
    %153 = tpu.matmul %150, %152, %cst_154 {dimension_numbers = #tpu.dot_dimension_numbers<[1], [0], [0], [1], [0, 0, 1, 1], [], []>} : vector<8x3xbf16>, vector<3x512xbf16>, vector<8x512xf32> -> vector<8x512xf32>
    %154 = arith.addf %148, %153 : vector<8x512xf32>
    %c26 = arith.constant 26 : index
    %c0_155 = arith.constant 0 : index
    %c0_156 = arith.constant 0 : index
    %155 = vector.load %arg2[%c26, %c0_155, %c0_156] : memref<49x8x3xbf16, #tpu.memory_space<vmem>>, vector<1x8x3xbf16>
    %156 = vector.shape_cast %155 : vector<1x8x3xbf16> to vector<8x3xbf16>
    %c26_157 = arith.constant 26 : index
    %c0_158 = arith.constant 0 : index
    %c0_159 = arith.constant 0 : index
    %157 = vector.load %arg1[%c26_157, %c0_158, %c0_159] : memref<49x3x512xbf16, #tpu.memory_space<vmem>>, vector<1x3x512xbf16>
    %158 = vector.shape_cast %157 : vector<1x3x512xbf16> to vector<3x512xbf16>
    %cst_160 = arith.constant dense<0.000000e+00> : vector<8x512xf32>
    %159 = tpu.matmul %156, %158, %cst_160 {dimension_numbers = #tpu.dot_dimension_numbers<[1], [0], [0], [1], [0, 0, 1, 1], [], []>} : vector<8x3xbf16>, vector<3x512xbf16>, vector<8x512xf32> -> vector<8x512xf32>
    %160 = arith.addf %154, %159 : vector<8x512xf32>
    %c27 = arith.constant 27 : index
    %c0_161 = arith.constant 0 : index
    %c0_162 = arith.constant 0 : index
    %161 = vector.load %arg2[%c27, %c0_161, %c0_162] : memref<49x8x3xbf16, #tpu.memory_space<vmem>>, vector<1x8x3xbf16>
    %162 = vector.shape_cast %161 : vector<1x8x3xbf16> to vector<8x3xbf16>
    %c27_163 = arith.constant 27 : index
    %c0_164 = arith.constant 0 : index
    %c0_165 = arith.constant 0 : index
    %163 = vector.load %arg1[%c27_163, %c0_164, %c0_165] : memref<49x3x512xbf16, #tpu.memory_space<vmem>>, vector<1x3x512xbf16>
    %164 = vector.shape_cast %163 : vector<1x3x512xbf16> to vector<3x512xbf16>
    %cst_166 = arith.constant dense<0.000000e+00> : vector<8x512xf32>
    %165 = tpu.matmul %162, %164, %cst_166 {dimension_numbers = #tpu.dot_dimension_numbers<[1], [0], [0], [1], [0, 0, 1, 1], [], []>} : vector<8x3xbf16>, vector<3x512xbf16>, vector<8x512xf32> -> vector<8x512xf32>
    %166 = arith.addf %160, %165 : vector<8x512xf32>
    %c28 = arith.constant 28 : index
    %c0_167 = arith.constant 0 : index
    %c0_168 = arith.constant 0 : index
    %167 = vector.load %arg2[%c28, %c0_167, %c0_168] : memref<49x8x3xbf16, #tpu.memory_space<vmem>>, vector<1x8x3xbf16>
    %168 = vector.shape_cast %167 : vector<1x8x3xbf16> to vector<8x3xbf16>
    %c28_169 = arith.constant 28 : index
    %c0_170 = arith.constant 0 : index
    %c0_171 = arith.constant 0 : index
    %169 = vector.load %arg1[%c28_169, %c0_170, %c0_171] : memref<49x3x512xbf16, #tpu.memory_space<vmem>>, vector<1x3x512xbf16>
    %170 = vector.shape_cast %169 : vector<1x3x512xbf16> to vector<3x512xbf16>
    %cst_172 = arith.constant dense<0.000000e+00> : vector<8x512xf32>
    %171 = tpu.matmul %168, %170, %cst_172 {dimension_numbers = #tpu.dot_dimension_numbers<[1], [0], [0], [1], [0, 0, 1, 1], [], []>} : vector<8x3xbf16>, vector<3x512xbf16>, vector<8x512xf32> -> vector<8x512xf32>
    %172 = arith.addf %166, %171 : vector<8x512xf32>
    %c29 = arith.constant 29 : index
    %c0_173 = arith.constant 0 : index
    %c0_174 = arith.constant 0 : index
    %173 = vector.load %arg2[%c29, %c0_173, %c0_174] : memref<49x8x3xbf16, #tpu.memory_space<vmem>>, vector<1x8x3xbf16>
    %174 = vector.shape_cast %173 : vector<1x8x3xbf16> to vector<8x3xbf16>
    %c29_175 = arith.constant 29 : index
    %c0_176 = arith.constant 0 : index
    %c0_177 = arith.constant 0 : index
    %175 = vector.load %arg1[%c29_175, %c0_176, %c0_177] : memref<49x3x512xbf16, #tpu.memory_space<vmem>>, vector<1x3x512xbf16>
    %176 = vector.shape_cast %175 : vector<1x3x512xbf16> to vector<3x512xbf16>
    %cst_178 = arith.constant dense<0.000000e+00> : vector<8x512xf32>
    %177 = tpu.matmul %174, %176, %cst_178 {dimension_numbers = #tpu.dot_dimension_numbers<[1], [0], [0], [1], [0, 0, 1, 1], [], []>} : vector<8x3xbf16>, vector<3x512xbf16>, vector<8x512xf32> -> vector<8x512xf32>
    %178 = arith.addf %172, %177 : vector<8x512xf32>
    %c30 = arith.constant 30 : index
    %c0_179 = arith.constant 0 : index
    %c0_180 = arith.constant 0 : index
    %179 = vector.load %arg2[%c30, %c0_179, %c0_180] : memref<49x8x3xbf16, #tpu.memory_space<vmem>>, vector<1x8x3xbf16>
    %180 = vector.shape_cast %179 : vector<1x8x3xbf16> to vector<8x3xbf16>
    %c30_181 = arith.constant 30 : index
    %c0_182 = arith.constant 0 : index
    %c0_183 = arith.constant 0 : index
    %181 = vector.load %arg1[%c30_181, %c0_182, %c0_183] : memref<49x3x512xbf16, #tpu.memory_space<vmem>>, vector<1x3x512xbf16>
    %182 = vector.shape_cast %181 : vector<1x3x512xbf16> to vector<3x512xbf16>
    %cst_184 = arith.constant dense<0.000000e+00> : vector<8x512xf32>
    %183 = tpu.matmul %180, %182, %cst_184 {dimension_numbers = #tpu.dot_dimension_numbers<[1], [0], [0], [1], [0, 0, 1, 1], [], []>} : vector<8x3xbf16>, vector<3x512xbf16>, vector<8x512xf32> -> vector<8x512xf32>
    %184 = arith.addf %178, %183 : vector<8x512xf32>
    %c31 = arith.constant 31 : index
    %c0_185 = arith.constant 0 : index
    %c0_186 = arith.constant 0 : index
    %185 = vector.load %arg2[%c31, %c0_185, %c0_186] : memref<49x8x3xbf16, #tpu.memory_space<vmem>>, vector<1x8x3xbf16>
    %186 = vector.shape_cast %185 : vector<1x8x3xbf16> to vector<8x3xbf16>
    %c31_187 = arith.constant 31 : index
    %c0_188 = arith.constant 0 : index
    %c0_189 = arith.constant 0 : index
    %187 = vector.load %arg1[%c31_187, %c0_188, %c0_189] : memref<49x3x512xbf16, #tpu.memory_space<vmem>>, vector<1x3x512xbf16>
    %188 = vector.shape_cast %187 : vector<1x3x512xbf16> to vector<3x512xbf16>
    %cst_190 = arith.constant dense<0.000000e+00> : vector<8x512xf32>
    %189 = tpu.matmul %186, %188, %cst_190 {dimension_numbers = #tpu.dot_dimension_numbers<[1], [0], [0], [1], [0, 0, 1, 1], [], []>} : vector<8x3xbf16>, vector<3x512xbf16>, vector<8x512xf32> -> vector<8x512xf32>
    %190 = arith.addf %184, %189 : vector<8x512xf32>
    %c32 = arith.constant 32 : index
    %c0_191 = arith.constant 0 : index
    %c0_192 = arith.constant 0 : index
    %191 = vector.load %arg2[%c32, %c0_191, %c0_192] : memref<49x8x3xbf16, #tpu.memory_space<vmem>>, vector<1x8x3xbf16>
    %192 = vector.shape_cast %191 : vector<1x8x3xbf16> to vector<8x3xbf16>
    %c32_193 = arith.constant 32 : index
    %c0_194 = arith.constant 0 : index
    %c0_195 = arith.constant 0 : index
    %193 = vector.load %arg1[%c32_193, %c0_194, %c0_195] : memref<49x3x512xbf16, #tpu.memory_space<vmem>>, vector<1x3x512xbf16>
    %194 = vector.shape_cast %193 : vector<1x3x512xbf16> to vector<3x512xbf16>
    %cst_196 = arith.constant dense<0.000000e+00> : vector<8x512xf32>
    %195 = tpu.matmul %192, %194, %cst_196 {dimension_numbers = #tpu.dot_dimension_numbers<[1], [0], [0], [1], [0, 0, 1, 1], [], []>} : vector<8x3xbf16>, vector<3x512xbf16>, vector<8x512xf32> -> vector<8x512xf32>
    %196 = arith.addf %190, %195 : vector<8x512xf32>
    %c33 = arith.constant 33 : index
    %c0_197 = arith.constant 0 : index
    %c0_198 = arith.constant 0 : index
    %197 = vector.load %arg2[%c33, %c0_197, %c0_198] : memref<49x8x3xbf16, #tpu.memory_space<vmem>>, vector<1x8x3xbf16>
    %198 = vector.shape_cast %197 : vector<1x8x3xbf16> to vector<8x3xbf16>
    %c33_199 = arith.constant 33 : index
    %c0_200 = arith.constant 0 : index
    %c0_201 = arith.constant 0 : index
    %199 = vector.load %arg1[%c33_199, %c0_200, %c0_201] : memref<49x3x512xbf16, #tpu.memory_space<vmem>>, vector<1x3x512xbf16>
    %200 = vector.shape_cast %199 : vector<1x3x512xbf16> to vector<3x512xbf16>
    %cst_202 = arith.constant dense<0.000000e+00> : vector<8x512xf32>
    %201 = tpu.matmul %198, %200, %cst_202 {dimension_numbers = #tpu.dot_dimension_numbers<[1], [0], [0], [1], [0, 0, 1, 1], [], []>} : vector<8x3xbf16>, vector<3x512xbf16>, vector<8x512xf32> -> vector<8x512xf32>
    %202 = arith.addf %196, %201 : vector<8x512xf32>
    %c34 = arith.constant 34 : index
    %c0_203 = arith.constant 0 : index
    %c0_204 = arith.constant 0 : index
    %203 = vector.load %arg2[%c34, %c0_203, %c0_204] : memref<49x8x3xbf16, #tpu.memory_space<vmem>>, vector<1x8x3xbf16>
    %204 = vector.shape_cast %203 : vector<1x8x3xbf16> to vector<8x3xbf16>
    %c34_205 = arith.constant 34 : index
    %c0_206 = arith.constant 0 : index
    %c0_207 = arith.constant 0 : index
    %205 = vector.load %arg1[%c34_205, %c0_206, %c0_207] : memref<49x3x512xbf16, #tpu.memory_space<vmem>>, vector<1x3x512xbf16>
    %206 = vector.shape_cast %205 : vector<1x3x512xbf16> to vector<3x512xbf16>
    %cst_208 = arith.constant dense<0.000000e+00> : vector<8x512xf32>
    %207 = tpu.matmul %204, %206, %cst_208 {dimension_numbers = #tpu.dot_dimension_numbers<[1], [0], [0], [1], [0, 0, 1, 1], [], []>} : vector<8x3xbf16>, vector<3x512xbf16>, vector<8x512xf32> -> vector<8x512xf32>
    %208 = arith.addf %202, %207 : vector<8x512xf32>
    %c35 = arith.constant 35 : index
    %c0_209 = arith.constant 0 : index
    %c0_210 = arith.constant 0 : index
    %209 = vector.load %arg2[%c35, %c0_209, %c0_210] : memref<49x8x3xbf16, #tpu.memory_space<vmem>>, vector<1x8x3xbf16>
    %210 = vector.shape_cast %209 : vector<1x8x3xbf16> to vector<8x3xbf16>
    %c35_211 = arith.constant 35 : index
    %c0_212 = arith.constant 0 : index
    %c0_213 = arith.constant 0 : index
    %211 = vector.load %arg1[%c35_211, %c0_212, %c0_213] : memref<49x3x512xbf16, #tpu.memory_space<vmem>>, vector<1x3x512xbf16>
    %212 = vector.shape_cast %211 : vector<1x3x512xbf16> to vector<3x512xbf16>
    %cst_214 = arith.constant dense<0.000000e+00> : vector<8x512xf32>
    %213 = tpu.matmul %210, %212, %cst_214 {dimension_numbers = #tpu.dot_dimension_numbers<[1], [0], [0], [1], [0, 0, 1, 1], [], []>} : vector<8x3xbf16>, vector<3x512xbf16>, vector<8x512xf32> -> vector<8x512xf32>
    %214 = arith.addf %208, %213 : vector<8x512xf32>
    %c36 = arith.constant 36 : index
    %c0_215 = arith.constant 0 : index
    %c0_216 = arith.constant 0 : index
    %215 = vector.load %arg2[%c36, %c0_215, %c0_216] : memref<49x8x3xbf16, #tpu.memory_space<vmem>>, vector<1x8x3xbf16>
    %216 = vector.shape_cast %215 : vector<1x8x3xbf16> to vector<8x3xbf16>
    %c36_217 = arith.constant 36 : index
    %c0_218 = arith.constant 0 : index
    %c0_219 = arith.constant 0 : index
    %217 = vector.load %arg1[%c36_217, %c0_218, %c0_219] : memref<49x3x512xbf16, #tpu.memory_space<vmem>>, vector<1x3x512xbf16>
    %218 = vector.shape_cast %217 : vector<1x3x512xbf16> to vector<3x512xbf16>
    %cst_220 = arith.constant dense<0.000000e+00> : vector<8x512xf32>
    %219 = tpu.matmul %216, %218, %cst_220 {dimension_numbers = #tpu.dot_dimension_numbers<[1], [0], [0], [1], [0, 0, 1, 1], [], []>} : vector<8x3xbf16>, vector<3x512xbf16>, vector<8x512xf32> -> vector<8x512xf32>
    %220 = arith.addf %214, %219 : vector<8x512xf32>
    %c37 = arith.constant 37 : index
    %c0_221 = arith.constant 0 : index
    %c0_222 = arith.constant 0 : index
    %221 = vector.load %arg2[%c37, %c0_221, %c0_222] : memref<49x8x3xbf16, #tpu.memory_space<vmem>>, vector<1x8x3xbf16>
    %222 = vector.shape_cast %221 : vector<1x8x3xbf16> to vector<8x3xbf16>
    %c37_223 = arith.constant 37 : index
    %c0_224 = arith.constant 0 : index
    %c0_225 = arith.constant 0 : index
    %223 = vector.load %arg1[%c37_223, %c0_224, %c0_225] : memref<49x3x512xbf16, #tpu.memory_space<vmem>>, vector<1x3x512xbf16>
    %224 = vector.shape_cast %223 : vector<1x3x512xbf16> to vector<3x512xbf16>
    %cst_226 = arith.constant dense<0.000000e+00> : vector<8x512xf32>
    %225 = tpu.matmul %222, %224, %cst_226 {dimension_numbers = #tpu.dot_dimension_numbers<[1], [0], [0], [1], [0, 0, 1, 1], [], []>} : vector<8x3xbf16>, vector<3x512xbf16>, vector<8x512xf32> -> vector<8x512xf32>
    %226 = arith.addf %220, %225 : vector<8x512xf32>
    %c38 = arith.constant 38 : index
    %c0_227 = arith.constant 0 : index
    %c0_228 = arith.constant 0 : index
    %227 = vector.load %arg2[%c38, %c0_227, %c0_228] : memref<49x8x3xbf16, #tpu.memory_space<vmem>>, vector<1x8x3xbf16>
    %228 = vector.shape_cast %227 : vector<1x8x3xbf16> to vector<8x3xbf16>
    %c38_229 = arith.constant 38 : index
    %c0_230 = arith.constant 0 : index
    %c0_231 = arith.constant 0 : index
    %229 = vector.load %arg1[%c38_229, %c0_230, %c0_231] : memref<49x3x512xbf16, #tpu.memory_space<vmem>>, vector<1x3x512xbf16>
    %230 = vector.shape_cast %229 : vector<1x3x512xbf16> to vector<3x512xbf16>
    %cst_232 = arith.constant dense<0.000000e+00> : vector<8x512xf32>
    %231 = tpu.matmul %228, %230, %cst_232 {dimension_numbers = #tpu.dot_dimension_numbers<[1], [0], [0], [1], [0, 0, 1, 1], [], []>} : vector<8x3xbf16>, vector<3x512xbf16>, vector<8x512xf32> -> vector<8x512xf32>
    %232 = arith.addf %226, %231 : vector<8x512xf32>
    %c39 = arith.constant 39 : index
    %c0_233 = arith.constant 0 : index
    %c0_234 = arith.constant 0 : index
    %233 = vector.load %arg2[%c39, %c0_233, %c0_234] : memref<49x8x3xbf16, #tpu.memory_space<vmem>>, vector<1x8x3xbf16>
    %234 = vector.shape_cast %233 : vector<1x8x3xbf16> to vector<8x3xbf16>
    %c39_235 = arith.constant 39 : index
    %c0_236 = arith.constant 0 : index
    %c0_237 = arith.constant 0 : index
    %235 = vector.load %arg1[%c39_235, %c0_236, %c0_237] : memref<49x3x512xbf16, #tpu.memory_space<vmem>>, vector<1x3x512xbf16>
    %236 = vector.shape_cast %235 : vector<1x3x512xbf16> to vector<3x512xbf16>
    %cst_238 = arith.constant dense<0.000000e+00> : vector<8x512xf32>
    %237 = tpu.matmul %234, %236, %cst_238 {dimension_numbers = #tpu.dot_dimension_numbers<[1], [0], [0], [1], [0, 0, 1, 1], [], []>} : vector<8x3xbf16>, vector<3x512xbf16>, vector<8x512xf32> -> vector<8x512xf32>
    %238 = arith.addf %232, %237 : vector<8x512xf32>
    %c40 = arith.constant 40 : index
    %c0_239 = arith.constant 0 : index
    %c0_240 = arith.constant 0 : index
    %239 = vector.load %arg2[%c40, %c0_239, %c0_240] : memref<49x8x3xbf16, #tpu.memory_space<vmem>>, vector<1x8x3xbf16>
    %240 = vector.shape_cast %239 : vector<1x8x3xbf16> to vector<8x3xbf16>
    %c40_241 = arith.constant 40 : index
    %c0_242 = arith.constant 0 : index
    %c0_243 = arith.constant 0 : index
    %241 = vector.load %arg1[%c40_241, %c0_242, %c0_243] : memref<49x3x512xbf16, #tpu.memory_space<vmem>>, vector<1x3x512xbf16>
    %242 = vector.shape_cast %241 : vector<1x3x512xbf16> to vector<3x512xbf16>
    %cst_244 = arith.constant dense<0.000000e+00> : vector<8x512xf32>
    %243 = tpu.matmul %240, %242, %cst_244 {dimension_numbers = #tpu.dot_dimension_numbers<[1], [0], [0], [1], [0, 0, 1, 1], [], []>} : vector<8x3xbf16>, vector<3x512xbf16>, vector<8x512xf32> -> vector<8x512xf32>
    %244 = arith.addf %238, %243 : vector<8x512xf32>
    %c41 = arith.constant 41 : index
    %c0_245 = arith.constant 0 : index
    %c0_246 = arith.constant 0 : index
    %245 = vector.load %arg2[%c41, %c0_245, %c0_246] : memref<49x8x3xbf16, #tpu.memory_space<vmem>>, vector<1x8x3xbf16>
    %246 = vector.shape_cast %245 : vector<1x8x3xbf16> to vector<8x3xbf16>
    %c41_247 = arith.constant 41 : index
    %c0_248 = arith.constant 0 : index
    %c0_249 = arith.constant 0 : index
    %247 = vector.load %arg1[%c41_247, %c0_248, %c0_249] : memref<49x3x512xbf16, #tpu.memory_space<vmem>>, vector<1x3x512xbf16>
    %248 = vector.shape_cast %247 : vector<1x3x512xbf16> to vector<3x512xbf16>
    %cst_250 = arith.constant dense<0.000000e+00> : vector<8x512xf32>
    %249 = tpu.matmul %246, %248, %cst_250 {dimension_numbers = #tpu.dot_dimension_numbers<[1], [0], [0], [1], [0, 0, 1, 1], [], []>} : vector<8x3xbf16>, vector<3x512xbf16>, vector<8x512xf32> -> vector<8x512xf32>
    %250 = arith.addf %244, %249 : vector<8x512xf32>
    %c42 = arith.constant 42 : index
    %c0_251 = arith.constant 0 : index
    %c0_252 = arith.constant 0 : index
    %251 = vector.load %arg2[%c42, %c0_251, %c0_252] : memref<49x8x3xbf16, #tpu.memory_space<vmem>>, vector<1x8x3xbf16>
    %252 = vector.shape_cast %251 : vector<1x8x3xbf16> to vector<8x3xbf16>
    %c42_253 = arith.constant 42 : index
    %c0_254 = arith.constant 0 : index
    %c0_255 = arith.constant 0 : index
    %253 = vector.load %arg1[%c42_253, %c0_254, %c0_255] : memref<49x3x512xbf16, #tpu.memory_space<vmem>>, vector<1x3x512xbf16>
    %254 = vector.shape_cast %253 : vector<1x3x512xbf16> to vector<3x512xbf16>
    %cst_256 = arith.constant dense<0.000000e+00> : vector<8x512xf32>
    %255 = tpu.matmul %252, %254, %cst_256 {dimension_numbers = #tpu.dot_dimension_numbers<[1], [0], [0], [1], [0, 0, 1, 1], [], []>} : vector<8x3xbf16>, vector<3x512xbf16>, vector<8x512xf32> -> vector<8x512xf32>
    %256 = arith.addf %250, %255 : vector<8x512xf32>
    %c43 = arith.constant 43 : index
    %c0_257 = arith.constant 0 : index
    %c0_258 = arith.constant 0 : index
    %257 = vector.load %arg2[%c43, %c0_257, %c0_258] : memref<49x8x3xbf16, #tpu.memory_space<vmem>>, vector<1x8x3xbf16>
    %258 = vector.shape_cast %257 : vector<1x8x3xbf16> to vector<8x3xbf16>
    %c43_259 = arith.constant 43 : index
    %c0_260 = arith.constant 0 : index
    %c0_261 = arith.constant 0 : index
    %259 = vector.load %arg1[%c43_259, %c0_260, %c0_261] : memref<49x3x512xbf16, #tpu.memory_space<vmem>>, vector<1x3x512xbf16>
    %260 = vector.shape_cast %259 : vector<1x3x512xbf16> to vector<3x512xbf16>
    %cst_262 = arith.constant dense<0.000000e+00> : vector<8x512xf32>
    %261 = tpu.matmul %258, %260, %cst_262 {dimension_numbers = #tpu.dot_dimension_numbers<[1], [0], [0], [1], [0, 0, 1, 1], [], []>} : vector<8x3xbf16>, vector<3x512xbf16>, vector<8x512xf32> -> vector<8x512xf32>
    %262 = arith.addf %256, %261 : vector<8x512xf32>
    %c44 = arith.constant 44 : index
    %c0_263 = arith.constant 0 : index
    %c0_264 = arith.constant 0 : index
    %263 = vector.load %arg2[%c44, %c0_263, %c0_264] : memref<49x8x3xbf16, #tpu.memory_space<vmem>>, vector<1x8x3xbf16>
    %264 = vector.shape_cast %263 : vector<1x8x3xbf16> to vector<8x3xbf16>
    %c44_265 = arith.constant 44 : index
    %c0_266 = arith.constant 0 : index
    %c0_267 = arith.constant 0 : index
    %265 = vector.load %arg1[%c44_265, %c0_266, %c0_267] : memref<49x3x512xbf16, #tpu.memory_space<vmem>>, vector<1x3x512xbf16>
    %266 = vector.shape_cast %265 : vector<1x3x512xbf16> to vector<3x512xbf16>
    %cst_268 = arith.constant dense<0.000000e+00> : vector<8x512xf32>
    %267 = tpu.matmul %264, %266, %cst_268 {dimension_numbers = #tpu.dot_dimension_numbers<[1], [0], [0], [1], [0, 0, 1, 1], [], []>} : vector<8x3xbf16>, vector<3x512xbf16>, vector<8x512xf32> -> vector<8x512xf32>
    %268 = arith.addf %262, %267 : vector<8x512xf32>
    %c45 = arith.constant 45 : index
    %c0_269 = arith.constant 0 : index
    %c0_270 = arith.constant 0 : index
    %269 = vector.load %arg2[%c45, %c0_269, %c0_270] : memref<49x8x3xbf16, #tpu.memory_space<vmem>>, vector<1x8x3xbf16>
    %270 = vector.shape_cast %269 : vector<1x8x3xbf16> to vector<8x3xbf16>
    %c45_271 = arith.constant 45 : index
    %c0_272 = arith.constant 0 : index
    %c0_273 = arith.constant 0 : index
    %271 = vector.load %arg1[%c45_271, %c0_272, %c0_273] : memref<49x3x512xbf16, #tpu.memory_space<vmem>>, vector<1x3x512xbf16>
    %272 = vector.shape_cast %271 : vector<1x3x512xbf16> to vector<3x512xbf16>
    %cst_274 = arith.constant dense<0.000000e+00> : vector<8x512xf32>
    %273 = tpu.matmul %270, %272, %cst_274 {dimension_numbers = #tpu.dot_dimension_numbers<[1], [0], [0], [1], [0, 0, 1, 1], [], []>} : vector<8x3xbf16>, vector<3x512xbf16>, vector<8x512xf32> -> vector<8x512xf32>
    %274 = arith.addf %268, %273 : vector<8x512xf32>
    %c46 = arith.constant 46 : index
    %c0_275 = arith.constant 0 : index
    %c0_276 = arith.constant 0 : index
    %275 = vector.load %arg2[%c46, %c0_275, %c0_276] : memref<49x8x3xbf16, #tpu.memory_space<vmem>>, vector<1x8x3xbf16>
    %276 = vector.shape_cast %275 : vector<1x8x3xbf16> to vector<8x3xbf16>
    %c46_277 = arith.constant 46 : index
    %c0_278 = arith.constant 0 : index
    %c0_279 = arith.constant 0 : index
    %277 = vector.load %arg1[%c46_277, %c0_278, %c0_279] : memref<49x3x512xbf16, #tpu.memory_space<vmem>>, vector<1x3x512xbf16>
    %278 = vector.shape_cast %277 : vector<1x3x512xbf16> to vector<3x512xbf16>
    %cst_280 = arith.constant dense<0.000000e+00> : vector<8x512xf32>
    %279 = tpu.matmul %276, %278, %cst_280 {dimension_numbers = #tpu.dot_dimension_numbers<[1], [0], [0], [1], [0, 0, 1, 1], [], []>} : vector<8x3xbf16>, vector<3x512xbf16>, vector<8x512xf32> -> vector<8x512xf32>
    %280 = arith.addf %274, %279 : vector<8x512xf32>
    %c47 = arith.constant 47 : index
    %c0_281 = arith.constant 0 : index
    %c0_282 = arith.constant 0 : index
    %281 = vector.load %arg2[%c47, %c0_281, %c0_282] : memref<49x8x3xbf16, #tpu.memory_space<vmem>>, vector<1x8x3xbf16>
    %282 = vector.shape_cast %281 : vector<1x8x3xbf16> to vector<8x3xbf16>
    %c47_283 = arith.constant 47 : index
    %c0_284 = arith.constant 0 : index
    %c0_285 = arith.constant 0 : index
    %283 = vector.load %arg1[%c47_283, %c0_284, %c0_285] : memref<49x3x512xbf16, #tpu.memory_space<vmem>>, vector<1x3x512xbf16>
    %284 = vector.shape_cast %283 : vector<1x3x512xbf16> to vector<3x512xbf16>
    %cst_286 = arith.constant dense<0.000000e+00> : vector<8x512xf32>
    %285 = tpu.matmul %282, %284, %cst_286 {dimension_numbers = #tpu.dot_dimension_numbers<[1], [0], [0], [1], [0, 0, 1, 1], [], []>} : vector<8x3xbf16>, vector<3x512xbf16>, vector<8x512xf32> -> vector<8x512xf32>
    %286 = arith.addf %280, %285 : vector<8x512xf32>
    %c48 = arith.constant 48 : index
    %c0_287 = arith.constant 0 : index
    %c0_288 = arith.constant 0 : index
    %287 = vector.load %arg2[%c48, %c0_287, %c0_288] : memref<49x8x3xbf16, #tpu.memory_space<vmem>>, vector<1x8x3xbf16>
    %288 = vector.shape_cast %287 : vector<1x8x3xbf16> to vector<8x3xbf16>
    %c48_289 = arith.constant 48 : index
    %c0_290 = arith.constant 0 : index
    %c0_291 = arith.constant 0 : index
    %289 = vector.load %arg1[%c48_289, %c0_290, %c0_291] : memref<49x3x512xbf16, #tpu.memory_space<vmem>>, vector<1x3x512xbf16>
    %290 = vector.shape_cast %289 : vector<1x3x512xbf16> to vector<3x512xbf16>
    %cst_292 = arith.constant dense<0.000000e+00> : vector<8x512xf32>
    %291 = tpu.matmul %288, %290, %cst_292 {dimension_numbers = #tpu.dot_dimension_numbers<[1], [0], [0], [1], [0, 0, 1, 1], [], []>} : vector<8x3xbf16>, vector<3x512xbf16>, vector<8x512xf32> -> vector<8x512xf32>
    %292 = arith.addf %286, %291 : vector<8x512xf32>
    %c0_293 = arith.constant 0 : index
    %c0_294 = arith.constant 0 : index
    %293 = vector.load %arg3[%c0_293, %c0_294] : memref<8x1xf32, #tpu.memory_space<vmem>>, vector<8x1xf32>
    %294 = vector.broadcast %293 : vector<8x1xf32> to vector<8x512xf32>
    %295 = arith.mulf %292, %294 : vector<8x512xf32>
    %c0_295 = arith.constant 0 : index
    %c0_296 = arith.constant 0 : index
    %296 = vector.load %arg4[%c0_295, %c0_296] : memref<8x1xf32, #tpu.memory_space<vmem>>, vector<8x1xf32>
    %297 = vector.broadcast %296 : vector<8x1xf32> to vector<8x512xf32>
    %298 = arith.addf %295, %297 : vector<8x512xf32>
    %cst_297 = arith.constant 0.000000e+00 : f32
    %299 = vector.broadcast %cst_297 : f32 to vector<8x512xf32>
    %300 = arith.maximumf %298, %299 : vector<8x512xf32>
    %301 = arith.truncf %300 : vector<8x512xf32> to vector<8x512xbf16>
    %c0_298 = arith.constant 0 : index
    %c0_299 = arith.constant 0 : index
    %302 = vector.load %arg5[%c0_298, %c0_299] : memref<8x512xbf16, #tpu.memory_space<vmem>>, vector<8x512xbf16>
    tpu.vector_store %arg5[%c0_298, %c0_299], %301 {strides = array<i32>} : memref<8x512xbf16, #tpu.memory_space<vmem>>, vector<8x512xbf16>,
    return
  }
  func.func @transform_0(%arg0: i32) -> (i32, i32, i32) {
    %c0_i32 = arith.constant 0 : i32
    %c0_i32_0 = arith.constant 0 : i32
    %c0_i32_1 = arith.constant 0 : i32
    return %c0_i32, %c0_i32_0, %arg0 : i32, i32, i32
  }
  func.func @transform_1(%arg0: i32) -> (i32, i32, i32) {
    %c0_i32 = arith.constant 0 : i32
    %c0_i32_0 = arith.constant 0 : i32
    %c0_i32_1 = arith.constant 0 : i32
    %c0_i32_2 = arith.constant 0 : i32
    return %c0_i32, %c0_i32_0, %c0_i32_1 : i32, i32, i32
  }
  func.func @transform_2(%arg0: i32) -> (i32, i32) {
    %c0_i32 = arith.constant 0 : i32
    %c0_i32_0 = arith.constant 0 : i32
    %c0_i32_1 = arith.constant 0 : i32
    return %c0_i32, %c0_i32_0 : i32, i32
  }
  func.func @transform_3(%arg0: i32) -> (i32, i32) {
    %c0_i32 = arith.constant 0 : i32
    %c0_i32_0 = arith.constant 0 : i32
    %c0_i32_1 = arith.constant 0 : i32
    return %c0_i32, %c0_i32_0 : i32, i32
  }
  func.func @transform_4(%arg0: i32) -> (i32, i32) {
    %c0_i32 = arith.constant 0 : i32
    %c0_i32_0 = arith.constant 0 : i32
    return %c0_i32, %arg0 : i32, i32
  }
}

module attributes {stable_mosaic.version = 11 : i64} {
  func.func @_maxpool_kernel(%arg0: i32, %arg1: memref<9x8x392xbf16, #tpu.memory_space<vmem>>, %arg2: memref<8x392xbf16, #tpu.memory_space<vmem>>) attributes {dimension_semantics = [#tpu.dimension_semantics<parallel>], iteration_bounds = array<i64: 1>, scalar_prefetch = 0 : i64, scratch_operands = 0 : i64, tpu.core_type = #tpu.core_type<tc>, window_params = [{transform_indices = @transform_0, window_bounds = array<i64: 9, 8, 392>}, {transform_indices = @transform_1, window_bounds = array<i64: 8, 392>}]} {
    %c0 = arith.constant 0 : index
    %c0_0 = arith.constant 0 : index
    %c0_1 = arith.constant 0 : index
    %0 = vector.load %arg1[%c0, %c0_0, %c0_1] : memref<9x8x392xbf16, #tpu.memory_space<vmem>>, vector<1x8x392xbf16>
    %1 = vector.shape_cast %0 : vector<1x8x392xbf16> to vector<8x392xbf16>
    %c1 = arith.constant 1 : index
    %c0_2 = arith.constant 0 : index
    %c0_3 = arith.constant 0 : index
    %2 = vector.load %arg1[%c1, %c0_2, %c0_3] : memref<9x8x392xbf16, #tpu.memory_space<vmem>>, vector<1x8x392xbf16>
    %3 = vector.shape_cast %2 : vector<1x8x392xbf16> to vector<8x392xbf16>
    %4 = arith.maximumf %1, %3 : vector<8x392xbf16>
    %c2 = arith.constant 2 : index
    %c0_4 = arith.constant 0 : index
    %c0_5 = arith.constant 0 : index
    %5 = vector.load %arg1[%c2, %c0_4, %c0_5] : memref<9x8x392xbf16, #tpu.memory_space<vmem>>, vector<1x8x392xbf16>
    %6 = vector.shape_cast %5 : vector<1x8x392xbf16> to vector<8x392xbf16>
    %7 = arith.maximumf %4, %6 : vector<8x392xbf16>
    %c3 = arith.constant 3 : index
    %c0_6 = arith.constant 0 : index
    %c0_7 = arith.constant 0 : index
    %8 = vector.load %arg1[%c3, %c0_6, %c0_7] : memref<9x8x392xbf16, #tpu.memory_space<vmem>>, vector<1x8x392xbf16>
    %9 = vector.shape_cast %8 : vector<1x8x392xbf16> to vector<8x392xbf16>
    %10 = arith.maximumf %7, %9 : vector<8x392xbf16>
    %c4 = arith.constant 4 : index
    %c0_8 = arith.constant 0 : index
    %c0_9 = arith.constant 0 : index
    %11 = vector.load %arg1[%c4, %c0_8, %c0_9] : memref<9x8x392xbf16, #tpu.memory_space<vmem>>, vector<1x8x392xbf16>
    %12 = vector.shape_cast %11 : vector<1x8x392xbf16> to vector<8x392xbf16>
    %13 = arith.maximumf %10, %12 : vector<8x392xbf16>
    %c5 = arith.constant 5 : index
    %c0_10 = arith.constant 0 : index
    %c0_11 = arith.constant 0 : index
    %14 = vector.load %arg1[%c5, %c0_10, %c0_11] : memref<9x8x392xbf16, #tpu.memory_space<vmem>>, vector<1x8x392xbf16>
    %15 = vector.shape_cast %14 : vector<1x8x392xbf16> to vector<8x392xbf16>
    %16 = arith.maximumf %13, %15 : vector<8x392xbf16>
    %c6 = arith.constant 6 : index
    %c0_12 = arith.constant 0 : index
    %c0_13 = arith.constant 0 : index
    %17 = vector.load %arg1[%c6, %c0_12, %c0_13] : memref<9x8x392xbf16, #tpu.memory_space<vmem>>, vector<1x8x392xbf16>
    %18 = vector.shape_cast %17 : vector<1x8x392xbf16> to vector<8x392xbf16>
    %19 = arith.maximumf %16, %18 : vector<8x392xbf16>
    %c7 = arith.constant 7 : index
    %c0_14 = arith.constant 0 : index
    %c0_15 = arith.constant 0 : index
    %20 = vector.load %arg1[%c7, %c0_14, %c0_15] : memref<9x8x392xbf16, #tpu.memory_space<vmem>>, vector<1x8x392xbf16>
    %21 = vector.shape_cast %20 : vector<1x8x392xbf16> to vector<8x392xbf16>
    %22 = arith.maximumf %19, %21 : vector<8x392xbf16>
    %c8 = arith.constant 8 : index
    %c0_16 = arith.constant 0 : index
    %c0_17 = arith.constant 0 : index
    %23 = vector.load %arg1[%c8, %c0_16, %c0_17] : memref<9x8x392xbf16, #tpu.memory_space<vmem>>, vector<1x8x392xbf16>
    %24 = vector.shape_cast %23 : vector<1x8x392xbf16> to vector<8x392xbf16>
    %25 = arith.maximumf %22, %24 : vector<8x392xbf16>
    %c0_18 = arith.constant 0 : index
    %c0_19 = arith.constant 0 : index
    %26 = vector.load %arg2[%c0_18, %c0_19] : memref<8x392xbf16, #tpu.memory_space<vmem>>, vector<8x392xbf16>
    tpu.vector_store %arg2[%c0_18, %c0_19], %25 {strides = array<i32>} : memref<8x392xbf16, #tpu.memory_space<vmem>>, vector<8x392xbf16>,
    return
  }
  func.func @transform_0(%arg0: i32) -> (i32, i32, i32) {
    %c0_i32 = arith.constant 0 : i32
    %c0_i32_0 = arith.constant 0 : i32
    %c0_i32_1 = arith.constant 0 : i32
    return %c0_i32, %c0_i32_0, %arg0 : i32, i32, i32
  }
  func.func @transform_1(%arg0: i32) -> (i32, i32) {
    %c0_i32 = arith.constant 0 : i32
    %c0_i32_0 = arith.constant 0 : i32
    return %c0_i32, %arg0 : i32, i32
  }
}

module attributes {stable_mosaic.version = 11 : i64} {
  func.func @_conv_bn_kernel(%arg0: i32, %arg1: memref<9x8x392xbf16, #tpu.memory_space<vmem>>, %arg2: memref<9x8x8xbf16, #tpu.memory_space<vmem>>, %arg3: memref<8x1xf32, #tpu.memory_space<vmem>>, %arg4: memref<8x1xf32, #tpu.memory_space<vmem>>, %arg5: memref<8x392xbf16, #tpu.memory_space<vmem>>) attributes {dimension_semantics = [#tpu.dimension_semantics<parallel>], iteration_bounds = array<i64: 1>, scalar_prefetch = 0 : i64, scratch_operands = 0 : i64, tpu.core_type = #tpu.core_type<tc>, window_params = [{transform_indices = @transform_0, window_bounds = array<i64: 9, 8, 392>}, {pipeline_mode = #tpu.pipeline_mode<synchronous>, transform_indices = @transform_1, window_bounds = array<i64: 9, 8, 8>}, {pipeline_mode = #tpu.pipeline_mode<synchronous>, transform_indices = @transform_2, window_bounds = array<i64: 8, 1>}, {pipeline_mode = #tpu.pipeline_mode<synchronous>, transform_indices = @transform_3, window_bounds = array<i64: 8, 1>}, {transform_indices = @transform_4, window_bounds = array<i64: 8, 392>}]} {
    %c0 = arith.constant 0 : index
    %c0_0 = arith.constant 0 : index
    %c0_1 = arith.constant 0 : index
    %0 = vector.load %arg2[%c0, %c0_0, %c0_1] : memref<9x8x8xbf16, #tpu.memory_space<vmem>>, vector<1x8x8xbf16>
    %1 = vector.shape_cast %0 : vector<1x8x8xbf16> to vector<8x8xbf16>
    %c0_2 = arith.constant 0 : index
    %c0_3 = arith.constant 0 : index
    %c0_4 = arith.constant 0 : index
    %2 = vector.load %arg1[%c0_2, %c0_3, %c0_4] : memref<9x8x392xbf16, #tpu.memory_space<vmem>>, vector<1x8x392xbf16>
    %3 = vector.shape_cast %2 : vector<1x8x392xbf16> to vector<8x392xbf16>
    %cst = arith.constant dense<0.000000e+00> : vector<8x392xf32>
    %4 = tpu.matmul %1, %3, %cst {dimension_numbers = #tpu.dot_dimension_numbers<[1], [0], [0], [1], [0, 0, 1, 1], [], []>} : vector<8x8xbf16>, vector<8x392xbf16>, vector<8x392xf32> -> vector<8x392xf32>
    %c1 = arith.constant 1 : index
    %c0_5 = arith.constant 0 : index
    %c0_6 = arith.constant 0 : index
    %5 = vector.load %arg2[%c1, %c0_5, %c0_6] : memref<9x8x8xbf16, #tpu.memory_space<vmem>>, vector<1x8x8xbf16>
    %6 = vector.shape_cast %5 : vector<1x8x8xbf16> to vector<8x8xbf16>
    %c1_7 = arith.constant 1 : index
    %c0_8 = arith.constant 0 : index
    %c0_9 = arith.constant 0 : index
    %7 = vector.load %arg1[%c1_7, %c0_8, %c0_9] : memref<9x8x392xbf16, #tpu.memory_space<vmem>>, vector<1x8x392xbf16>
    %8 = vector.shape_cast %7 : vector<1x8x392xbf16> to vector<8x392xbf16>
    %cst_10 = arith.constant dense<0.000000e+00> : vector<8x392xf32>
    %9 = tpu.matmul %6, %8, %cst_10 {dimension_numbers = #tpu.dot_dimension_numbers<[1], [0], [0], [1], [0, 0, 1, 1], [], []>} : vector<8x8xbf16>, vector<8x392xbf16>, vector<8x392xf32> -> vector<8x392xf32>
    %10 = arith.addf %4, %9 : vector<8x392xf32>
    %c2 = arith.constant 2 : index
    %c0_11 = arith.constant 0 : index
    %c0_12 = arith.constant 0 : index
    %11 = vector.load %arg2[%c2, %c0_11, %c0_12] : memref<9x8x8xbf16, #tpu.memory_space<vmem>>, vector<1x8x8xbf16>
    %12 = vector.shape_cast %11 : vector<1x8x8xbf16> to vector<8x8xbf16>
    %c2_13 = arith.constant 2 : index
    %c0_14 = arith.constant 0 : index
    %c0_15 = arith.constant 0 : index
    %13 = vector.load %arg1[%c2_13, %c0_14, %c0_15] : memref<9x8x392xbf16, #tpu.memory_space<vmem>>, vector<1x8x392xbf16>
    %14 = vector.shape_cast %13 : vector<1x8x392xbf16> to vector<8x392xbf16>
    %cst_16 = arith.constant dense<0.000000e+00> : vector<8x392xf32>
    %15 = tpu.matmul %12, %14, %cst_16 {dimension_numbers = #tpu.dot_dimension_numbers<[1], [0], [0], [1], [0, 0, 1, 1], [], []>} : vector<8x8xbf16>, vector<8x392xbf16>, vector<8x392xf32> -> vector<8x392xf32>
    %16 = arith.addf %10, %15 : vector<8x392xf32>
    %c3 = arith.constant 3 : index
    %c0_17 = arith.constant 0 : index
    %c0_18 = arith.constant 0 : index
    %17 = vector.load %arg2[%c3, %c0_17, %c0_18] : memref<9x8x8xbf16, #tpu.memory_space<vmem>>, vector<1x8x8xbf16>
    %18 = vector.shape_cast %17 : vector<1x8x8xbf16> to vector<8x8xbf16>
    %c3_19 = arith.constant 3 : index
    %c0_20 = arith.constant 0 : index
    %c0_21 = arith.constant 0 : index
    %19 = vector.load %arg1[%c3_19, %c0_20, %c0_21] : memref<9x8x392xbf16, #tpu.memory_space<vmem>>, vector<1x8x392xbf16>
    %20 = vector.shape_cast %19 : vector<1x8x392xbf16> to vector<8x392xbf16>
    %cst_22 = arith.constant dense<0.000000e+00> : vector<8x392xf32>
    %21 = tpu.matmul %18, %20, %cst_22 {dimension_numbers = #tpu.dot_dimension_numbers<[1], [0], [0], [1], [0, 0, 1, 1], [], []>} : vector<8x8xbf16>, vector<8x392xbf16>, vector<8x392xf32> -> vector<8x392xf32>
    %22 = arith.addf %16, %21 : vector<8x392xf32>
    %c4 = arith.constant 4 : index
    %c0_23 = arith.constant 0 : index
    %c0_24 = arith.constant 0 : index
    %23 = vector.load %arg2[%c4, %c0_23, %c0_24] : memref<9x8x8xbf16, #tpu.memory_space<vmem>>, vector<1x8x8xbf16>
    %24 = vector.shape_cast %23 : vector<1x8x8xbf16> to vector<8x8xbf16>
    %c4_25 = arith.constant 4 : index
    %c0_26 = arith.constant 0 : index
    %c0_27 = arith.constant 0 : index
    %25 = vector.load %arg1[%c4_25, %c0_26, %c0_27] : memref<9x8x392xbf16, #tpu.memory_space<vmem>>, vector<1x8x392xbf16>
    %26 = vector.shape_cast %25 : vector<1x8x392xbf16> to vector<8x392xbf16>
    %cst_28 = arith.constant dense<0.000000e+00> : vector<8x392xf32>
    %27 = tpu.matmul %24, %26, %cst_28 {dimension_numbers = #tpu.dot_dimension_numbers<[1], [0], [0], [1], [0, 0, 1, 1], [], []>} : vector<8x8xbf16>, vector<8x392xbf16>, vector<8x392xf32> -> vector<8x392xf32>
    %28 = arith.addf %22, %27 : vector<8x392xf32>
    %c5 = arith.constant 5 : index
    %c0_29 = arith.constant 0 : index
    %c0_30 = arith.constant 0 : index
    %29 = vector.load %arg2[%c5, %c0_29, %c0_30] : memref<9x8x8xbf16, #tpu.memory_space<vmem>>, vector<1x8x8xbf16>
    %30 = vector.shape_cast %29 : vector<1x8x8xbf16> to vector<8x8xbf16>
    %c5_31 = arith.constant 5 : index
    %c0_32 = arith.constant 0 : index
    %c0_33 = arith.constant 0 : index
    %31 = vector.load %arg1[%c5_31, %c0_32, %c0_33] : memref<9x8x392xbf16, #tpu.memory_space<vmem>>, vector<1x8x392xbf16>
    %32 = vector.shape_cast %31 : vector<1x8x392xbf16> to vector<8x392xbf16>
    %cst_34 = arith.constant dense<0.000000e+00> : vector<8x392xf32>
    %33 = tpu.matmul %30, %32, %cst_34 {dimension_numbers = #tpu.dot_dimension_numbers<[1], [0], [0], [1], [0, 0, 1, 1], [], []>} : vector<8x8xbf16>, vector<8x392xbf16>, vector<8x392xf32> -> vector<8x392xf32>
    %34 = arith.addf %28, %33 : vector<8x392xf32>
    %c6 = arith.constant 6 : index
    %c0_35 = arith.constant 0 : index
    %c0_36 = arith.constant 0 : index
    %35 = vector.load %arg2[%c6, %c0_35, %c0_36] : memref<9x8x8xbf16, #tpu.memory_space<vmem>>, vector<1x8x8xbf16>
    %36 = vector.shape_cast %35 : vector<1x8x8xbf16> to vector<8x8xbf16>
    %c6_37 = arith.constant 6 : index
    %c0_38 = arith.constant 0 : index
    %c0_39 = arith.constant 0 : index
    %37 = vector.load %arg1[%c6_37, %c0_38, %c0_39] : memref<9x8x392xbf16, #tpu.memory_space<vmem>>, vector<1x8x392xbf16>
    %38 = vector.shape_cast %37 : vector<1x8x392xbf16> to vector<8x392xbf16>
    %cst_40 = arith.constant dense<0.000000e+00> : vector<8x392xf32>
    %39 = tpu.matmul %36, %38, %cst_40 {dimension_numbers = #tpu.dot_dimension_numbers<[1], [0], [0], [1], [0, 0, 1, 1], [], []>} : vector<8x8xbf16>, vector<8x392xbf16>, vector<8x392xf32> -> vector<8x392xf32>
    %40 = arith.addf %34, %39 : vector<8x392xf32>
    %c7 = arith.constant 7 : index
    %c0_41 = arith.constant 0 : index
    %c0_42 = arith.constant 0 : index
    %41 = vector.load %arg2[%c7, %c0_41, %c0_42] : memref<9x8x8xbf16, #tpu.memory_space<vmem>>, vector<1x8x8xbf16>
    %42 = vector.shape_cast %41 : vector<1x8x8xbf16> to vector<8x8xbf16>
    %c7_43 = arith.constant 7 : index
    %c0_44 = arith.constant 0 : index
    %c0_45 = arith.constant 0 : index
    %43 = vector.load %arg1[%c7_43, %c0_44, %c0_45] : memref<9x8x392xbf16, #tpu.memory_space<vmem>>, vector<1x8x392xbf16>
    %44 = vector.shape_cast %43 : vector<1x8x392xbf16> to vector<8x392xbf16>
    %cst_46 = arith.constant dense<0.000000e+00> : vector<8x392xf32>
    %45 = tpu.matmul %42, %44, %cst_46 {dimension_numbers = #tpu.dot_dimension_numbers<[1], [0], [0], [1], [0, 0, 1, 1], [], []>} : vector<8x8xbf16>, vector<8x392xbf16>, vector<8x392xf32> -> vector<8x392xf32>
    %46 = arith.addf %40, %45 : vector<8x392xf32>
    %c8 = arith.constant 8 : index
    %c0_47 = arith.constant 0 : index
    %c0_48 = arith.constant 0 : index
    %47 = vector.load %arg2[%c8, %c0_47, %c0_48] : memref<9x8x8xbf16, #tpu.memory_space<vmem>>, vector<1x8x8xbf16>
    %48 = vector.shape_cast %47 : vector<1x8x8xbf16> to vector<8x8xbf16>
    %c8_49 = arith.constant 8 : index
    %c0_50 = arith.constant 0 : index
    %c0_51 = arith.constant 0 : index
    %49 = vector.load %arg1[%c8_49, %c0_50, %c0_51] : memref<9x8x392xbf16, #tpu.memory_space<vmem>>, vector<1x8x392xbf16>
    %50 = vector.shape_cast %49 : vector<1x8x392xbf16> to vector<8x392xbf16>
    %cst_52 = arith.constant dense<0.000000e+00> : vector<8x392xf32>
    %51 = tpu.matmul %48, %50, %cst_52 {dimension_numbers = #tpu.dot_dimension_numbers<[1], [0], [0], [1], [0, 0, 1, 1], [], []>} : vector<8x8xbf16>, vector<8x392xbf16>, vector<8x392xf32> -> vector<8x392xf32>
    %52 = arith.addf %46, %51 : vector<8x392xf32>
    %c0_53 = arith.constant 0 : index
    %c0_54 = arith.constant 0 : index
    %53 = vector.load %arg3[%c0_53, %c0_54] : memref<8x1xf32, #tpu.memory_space<vmem>>, vector<8x1xf32>
    %54 = vector.broadcast %53 : vector<8x1xf32> to vector<8x392xf32>
    %55 = arith.mulf %52, %54 : vector<8x392xf32>
    %c0_55 = arith.constant 0 : index
    %c0_56 = arith.constant 0 : index
    %56 = vector.load %arg4[%c0_55, %c0_56] : memref<8x1xf32, #tpu.memory_space<vmem>>, vector<8x1xf32>
    %57 = vector.broadcast %56 : vector<8x1xf32> to vector<8x392xf32>
    %58 = arith.addf %55, %57 : vector<8x392xf32>
    %cst_57 = arith.constant 0.000000e+00 : f32
    %59 = vector.broadcast %cst_57 : f32 to vector<8x392xf32>
    %60 = arith.maximumf %58, %59 : vector<8x392xf32>
    %61 = arith.truncf %60 : vector<8x392xf32> to vector<8x392xbf16>
    %c0_58 = arith.constant 0 : index
    %c0_59 = arith.constant 0 : index
    %62 = vector.load %arg5[%c0_58, %c0_59] : memref<8x392xbf16, #tpu.memory_space<vmem>>, vector<8x392xbf16>
    tpu.vector_store %arg5[%c0_58, %c0_59], %61 {strides = array<i32>} : memref<8x392xbf16, #tpu.memory_space<vmem>>, vector<8x392xbf16>,
    return
  }
  func.func @transform_0(%arg0: i32) -> (i32, i32, i32) {
    %c0_i32 = arith.constant 0 : i32
    %c0_i32_0 = arith.constant 0 : i32
    %c0_i32_1 = arith.constant 0 : i32
    return %c0_i32, %c0_i32_0, %arg0 : i32, i32, i32
  }
  func.func @transform_1(%arg0: i32) -> (i32, i32, i32) {
    %c0_i32 = arith.constant 0 : i32
    %c0_i32_0 = arith.constant 0 : i32
    %c0_i32_1 = arith.constant 0 : i32
    %c0_i32_2 = arith.constant 0 : i32
    return %c0_i32, %c0_i32_0, %c0_i32_1 : i32, i32, i32
  }
  func.func @transform_2(%arg0: i32) -> (i32, i32) {
    %c0_i32 = arith.constant 0 : i32
    %c0_i32_0 = arith.constant 0 : i32
    %c0_i32_1 = arith.constant 0 : i32
    return %c0_i32, %c0_i32_0 : i32, i32
  }
  func.func @transform_3(%arg0: i32) -> (i32, i32) {
    %c0_i32 = arith.constant 0 : i32
    %c0_i32_0 = arith.constant 0 : i32
    %c0_i32_1 = arith.constant 0 : i32
    return %c0_i32, %c0_i32_0 : i32, i32
  }
  func.func @transform_4(%arg0: i32) -> (i32, i32) {
    %c0_i32 = arith.constant 0 : i32
    %c0_i32_0 = arith.constant 0 : i32
    return %c0_i32, %arg0 : i32, i32
  }
}

module attributes {stable_mosaic.version = 11 : i64} {
  func.func @_conv_bn_kernel(%arg0: i32, %arg1: memref<9x8x392xbf16, #tpu.memory_space<vmem>>, %arg2: memref<9x8x8xbf16, #tpu.memory_space<vmem>>, %arg3: memref<8x1xf32, #tpu.memory_space<vmem>>, %arg4: memref<8x1xf32, #tpu.memory_space<vmem>>, %arg5: memref<8x392xbf16, #tpu.memory_space<vmem>>) attributes {dimension_semantics = [#tpu.dimension_semantics<parallel>], iteration_bounds = array<i64: 1>, scalar_prefetch = 0 : i64, scratch_operands = 0 : i64, tpu.core_type = #tpu.core_type<tc>, window_params = [{transform_indices = @transform_0, window_bounds = array<i64: 9, 8, 392>}, {pipeline_mode = #tpu.pipeline_mode<synchronous>, transform_indices = @transform_1, window_bounds = array<i64: 9, 8, 8>}, {pipeline_mode = #tpu.pipeline_mode<synchronous>, transform_indices = @transform_2, window_bounds = array<i64: 8, 1>}, {pipeline_mode = #tpu.pipeline_mode<synchronous>, transform_indices = @transform_3, window_bounds = array<i64: 8, 1>}, {transform_indices = @transform_4, window_bounds = array<i64: 8, 392>}]} {
    %c0 = arith.constant 0 : index
    %c0_0 = arith.constant 0 : index
    %c0_1 = arith.constant 0 : index
    %0 = vector.load %arg2[%c0, %c0_0, %c0_1] : memref<9x8x8xbf16, #tpu.memory_space<vmem>>, vector<1x8x8xbf16>
    %1 = vector.shape_cast %0 : vector<1x8x8xbf16> to vector<8x8xbf16>
    %c0_2 = arith.constant 0 : index
    %c0_3 = arith.constant 0 : index
    %c0_4 = arith.constant 0 : index
    %2 = vector.load %arg1[%c0_2, %c0_3, %c0_4] : memref<9x8x392xbf16, #tpu.memory_space<vmem>>, vector<1x8x392xbf16>
    %3 = vector.shape_cast %2 : vector<1x8x392xbf16> to vector<8x392xbf16>
    %cst = arith.constant dense<0.000000e+00> : vector<8x392xf32>
    %4 = tpu.matmul %1, %3, %cst {dimension_numbers = #tpu.dot_dimension_numbers<[1], [0], [0], [1], [0, 0, 1, 1], [], []>} : vector<8x8xbf16>, vector<8x392xbf16>, vector<8x392xf32> -> vector<8x392xf32>
    %c1 = arith.constant 1 : index
    %c0_5 = arith.constant 0 : index
    %c0_6 = arith.constant 0 : index
    %5 = vector.load %arg2[%c1, %c0_5, %c0_6] : memref<9x8x8xbf16, #tpu.memory_space<vmem>>, vector<1x8x8xbf16>
    %6 = vector.shape_cast %5 : vector<1x8x8xbf16> to vector<8x8xbf16>
    %c1_7 = arith.constant 1 : index
    %c0_8 = arith.constant 0 : index
    %c0_9 = arith.constant 0 : index
    %7 = vector.load %arg1[%c1_7, %c0_8, %c0_9] : memref<9x8x392xbf16, #tpu.memory_space<vmem>>, vector<1x8x392xbf16>
    %8 = vector.shape_cast %7 : vector<1x8x392xbf16> to vector<8x392xbf16>
    %cst_10 = arith.constant dense<0.000000e+00> : vector<8x392xf32>
    %9 = tpu.matmul %6, %8, %cst_10 {dimension_numbers = #tpu.dot_dimension_numbers<[1], [0], [0], [1], [0, 0, 1, 1], [], []>} : vector<8x8xbf16>, vector<8x392xbf16>, vector<8x392xf32> -> vector<8x392xf32>
    %10 = arith.addf %4, %9 : vector<8x392xf32>
    %c2 = arith.constant 2 : index
    %c0_11 = arith.constant 0 : index
    %c0_12 = arith.constant 0 : index
    %11 = vector.load %arg2[%c2, %c0_11, %c0_12] : memref<9x8x8xbf16, #tpu.memory_space<vmem>>, vector<1x8x8xbf16>
    %12 = vector.shape_cast %11 : vector<1x8x8xbf16> to vector<8x8xbf16>
    %c2_13 = arith.constant 2 : index
    %c0_14 = arith.constant 0 : index
    %c0_15 = arith.constant 0 : index
    %13 = vector.load %arg1[%c2_13, %c0_14, %c0_15] : memref<9x8x392xbf16, #tpu.memory_space<vmem>>, vector<1x8x392xbf16>
    %14 = vector.shape_cast %13 : vector<1x8x392xbf16> to vector<8x392xbf16>
    %cst_16 = arith.constant dense<0.000000e+00> : vector<8x392xf32>
    %15 = tpu.matmul %12, %14, %cst_16 {dimension_numbers = #tpu.dot_dimension_numbers<[1], [0], [0], [1], [0, 0, 1, 1], [], []>} : vector<8x8xbf16>, vector<8x392xbf16>, vector<8x392xf32> -> vector<8x392xf32>
    %16 = arith.addf %10, %15 : vector<8x392xf32>
    %c3 = arith.constant 3 : index
    %c0_17 = arith.constant 0 : index
    %c0_18 = arith.constant 0 : index
    %17 = vector.load %arg2[%c3, %c0_17, %c0_18] : memref<9x8x8xbf16, #tpu.memory_space<vmem>>, vector<1x8x8xbf16>
    %18 = vector.shape_cast %17 : vector<1x8x8xbf16> to vector<8x8xbf16>
    %c3_19 = arith.constant 3 : index
    %c0_20 = arith.constant 0 : index
    %c0_21 = arith.constant 0 : index
    %19 = vector.load %arg1[%c3_19, %c0_20, %c0_21] : memref<9x8x392xbf16, #tpu.memory_space<vmem>>, vector<1x8x392xbf16>
    %20 = vector.shape_cast %19 : vector<1x8x392xbf16> to vector<8x392xbf16>
    %cst_22 = arith.constant dense<0.000000e+00> : vector<8x392xf32>
    %21 = tpu.matmul %18, %20, %cst_22 {dimension_numbers = #tpu.dot_dimension_numbers<[1], [0], [0], [1], [0, 0, 1, 1], [], []>} : vector<8x8xbf16>, vector<8x392xbf16>, vector<8x392xf32> -> vector<8x392xf32>
    %22 = arith.addf %16, %21 : vector<8x392xf32>
    %c4 = arith.constant 4 : index
    %c0_23 = arith.constant 0 : index
    %c0_24 = arith.constant 0 : index
    %23 = vector.load %arg2[%c4, %c0_23, %c0_24] : memref<9x8x8xbf16, #tpu.memory_space<vmem>>, vector<1x8x8xbf16>
    %24 = vector.shape_cast %23 : vector<1x8x8xbf16> to vector<8x8xbf16>
    %c4_25 = arith.constant 4 : index
    %c0_26 = arith.constant 0 : index
    %c0_27 = arith.constant 0 : index
    %25 = vector.load %arg1[%c4_25, %c0_26, %c0_27] : memref<9x8x392xbf16, #tpu.memory_space<vmem>>, vector<1x8x392xbf16>
    %26 = vector.shape_cast %25 : vector<1x8x392xbf16> to vector<8x392xbf16>
    %cst_28 = arith.constant dense<0.000000e+00> : vector<8x392xf32>
    %27 = tpu.matmul %24, %26, %cst_28 {dimension_numbers = #tpu.dot_dimension_numbers<[1], [0], [0], [1], [0, 0, 1, 1], [], []>} : vector<8x8xbf16>, vector<8x392xbf16>, vector<8x392xf32> -> vector<8x392xf32>
    %28 = arith.addf %22, %27 : vector<8x392xf32>
    %c5 = arith.constant 5 : index
    %c0_29 = arith.constant 0 : index
    %c0_30 = arith.constant 0 : index
    %29 = vector.load %arg2[%c5, %c0_29, %c0_30] : memref<9x8x8xbf16, #tpu.memory_space<vmem>>, vector<1x8x8xbf16>
    %30 = vector.shape_cast %29 : vector<1x8x8xbf16> to vector<8x8xbf16>
    %c5_31 = arith.constant 5 : index
    %c0_32 = arith.constant 0 : index
    %c0_33 = arith.constant 0 : index
    %31 = vector.load %arg1[%c5_31, %c0_32, %c0_33] : memref<9x8x392xbf16, #tpu.memory_space<vmem>>, vector<1x8x392xbf16>
    %32 = vector.shape_cast %31 : vector<1x8x392xbf16> to vector<8x392xbf16>
    %cst_34 = arith.constant dense<0.000000e+00> : vector<8x392xf32>
    %33 = tpu.matmul %30, %32, %cst_34 {dimension_numbers = #tpu.dot_dimension_numbers<[1], [0], [0], [1], [0, 0, 1, 1], [], []>} : vector<8x8xbf16>, vector<8x392xbf16>, vector<8x392xf32> -> vector<8x392xf32>
    %34 = arith.addf %28, %33 : vector<8x392xf32>
    %c6 = arith.constant 6 : index
    %c0_35 = arith.constant 0 : index
    %c0_36 = arith.constant 0 : index
    %35 = vector.load %arg2[%c6, %c0_35, %c0_36] : memref<9x8x8xbf16, #tpu.memory_space<vmem>>, vector<1x8x8xbf16>
    %36 = vector.shape_cast %35 : vector<1x8x8xbf16> to vector<8x8xbf16>
    %c6_37 = arith.constant 6 : index
    %c0_38 = arith.constant 0 : index
    %c0_39 = arith.constant 0 : index
    %37 = vector.load %arg1[%c6_37, %c0_38, %c0_39] : memref<9x8x392xbf16, #tpu.memory_space<vmem>>, vector<1x8x392xbf16>
    %38 = vector.shape_cast %37 : vector<1x8x392xbf16> to vector<8x392xbf16>
    %cst_40 = arith.constant dense<0.000000e+00> : vector<8x392xf32>
    %39 = tpu.matmul %36, %38, %cst_40 {dimension_numbers = #tpu.dot_dimension_numbers<[1], [0], [0], [1], [0, 0, 1, 1], [], []>} : vector<8x8xbf16>, vector<8x392xbf16>, vector<8x392xf32> -> vector<8x392xf32>
    %40 = arith.addf %34, %39 : vector<8x392xf32>
    %c7 = arith.constant 7 : index
    %c0_41 = arith.constant 0 : index
    %c0_42 = arith.constant 0 : index
    %41 = vector.load %arg2[%c7, %c0_41, %c0_42] : memref<9x8x8xbf16, #tpu.memory_space<vmem>>, vector<1x8x8xbf16>
    %42 = vector.shape_cast %41 : vector<1x8x8xbf16> to vector<8x8xbf16>
    %c7_43 = arith.constant 7 : index
    %c0_44 = arith.constant 0 : index
    %c0_45 = arith.constant 0 : index
    %43 = vector.load %arg1[%c7_43, %c0_44, %c0_45] : memref<9x8x392xbf16, #tpu.memory_space<vmem>>, vector<1x8x392xbf16>
    %44 = vector.shape_cast %43 : vector<1x8x392xbf16> to vector<8x392xbf16>
    %cst_46 = arith.constant dense<0.000000e+00> : vector<8x392xf32>
    %45 = tpu.matmul %42, %44, %cst_46 {dimension_numbers = #tpu.dot_dimension_numbers<[1], [0], [0], [1], [0, 0, 1, 1], [], []>} : vector<8x8xbf16>, vector<8x392xbf16>, vector<8x392xf32> -> vector<8x392xf32>
    %46 = arith.addf %40, %45 : vector<8x392xf32>
    %c8 = arith.constant 8 : index
    %c0_47 = arith.constant 0 : index
    %c0_48 = arith.constant 0 : index
    %47 = vector.load %arg2[%c8, %c0_47, %c0_48] : memref<9x8x8xbf16, #tpu.memory_space<vmem>>, vector<1x8x8xbf16>
    %48 = vector.shape_cast %47 : vector<1x8x8xbf16> to vector<8x8xbf16>
    %c8_49 = arith.constant 8 : index
    %c0_50 = arith.constant 0 : index
    %c0_51 = arith.constant 0 : index
    %49 = vector.load %arg1[%c8_49, %c0_50, %c0_51] : memref<9x8x392xbf16, #tpu.memory_space<vmem>>, vector<1x8x392xbf16>
    %50 = vector.shape_cast %49 : vector<1x8x392xbf16> to vector<8x392xbf16>
    %cst_52 = arith.constant dense<0.000000e+00> : vector<8x392xf32>
    %51 = tpu.matmul %48, %50, %cst_52 {dimension_numbers = #tpu.dot_dimension_numbers<[1], [0], [0], [1], [0, 0, 1, 1], [], []>} : vector<8x8xbf16>, vector<8x392xbf16>, vector<8x392xf32> -> vector<8x392xf32>
    %52 = arith.addf %46, %51 : vector<8x392xf32>
    %c0_53 = arith.constant 0 : index
    %c0_54 = arith.constant 0 : index
    %53 = vector.load %arg3[%c0_53, %c0_54] : memref<8x1xf32, #tpu.memory_space<vmem>>, vector<8x1xf32>
    %54 = vector.broadcast %53 : vector<8x1xf32> to vector<8x392xf32>
    %55 = arith.mulf %52, %54 : vector<8x392xf32>
    %c0_55 = arith.constant 0 : index
    %c0_56 = arith.constant 0 : index
    %56 = vector.load %arg4[%c0_55, %c0_56] : memref<8x1xf32, #tpu.memory_space<vmem>>, vector<8x1xf32>
    %57 = vector.broadcast %56 : vector<8x1xf32> to vector<8x392xf32>
    %58 = arith.addf %55, %57 : vector<8x392xf32>
    %59 = arith.truncf %58 : vector<8x392xf32> to vector<8x392xbf16>
    %c0_57 = arith.constant 0 : index
    %c0_58 = arith.constant 0 : index
    %60 = vector.load %arg5[%c0_57, %c0_58] : memref<8x392xbf16, #tpu.memory_space<vmem>>, vector<8x392xbf16>
    tpu.vector_store %arg5[%c0_57, %c0_58], %59 {strides = array<i32>} : memref<8x392xbf16, #tpu.memory_space<vmem>>, vector<8x392xbf16>,
    return
  }
  func.func @transform_0(%arg0: i32) -> (i32, i32, i32) {
    %c0_i32 = arith.constant 0 : i32
    %c0_i32_0 = arith.constant 0 : i32
    %c0_i32_1 = arith.constant 0 : i32
    return %c0_i32, %c0_i32_0, %arg0 : i32, i32, i32
  }
  func.func @transform_1(%arg0: i32) -> (i32, i32, i32) {
    %c0_i32 = arith.constant 0 : i32
    %c0_i32_0 = arith.constant 0 : i32
    %c0_i32_1 = arith.constant 0 : i32
    %c0_i32_2 = arith.constant 0 : i32
    return %c0_i32, %c0_i32_0, %c0_i32_1 : i32, i32, i32
  }
  func.func @transform_2(%arg0: i32) -> (i32, i32) {
    %c0_i32 = arith.constant 0 : i32
    %c0_i32_0 = arith.constant 0 : i32
    %c0_i32_1 = arith.constant 0 : i32
    return %c0_i32, %c0_i32_0 : i32, i32
  }
  func.func @transform_3(%arg0: i32) -> (i32, i32) {
    %c0_i32 = arith.constant 0 : i32
    %c0_i32_0 = arith.constant 0 : i32
    %c0_i32_1 = arith.constant 0 : i32
    return %c0_i32, %c0_i32_0 : i32, i32
  }
  func.func @transform_4(%arg0: i32) -> (i32, i32) {
    %c0_i32 = arith.constant 0 : i32
    %c0_i32_0 = arith.constant 0 : i32
    return %c0_i32, %arg0 : i32, i32
  }
}

module attributes {stable_mosaic.version = 11 : i64} {
  func.func @_se_tail_kernel(%arg0: i32, %arg1: memref<8x2x196xbf16, #tpu.memory_space<vmem>>, %arg2: memref<8x2x196xbf16, #tpu.memory_space<vmem>>, %arg3: memref<8x8xf32, #tpu.memory_space<vmem>>, %arg4: memref<8x1xf32, #tpu.memory_space<vmem>>, %arg5: memref<8x8xf32, #tpu.memory_space<vmem>>, %arg6: memref<8x1xf32, #tpu.memory_space<vmem>>, %arg7: memref<8x2x196xbf16, #tpu.memory_space<vmem>>) attributes {dimension_semantics = [#tpu.dimension_semantics<arbitrary>], iteration_bounds = array<i64: 1>, scalar_prefetch = 0 : i64, scratch_operands = 0 : i64, tpu.core_type = #tpu.core_type<tc>, window_params = [{pipeline_mode = #tpu.pipeline_mode<synchronous>, transform_indices = @transform_0, window_bounds = array<i64: 8, 2, 196>}, {pipeline_mode = #tpu.pipeline_mode<synchronous>, transform_indices = @transform_1, window_bounds = array<i64: 8, 2, 196>}, {pipeline_mode = #tpu.pipeline_mode<synchronous>, transform_indices = @transform_2, window_bounds = array<i64: 8, 8>}, {pipeline_mode = #tpu.pipeline_mode<synchronous>, transform_indices = @transform_3, window_bounds = array<i64: 8, 1>}, {pipeline_mode = #tpu.pipeline_mode<synchronous>, transform_indices = @transform_4, window_bounds = array<i64: 8, 8>}, {pipeline_mode = #tpu.pipeline_mode<synchronous>, transform_indices = @transform_5, window_bounds = array<i64: 8, 1>}, {pipeline_mode = #tpu.pipeline_mode<synchronous>, transform_indices = @transform_6, window_bounds = array<i64: 8, 2, 196>}]} {
    %c0 = arith.constant 0 : index
    %c0_0 = arith.constant 0 : index
    %c0_1 = arith.constant 0 : index
    %0 = vector.load %arg1[%c0, %c0_0, %c0_1] : memref<8x2x196xbf16, #tpu.memory_space<vmem>>, vector<8x2x196xbf16>
    %1 = arith.extf %0 : vector<8x2x196xbf16> to vector<8x2x196xf32>
    %cst = arith.constant dense<0.000000e+00> : vector<8x2xf32>
    %2 = vector.multi_reduction <add>, %1, %cst [2] : vector<8x2x196xf32> to vector<8x2xf32>
    %cst_2 = arith.constant 1.960000e+02 : f32
    %3 = vector.broadcast %cst_2 : f32 to vector<8x2xf32>
    %4 = arith.divf %2, %3 : vector<8x2xf32>
    %c0_3 = arith.constant 0 : index
    %c0_4 = arith.constant 0 : index
    %5 = vector.load %arg3[%c0_3, %c0_4] : memref<8x8xf32, #tpu.memory_space<vmem>>, vector<8x8xf32>
    %cst_5 = arith.constant dense<0.000000e+00> : vector<8x2xf32>
    %6 = tpu.matmul %5, %4, %cst_5 {dimension_numbers = #tpu.dot_dimension_numbers<[1], [0], [0], [1], [0, 0, 1, 1], [], []>} : vector<8x8xf32>, vector<8x2xf32>, vector<8x2xf32> -> vector<8x2xf32>
    %c0_6 = arith.constant 0 : index
    %c0_7 = arith.constant 0 : index
    %7 = vector.load %arg4[%c0_6, %c0_7] : memref<8x1xf32, #tpu.memory_space<vmem>>, vector<8x1xf32>
    %8 = vector.broadcast %7 : vector<8x1xf32> to vector<8x2xf32>
    %9 = arith.addf %6, %8 : vector<8x2xf32>
    %cst_8 = arith.constant 0.000000e+00 : f32
    %10 = vector.broadcast %cst_8 : f32 to vector<8x2xf32>
    %11 = arith.maximumf %9, %10 : vector<8x2xf32>
    %c0_9 = arith.constant 0 : index
    %c0_10 = arith.constant 0 : index
    %12 = vector.load %arg5[%c0_9, %c0_10] : memref<8x8xf32, #tpu.memory_space<vmem>>, vector<8x8xf32>
    %cst_11 = arith.constant dense<0.000000e+00> : vector<8x2xf32>
    %13 = tpu.matmul %12, %11, %cst_11 {dimension_numbers = #tpu.dot_dimension_numbers<[1], [0], [0], [1], [0, 0, 1, 1], [], []>} : vector<8x8xf32>, vector<8x2xf32>, vector<8x2xf32> -> vector<8x2xf32>
    %c0_12 = arith.constant 0 : index
    %c0_13 = arith.constant 0 : index
    %14 = vector.load %arg6[%c0_12, %c0_13] : memref<8x1xf32, #tpu.memory_space<vmem>>, vector<8x1xf32>
    %15 = vector.broadcast %14 : vector<8x1xf32> to vector<8x2xf32>
    %16 = arith.addf %13, %15 : vector<8x2xf32>
    %17 = arith.negf %16 : vector<8x2xf32>
    %18 = math.exp %17 : vector<8x2xf32>
    %cst_14 = arith.constant 1.000000e+00 : f32
    %19 = vector.broadcast %cst_14 : f32 to vector<8x2xf32>
    %20 = arith.addf %19, %18 : vector<8x2xf32>
    %21 = arith.divf %19, %20 : vector<8x2xf32>
    %22 = vector.shape_cast %21 : vector<8x2xf32> to vector<8x2x1xf32>
    %23 = vector.broadcast %22 : vector<8x2x1xf32> to vector<8x2x196xf32>
    %24 = arith.mulf %1, %23 : vector<8x2x196xf32>
    %c0_15 = arith.constant 0 : index
    %c0_16 = arith.constant 0 : index
    %c0_17 = arith.constant 0 : index
    %25 = vector.load %arg2[%c0_15, %c0_16, %c0_17] : memref<8x2x196xbf16, #tpu.memory_space<vmem>>, vector<8x2x196xbf16>
    %26 = arith.extf %25 : vector<8x2x196xbf16> to vector<8x2x196xf32>
    %27 = arith.addf %24, %26 : vector<8x2x196xf32>
    %cst_18 = arith.constant 0.000000e+00 : f32
    %28 = vector.broadcast %cst_18 : f32 to vector<8x2x196xf32>
    %29 = arith.maximumf %27, %28 : vector<8x2x196xf32>
    %30 = arith.truncf %29 : vector<8x2x196xf32> to vector<8x2x196xbf16>
    %c0_19 = arith.constant 0 : index
    %c0_20 = arith.constant 0 : index
    %c0_21 = arith.constant 0 : index
    %31 = vector.load %arg7[%c0_19, %c0_20, %c0_21] : memref<8x2x196xbf16, #tpu.memory_space<vmem>>, vector<8x2x196xbf16>
    tpu.vector_store %arg7[%c0_19, %c0_20, %c0_21], %30 {strides = array<i32>} : memref<8x2x196xbf16, #tpu.memory_space<vmem>>, vector<8x2x196xbf16>,
    return
  }
  func.func @transform_0(%arg0: i32) -> (i32, i32, i32) {
    %c0_i32 = arith.constant 0 : i32
    %c0_i32_0 = arith.constant 0 : i32
    %c0_i32_1 = arith.constant 0 : i32
    %c0_i32_2 = arith.constant 0 : i32
    return %c0_i32, %c0_i32_0, %c0_i32_1 : i32, i32, i32
  }
  func.func @transform_1(%arg0: i32) -> (i32, i32, i32) {
    %c0_i32 = arith.constant 0 : i32
    %c0_i32_0 = arith.constant 0 : i32
    %c0_i32_1 = arith.constant 0 : i32
    %c0_i32_2 = arith.constant 0 : i32
    return %c0_i32, %c0_i32_0, %c0_i32_1 : i32, i32, i32
  }
  func.func @transform_2(%arg0: i32) -> (i32, i32) {
    %c0_i32 = arith.constant 0 : i32
    %c0_i32_0 = arith.constant 0 : i32
    %c0_i32_1 = arith.constant 0 : i32
    return %c0_i32, %c0_i32_0 : i32, i32
  }
  func.func @transform_3(%arg0: i32) -> (i32, i32) {
    %c0_i32 = arith.constant 0 : i32
    %c0_i32_0 = arith.constant 0 : i32
    %c0_i32_1 = arith.constant 0 : i32
    return %c0_i32, %c0_i32_0 : i32, i32
  }
  func.func @transform_4(%arg0: i32) -> (i32, i32) {
    %c0_i32 = arith.constant 0 : i32
    %c0_i32_0 = arith.constant 0 : i32
    %c0_i32_1 = arith.constant 0 : i32
    return %c0_i32, %c0_i32_0 : i32, i32
  }
  func.func @transform_5(%arg0: i32) -> (i32, i32) {
    %c0_i32 = arith.constant 0 : i32
    %c0_i32_0 = arith.constant 0 : i32
    %c0_i32_1 = arith.constant 0 : i32
    return %c0_i32, %c0_i32_0 : i32, i32
  }
  func.func @transform_6(%arg0: i32) -> (i32, i32, i32) {
    %c0_i32 = arith.constant 0 : i32
    %c0_i32_0 = arith.constant 0 : i32
    %c0_i32_1 = arith.constant 0 : i32
    %c0_i32_2 = arith.constant 0 : i32
    return %c0_i32, %c0_i32_0, %c0_i32_1 : i32, i32, i32
  }
}

module attributes {stable_mosaic.version = 11 : i64} {
  func.func @_conv_bn_kernel(%arg0: i32, %arg1: memref<9x8x392xbf16, #tpu.memory_space<vmem>>, %arg2: memref<9x8x8xbf16, #tpu.memory_space<vmem>>, %arg3: memref<8x1xf32, #tpu.memory_space<vmem>>, %arg4: memref<8x1xf32, #tpu.memory_space<vmem>>, %arg5: memref<8x392xbf16, #tpu.memory_space<vmem>>, %arg6: memref<8x392xbf16, #tpu.memory_space<vmem>>) attributes {dimension_semantics = [#tpu.dimension_semantics<parallel>], iteration_bounds = array<i64: 1>, scalar_prefetch = 0 : i64, scratch_operands = 0 : i64, tpu.core_type = #tpu.core_type<tc>, window_params = [{transform_indices = @transform_0, window_bounds = array<i64: 9, 8, 392>}, {pipeline_mode = #tpu.pipeline_mode<synchronous>, transform_indices = @transform_1, window_bounds = array<i64: 9, 8, 8>}, {pipeline_mode = #tpu.pipeline_mode<synchronous>, transform_indices = @transform_2, window_bounds = array<i64: 8, 1>}, {pipeline_mode = #tpu.pipeline_mode<synchronous>, transform_indices = @transform_3, window_bounds = array<i64: 8, 1>}, {transform_indices = @transform_4, window_bounds = array<i64: 8, 392>}, {transform_indices = @transform_5, window_bounds = array<i64: 8, 392>}]} {
    %c0 = arith.constant 0 : index
    %c0_0 = arith.constant 0 : index
    %c0_1 = arith.constant 0 : index
    %0 = vector.load %arg2[%c0, %c0_0, %c0_1] : memref<9x8x8xbf16, #tpu.memory_space<vmem>>, vector<1x8x8xbf16>
    %1 = vector.shape_cast %0 : vector<1x8x8xbf16> to vector<8x8xbf16>
    %c0_2 = arith.constant 0 : index
    %c0_3 = arith.constant 0 : index
    %c0_4 = arith.constant 0 : index
    %2 = vector.load %arg1[%c0_2, %c0_3, %c0_4] : memref<9x8x392xbf16, #tpu.memory_space<vmem>>, vector<1x8x392xbf16>
    %3 = vector.shape_cast %2 : vector<1x8x392xbf16> to vector<8x392xbf16>
    %cst = arith.constant dense<0.000000e+00> : vector<8x392xf32>
    %4 = tpu.matmul %1, %3, %cst {dimension_numbers = #tpu.dot_dimension_numbers<[1], [0], [0], [1], [0, 0, 1, 1], [], []>} : vector<8x8xbf16>, vector<8x392xbf16>, vector<8x392xf32> -> vector<8x392xf32>
    %c1 = arith.constant 1 : index
    %c0_5 = arith.constant 0 : index
    %c0_6 = arith.constant 0 : index
    %5 = vector.load %arg2[%c1, %c0_5, %c0_6] : memref<9x8x8xbf16, #tpu.memory_space<vmem>>, vector<1x8x8xbf16>
    %6 = vector.shape_cast %5 : vector<1x8x8xbf16> to vector<8x8xbf16>
    %c1_7 = arith.constant 1 : index
    %c0_8 = arith.constant 0 : index
    %c0_9 = arith.constant 0 : index
    %7 = vector.load %arg1[%c1_7, %c0_8, %c0_9] : memref<9x8x392xbf16, #tpu.memory_space<vmem>>, vector<1x8x392xbf16>
    %8 = vector.shape_cast %7 : vector<1x8x392xbf16> to vector<8x392xbf16>
    %cst_10 = arith.constant dense<0.000000e+00> : vector<8x392xf32>
    %9 = tpu.matmul %6, %8, %cst_10 {dimension_numbers = #tpu.dot_dimension_numbers<[1], [0], [0], [1], [0, 0, 1, 1], [], []>} : vector<8x8xbf16>, vector<8x392xbf16>, vector<8x392xf32> -> vector<8x392xf32>
    %10 = arith.addf %4, %9 : vector<8x392xf32>
    %c2 = arith.constant 2 : index
    %c0_11 = arith.constant 0 : index
    %c0_12 = arith.constant 0 : index
    %11 = vector.load %arg2[%c2, %c0_11, %c0_12] : memref<9x8x8xbf16, #tpu.memory_space<vmem>>, vector<1x8x8xbf16>
    %12 = vector.shape_cast %11 : vector<1x8x8xbf16> to vector<8x8xbf16>
    %c2_13 = arith.constant 2 : index
    %c0_14 = arith.constant 0 : index
    %c0_15 = arith.constant 0 : index
    %13 = vector.load %arg1[%c2_13, %c0_14, %c0_15] : memref<9x8x392xbf16, #tpu.memory_space<vmem>>, vector<1x8x392xbf16>
    %14 = vector.shape_cast %13 : vector<1x8x392xbf16> to vector<8x392xbf16>
    %cst_16 = arith.constant dense<0.000000e+00> : vector<8x392xf32>
    %15 = tpu.matmul %12, %14, %cst_16 {dimension_numbers = #tpu.dot_dimension_numbers<[1], [0], [0], [1], [0, 0, 1, 1], [], []>} : vector<8x8xbf16>, vector<8x392xbf16>, vector<8x392xf32> -> vector<8x392xf32>
    %16 = arith.addf %10, %15 : vector<8x392xf32>
    %c3 = arith.constant 3 : index
    %c0_17 = arith.constant 0 : index
    %c0_18 = arith.constant 0 : index
    %17 = vector.load %arg2[%c3, %c0_17, %c0_18] : memref<9x8x8xbf16, #tpu.memory_space<vmem>>, vector<1x8x8xbf16>
    %18 = vector.shape_cast %17 : vector<1x8x8xbf16> to vector<8x8xbf16>
    %c3_19 = arith.constant 3 : index
    %c0_20 = arith.constant 0 : index
    %c0_21 = arith.constant 0 : index
    %19 = vector.load %arg1[%c3_19, %c0_20, %c0_21] : memref<9x8x392xbf16, #tpu.memory_space<vmem>>, vector<1x8x392xbf16>
    %20 = vector.shape_cast %19 : vector<1x8x392xbf16> to vector<8x392xbf16>
    %cst_22 = arith.constant dense<0.000000e+00> : vector<8x392xf32>
    %21 = tpu.matmul %18, %20, %cst_22 {dimension_numbers = #tpu.dot_dimension_numbers<[1], [0], [0], [1], [0, 0, 1, 1], [], []>} : vector<8x8xbf16>, vector<8x392xbf16>, vector<8x392xf32> -> vector<8x392xf32>
    %22 = arith.addf %16, %21 : vector<8x392xf32>
    %c4 = arith.constant 4 : index
    %c0_23 = arith.constant 0 : index
    %c0_24 = arith.constant 0 : index
    %23 = vector.load %arg2[%c4, %c0_23, %c0_24] : memref<9x8x8xbf16, #tpu.memory_space<vmem>>, vector<1x8x8xbf16>
    %24 = vector.shape_cast %23 : vector<1x8x8xbf16> to vector<8x8xbf16>
    %c4_25 = arith.constant 4 : index
    %c0_26 = arith.constant 0 : index
    %c0_27 = arith.constant 0 : index
    %25 = vector.load %arg1[%c4_25, %c0_26, %c0_27] : memref<9x8x392xbf16, #tpu.memory_space<vmem>>, vector<1x8x392xbf16>
    %26 = vector.shape_cast %25 : vector<1x8x392xbf16> to vector<8x392xbf16>
    %cst_28 = arith.constant dense<0.000000e+00> : vector<8x392xf32>
    %27 = tpu.matmul %24, %26, %cst_28 {dimension_numbers = #tpu.dot_dimension_numbers<[1], [0], [0], [1], [0, 0, 1, 1], [], []>} : vector<8x8xbf16>, vector<8x392xbf16>, vector<8x392xf32> -> vector<8x392xf32>
    %28 = arith.addf %22, %27 : vector<8x392xf32>
    %c5 = arith.constant 5 : index
    %c0_29 = arith.constant 0 : index
    %c0_30 = arith.constant 0 : index
    %29 = vector.load %arg2[%c5, %c0_29, %c0_30] : memref<9x8x8xbf16, #tpu.memory_space<vmem>>, vector<1x8x8xbf16>
    %30 = vector.shape_cast %29 : vector<1x8x8xbf16> to vector<8x8xbf16>
    %c5_31 = arith.constant 5 : index
    %c0_32 = arith.constant 0 : index
    %c0_33 = arith.constant 0 : index
    %31 = vector.load %arg1[%c5_31, %c0_32, %c0_33] : memref<9x8x392xbf16, #tpu.memory_space<vmem>>, vector<1x8x392xbf16>
    %32 = vector.shape_cast %31 : vector<1x8x392xbf16> to vector<8x392xbf16>
    %cst_34 = arith.constant dense<0.000000e+00> : vector<8x392xf32>
    %33 = tpu.matmul %30, %32, %cst_34 {dimension_numbers = #tpu.dot_dimension_numbers<[1], [0], [0], [1], [0, 0, 1, 1], [], []>} : vector<8x8xbf16>, vector<8x392xbf16>, vector<8x392xf32> -> vector<8x392xf32>
    %34 = arith.addf %28, %33 : vector<8x392xf32>
    %c6 = arith.constant 6 : index
    %c0_35 = arith.constant 0 : index
    %c0_36 = arith.constant 0 : index
    %35 = vector.load %arg2[%c6, %c0_35, %c0_36] : memref<9x8x8xbf16, #tpu.memory_space<vmem>>, vector<1x8x8xbf16>
    %36 = vector.shape_cast %35 : vector<1x8x8xbf16> to vector<8x8xbf16>
    %c6_37 = arith.constant 6 : index
    %c0_38 = arith.constant 0 : index
    %c0_39 = arith.constant 0 : index
    %37 = vector.load %arg1[%c6_37, %c0_38, %c0_39] : memref<9x8x392xbf16, #tpu.memory_space<vmem>>, vector<1x8x392xbf16>
    %38 = vector.shape_cast %37 : vector<1x8x392xbf16> to vector<8x392xbf16>
    %cst_40 = arith.constant dense<0.000000e+00> : vector<8x392xf32>
    %39 = tpu.matmul %36, %38, %cst_40 {dimension_numbers = #tpu.dot_dimension_numbers<[1], [0], [0], [1], [0, 0, 1, 1], [], []>} : vector<8x8xbf16>, vector<8x392xbf16>, vector<8x392xf32> -> vector<8x392xf32>
    %40 = arith.addf %34, %39 : vector<8x392xf32>
    %c7 = arith.constant 7 : index
    %c0_41 = arith.constant 0 : index
    %c0_42 = arith.constant 0 : index
    %41 = vector.load %arg2[%c7, %c0_41, %c0_42] : memref<9x8x8xbf16, #tpu.memory_space<vmem>>, vector<1x8x8xbf16>
    %42 = vector.shape_cast %41 : vector<1x8x8xbf16> to vector<8x8xbf16>
    %c7_43 = arith.constant 7 : index
    %c0_44 = arith.constant 0 : index
    %c0_45 = arith.constant 0 : index
    %43 = vector.load %arg1[%c7_43, %c0_44, %c0_45] : memref<9x8x392xbf16, #tpu.memory_space<vmem>>, vector<1x8x392xbf16>
    %44 = vector.shape_cast %43 : vector<1x8x392xbf16> to vector<8x392xbf16>
    %cst_46 = arith.constant dense<0.000000e+00> : vector<8x392xf32>
    %45 = tpu.matmul %42, %44, %cst_46 {dimension_numbers = #tpu.dot_dimension_numbers<[1], [0], [0], [1], [0, 0, 1, 1], [], []>} : vector<8x8xbf16>, vector<8x392xbf16>, vector<8x392xf32> -> vector<8x392xf32>
    %46 = arith.addf %40, %45 : vector<8x392xf32>
    %c8 = arith.constant 8 : index
    %c0_47 = arith.constant 0 : index
    %c0_48 = arith.constant 0 : index
    %47 = vector.load %arg2[%c8, %c0_47, %c0_48] : memref<9x8x8xbf16, #tpu.memory_space<vmem>>, vector<1x8x8xbf16>
    %48 = vector.shape_cast %47 : vector<1x8x8xbf16> to vector<8x8xbf16>
    %c8_49 = arith.constant 8 : index
    %c0_50 = arith.constant 0 : index
    %c0_51 = arith.constant 0 : index
    %49 = vector.load %arg1[%c8_49, %c0_50, %c0_51] : memref<9x8x392xbf16, #tpu.memory_space<vmem>>, vector<1x8x392xbf16>
    %50 = vector.shape_cast %49 : vector<1x8x392xbf16> to vector<8x392xbf16>
    %cst_52 = arith.constant dense<0.000000e+00> : vector<8x392xf32>
    %51 = tpu.matmul %48, %50, %cst_52 {dimension_numbers = #tpu.dot_dimension_numbers<[1], [0], [0], [1], [0, 0, 1, 1], [], []>} : vector<8x8xbf16>, vector<8x392xbf16>, vector<8x392xf32> -> vector<8x392xf32>
    %52 = arith.addf %46, %51 : vector<8x392xf32>
    %c0_53 = arith.constant 0 : index
    %c0_54 = arith.constant 0 : index
    %53 = vector.load %arg3[%c0_53, %c0_54] : memref<8x1xf32, #tpu.memory_space<vmem>>, vector<8x1xf32>
    %54 = vector.broadcast %53 : vector<8x1xf32> to vector<8x392xf32>
    %55 = arith.mulf %52, %54 : vector<8x392xf32>
    %c0_55 = arith.constant 0 : index
    %c0_56 = arith.constant 0 : index
    %56 = vector.load %arg4[%c0_55, %c0_56] : memref<8x1xf32, #tpu.memory_space<vmem>>, vector<8x1xf32>
    %57 = vector.broadcast %56 : vector<8x1xf32> to vector<8x392xf32>
    %58 = arith.addf %55, %57 : vector<8x392xf32>
    %c0_57 = arith.constant 0 : index
    %c0_58 = arith.constant 0 : index
    %59 = vector.load %arg5[%c0_57, %c0_58] : memref<8x392xbf16, #tpu.memory_space<vmem>>, vector<8x392xbf16>
    %60 = arith.extf %59 : vector<8x392xbf16> to vector<8x392xf32>
    %61 = arith.addf %58, %60 : vector<8x392xf32>
    %cst_59 = arith.constant 0.000000e+00 : f32
    %62 = vector.broadcast %cst_59 : f32 to vector<8x392xf32>
    %63 = arith.maximumf %61, %62 : vector<8x392xf32>
    %64 = arith.truncf %63 : vector<8x392xf32> to vector<8x392xbf16>
    %c0_60 = arith.constant 0 : index
    %c0_61 = arith.constant 0 : index
    %65 = vector.load %arg6[%c0_60, %c0_61] : memref<8x392xbf16, #tpu.memory_space<vmem>>, vector<8x392xbf16>
    tpu.vector_store %arg6[%c0_60, %c0_61], %64 {strides = array<i32>} : memref<8x392xbf16, #tpu.memory_space<vmem>>, vector<8x392xbf16>,
    return
  }
  func.func @transform_0(%arg0: i32) -> (i32, i32, i32) {
    %c0_i32 = arith.constant 0 : i32
    %c0_i32_0 = arith.constant 0 : i32
    %c0_i32_1 = arith.constant 0 : i32
    return %c0_i32, %c0_i32_0, %arg0 : i32, i32, i32
  }
  func.func @transform_1(%arg0: i32) -> (i32, i32, i32) {
    %c0_i32 = arith.constant 0 : i32
    %c0_i32_0 = arith.constant 0 : i32
    %c0_i32_1 = arith.constant 0 : i32
    %c0_i32_2 = arith.constant 0 : i32
    return %c0_i32, %c0_i32_0, %c0_i32_1 : i32, i32, i32
  }
  func.func @transform_2(%arg0: i32) -> (i32, i32) {
    %c0_i32 = arith.constant 0 : i32
    %c0_i32_0 = arith.constant 0 : i32
    %c0_i32_1 = arith.constant 0 : i32
    return %c0_i32, %c0_i32_0 : i32, i32
  }
  func.func @transform_3(%arg0: i32) -> (i32, i32) {
    %c0_i32 = arith.constant 0 : i32
    %c0_i32_0 = arith.constant 0 : i32
    %c0_i32_1 = arith.constant 0 : i32
    return %c0_i32, %c0_i32_0 : i32, i32
  }
  func.func @transform_4(%arg0: i32) -> (i32, i32) {
    %c0_i32 = arith.constant 0 : i32
    %c0_i32_0 = arith.constant 0 : i32
    return %c0_i32, %arg0 : i32, i32
  }
  func.func @transform_5(%arg0: i32) -> (i32, i32) {
    %c0_i32 = arith.constant 0 : i32
    %c0_i32_0 = arith.constant 0 : i32
    return %c0_i32, %arg0 : i32, i32
  }
}

module attributes {stable_mosaic.version = 11 : i64} {
  func.func @_conv_bn_kernel(%arg0: i32, %arg1: memref<9x8x98xbf16, #tpu.memory_space<vmem>>, %arg2: memref<9x16x8xbf16, #tpu.memory_space<vmem>>, %arg3: memref<16x1xf32, #tpu.memory_space<vmem>>, %arg4: memref<16x1xf32, #tpu.memory_space<vmem>>, %arg5: memref<16x98xbf16, #tpu.memory_space<vmem>>) attributes {dimension_semantics = [#tpu.dimension_semantics<parallel>], iteration_bounds = array<i64: 1>, scalar_prefetch = 0 : i64, scratch_operands = 0 : i64, tpu.core_type = #tpu.core_type<tc>, window_params = [{transform_indices = @transform_0, window_bounds = array<i64: 9, 8, 98>}, {pipeline_mode = #tpu.pipeline_mode<synchronous>, transform_indices = @transform_1, window_bounds = array<i64: 9, 16, 8>}, {pipeline_mode = #tpu.pipeline_mode<synchronous>, transform_indices = @transform_2, window_bounds = array<i64: 16, 1>}, {pipeline_mode = #tpu.pipeline_mode<synchronous>, transform_indices = @transform_3, window_bounds = array<i64: 16, 1>}, {transform_indices = @transform_4, window_bounds = array<i64: 16, 98>}]} {
    %c0 = arith.constant 0 : index
    %c0_0 = arith.constant 0 : index
    %c0_1 = arith.constant 0 : index
    %0 = vector.load %arg2[%c0, %c0_0, %c0_1] : memref<9x16x8xbf16, #tpu.memory_space<vmem>>, vector<1x16x8xbf16>
    %1 = vector.shape_cast %0 : vector<1x16x8xbf16> to vector<16x8xbf16>
    %c0_2 = arith.constant 0 : index
    %c0_3 = arith.constant 0 : index
    %c0_4 = arith.constant 0 : index
    %2 = vector.load %arg1[%c0_2, %c0_3, %c0_4] : memref<9x8x98xbf16, #tpu.memory_space<vmem>>, vector<1x8x98xbf16>
    %3 = vector.shape_cast %2 : vector<1x8x98xbf16> to vector<8x98xbf16>
    %cst = arith.constant dense<0.000000e+00> : vector<16x98xf32>
    %4 = tpu.matmul %1, %3, %cst {dimension_numbers = #tpu.dot_dimension_numbers<[1], [0], [0], [1], [0, 0, 1, 1], [], []>} : vector<16x8xbf16>, vector<8x98xbf16>, vector<16x98xf32> -> vector<16x98xf32>
    %c1 = arith.constant 1 : index
    %c0_5 = arith.constant 0 : index
    %c0_6 = arith.constant 0 : index
    %5 = vector.load %arg2[%c1, %c0_5, %c0_6] : memref<9x16x8xbf16, #tpu.memory_space<vmem>>, vector<1x16x8xbf16>
    %6 = vector.shape_cast %5 : vector<1x16x8xbf16> to vector<16x8xbf16>
    %c1_7 = arith.constant 1 : index
    %c0_8 = arith.constant 0 : index
    %c0_9 = arith.constant 0 : index
    %7 = vector.load %arg1[%c1_7, %c0_8, %c0_9] : memref<9x8x98xbf16, #tpu.memory_space<vmem>>, vector<1x8x98xbf16>
    %8 = vector.shape_cast %7 : vector<1x8x98xbf16> to vector<8x98xbf16>
    %cst_10 = arith.constant dense<0.000000e+00> : vector<16x98xf32>
    %9 = tpu.matmul %6, %8, %cst_10 {dimension_numbers = #tpu.dot_dimension_numbers<[1], [0], [0], [1], [0, 0, 1, 1], [], []>} : vector<16x8xbf16>, vector<8x98xbf16>, vector<16x98xf32> -> vector<16x98xf32>
    %10 = arith.addf %4, %9 : vector<16x98xf32>
    %c2 = arith.constant 2 : index
    %c0_11 = arith.constant 0 : index
    %c0_12 = arith.constant 0 : index
    %11 = vector.load %arg2[%c2, %c0_11, %c0_12] : memref<9x16x8xbf16, #tpu.memory_space<vmem>>, vector<1x16x8xbf16>
    %12 = vector.shape_cast %11 : vector<1x16x8xbf16> to vector<16x8xbf16>
    %c2_13 = arith.constant 2 : index
    %c0_14 = arith.constant 0 : index
    %c0_15 = arith.constant 0 : index
    %13 = vector.load %arg1[%c2_13, %c0_14, %c0_15] : memref<9x8x98xbf16, #tpu.memory_space<vmem>>, vector<1x8x98xbf16>
    %14 = vector.shape_cast %13 : vector<1x8x98xbf16> to vector<8x98xbf16>
    %cst_16 = arith.constant dense<0.000000e+00> : vector<16x98xf32>
    %15 = tpu.matmul %12, %14, %cst_16 {dimension_numbers = #tpu.dot_dimension_numbers<[1], [0], [0], [1], [0, 0, 1, 1], [], []>} : vector<16x8xbf16>, vector<8x98xbf16>, vector<16x98xf32> -> vector<16x98xf32>
    %16 = arith.addf %10, %15 : vector<16x98xf32>
    %c3 = arith.constant 3 : index
    %c0_17 = arith.constant 0 : index
    %c0_18 = arith.constant 0 : index
    %17 = vector.load %arg2[%c3, %c0_17, %c0_18] : memref<9x16x8xbf16, #tpu.memory_space<vmem>>, vector<1x16x8xbf16>
    %18 = vector.shape_cast %17 : vector<1x16x8xbf16> to vector<16x8xbf16>
    %c3_19 = arith.constant 3 : index
    %c0_20 = arith.constant 0 : index
    %c0_21 = arith.constant 0 : index
    %19 = vector.load %arg1[%c3_19, %c0_20, %c0_21] : memref<9x8x98xbf16, #tpu.memory_space<vmem>>, vector<1x8x98xbf16>
    %20 = vector.shape_cast %19 : vector<1x8x98xbf16> to vector<8x98xbf16>
    %cst_22 = arith.constant dense<0.000000e+00> : vector<16x98xf32>
    %21 = tpu.matmul %18, %20, %cst_22 {dimension_numbers = #tpu.dot_dimension_numbers<[1], [0], [0], [1], [0, 0, 1, 1], [], []>} : vector<16x8xbf16>, vector<8x98xbf16>, vector<16x98xf32> -> vector<16x98xf32>
    %22 = arith.addf %16, %21 : vector<16x98xf32>
    %c4 = arith.constant 4 : index
    %c0_23 = arith.constant 0 : index
    %c0_24 = arith.constant 0 : index
    %23 = vector.load %arg2[%c4, %c0_23, %c0_24] : memref<9x16x8xbf16, #tpu.memory_space<vmem>>, vector<1x16x8xbf16>
    %24 = vector.shape_cast %23 : vector<1x16x8xbf16> to vector<16x8xbf16>
    %c4_25 = arith.constant 4 : index
    %c0_26 = arith.constant 0 : index
    %c0_27 = arith.constant 0 : index
    %25 = vector.load %arg1[%c4_25, %c0_26, %c0_27] : memref<9x8x98xbf16, #tpu.memory_space<vmem>>, vector<1x8x98xbf16>
    %26 = vector.shape_cast %25 : vector<1x8x98xbf16> to vector<8x98xbf16>
    %cst_28 = arith.constant dense<0.000000e+00> : vector<16x98xf32>
    %27 = tpu.matmul %24, %26, %cst_28 {dimension_numbers = #tpu.dot_dimension_numbers<[1], [0], [0], [1], [0, 0, 1, 1], [], []>} : vector<16x8xbf16>, vector<8x98xbf16>, vector<16x98xf32> -> vector<16x98xf32>
    %28 = arith.addf %22, %27 : vector<16x98xf32>
    %c5 = arith.constant 5 : index
    %c0_29 = arith.constant 0 : index
    %c0_30 = arith.constant 0 : index
    %29 = vector.load %arg2[%c5, %c0_29, %c0_30] : memref<9x16x8xbf16, #tpu.memory_space<vmem>>, vector<1x16x8xbf16>
    %30 = vector.shape_cast %29 : vector<1x16x8xbf16> to vector<16x8xbf16>
    %c5_31 = arith.constant 5 : index
    %c0_32 = arith.constant 0 : index
    %c0_33 = arith.constant 0 : index
    %31 = vector.load %arg1[%c5_31, %c0_32, %c0_33] : memref<9x8x98xbf16, #tpu.memory_space<vmem>>, vector<1x8x98xbf16>
    %32 = vector.shape_cast %31 : vector<1x8x98xbf16> to vector<8x98xbf16>
    %cst_34 = arith.constant dense<0.000000e+00> : vector<16x98xf32>
    %33 = tpu.matmul %30, %32, %cst_34 {dimension_numbers = #tpu.dot_dimension_numbers<[1], [0], [0], [1], [0, 0, 1, 1], [], []>} : vector<16x8xbf16>, vector<8x98xbf16>, vector<16x98xf32> -> vector<16x98xf32>
    %34 = arith.addf %28, %33 : vector<16x98xf32>
    %c6 = arith.constant 6 : index
    %c0_35 = arith.constant 0 : index
    %c0_36 = arith.constant 0 : index
    %35 = vector.load %arg2[%c6, %c0_35, %c0_36] : memref<9x16x8xbf16, #tpu.memory_space<vmem>>, vector<1x16x8xbf16>
    %36 = vector.shape_cast %35 : vector<1x16x8xbf16> to vector<16x8xbf16>
    %c6_37 = arith.constant 6 : index
    %c0_38 = arith.constant 0 : index
    %c0_39 = arith.constant 0 : index
    %37 = vector.load %arg1[%c6_37, %c0_38, %c0_39] : memref<9x8x98xbf16, #tpu.memory_space<vmem>>, vector<1x8x98xbf16>
    %38 = vector.shape_cast %37 : vector<1x8x98xbf16> to vector<8x98xbf16>
    %cst_40 = arith.constant dense<0.000000e+00> : vector<16x98xf32>
    %39 = tpu.matmul %36, %38, %cst_40 {dimension_numbers = #tpu.dot_dimension_numbers<[1], [0], [0], [1], [0, 0, 1, 1], [], []>} : vector<16x8xbf16>, vector<8x98xbf16>, vector<16x98xf32> -> vector<16x98xf32>
    %40 = arith.addf %34, %39 : vector<16x98xf32>
    %c7 = arith.constant 7 : index
    %c0_41 = arith.constant 0 : index
    %c0_42 = arith.constant 0 : index
    %41 = vector.load %arg2[%c7, %c0_41, %c0_42] : memref<9x16x8xbf16, #tpu.memory_space<vmem>>, vector<1x16x8xbf16>
    %42 = vector.shape_cast %41 : vector<1x16x8xbf16> to vector<16x8xbf16>
    %c7_43 = arith.constant 7 : index
    %c0_44 = arith.constant 0 : index
    %c0_45 = arith.constant 0 : index
    %43 = vector.load %arg1[%c7_43, %c0_44, %c0_45] : memref<9x8x98xbf16, #tpu.memory_space<vmem>>, vector<1x8x98xbf16>
    %44 = vector.shape_cast %43 : vector<1x8x98xbf16> to vector<8x98xbf16>
    %cst_46 = arith.constant dense<0.000000e+00> : vector<16x98xf32>
    %45 = tpu.matmul %42, %44, %cst_46 {dimension_numbers = #tpu.dot_dimension_numbers<[1], [0], [0], [1], [0, 0, 1, 1], [], []>} : vector<16x8xbf16>, vector<8x98xbf16>, vector<16x98xf32> -> vector<16x98xf32>
    %46 = arith.addf %40, %45 : vector<16x98xf32>
    %c8 = arith.constant 8 : index
    %c0_47 = arith.constant 0 : index
    %c0_48 = arith.constant 0 : index
    %47 = vector.load %arg2[%c8, %c0_47, %c0_48] : memref<9x16x8xbf16, #tpu.memory_space<vmem>>, vector<1x16x8xbf16>
    %48 = vector.shape_cast %47 : vector<1x16x8xbf16> to vector<16x8xbf16>
    %c8_49 = arith.constant 8 : index
    %c0_50 = arith.constant 0 : index
    %c0_51 = arith.constant 0 : index
    %49 = vector.load %arg1[%c8_49, %c0_50, %c0_51] : memref<9x8x98xbf16, #tpu.memory_space<vmem>>, vector<1x8x98xbf16>
    %50 = vector.shape_cast %49 : vector<1x8x98xbf16> to vector<8x98xbf16>
    %cst_52 = arith.constant dense<0.000000e+00> : vector<16x98xf32>
    %51 = tpu.matmul %48, %50, %cst_52 {dimension_numbers = #tpu.dot_dimension_numbers<[1], [0], [0], [1], [0, 0, 1, 1], [], []>} : vector<16x8xbf16>, vector<8x98xbf16>, vector<16x98xf32> -> vector<16x98xf32>
    %52 = arith.addf %46, %51 : vector<16x98xf32>
    %c0_53 = arith.constant 0 : index
    %c0_54 = arith.constant 0 : index
    %53 = vector.load %arg3[%c0_53, %c0_54] : memref<16x1xf32, #tpu.memory_space<vmem>>, vector<16x1xf32>
    %54 = vector.broadcast %53 : vector<16x1xf32> to vector<16x98xf32>
    %55 = arith.mulf %52, %54 : vector<16x98xf32>
    %c0_55 = arith.constant 0 : index
    %c0_56 = arith.constant 0 : index
    %56 = vector.load %arg4[%c0_55, %c0_56] : memref<16x1xf32, #tpu.memory_space<vmem>>, vector<16x1xf32>
    %57 = vector.broadcast %56 : vector<16x1xf32> to vector<16x98xf32>
    %58 = arith.addf %55, %57 : vector<16x98xf32>
    %cst_57 = arith.constant 0.000000e+00 : f32
    %59 = vector.broadcast %cst_57 : f32 to vector<16x98xf32>
    %60 = arith.maximumf %58, %59 : vector<16x98xf32>
    %61 = arith.truncf %60 : vector<16x98xf32> to vector<16x98xbf16>
    %c0_58 = arith.constant 0 : index
    %c0_59 = arith.constant 0 : index
    %62 = vector.load %arg5[%c0_58, %c0_59] : memref<16x98xbf16, #tpu.memory_space<vmem>>, vector<16x98xbf16>
    tpu.vector_store %arg5[%c0_58, %c0_59], %61 {strides = array<i32>} : memref<16x98xbf16, #tpu.memory_space<vmem>>, vector<16x98xbf16>,
    return
  }
  func.func @transform_0(%arg0: i32) -> (i32, i32, i32) {
    %c0_i32 = arith.constant 0 : i32
    %c0_i32_0 = arith.constant 0 : i32
    %c0_i32_1 = arith.constant 0 : i32
    return %c0_i32, %c0_i32_0, %arg0 : i32, i32, i32
  }
  func.func @transform_1(%arg0: i32) -> (i32, i32, i32) {
    %c0_i32 = arith.constant 0 : i32
    %c0_i32_0 = arith.constant 0 : i32
    %c0_i32_1 = arith.constant 0 : i32
    %c0_i32_2 = arith.constant 0 : i32
    return %c0_i32, %c0_i32_0, %c0_i32_1 : i32, i32, i32
  }
  func.func @transform_2(%arg0: i32) -> (i32, i32) {
    %c0_i32 = arith.constant 0 : i32
    %c0_i32_0 = arith.constant 0 : i32
    %c0_i32_1 = arith.constant 0 : i32
    return %c0_i32, %c0_i32_0 : i32, i32
  }
  func.func @transform_3(%arg0: i32) -> (i32, i32) {
    %c0_i32 = arith.constant 0 : i32
    %c0_i32_0 = arith.constant 0 : i32
    %c0_i32_1 = arith.constant 0 : i32
    return %c0_i32, %c0_i32_0 : i32, i32
  }
  func.func @transform_4(%arg0: i32) -> (i32, i32) {
    %c0_i32 = arith.constant 0 : i32
    %c0_i32_0 = arith.constant 0 : i32
    return %c0_i32, %arg0 : i32, i32
  }
}

module attributes {stable_mosaic.version = 11 : i64} {
  func.func @_conv_bn_kernel(%arg0: i32, %arg1: memref<9x16x98xbf16, #tpu.memory_space<vmem>>, %arg2: memref<9x16x16xbf16, #tpu.memory_space<vmem>>, %arg3: memref<16x1xf32, #tpu.memory_space<vmem>>, %arg4: memref<16x1xf32, #tpu.memory_space<vmem>>, %arg5: memref<16x98xbf16, #tpu.memory_space<vmem>>) attributes {dimension_semantics = [#tpu.dimension_semantics<parallel>], iteration_bounds = array<i64: 1>, scalar_prefetch = 0 : i64, scratch_operands = 0 : i64, tpu.core_type = #tpu.core_type<tc>, window_params = [{transform_indices = @transform_0, window_bounds = array<i64: 9, 16, 98>}, {pipeline_mode = #tpu.pipeline_mode<synchronous>, transform_indices = @transform_1, window_bounds = array<i64: 9, 16, 16>}, {pipeline_mode = #tpu.pipeline_mode<synchronous>, transform_indices = @transform_2, window_bounds = array<i64: 16, 1>}, {pipeline_mode = #tpu.pipeline_mode<synchronous>, transform_indices = @transform_3, window_bounds = array<i64: 16, 1>}, {transform_indices = @transform_4, window_bounds = array<i64: 16, 98>}]} {
    %c0 = arith.constant 0 : index
    %c0_0 = arith.constant 0 : index
    %c0_1 = arith.constant 0 : index
    %0 = vector.load %arg2[%c0, %c0_0, %c0_1] : memref<9x16x16xbf16, #tpu.memory_space<vmem>>, vector<1x16x16xbf16>
    %1 = vector.shape_cast %0 : vector<1x16x16xbf16> to vector<16x16xbf16>
    %c0_2 = arith.constant 0 : index
    %c0_3 = arith.constant 0 : index
    %c0_4 = arith.constant 0 : index
    %2 = vector.load %arg1[%c0_2, %c0_3, %c0_4] : memref<9x16x98xbf16, #tpu.memory_space<vmem>>, vector<1x16x98xbf16>
    %3 = vector.shape_cast %2 : vector<1x16x98xbf16> to vector<16x98xbf16>
    %cst = arith.constant dense<0.000000e+00> : vector<16x98xf32>
    %4 = tpu.matmul %1, %3, %cst {dimension_numbers = #tpu.dot_dimension_numbers<[1], [0], [0], [1], [0, 0, 1, 1], [], []>} : vector<16x16xbf16>, vector<16x98xbf16>, vector<16x98xf32> -> vector<16x98xf32>
    %c1 = arith.constant 1 : index
    %c0_5 = arith.constant 0 : index
    %c0_6 = arith.constant 0 : index
    %5 = vector.load %arg2[%c1, %c0_5, %c0_6] : memref<9x16x16xbf16, #tpu.memory_space<vmem>>, vector<1x16x16xbf16>
    %6 = vector.shape_cast %5 : vector<1x16x16xbf16> to vector<16x16xbf16>
    %c1_7 = arith.constant 1 : index
    %c0_8 = arith.constant 0 : index
    %c0_9 = arith.constant 0 : index
    %7 = vector.load %arg1[%c1_7, %c0_8, %c0_9] : memref<9x16x98xbf16, #tpu.memory_space<vmem>>, vector<1x16x98xbf16>
    %8 = vector.shape_cast %7 : vector<1x16x98xbf16> to vector<16x98xbf16>
    %cst_10 = arith.constant dense<0.000000e+00> : vector<16x98xf32>
    %9 = tpu.matmul %6, %8, %cst_10 {dimension_numbers = #tpu.dot_dimension_numbers<[1], [0], [0], [1], [0, 0, 1, 1], [], []>} : vector<16x16xbf16>, vector<16x98xbf16>, vector<16x98xf32> -> vector<16x98xf32>
    %10 = arith.addf %4, %9 : vector<16x98xf32>
    %c2 = arith.constant 2 : index
    %c0_11 = arith.constant 0 : index
    %c0_12 = arith.constant 0 : index
    %11 = vector.load %arg2[%c2, %c0_11, %c0_12] : memref<9x16x16xbf16, #tpu.memory_space<vmem>>, vector<1x16x16xbf16>
    %12 = vector.shape_cast %11 : vector<1x16x16xbf16> to vector<16x16xbf16>
    %c2_13 = arith.constant 2 : index
    %c0_14 = arith.constant 0 : index
    %c0_15 = arith.constant 0 : index
    %13 = vector.load %arg1[%c2_13, %c0_14, %c0_15] : memref<9x16x98xbf16, #tpu.memory_space<vmem>>, vector<1x16x98xbf16>
    %14 = vector.shape_cast %13 : vector<1x16x98xbf16> to vector<16x98xbf16>
    %cst_16 = arith.constant dense<0.000000e+00> : vector<16x98xf32>
    %15 = tpu.matmul %12, %14, %cst_16 {dimension_numbers = #tpu.dot_dimension_numbers<[1], [0], [0], [1], [0, 0, 1, 1], [], []>} : vector<16x16xbf16>, vector<16x98xbf16>, vector<16x98xf32> -> vector<16x98xf32>
    %16 = arith.addf %10, %15 : vector<16x98xf32>
    %c3 = arith.constant 3 : index
    %c0_17 = arith.constant 0 : index
    %c0_18 = arith.constant 0 : index
    %17 = vector.load %arg2[%c3, %c0_17, %c0_18] : memref<9x16x16xbf16, #tpu.memory_space<vmem>>, vector<1x16x16xbf16>
    %18 = vector.shape_cast %17 : vector<1x16x16xbf16> to vector<16x16xbf16>
    %c3_19 = arith.constant 3 : index
    %c0_20 = arith.constant 0 : index
    %c0_21 = arith.constant 0 : index
    %19 = vector.load %arg1[%c3_19, %c0_20, %c0_21] : memref<9x16x98xbf16, #tpu.memory_space<vmem>>, vector<1x16x98xbf16>
    %20 = vector.shape_cast %19 : vector<1x16x98xbf16> to vector<16x98xbf16>
    %cst_22 = arith.constant dense<0.000000e+00> : vector<16x98xf32>
    %21 = tpu.matmul %18, %20, %cst_22 {dimension_numbers = #tpu.dot_dimension_numbers<[1], [0], [0], [1], [0, 0, 1, 1], [], []>} : vector<16x16xbf16>, vector<16x98xbf16>, vector<16x98xf32> -> vector<16x98xf32>
    %22 = arith.addf %16, %21 : vector<16x98xf32>
    %c4 = arith.constant 4 : index
    %c0_23 = arith.constant 0 : index
    %c0_24 = arith.constant 0 : index
    %23 = vector.load %arg2[%c4, %c0_23, %c0_24] : memref<9x16x16xbf16, #tpu.memory_space<vmem>>, vector<1x16x16xbf16>
    %24 = vector.shape_cast %23 : vector<1x16x16xbf16> to vector<16x16xbf16>
    %c4_25 = arith.constant 4 : index
    %c0_26 = arith.constant 0 : index
    %c0_27 = arith.constant 0 : index
    %25 = vector.load %arg1[%c4_25, %c0_26, %c0_27] : memref<9x16x98xbf16, #tpu.memory_space<vmem>>, vector<1x16x98xbf16>
    %26 = vector.shape_cast %25 : vector<1x16x98xbf16> to vector<16x98xbf16>
    %cst_28 = arith.constant dense<0.000000e+00> : vector<16x98xf32>
    %27 = tpu.matmul %24, %26, %cst_28 {dimension_numbers = #tpu.dot_dimension_numbers<[1], [0], [0], [1], [0, 0, 1, 1], [], []>} : vector<16x16xbf16>, vector<16x98xbf16>, vector<16x98xf32> -> vector<16x98xf32>
    %28 = arith.addf %22, %27 : vector<16x98xf32>
    %c5 = arith.constant 5 : index
    %c0_29 = arith.constant 0 : index
    %c0_30 = arith.constant 0 : index
    %29 = vector.load %arg2[%c5, %c0_29, %c0_30] : memref<9x16x16xbf16, #tpu.memory_space<vmem>>, vector<1x16x16xbf16>
    %30 = vector.shape_cast %29 : vector<1x16x16xbf16> to vector<16x16xbf16>
    %c5_31 = arith.constant 5 : index
    %c0_32 = arith.constant 0 : index
    %c0_33 = arith.constant 0 : index
    %31 = vector.load %arg1[%c5_31, %c0_32, %c0_33] : memref<9x16x98xbf16, #tpu.memory_space<vmem>>, vector<1x16x98xbf16>
    %32 = vector.shape_cast %31 : vector<1x16x98xbf16> to vector<16x98xbf16>
    %cst_34 = arith.constant dense<0.000000e+00> : vector<16x98xf32>
    %33 = tpu.matmul %30, %32, %cst_34 {dimension_numbers = #tpu.dot_dimension_numbers<[1], [0], [0], [1], [0, 0, 1, 1], [], []>} : vector<16x16xbf16>, vector<16x98xbf16>, vector<16x98xf32> -> vector<16x98xf32>
    %34 = arith.addf %28, %33 : vector<16x98xf32>
    %c6 = arith.constant 6 : index
    %c0_35 = arith.constant 0 : index
    %c0_36 = arith.constant 0 : index
    %35 = vector.load %arg2[%c6, %c0_35, %c0_36] : memref<9x16x16xbf16, #tpu.memory_space<vmem>>, vector<1x16x16xbf16>
    %36 = vector.shape_cast %35 : vector<1x16x16xbf16> to vector<16x16xbf16>
    %c6_37 = arith.constant 6 : index
    %c0_38 = arith.constant 0 : index
    %c0_39 = arith.constant 0 : index
    %37 = vector.load %arg1[%c6_37, %c0_38, %c0_39] : memref<9x16x98xbf16, #tpu.memory_space<vmem>>, vector<1x16x98xbf16>
    %38 = vector.shape_cast %37 : vector<1x16x98xbf16> to vector<16x98xbf16>
    %cst_40 = arith.constant dense<0.000000e+00> : vector<16x98xf32>
    %39 = tpu.matmul %36, %38, %cst_40 {dimension_numbers = #tpu.dot_dimension_numbers<[1], [0], [0], [1], [0, 0, 1, 1], [], []>} : vector<16x16xbf16>, vector<16x98xbf16>, vector<16x98xf32> -> vector<16x98xf32>
    %40 = arith.addf %34, %39 : vector<16x98xf32>
    %c7 = arith.constant 7 : index
    %c0_41 = arith.constant 0 : index
    %c0_42 = arith.constant 0 : index
    %41 = vector.load %arg2[%c7, %c0_41, %c0_42] : memref<9x16x16xbf16, #tpu.memory_space<vmem>>, vector<1x16x16xbf16>
    %42 = vector.shape_cast %41 : vector<1x16x16xbf16> to vector<16x16xbf16>
    %c7_43 = arith.constant 7 : index
    %c0_44 = arith.constant 0 : index
    %c0_45 = arith.constant 0 : index
    %43 = vector.load %arg1[%c7_43, %c0_44, %c0_45] : memref<9x16x98xbf16, #tpu.memory_space<vmem>>, vector<1x16x98xbf16>
    %44 = vector.shape_cast %43 : vector<1x16x98xbf16> to vector<16x98xbf16>
    %cst_46 = arith.constant dense<0.000000e+00> : vector<16x98xf32>
    %45 = tpu.matmul %42, %44, %cst_46 {dimension_numbers = #tpu.dot_dimension_numbers<[1], [0], [0], [1], [0, 0, 1, 1], [], []>} : vector<16x16xbf16>, vector<16x98xbf16>, vector<16x98xf32> -> vector<16x98xf32>
    %46 = arith.addf %40, %45 : vector<16x98xf32>
    %c8 = arith.constant 8 : index
    %c0_47 = arith.constant 0 : index
    %c0_48 = arith.constant 0 : index
    %47 = vector.load %arg2[%c8, %c0_47, %c0_48] : memref<9x16x16xbf16, #tpu.memory_space<vmem>>, vector<1x16x16xbf16>
    %48 = vector.shape_cast %47 : vector<1x16x16xbf16> to vector<16x16xbf16>
    %c8_49 = arith.constant 8 : index
    %c0_50 = arith.constant 0 : index
    %c0_51 = arith.constant 0 : index
    %49 = vector.load %arg1[%c8_49, %c0_50, %c0_51] : memref<9x16x98xbf16, #tpu.memory_space<vmem>>, vector<1x16x98xbf16>
    %50 = vector.shape_cast %49 : vector<1x16x98xbf16> to vector<16x98xbf16>
    %cst_52 = arith.constant dense<0.000000e+00> : vector<16x98xf32>
    %51 = tpu.matmul %48, %50, %cst_52 {dimension_numbers = #tpu.dot_dimension_numbers<[1], [0], [0], [1], [0, 0, 1, 1], [], []>} : vector<16x16xbf16>, vector<16x98xbf16>, vector<16x98xf32> -> vector<16x98xf32>
    %52 = arith.addf %46, %51 : vector<16x98xf32>
    %c0_53 = arith.constant 0 : index
    %c0_54 = arith.constant 0 : index
    %53 = vector.load %arg3[%c0_53, %c0_54] : memref<16x1xf32, #tpu.memory_space<vmem>>, vector<16x1xf32>
    %54 = vector.broadcast %53 : vector<16x1xf32> to vector<16x98xf32>
    %55 = arith.mulf %52, %54 : vector<16x98xf32>
    %c0_55 = arith.constant 0 : index
    %c0_56 = arith.constant 0 : index
    %56 = vector.load %arg4[%c0_55, %c0_56] : memref<16x1xf32, #tpu.memory_space<vmem>>, vector<16x1xf32>
    %57 = vector.broadcast %56 : vector<16x1xf32> to vector<16x98xf32>
    %58 = arith.addf %55, %57 : vector<16x98xf32>
    %59 = arith.truncf %58 : vector<16x98xf32> to vector<16x98xbf16>
    %c0_57 = arith.constant 0 : index
    %c0_58 = arith.constant 0 : index
    %60 = vector.load %arg5[%c0_57, %c0_58] : memref<16x98xbf16, #tpu.memory_space<vmem>>, vector<16x98xbf16>
    tpu.vector_store %arg5[%c0_57, %c0_58], %59 {strides = array<i32>} : memref<16x98xbf16, #tpu.memory_space<vmem>>, vector<16x98xbf16>,
    return
  }
  func.func @transform_0(%arg0: i32) -> (i32, i32, i32) {
    %c0_i32 = arith.constant 0 : i32
    %c0_i32_0 = arith.constant 0 : i32
    %c0_i32_1 = arith.constant 0 : i32
    return %c0_i32, %c0_i32_0, %arg0 : i32, i32, i32
  }
  func.func @transform_1(%arg0: i32) -> (i32, i32, i32) {
    %c0_i32 = arith.constant 0 : i32
    %c0_i32_0 = arith.constant 0 : i32
    %c0_i32_1 = arith.constant 0 : i32
    %c0_i32_2 = arith.constant 0 : i32
    return %c0_i32, %c0_i32_0, %c0_i32_1 : i32, i32, i32
  }
  func.func @transform_2(%arg0: i32) -> (i32, i32) {
    %c0_i32 = arith.constant 0 : i32
    %c0_i32_0 = arith.constant 0 : i32
    %c0_i32_1 = arith.constant 0 : i32
    return %c0_i32, %c0_i32_0 : i32, i32
  }
  func.func @transform_3(%arg0: i32) -> (i32, i32) {
    %c0_i32 = arith.constant 0 : i32
    %c0_i32_0 = arith.constant 0 : i32
    %c0_i32_1 = arith.constant 0 : i32
    return %c0_i32, %c0_i32_0 : i32, i32
  }
  func.func @transform_4(%arg0: i32) -> (i32, i32) {
    %c0_i32 = arith.constant 0 : i32
    %c0_i32_0 = arith.constant 0 : i32
    return %c0_i32, %arg0 : i32, i32
  }
}

module attributes {stable_mosaic.version = 11 : i64} {
  func.func @_conv_bn_kernel(%arg0: i32, %arg1: memref<1x8x98xbf16, #tpu.memory_space<vmem>>, %arg2: memref<1x16x8xbf16, #tpu.memory_space<vmem>>, %arg3: memref<16x1xf32, #tpu.memory_space<vmem>>, %arg4: memref<16x1xf32, #tpu.memory_space<vmem>>, %arg5: memref<16x98xbf16, #tpu.memory_space<vmem>>) attributes {dimension_semantics = [#tpu.dimension_semantics<parallel>], iteration_bounds = array<i64: 1>, scalar_prefetch = 0 : i64, scratch_operands = 0 : i64, tpu.core_type = #tpu.core_type<tc>, window_params = [{transform_indices = @transform_0, window_bounds = array<i64: 1, 8, 98>}, {pipeline_mode = #tpu.pipeline_mode<synchronous>, transform_indices = @transform_1, window_bounds = array<i64: 1, 16, 8>}, {pipeline_mode = #tpu.pipeline_mode<synchronous>, transform_indices = @transform_2, window_bounds = array<i64: 16, 1>}, {pipeline_mode = #tpu.pipeline_mode<synchronous>, transform_indices = @transform_3, window_bounds = array<i64: 16, 1>}, {transform_indices = @transform_4, window_bounds = array<i64: 16, 98>}]} {
    %c0 = arith.constant 0 : index
    %c0_0 = arith.constant 0 : index
    %c0_1 = arith.constant 0 : index
    %0 = vector.load %arg2[%c0, %c0_0, %c0_1] : memref<1x16x8xbf16, #tpu.memory_space<vmem>>, vector<1x16x8xbf16>
    %1 = vector.shape_cast %0 : vector<1x16x8xbf16> to vector<16x8xbf16>
    %c0_2 = arith.constant 0 : index
    %c0_3 = arith.constant 0 : index
    %c0_4 = arith.constant 0 : index
    %2 = vector.load %arg1[%c0_2, %c0_3, %c0_4] : memref<1x8x98xbf16, #tpu.memory_space<vmem>>, vector<1x8x98xbf16>
    %3 = vector.shape_cast %2 : vector<1x8x98xbf16> to vector<8x98xbf16>
    %cst = arith.constant dense<0.000000e+00> : vector<16x98xf32>
    %4 = tpu.matmul %1, %3, %cst {dimension_numbers = #tpu.dot_dimension_numbers<[1], [0], [0], [1], [0, 0, 1, 1], [], []>} : vector<16x8xbf16>, vector<8x98xbf16>, vector<16x98xf32> -> vector<16x98xf32>
    %c0_5 = arith.constant 0 : index
    %c0_6 = arith.constant 0 : index
    %5 = vector.load %arg3[%c0_5, %c0_6] : memref<16x1xf32, #tpu.memory_space<vmem>>, vector<16x1xf32>
    %6 = vector.broadcast %5 : vector<16x1xf32> to vector<16x98xf32>
    %7 = arith.mulf %4, %6 : vector<16x98xf32>
    %c0_7 = arith.constant 0 : index
    %c0_8 = arith.constant 0 : index
    %8 = vector.load %arg4[%c0_7, %c0_8] : memref<16x1xf32, #tpu.memory_space<vmem>>, vector<16x1xf32>
    %9 = vector.broadcast %8 : vector<16x1xf32> to vector<16x98xf32>
    %10 = arith.addf %7, %9 : vector<16x98xf32>
    %11 = arith.truncf %10 : vector<16x98xf32> to vector<16x98xbf16>
    %c0_9 = arith.constant 0 : index
    %c0_10 = arith.constant 0 : index
    %12 = vector.load %arg5[%c0_9, %c0_10] : memref<16x98xbf16, #tpu.memory_space<vmem>>, vector<16x98xbf16>
    tpu.vector_store %arg5[%c0_9, %c0_10], %11 {strides = array<i32>} : memref<16x98xbf16, #tpu.memory_space<vmem>>, vector<16x98xbf16>,
    return
  }
  func.func @transform_0(%arg0: i32) -> (i32, i32, i32) {
    %c0_i32 = arith.constant 0 : i32
    %c0_i32_0 = arith.constant 0 : i32
    %c0_i32_1 = arith.constant 0 : i32
    return %c0_i32, %c0_i32_0, %arg0 : i32, i32, i32
  }
  func.func @transform_1(%arg0: i32) -> (i32, i32, i32) {
    %c0_i32 = arith.constant 0 : i32
    %c0_i32_0 = arith.constant 0 : i32
    %c0_i32_1 = arith.constant 0 : i32
    %c0_i32_2 = arith.constant 0 : i32
    return %c0_i32, %c0_i32_0, %c0_i32_1 : i32, i32, i32
  }
  func.func @transform_2(%arg0: i32) -> (i32, i32) {
    %c0_i32 = arith.constant 0 : i32
    %c0_i32_0 = arith.constant 0 : i32
    %c0_i32_1 = arith.constant 0 : i32
    return %c0_i32, %c0_i32_0 : i32, i32
  }
  func.func @transform_3(%arg0: i32) -> (i32, i32) {
    %c0_i32 = arith.constant 0 : i32
    %c0_i32_0 = arith.constant 0 : i32
    %c0_i32_1 = arith.constant 0 : i32
    return %c0_i32, %c0_i32_0 : i32, i32
  }
  func.func @transform_4(%arg0: i32) -> (i32, i32) {
    %c0_i32 = arith.constant 0 : i32
    %c0_i32_0 = arith.constant 0 : i32
    return %c0_i32, %arg0 : i32, i32
  }
}

module attributes {stable_mosaic.version = 11 : i64} {
  func.func @_se_tail_kernel(%arg0: i32, %arg1: memref<16x2x49xbf16, #tpu.memory_space<vmem>>, %arg2: memref<16x2x49xbf16, #tpu.memory_space<vmem>>, %arg3: memref<16x16xf32, #tpu.memory_space<vmem>>, %arg4: memref<16x1xf32, #tpu.memory_space<vmem>>, %arg5: memref<16x16xf32, #tpu.memory_space<vmem>>, %arg6: memref<16x1xf32, #tpu.memory_space<vmem>>, %arg7: memref<16x2x49xbf16, #tpu.memory_space<vmem>>) attributes {dimension_semantics = [#tpu.dimension_semantics<arbitrary>], iteration_bounds = array<i64: 1>, scalar_prefetch = 0 : i64, scratch_operands = 0 : i64, tpu.core_type = #tpu.core_type<tc>, window_params = [{pipeline_mode = #tpu.pipeline_mode<synchronous>, transform_indices = @transform_0, window_bounds = array<i64: 16, 2, 49>}, {pipeline_mode = #tpu.pipeline_mode<synchronous>, transform_indices = @transform_1, window_bounds = array<i64: 16, 2, 49>}, {pipeline_mode = #tpu.pipeline_mode<synchronous>, transform_indices = @transform_2, window_bounds = array<i64: 16, 16>}, {pipeline_mode = #tpu.pipeline_mode<synchronous>, transform_indices = @transform_3, window_bounds = array<i64: 16, 1>}, {pipeline_mode = #tpu.pipeline_mode<synchronous>, transform_indices = @transform_4, window_bounds = array<i64: 16, 16>}, {pipeline_mode = #tpu.pipeline_mode<synchronous>, transform_indices = @transform_5, window_bounds = array<i64: 16, 1>}, {pipeline_mode = #tpu.pipeline_mode<synchronous>, transform_indices = @transform_6, window_bounds = array<i64: 16, 2, 49>}]} {
    %c0 = arith.constant 0 : index
    %c0_0 = arith.constant 0 : index
    %c0_1 = arith.constant 0 : index
    %0 = vector.load %arg1[%c0, %c0_0, %c0_1] : memref<16x2x49xbf16, #tpu.memory_space<vmem>>, vector<16x2x49xbf16>
    %1 = arith.extf %0 : vector<16x2x49xbf16> to vector<16x2x49xf32>
    %cst = arith.constant dense<0.000000e+00> : vector<16x2xf32>
    %2 = vector.multi_reduction <add>, %1, %cst [2] : vector<16x2x49xf32> to vector<16x2xf32>
    %cst_2 = arith.constant 4.900000e+01 : f32
    %3 = vector.broadcast %cst_2 : f32 to vector<16x2xf32>
    %4 = arith.divf %2, %3 : vector<16x2xf32>
    %c0_3 = arith.constant 0 : index
    %c0_4 = arith.constant 0 : index
    %5 = vector.load %arg3[%c0_3, %c0_4] : memref<16x16xf32, #tpu.memory_space<vmem>>, vector<16x16xf32>
    %cst_5 = arith.constant dense<0.000000e+00> : vector<16x2xf32>
    %6 = tpu.matmul %5, %4, %cst_5 {dimension_numbers = #tpu.dot_dimension_numbers<[1], [0], [0], [1], [0, 0, 1, 1], [], []>} : vector<16x16xf32>, vector<16x2xf32>, vector<16x2xf32> -> vector<16x2xf32>
    %c0_6 = arith.constant 0 : index
    %c0_7 = arith.constant 0 : index
    %7 = vector.load %arg4[%c0_6, %c0_7] : memref<16x1xf32, #tpu.memory_space<vmem>>, vector<16x1xf32>
    %8 = vector.broadcast %7 : vector<16x1xf32> to vector<16x2xf32>
    %9 = arith.addf %6, %8 : vector<16x2xf32>
    %cst_8 = arith.constant 0.000000e+00 : f32
    %10 = vector.broadcast %cst_8 : f32 to vector<16x2xf32>
    %11 = arith.maximumf %9, %10 : vector<16x2xf32>
    %c0_9 = arith.constant 0 : index
    %c0_10 = arith.constant 0 : index
    %12 = vector.load %arg5[%c0_9, %c0_10] : memref<16x16xf32, #tpu.memory_space<vmem>>, vector<16x16xf32>
    %cst_11 = arith.constant dense<0.000000e+00> : vector<16x2xf32>
    %13 = tpu.matmul %12, %11, %cst_11 {dimension_numbers = #tpu.dot_dimension_numbers<[1], [0], [0], [1], [0, 0, 1, 1], [], []>} : vector<16x16xf32>, vector<16x2xf32>, vector<16x2xf32> -> vector<16x2xf32>
    %c0_12 = arith.constant 0 : index
    %c0_13 = arith.constant 0 : index
    %14 = vector.load %arg6[%c0_12, %c0_13] : memref<16x1xf32, #tpu.memory_space<vmem>>, vector<16x1xf32>
    %15 = vector.broadcast %14 : vector<16x1xf32> to vector<16x2xf32>
    %16 = arith.addf %13, %15 : vector<16x2xf32>
    %17 = arith.negf %16 : vector<16x2xf32>
    %18 = math.exp %17 : vector<16x2xf32>
    %cst_14 = arith.constant 1.000000e+00 : f32
    %19 = vector.broadcast %cst_14 : f32 to vector<16x2xf32>
    %20 = arith.addf %19, %18 : vector<16x2xf32>
    %21 = arith.divf %19, %20 : vector<16x2xf32>
    %22 = vector.shape_cast %21 : vector<16x2xf32> to vector<16x2x1xf32>
    %23 = vector.broadcast %22 : vector<16x2x1xf32> to vector<16x2x49xf32>
    %24 = arith.mulf %1, %23 : vector<16x2x49xf32>
    %c0_15 = arith.constant 0 : index
    %c0_16 = arith.constant 0 : index
    %c0_17 = arith.constant 0 : index
    %25 = vector.load %arg2[%c0_15, %c0_16, %c0_17] : memref<16x2x49xbf16, #tpu.memory_space<vmem>>, vector<16x2x49xbf16>
    %26 = arith.extf %25 : vector<16x2x49xbf16> to vector<16x2x49xf32>
    %27 = arith.addf %24, %26 : vector<16x2x49xf32>
    %cst_18 = arith.constant 0.000000e+00 : f32
    %28 = vector.broadcast %cst_18 : f32 to vector<16x2x49xf32>
    %29 = arith.maximumf %27, %28 : vector<16x2x49xf32>
    %30 = arith.truncf %29 : vector<16x2x49xf32> to vector<16x2x49xbf16>
    %c0_19 = arith.constant 0 : index
    %c0_20 = arith.constant 0 : index
    %c0_21 = arith.constant 0 : index
    %31 = vector.load %arg7[%c0_19, %c0_20, %c0_21] : memref<16x2x49xbf16, #tpu.memory_space<vmem>>, vector<16x2x49xbf16>
    tpu.vector_store %arg7[%c0_19, %c0_20, %c0_21], %30 {strides = array<i32>} : memref<16x2x49xbf16, #tpu.memory_space<vmem>>, vector<16x2x49xbf16>,
    return
  }
  func.func @transform_0(%arg0: i32) -> (i32, i32, i32) {
    %c0_i32 = arith.constant 0 : i32
    %c0_i32_0 = arith.constant 0 : i32
    %c0_i32_1 = arith.constant 0 : i32
    %c0_i32_2 = arith.constant 0 : i32
    return %c0_i32, %c0_i32_0, %c0_i32_1 : i32, i32, i32
  }
  func.func @transform_1(%arg0: i32) -> (i32, i32, i32) {
    %c0_i32 = arith.constant 0 : i32
    %c0_i32_0 = arith.constant 0 : i32
    %c0_i32_1 = arith.constant 0 : i32
    %c0_i32_2 = arith.constant 0 : i32
    return %c0_i32, %c0_i32_0, %c0_i32_1 : i32, i32, i32
  }
  func.func @transform_2(%arg0: i32) -> (i32, i32) {
    %c0_i32 = arith.constant 0 : i32
    %c0_i32_0 = arith.constant 0 : i32
    %c0_i32_1 = arith.constant 0 : i32
    return %c0_i32, %c0_i32_0 : i32, i32
  }
  func.func @transform_3(%arg0: i32) -> (i32, i32) {
    %c0_i32 = arith.constant 0 : i32
    %c0_i32_0 = arith.constant 0 : i32
    %c0_i32_1 = arith.constant 0 : i32
    return %c0_i32, %c0_i32_0 : i32, i32
  }
  func.func @transform_4(%arg0: i32) -> (i32, i32) {
    %c0_i32 = arith.constant 0 : i32
    %c0_i32_0 = arith.constant 0 : i32
    %c0_i32_1 = arith.constant 0 : i32
    return %c0_i32, %c0_i32_0 : i32, i32
  }
  func.func @transform_5(%arg0: i32) -> (i32, i32) {
    %c0_i32 = arith.constant 0 : i32
    %c0_i32_0 = arith.constant 0 : i32
    %c0_i32_1 = arith.constant 0 : i32
    return %c0_i32, %c0_i32_0 : i32, i32
  }
  func.func @transform_6(%arg0: i32) -> (i32, i32, i32) {
    %c0_i32 = arith.constant 0 : i32
    %c0_i32_0 = arith.constant 0 : i32
    %c0_i32_1 = arith.constant 0 : i32
    %c0_i32_2 = arith.constant 0 : i32
    return %c0_i32, %c0_i32_0, %c0_i32_1 : i32, i32, i32
  }
}

module attributes {stable_mosaic.version = 11 : i64} {
  func.func @_conv_bn_kernel(%arg0: i32, %arg1: memref<9x16x98xbf16, #tpu.memory_space<vmem>>, %arg2: memref<9x16x16xbf16, #tpu.memory_space<vmem>>, %arg3: memref<16x1xf32, #tpu.memory_space<vmem>>, %arg4: memref<16x1xf32, #tpu.memory_space<vmem>>, %arg5: memref<16x98xbf16, #tpu.memory_space<vmem>>) attributes {dimension_semantics = [#tpu.dimension_semantics<parallel>], iteration_bounds = array<i64: 1>, scalar_prefetch = 0 : i64, scratch_operands = 0 : i64, tpu.core_type = #tpu.core_type<tc>, window_params = [{transform_indices = @transform_0, window_bounds = array<i64: 9, 16, 98>}, {pipeline_mode = #tpu.pipeline_mode<synchronous>, transform_indices = @transform_1, window_bounds = array<i64: 9, 16, 16>}, {pipeline_mode = #tpu.pipeline_mode<synchronous>, transform_indices = @transform_2, window_bounds = array<i64: 16, 1>}, {pipeline_mode = #tpu.pipeline_mode<synchronous>, transform_indices = @transform_3, window_bounds = array<i64: 16, 1>}, {transform_indices = @transform_4, window_bounds = array<i64: 16, 98>}]} {
    %c0 = arith.constant 0 : index
    %c0_0 = arith.constant 0 : index
    %c0_1 = arith.constant 0 : index
    %0 = vector.load %arg2[%c0, %c0_0, %c0_1] : memref<9x16x16xbf16, #tpu.memory_space<vmem>>, vector<1x16x16xbf16>
    %1 = vector.shape_cast %0 : vector<1x16x16xbf16> to vector<16x16xbf16>
    %c0_2 = arith.constant 0 : index
    %c0_3 = arith.constant 0 : index
    %c0_4 = arith.constant 0 : index
    %2 = vector.load %arg1[%c0_2, %c0_3, %c0_4] : memref<9x16x98xbf16, #tpu.memory_space<vmem>>, vector<1x16x98xbf16>
    %3 = vector.shape_cast %2 : vector<1x16x98xbf16> to vector<16x98xbf16>
    %cst = arith.constant dense<0.000000e+00> : vector<16x98xf32>
    %4 = tpu.matmul %1, %3, %cst {dimension_numbers = #tpu.dot_dimension_numbers<[1], [0], [0], [1], [0, 0, 1, 1], [], []>} : vector<16x16xbf16>, vector<16x98xbf16>, vector<16x98xf32> -> vector<16x98xf32>
    %c1 = arith.constant 1 : index
    %c0_5 = arith.constant 0 : index
    %c0_6 = arith.constant 0 : index
    %5 = vector.load %arg2[%c1, %c0_5, %c0_6] : memref<9x16x16xbf16, #tpu.memory_space<vmem>>, vector<1x16x16xbf16>
    %6 = vector.shape_cast %5 : vector<1x16x16xbf16> to vector<16x16xbf16>
    %c1_7 = arith.constant 1 : index
    %c0_8 = arith.constant 0 : index
    %c0_9 = arith.constant 0 : index
    %7 = vector.load %arg1[%c1_7, %c0_8, %c0_9] : memref<9x16x98xbf16, #tpu.memory_space<vmem>>, vector<1x16x98xbf16>
    %8 = vector.shape_cast %7 : vector<1x16x98xbf16> to vector<16x98xbf16>
    %cst_10 = arith.constant dense<0.000000e+00> : vector<16x98xf32>
    %9 = tpu.matmul %6, %8, %cst_10 {dimension_numbers = #tpu.dot_dimension_numbers<[1], [0], [0], [1], [0, 0, 1, 1], [], []>} : vector<16x16xbf16>, vector<16x98xbf16>, vector<16x98xf32> -> vector<16x98xf32>
    %10 = arith.addf %4, %9 : vector<16x98xf32>
    %c2 = arith.constant 2 : index
    %c0_11 = arith.constant 0 : index
    %c0_12 = arith.constant 0 : index
    %11 = vector.load %arg2[%c2, %c0_11, %c0_12] : memref<9x16x16xbf16, #tpu.memory_space<vmem>>, vector<1x16x16xbf16>
    %12 = vector.shape_cast %11 : vector<1x16x16xbf16> to vector<16x16xbf16>
    %c2_13 = arith.constant 2 : index
    %c0_14 = arith.constant 0 : index
    %c0_15 = arith.constant 0 : index
    %13 = vector.load %arg1[%c2_13, %c0_14, %c0_15] : memref<9x16x98xbf16, #tpu.memory_space<vmem>>, vector<1x16x98xbf16>
    %14 = vector.shape_cast %13 : vector<1x16x98xbf16> to vector<16x98xbf16>
    %cst_16 = arith.constant dense<0.000000e+00> : vector<16x98xf32>
    %15 = tpu.matmul %12, %14, %cst_16 {dimension_numbers = #tpu.dot_dimension_numbers<[1], [0], [0], [1], [0, 0, 1, 1], [], []>} : vector<16x16xbf16>, vector<16x98xbf16>, vector<16x98xf32> -> vector<16x98xf32>
    %16 = arith.addf %10, %15 : vector<16x98xf32>
    %c3 = arith.constant 3 : index
    %c0_17 = arith.constant 0 : index
    %c0_18 = arith.constant 0 : index
    %17 = vector.load %arg2[%c3, %c0_17, %c0_18] : memref<9x16x16xbf16, #tpu.memory_space<vmem>>, vector<1x16x16xbf16>
    %18 = vector.shape_cast %17 : vector<1x16x16xbf16> to vector<16x16xbf16>
    %c3_19 = arith.constant 3 : index
    %c0_20 = arith.constant 0 : index
    %c0_21 = arith.constant 0 : index
    %19 = vector.load %arg1[%c3_19, %c0_20, %c0_21] : memref<9x16x98xbf16, #tpu.memory_space<vmem>>, vector<1x16x98xbf16>
    %20 = vector.shape_cast %19 : vector<1x16x98xbf16> to vector<16x98xbf16>
    %cst_22 = arith.constant dense<0.000000e+00> : vector<16x98xf32>
    %21 = tpu.matmul %18, %20, %cst_22 {dimension_numbers = #tpu.dot_dimension_numbers<[1], [0], [0], [1], [0, 0, 1, 1], [], []>} : vector<16x16xbf16>, vector<16x98xbf16>, vector<16x98xf32> -> vector<16x98xf32>
    %22 = arith.addf %16, %21 : vector<16x98xf32>
    %c4 = arith.constant 4 : index
    %c0_23 = arith.constant 0 : index
    %c0_24 = arith.constant 0 : index
    %23 = vector.load %arg2[%c4, %c0_23, %c0_24] : memref<9x16x16xbf16, #tpu.memory_space<vmem>>, vector<1x16x16xbf16>
    %24 = vector.shape_cast %23 : vector<1x16x16xbf16> to vector<16x16xbf16>
    %c4_25 = arith.constant 4 : index
    %c0_26 = arith.constant 0 : index
    %c0_27 = arith.constant 0 : index
    %25 = vector.load %arg1[%c4_25, %c0_26, %c0_27] : memref<9x16x98xbf16, #tpu.memory_space<vmem>>, vector<1x16x98xbf16>
    %26 = vector.shape_cast %25 : vector<1x16x98xbf16> to vector<16x98xbf16>
    %cst_28 = arith.constant dense<0.000000e+00> : vector<16x98xf32>
    %27 = tpu.matmul %24, %26, %cst_28 {dimension_numbers = #tpu.dot_dimension_numbers<[1], [0], [0], [1], [0, 0, 1, 1], [], []>} : vector<16x16xbf16>, vector<16x98xbf16>, vector<16x98xf32> -> vector<16x98xf32>
    %28 = arith.addf %22, %27 : vector<16x98xf32>
    %c5 = arith.constant 5 : index
    %c0_29 = arith.constant 0 : index
    %c0_30 = arith.constant 0 : index
    %29 = vector.load %arg2[%c5, %c0_29, %c0_30] : memref<9x16x16xbf16, #tpu.memory_space<vmem>>, vector<1x16x16xbf16>
    %30 = vector.shape_cast %29 : vector<1x16x16xbf16> to vector<16x16xbf16>
    %c5_31 = arith.constant 5 : index
    %c0_32 = arith.constant 0 : index
    %c0_33 = arith.constant 0 : index
    %31 = vector.load %arg1[%c5_31, %c0_32, %c0_33] : memref<9x16x98xbf16, #tpu.memory_space<vmem>>, vector<1x16x98xbf16>
    %32 = vector.shape_cast %31 : vector<1x16x98xbf16> to vector<16x98xbf16>
    %cst_34 = arith.constant dense<0.000000e+00> : vector<16x98xf32>
    %33 = tpu.matmul %30, %32, %cst_34 {dimension_numbers = #tpu.dot_dimension_numbers<[1], [0], [0], [1], [0, 0, 1, 1], [], []>} : vector<16x16xbf16>, vector<16x98xbf16>, vector<16x98xf32> -> vector<16x98xf32>
    %34 = arith.addf %28, %33 : vector<16x98xf32>
    %c6 = arith.constant 6 : index
    %c0_35 = arith.constant 0 : index
    %c0_36 = arith.constant 0 : index
    %35 = vector.load %arg2[%c6, %c0_35, %c0_36] : memref<9x16x16xbf16, #tpu.memory_space<vmem>>, vector<1x16x16xbf16>
    %36 = vector.shape_cast %35 : vector<1x16x16xbf16> to vector<16x16xbf16>
    %c6_37 = arith.constant 6 : index
    %c0_38 = arith.constant 0 : index
    %c0_39 = arith.constant 0 : index
    %37 = vector.load %arg1[%c6_37, %c0_38, %c0_39] : memref<9x16x98xbf16, #tpu.memory_space<vmem>>, vector<1x16x98xbf16>
    %38 = vector.shape_cast %37 : vector<1x16x98xbf16> to vector<16x98xbf16>
    %cst_40 = arith.constant dense<0.000000e+00> : vector<16x98xf32>
    %39 = tpu.matmul %36, %38, %cst_40 {dimension_numbers = #tpu.dot_dimension_numbers<[1], [0], [0], [1], [0, 0, 1, 1], [], []>} : vector<16x16xbf16>, vector<16x98xbf16>, vector<16x98xf32> -> vector<16x98xf32>
    %40 = arith.addf %34, %39 : vector<16x98xf32>
    %c7 = arith.constant 7 : index
    %c0_41 = arith.constant 0 : index
    %c0_42 = arith.constant 0 : index
    %41 = vector.load %arg2[%c7, %c0_41, %c0_42] : memref<9x16x16xbf16, #tpu.memory_space<vmem>>, vector<1x16x16xbf16>
    %42 = vector.shape_cast %41 : vector<1x16x16xbf16> to vector<16x16xbf16>
    %c7_43 = arith.constant 7 : index
    %c0_44 = arith.constant 0 : index
    %c0_45 = arith.constant 0 : index
    %43 = vector.load %arg1[%c7_43, %c0_44, %c0_45] : memref<9x16x98xbf16, #tpu.memory_space<vmem>>, vector<1x16x98xbf16>
    %44 = vector.shape_cast %43 : vector<1x16x98xbf16> to vector<16x98xbf16>
    %cst_46 = arith.constant dense<0.000000e+00> : vector<16x98xf32>
    %45 = tpu.matmul %42, %44, %cst_46 {dimension_numbers = #tpu.dot_dimension_numbers<[1], [0], [0], [1], [0, 0, 1, 1], [], []>} : vector<16x16xbf16>, vector<16x98xbf16>, vector<16x98xf32> -> vector<16x98xf32>
    %46 = arith.addf %40, %45 : vector<16x98xf32>
    %c8 = arith.constant 8 : index
    %c0_47 = arith.constant 0 : index
    %c0_48 = arith.constant 0 : index
    %47 = vector.load %arg2[%c8, %c0_47, %c0_48] : memref<9x16x16xbf16, #tpu.memory_space<vmem>>, vector<1x16x16xbf16>
    %48 = vector.shape_cast %47 : vector<1x16x16xbf16> to vector<16x16xbf16>
    %c8_49 = arith.constant 8 : index
    %c0_50 = arith.constant 0 : index
    %c0_51 = arith.constant 0 : index
    %49 = vector.load %arg1[%c8_49, %c0_50, %c0_51] : memref<9x16x98xbf16, #tpu.memory_space<vmem>>, vector<1x16x98xbf16>
    %50 = vector.shape_cast %49 : vector<1x16x98xbf16> to vector<16x98xbf16>
    %cst_52 = arith.constant dense<0.000000e+00> : vector<16x98xf32>
    %51 = tpu.matmul %48, %50, %cst_52 {dimension_numbers = #tpu.dot_dimension_numbers<[1], [0], [0], [1], [0, 0, 1, 1], [], []>} : vector<16x16xbf16>, vector<16x98xbf16>, vector<16x98xf32> -> vector<16x98xf32>
    %52 = arith.addf %46, %51 : vector<16x98xf32>
    %c0_53 = arith.constant 0 : index
    %c0_54 = arith.constant 0 : index
    %53 = vector.load %arg3[%c0_53, %c0_54] : memref<16x1xf32, #tpu.memory_space<vmem>>, vector<16x1xf32>
    %54 = vector.broadcast %53 : vector<16x1xf32> to vector<16x98xf32>
    %55 = arith.mulf %52, %54 : vector<16x98xf32>
    %c0_55 = arith.constant 0 : index
    %c0_56 = arith.constant 0 : index
    %56 = vector.load %arg4[%c0_55, %c0_56] : memref<16x1xf32, #tpu.memory_space<vmem>>, vector<16x1xf32>
    %57 = vector.broadcast %56 : vector<16x1xf32> to vector<16x98xf32>
    %58 = arith.addf %55, %57 : vector<16x98xf32>
    %cst_57 = arith.constant 0.000000e+00 : f32
    %59 = vector.broadcast %cst_57 : f32 to vector<16x98xf32>
    %60 = arith.maximumf %58, %59 : vector<16x98xf32>
    %61 = arith.truncf %60 : vector<16x98xf32> to vector<16x98xbf16>
    %c0_58 = arith.constant 0 : index
    %c0_59 = arith.constant 0 : index
    %62 = vector.load %arg5[%c0_58, %c0_59] : memref<16x98xbf16, #tpu.memory_space<vmem>>, vector<16x98xbf16>
    tpu.vector_store %arg5[%c0_58, %c0_59], %61 {strides = array<i32>} : memref<16x98xbf16, #tpu.memory_space<vmem>>, vector<16x98xbf16>,
    return
  }
  func.func @transform_0(%arg0: i32) -> (i32, i32, i32) {
    %c0_i32 = arith.constant 0 : i32
    %c0_i32_0 = arith.constant 0 : i32
    %c0_i32_1 = arith.constant 0 : i32
    return %c0_i32, %c0_i32_0, %arg0 : i32, i32, i32
  }
  func.func @transform_1(%arg0: i32) -> (i32, i32, i32) {
    %c0_i32 = arith.constant 0 : i32
    %c0_i32_0 = arith.constant 0 : i32
    %c0_i32_1 = arith.constant 0 : i32
    %c0_i32_2 = arith.constant 0 : i32
    return %c0_i32, %c0_i32_0, %c0_i32_1 : i32, i32, i32
  }
  func.func @transform_2(%arg0: i32) -> (i32, i32) {
    %c0_i32 = arith.constant 0 : i32
    %c0_i32_0 = arith.constant 0 : i32
    %c0_i32_1 = arith.constant 0 : i32
    return %c0_i32, %c0_i32_0 : i32, i32
  }
  func.func @transform_3(%arg0: i32) -> (i32, i32) {
    %c0_i32 = arith.constant 0 : i32
    %c0_i32_0 = arith.constant 0 : i32
    %c0_i32_1 = arith.constant 0 : i32
    return %c0_i32, %c0_i32_0 : i32, i32
  }
  func.func @transform_4(%arg0: i32) -> (i32, i32) {
    %c0_i32 = arith.constant 0 : i32
    %c0_i32_0 = arith.constant 0 : i32
    return %c0_i32, %arg0 : i32, i32
  }
}

module attributes {stable_mosaic.version = 11 : i64} {
  func.func @_conv_bn_kernel(%arg0: i32, %arg1: memref<9x16x98xbf16, #tpu.memory_space<vmem>>, %arg2: memref<9x16x16xbf16, #tpu.memory_space<vmem>>, %arg3: memref<16x1xf32, #tpu.memory_space<vmem>>, %arg4: memref<16x1xf32, #tpu.memory_space<vmem>>, %arg5: memref<16x98xbf16, #tpu.memory_space<vmem>>, %arg6: memref<16x98xbf16, #tpu.memory_space<vmem>>) attributes {dimension_semantics = [#tpu.dimension_semantics<parallel>], iteration_bounds = array<i64: 1>, scalar_prefetch = 0 : i64, scratch_operands = 0 : i64, tpu.core_type = #tpu.core_type<tc>, window_params = [{transform_indices = @transform_0, window_bounds = array<i64: 9, 16, 98>}, {pipeline_mode = #tpu.pipeline_mode<synchronous>, transform_indices = @transform_1, window_bounds = array<i64: 9, 16, 16>}, {pipeline_mode = #tpu.pipeline_mode<synchronous>, transform_indices = @transform_2, window_bounds = array<i64: 16, 1>}, {pipeline_mode = #tpu.pipeline_mode<synchronous>, transform_indices = @transform_3, window_bounds = array<i64: 16, 1>}, {transform_indices = @transform_4, window_bounds = array<i64: 16, 98>}, {transform_indices = @transform_5, window_bounds = array<i64: 16, 98>}]} {
    %c0 = arith.constant 0 : index
    %c0_0 = arith.constant 0 : index
    %c0_1 = arith.constant 0 : index
    %0 = vector.load %arg2[%c0, %c0_0, %c0_1] : memref<9x16x16xbf16, #tpu.memory_space<vmem>>, vector<1x16x16xbf16>
    %1 = vector.shape_cast %0 : vector<1x16x16xbf16> to vector<16x16xbf16>
    %c0_2 = arith.constant 0 : index
    %c0_3 = arith.constant 0 : index
    %c0_4 = arith.constant 0 : index
    %2 = vector.load %arg1[%c0_2, %c0_3, %c0_4] : memref<9x16x98xbf16, #tpu.memory_space<vmem>>, vector<1x16x98xbf16>
    %3 = vector.shape_cast %2 : vector<1x16x98xbf16> to vector<16x98xbf16>
    %cst = arith.constant dense<0.000000e+00> : vector<16x98xf32>
    %4 = tpu.matmul %1, %3, %cst {dimension_numbers = #tpu.dot_dimension_numbers<[1], [0], [0], [1], [0, 0, 1, 1], [], []>} : vector<16x16xbf16>, vector<16x98xbf16>, vector<16x98xf32> -> vector<16x98xf32>
    %c1 = arith.constant 1 : index
    %c0_5 = arith.constant 0 : index
    %c0_6 = arith.constant 0 : index
    %5 = vector.load %arg2[%c1, %c0_5, %c0_6] : memref<9x16x16xbf16, #tpu.memory_space<vmem>>, vector<1x16x16xbf16>
    %6 = vector.shape_cast %5 : vector<1x16x16xbf16> to vector<16x16xbf16>
    %c1_7 = arith.constant 1 : index
    %c0_8 = arith.constant 0 : index
    %c0_9 = arith.constant 0 : index
    %7 = vector.load %arg1[%c1_7, %c0_8, %c0_9] : memref<9x16x98xbf16, #tpu.memory_space<vmem>>, vector<1x16x98xbf16>
    %8 = vector.shape_cast %7 : vector<1x16x98xbf16> to vector<16x98xbf16>
    %cst_10 = arith.constant dense<0.000000e+00> : vector<16x98xf32>
    %9 = tpu.matmul %6, %8, %cst_10 {dimension_numbers = #tpu.dot_dimension_numbers<[1], [0], [0], [1], [0, 0, 1, 1], [], []>} : vector<16x16xbf16>, vector<16x98xbf16>, vector<16x98xf32> -> vector<16x98xf32>
    %10 = arith.addf %4, %9 : vector<16x98xf32>
    %c2 = arith.constant 2 : index
    %c0_11 = arith.constant 0 : index
    %c0_12 = arith.constant 0 : index
    %11 = vector.load %arg2[%c2, %c0_11, %c0_12] : memref<9x16x16xbf16, #tpu.memory_space<vmem>>, vector<1x16x16xbf16>
    %12 = vector.shape_cast %11 : vector<1x16x16xbf16> to vector<16x16xbf16>
    %c2_13 = arith.constant 2 : index
    %c0_14 = arith.constant 0 : index
    %c0_15 = arith.constant 0 : index
    %13 = vector.load %arg1[%c2_13, %c0_14, %c0_15] : memref<9x16x98xbf16, #tpu.memory_space<vmem>>, vector<1x16x98xbf16>
    %14 = vector.shape_cast %13 : vector<1x16x98xbf16> to vector<16x98xbf16>
    %cst_16 = arith.constant dense<0.000000e+00> : vector<16x98xf32>
    %15 = tpu.matmul %12, %14, %cst_16 {dimension_numbers = #tpu.dot_dimension_numbers<[1], [0], [0], [1], [0, 0, 1, 1], [], []>} : vector<16x16xbf16>, vector<16x98xbf16>, vector<16x98xf32> -> vector<16x98xf32>
    %16 = arith.addf %10, %15 : vector<16x98xf32>
    %c3 = arith.constant 3 : index
    %c0_17 = arith.constant 0 : index
    %c0_18 = arith.constant 0 : index
    %17 = vector.load %arg2[%c3, %c0_17, %c0_18] : memref<9x16x16xbf16, #tpu.memory_space<vmem>>, vector<1x16x16xbf16>
    %18 = vector.shape_cast %17 : vector<1x16x16xbf16> to vector<16x16xbf16>
    %c3_19 = arith.constant 3 : index
    %c0_20 = arith.constant 0 : index
    %c0_21 = arith.constant 0 : index
    %19 = vector.load %arg1[%c3_19, %c0_20, %c0_21] : memref<9x16x98xbf16, #tpu.memory_space<vmem>>, vector<1x16x98xbf16>
    %20 = vector.shape_cast %19 : vector<1x16x98xbf16> to vector<16x98xbf16>
    %cst_22 = arith.constant dense<0.000000e+00> : vector<16x98xf32>
    %21 = tpu.matmul %18, %20, %cst_22 {dimension_numbers = #tpu.dot_dimension_numbers<[1], [0], [0], [1], [0, 0, 1, 1], [], []>} : vector<16x16xbf16>, vector<16x98xbf16>, vector<16x98xf32> -> vector<16x98xf32>
    %22 = arith.addf %16, %21 : vector<16x98xf32>
    %c4 = arith.constant 4 : index
    %c0_23 = arith.constant 0 : index
    %c0_24 = arith.constant 0 : index
    %23 = vector.load %arg2[%c4, %c0_23, %c0_24] : memref<9x16x16xbf16, #tpu.memory_space<vmem>>, vector<1x16x16xbf16>
    %24 = vector.shape_cast %23 : vector<1x16x16xbf16> to vector<16x16xbf16>
    %c4_25 = arith.constant 4 : index
    %c0_26 = arith.constant 0 : index
    %c0_27 = arith.constant 0 : index
    %25 = vector.load %arg1[%c4_25, %c0_26, %c0_27] : memref<9x16x98xbf16, #tpu.memory_space<vmem>>, vector<1x16x98xbf16>
    %26 = vector.shape_cast %25 : vector<1x16x98xbf16> to vector<16x98xbf16>
    %cst_28 = arith.constant dense<0.000000e+00> : vector<16x98xf32>
    %27 = tpu.matmul %24, %26, %cst_28 {dimension_numbers = #tpu.dot_dimension_numbers<[1], [0], [0], [1], [0, 0, 1, 1], [], []>} : vector<16x16xbf16>, vector<16x98xbf16>, vector<16x98xf32> -> vector<16x98xf32>
    %28 = arith.addf %22, %27 : vector<16x98xf32>
    %c5 = arith.constant 5 : index
    %c0_29 = arith.constant 0 : index
    %c0_30 = arith.constant 0 : index
    %29 = vector.load %arg2[%c5, %c0_29, %c0_30] : memref<9x16x16xbf16, #tpu.memory_space<vmem>>, vector<1x16x16xbf16>
    %30 = vector.shape_cast %29 : vector<1x16x16xbf16> to vector<16x16xbf16>
    %c5_31 = arith.constant 5 : index
    %c0_32 = arith.constant 0 : index
    %c0_33 = arith.constant 0 : index
    %31 = vector.load %arg1[%c5_31, %c0_32, %c0_33] : memref<9x16x98xbf16, #tpu.memory_space<vmem>>, vector<1x16x98xbf16>
    %32 = vector.shape_cast %31 : vector<1x16x98xbf16> to vector<16x98xbf16>
    %cst_34 = arith.constant dense<0.000000e+00> : vector<16x98xf32>
    %33 = tpu.matmul %30, %32, %cst_34 {dimension_numbers = #tpu.dot_dimension_numbers<[1], [0], [0], [1], [0, 0, 1, 1], [], []>} : vector<16x16xbf16>, vector<16x98xbf16>, vector<16x98xf32> -> vector<16x98xf32>
    %34 = arith.addf %28, %33 : vector<16x98xf32>
    %c6 = arith.constant 6 : index
    %c0_35 = arith.constant 0 : index
    %c0_36 = arith.constant 0 : index
    %35 = vector.load %arg2[%c6, %c0_35, %c0_36] : memref<9x16x16xbf16, #tpu.memory_space<vmem>>, vector<1x16x16xbf16>
    %36 = vector.shape_cast %35 : vector<1x16x16xbf16> to vector<16x16xbf16>
    %c6_37 = arith.constant 6 : index
    %c0_38 = arith.constant 0 : index
    %c0_39 = arith.constant 0 : index
    %37 = vector.load %arg1[%c6_37, %c0_38, %c0_39] : memref<9x16x98xbf16, #tpu.memory_space<vmem>>, vector<1x16x98xbf16>
    %38 = vector.shape_cast %37 : vector<1x16x98xbf16> to vector<16x98xbf16>
    %cst_40 = arith.constant dense<0.000000e+00> : vector<16x98xf32>
    %39 = tpu.matmul %36, %38, %cst_40 {dimension_numbers = #tpu.dot_dimension_numbers<[1], [0], [0], [1], [0, 0, 1, 1], [], []>} : vector<16x16xbf16>, vector<16x98xbf16>, vector<16x98xf32> -> vector<16x98xf32>
    %40 = arith.addf %34, %39 : vector<16x98xf32>
    %c7 = arith.constant 7 : index
    %c0_41 = arith.constant 0 : index
    %c0_42 = arith.constant 0 : index
    %41 = vector.load %arg2[%c7, %c0_41, %c0_42] : memref<9x16x16xbf16, #tpu.memory_space<vmem>>, vector<1x16x16xbf16>
    %42 = vector.shape_cast %41 : vector<1x16x16xbf16> to vector<16x16xbf16>
    %c7_43 = arith.constant 7 : index
    %c0_44 = arith.constant 0 : index
    %c0_45 = arith.constant 0 : index
    %43 = vector.load %arg1[%c7_43, %c0_44, %c0_45] : memref<9x16x98xbf16, #tpu.memory_space<vmem>>, vector<1x16x98xbf16>
    %44 = vector.shape_cast %43 : vector<1x16x98xbf16> to vector<16x98xbf16>
    %cst_46 = arith.constant dense<0.000000e+00> : vector<16x98xf32>
    %45 = tpu.matmul %42, %44, %cst_46 {dimension_numbers = #tpu.dot_dimension_numbers<[1], [0], [0], [1], [0, 0, 1, 1], [], []>} : vector<16x16xbf16>, vector<16x98xbf16>, vector<16x98xf32> -> vector<16x98xf32>
    %46 = arith.addf %40, %45 : vector<16x98xf32>
    %c8 = arith.constant 8 : index
    %c0_47 = arith.constant 0 : index
    %c0_48 = arith.constant 0 : index
    %47 = vector.load %arg2[%c8, %c0_47, %c0_48] : memref<9x16x16xbf16, #tpu.memory_space<vmem>>, vector<1x16x16xbf16>
    %48 = vector.shape_cast %47 : vector<1x16x16xbf16> to vector<16x16xbf16>
    %c8_49 = arith.constant 8 : index
    %c0_50 = arith.constant 0 : index
    %c0_51 = arith.constant 0 : index
    %49 = vector.load %arg1[%c8_49, %c0_50, %c0_51] : memref<9x16x98xbf16, #tpu.memory_space<vmem>>, vector<1x16x98xbf16>
    %50 = vector.shape_cast %49 : vector<1x16x98xbf16> to vector<16x98xbf16>
    %cst_52 = arith.constant dense<0.000000e+00> : vector<16x98xf32>
    %51 = tpu.matmul %48, %50, %cst_52 {dimension_numbers = #tpu.dot_dimension_numbers<[1], [0], [0], [1], [0, 0, 1, 1], [], []>} : vector<16x16xbf16>, vector<16x98xbf16>, vector<16x98xf32> -> vector<16x98xf32>
    %52 = arith.addf %46, %51 : vector<16x98xf32>
    %c0_53 = arith.constant 0 : index
    %c0_54 = arith.constant 0 : index
    %53 = vector.load %arg3[%c0_53, %c0_54] : memref<16x1xf32, #tpu.memory_space<vmem>>, vector<16x1xf32>
    %54 = vector.broadcast %53 : vector<16x1xf32> to vector<16x98xf32>
    %55 = arith.mulf %52, %54 : vector<16x98xf32>
    %c0_55 = arith.constant 0 : index
    %c0_56 = arith.constant 0 : index
    %56 = vector.load %arg4[%c0_55, %c0_56] : memref<16x1xf32, #tpu.memory_space<vmem>>, vector<16x1xf32>
    %57 = vector.broadcast %56 : vector<16x1xf32> to vector<16x98xf32>
    %58 = arith.addf %55, %57 : vector<16x98xf32>
    %c0_57 = arith.constant 0 : index
    %c0_58 = arith.constant 0 : index
    %59 = vector.load %arg5[%c0_57, %c0_58] : memref<16x98xbf16, #tpu.memory_space<vmem>>, vector<16x98xbf16>
    %60 = arith.extf %59 : vector<16x98xbf16> to vector<16x98xf32>
    %61 = arith.addf %58, %60 : vector<16x98xf32>
    %cst_59 = arith.constant 0.000000e+00 : f32
    %62 = vector.broadcast %cst_59 : f32 to vector<16x98xf32>
    %63 = arith.maximumf %61, %62 : vector<16x98xf32>
    %64 = arith.truncf %63 : vector<16x98xf32> to vector<16x98xbf16>
    %c0_60 = arith.constant 0 : index
    %c0_61 = arith.constant 0 : index
    %65 = vector.load %arg6[%c0_60, %c0_61] : memref<16x98xbf16, #tpu.memory_space<vmem>>, vector<16x98xbf16>
    tpu.vector_store %arg6[%c0_60, %c0_61], %64 {strides = array<i32>} : memref<16x98xbf16, #tpu.memory_space<vmem>>, vector<16x98xbf16>,
    return
  }
  func.func @transform_0(%arg0: i32) -> (i32, i32, i32) {
    %c0_i32 = arith.constant 0 : i32
    %c0_i32_0 = arith.constant 0 : i32
    %c0_i32_1 = arith.constant 0 : i32
    return %c0_i32, %c0_i32_0, %arg0 : i32, i32, i32
  }
  func.func @transform_1(%arg0: i32) -> (i32, i32, i32) {
    %c0_i32 = arith.constant 0 : i32
    %c0_i32_0 = arith.constant 0 : i32
    %c0_i32_1 = arith.constant 0 : i32
    %c0_i32_2 = arith.constant 0 : i32
    return %c0_i32, %c0_i32_0, %c0_i32_1 : i32, i32, i32
  }
  func.func @transform_2(%arg0: i32) -> (i32, i32) {
    %c0_i32 = arith.constant 0 : i32
    %c0_i32_0 = arith.constant 0 : i32
    %c0_i32_1 = arith.constant 0 : i32
    return %c0_i32, %c0_i32_0 : i32, i32
  }
  func.func @transform_3(%arg0: i32) -> (i32, i32) {
    %c0_i32 = arith.constant 0 : i32
    %c0_i32_0 = arith.constant 0 : i32
    %c0_i32_1 = arith.constant 0 : i32
    return %c0_i32, %c0_i32_0 : i32, i32
  }
  func.func @transform_4(%arg0: i32) -> (i32, i32) {
    %c0_i32 = arith.constant 0 : i32
    %c0_i32_0 = arith.constant 0 : i32
    return %c0_i32, %arg0 : i32, i32
  }
  func.func @transform_5(%arg0: i32) -> (i32, i32) {
    %c0_i32 = arith.constant 0 : i32
    %c0_i32_0 = arith.constant 0 : i32
    return %c0_i32, %arg0 : i32, i32
  }
}

module attributes {stable_mosaic.version = 11 : i64} {
  func.func @_head_kernel(%arg0: i32, %arg1: memref<16x2x49xbf16, #tpu.memory_space<vmem>>, %arg2: memref<10x16xf32, #tpu.memory_space<vmem>>, %arg3: memref<10x1xf32, #tpu.memory_space<vmem>>, %arg4: memref<10x2xf32, #tpu.memory_space<vmem>>) attributes {dimension_semantics = [#tpu.dimension_semantics<arbitrary>], iteration_bounds = array<i64: 1>, scalar_prefetch = 0 : i64, scratch_operands = 0 : i64, tpu.core_type = #tpu.core_type<tc>, window_params = [{pipeline_mode = #tpu.pipeline_mode<synchronous>, transform_indices = @transform_0, window_bounds = array<i64: 16, 2, 49>}, {pipeline_mode = #tpu.pipeline_mode<synchronous>, transform_indices = @transform_1, window_bounds = array<i64: 10, 16>}, {pipeline_mode = #tpu.pipeline_mode<synchronous>, transform_indices = @transform_2, window_bounds = array<i64: 10, 1>}, {pipeline_mode = #tpu.pipeline_mode<synchronous>, transform_indices = @transform_3, window_bounds = array<i64: 10, 2>}]} {
    %c0 = arith.constant 0 : index
    %c0_0 = arith.constant 0 : index
    %c0_1 = arith.constant 0 : index
    %0 = vector.load %arg1[%c0, %c0_0, %c0_1] : memref<16x2x49xbf16, #tpu.memory_space<vmem>>, vector<16x2x49xbf16>
    %1 = arith.extf %0 : vector<16x2x49xbf16> to vector<16x2x49xf32>
    %cst = arith.constant dense<0.000000e+00> : vector<16x2xf32>
    %2 = vector.multi_reduction <add>, %1, %cst [2] : vector<16x2x49xf32> to vector<16x2xf32>
    %cst_2 = arith.constant 4.900000e+01 : f32
    %3 = vector.broadcast %cst_2 : f32 to vector<16x2xf32>
    %4 = arith.divf %2, %3 : vector<16x2xf32>
    %c0_3 = arith.constant 0 : index
    %c0_4 = arith.constant 0 : index
    %5 = vector.load %arg2[%c0_3, %c0_4] : memref<10x16xf32, #tpu.memory_space<vmem>>, vector<10x16xf32>
    %cst_5 = arith.constant dense<0.000000e+00> : vector<10x2xf32>
    %6 = tpu.matmul %5, %4, %cst_5 {dimension_numbers = #tpu.dot_dimension_numbers<[1], [0], [0], [1], [0, 0, 1, 1], [], []>} : vector<10x16xf32>, vector<16x2xf32>, vector<10x2xf32> -> vector<10x2xf32>
    %c0_6 = arith.constant 0 : index
    %c0_7 = arith.constant 0 : index
    %7 = vector.load %arg3[%c0_6, %c0_7] : memref<10x1xf32, #tpu.memory_space<vmem>>, vector<10x1xf32>
    %8 = vector.broadcast %7 : vector<10x1xf32> to vector<10x2xf32>
    %9 = arith.addf %6, %8 : vector<10x2xf32>
    %c0_8 = arith.constant 0 : index
    %c0_9 = arith.constant 0 : index
    %10 = vector.load %arg4[%c0_8, %c0_9] : memref<10x2xf32, #tpu.memory_space<vmem>>, vector<10x2xf32>
    tpu.vector_store %arg4[%c0_8, %c0_9], %9 {strides = array<i32>} : memref<10x2xf32, #tpu.memory_space<vmem>>, vector<10x2xf32>,
    return
  }
  func.func @transform_0(%arg0: i32) -> (i32, i32, i32) {
    %c0_i32 = arith.constant 0 : i32
    %c0_i32_0 = arith.constant 0 : i32
    %c0_i32_1 = arith.constant 0 : i32
    %c0_i32_2 = arith.constant 0 : i32
    return %c0_i32, %c0_i32_0, %c0_i32_1 : i32, i32, i32
  }
  func.func @transform_1(%arg0: i32) -> (i32, i32) {
    %c0_i32 = arith.constant 0 : i32
    %c0_i32_0 = arith.constant 0 : i32
    %c0_i32_1 = arith.constant 0 : i32
    return %c0_i32, %c0_i32_0 : i32, i32
  }
  func.func @transform_2(%arg0: i32) -> (i32, i32) {
    %c0_i32 = arith.constant 0 : i32
    %c0_i32_0 = arith.constant 0 : i32
    %c0_i32_1 = arith.constant 0 : i32
    return %c0_i32, %c0_i32_0 : i32, i32
  }
  func.func @transform_3(%arg0: i32) -> (i32, i32) {
    %c0_i32 = arith.constant 0 : i32
    %c0_i32_0 = arith.constant 0 : i32
    %c0_i32_1 = arith.constant 0 : i32
    return %c0_i32, %c0_i32_0 : i32, i32
  }
}

</mosaic_0001>

<bundles_post_ra>
// kernel: _lambda_.15
= control target key start
LH: loop header
LB: loop body
LE: loop exit
PB: predicated region body
PF: predicated region fallthrough
CT: control target
= control target key end

     0   :  { %vm51_vm0 = vcmask 1043456   ;;  %vm52_vm1 = vcmask 64516   ;;  %s145_s0 = inlined_call_operand.vmem [shape: bf16[9,8,392], index: 0, kind: input, shape index: {}]   ;;  %s146_s1 = inlined_call_operand.vmem [shape: bf16[8,392], index: 1, kind: output, shape index: {}]  }
   0x1   :  { %v8_v0 = vld [vmem:[%s145_s0] sm:$0xff]  ;;  %v59_v1 = vld [vmem:[%s145_s0 + $0x10] sm:$0xff]  ;;  %v9_v6 = vld [vmem:[%s145_s0 + $0x8] sm:$0xff] }
   0x2   :  { %v61_v2 = vld [vmem:[%s145_s0 + $0x20] sm:$0xff]  ;;  %v13_v3 = vmax.bf16 %v59_v1, %v8_v0  ;;  %v63_v4 = vld [vmem:[%s145_s0 + $0x30] sm:$0xff]  ;;  %v60_v7 = vld [vmem:[%s145_s0 + $0x18] sm:$0xff] }
   0x3   :  { %v62_v8 = vld [vmem:[%s145_s0 + $0x28] sm:$0xff]  ;;  %v65_v9 = vld [vmem:[%s145_s0 + $0x40] sm:$0xff]  ;;  %v14_v10 = vmax.bf16 %v60_v7, %v9_v6  ;;  %v64_v12 = vld [vmem:[%s145_s0 + $0x38] sm:$0xff] }
   0x4   :  { %v18_v5 = vmax.bf16 %v61_v2, %v13_v3  ;;  %v67_v13 = vld [vmem:[%s145_s0 + $0x50] sm:$0xff]  ;;  %v66_v16 = vld [vmem:[%s145_s0 + $0x48] sm:$0xff]  ;;  %v69_v17 = vld [vmem:[%s145_s0 + $0x60] sm:$0xff] }
   0x5   :  { %v19_v14 = vmax.bf16 %v62_v8, %v14_v10  ;;  %v68_v20 = vld [vmem:[%s145_s0 + $0x58] sm:$0xff]  ;;  %v71_v21 = vld [vmem:[%s145_s0 + $0x70] sm:$0xff]  ;;  %v70_v24 = vld [vmem:[%s145_s0 + $0x68] sm:$0xff] }
   0x6   :  { %v23_v11 = vmax.bf16 %v63_v4, %v18_v5  ;;  %v73_v25 = vld [vmem:[%s145_s0 + $0x80] sm:$0xff]  ;;  %v72_v28 = vld [vmem:[%s145_s0 + $0x78] sm:$0xff]  ;;  %v74_v31 = vld [vmem:[%s145_s0 + $0x88] sm:$0xff] }
   0x7   :  { %v24_v18 = vmax.bf16 %v64_v12, %v19_v14  ;;  %vm53_vm2 = vmor %vm52_vm1, %vm51_vm0 }
   0x8   :  { %v28_v15 = vmax.bf16 %v65_v9, %v23_v11 }
   0x9   :  { %v29_v22 = vmax.bf16 %v66_v16, %v24_v18 }
   0xa   :  { %v33_v19 = vmax.bf16 %v67_v13, %v28_v15 }
   0xb   :  { %v34_v26 = vmax.bf16 %v68_v20, %v29_v22 }
   0xc   :  { %v38_v23 = vmax.bf16 %v69_v17, %v33_v19 }
   0xd   :  { %v39_v29 = vmax.bf16 %v70_v24, %v34_v26 }
   0xe   :  { %v43_v27 = vmax.bf16 %v71_v21, %v38_v23 }
   0xf   :  { %v44_v32 = vmax.bf16 %v72_v28, %v39_v29 }
  0x10   :  { %v48_v30 = vmax.bf16 %v73_v25, %v43_v27 }
  0x11   :  { %v49_v33 = vmax.bf16 %v74_v31, %v44_v32 }
  0x12   :  { %50 = vst [vmem:[%s146_s1] sm:$0xff] %v48_v30 }
  0x13   :  { %54 = vst.msk [vmem:[%s146_s1 + $0x8] sm:$0xff] %vm53_vm2, %v49_v33 }

// kernel: _lambda_.16
= control target key start
LH: loop header
LB: loop body
LE: loop exit
PB: predicated region body
PF: predicated region fallthrough
CT: control target
= control target key end

     0   :  { %vm40_vm0 = vcmask 1043456   ;;  %v1304_v2 = vmov 0   ;;  %vm36_vm1 = vcmask 64512   ;;  %vm1095_vm2 = vcmask 64516   ;;  %s1497_s0 = inlined_call_operand.vmem [shape: bf16[9,8,392], index: 0, kind: input, shape index: {}]   ;;  %s1498_s1 = inlined_call_operand.vmem [shape: bf16[9,8,8], index: 1, kind: input, shape index: {}]   ;;  %s1499_s2 = inlined_call_operand.vmem [shape: f32[8,1], index: 2, kind: input, shape index: {}]   ;;  %s1500_s3 = inlined_call_operand.vmem [shape: f32[8,1], index: 3, kind: input, shape index: {}]   ;;  %s1501_s4 = inlined_call_operand.vmem [shape: bf16[8,392], index: 4, kind: output, shape index: {}]  }
   0x1   :  { %v1103_v0 = vld [vmem:[%s1497_s0 + $0x10] sm:$0xff]  ;;  %v1104_v1 = vld [vmem:[%s1497_s0 + $0x18] sm:$0xff]  ;;  %85 = vmatprep.mubr.bf16.mxu0 %v1304_v2  ;;  %126 = vmatprep.mubr.bf16.mxu1 %v1304_v2  ;;  %v19_v7 = vld [vmem:[%s1497_s0] sm:$0xff] }
   0x2   :  { %v1106_v3 = vcombine.high %v1103_v0, %v1103_v0  ;;  %v1108_v4 = vcombine.high %v1104_v1, %v1104_v1  ;;  %v1105_v5 = vcombine.low %v1103_v0, %v1103_v0  ;;  %v1107_v6 = vcombine.low %v1104_v1, %v1104_v1  ;;  %v20_v8 = vld [vmem:[%s1497_s0 + $0x8] sm:$0xff]  ;;  %1267 = vset.pattern.permute.xlu0 %v1304_v2  ;;  %v1122_v15 = vld [vmem:[%s1497_s0 + $0x20] sm:$0xff]  ;;  %v1133_v26 = vld [vmem:[%s1497_s0 + $0x30] sm:$0xff] }
   0x3   :  { %v1114_v9 = vcombine.high %v19_v7, %v19_v7  ;;  %v1116_v10 = vcombine.high %v20_v8, %v20_v8  ;;  %v1113_v11 = vcombine.low %v19_v7, %v19_v7  ;;  %v1115_v12 = vcombine.low %v20_v8, %v20_v8  ;;  %v1123_v16 = vld [vmem:[%s1497_s0 + $0x28] sm:$0xff]  ;;  %v1102_v17 = vld [vmem:[%s1498_s1 + $0x4] sm:$0xf]  ;;  %v1134_v27 = vld [vmem:[%s1497_s0 + $0x38] sm:$0xff] }
   0x4   :  { %1109 = vmatprep.subr.msk.bf16.mxu0 %vm40_vm0, %v1106_v3  ;;  %1111 = vmatprep.subr.msk.bf16.mxu1 %vm40_vm0, %v1108_v4  ;;  %v42_v13 = vsel %vm40_vm0, %v1105_v5, 0  ;;  %v48_v14 = vsel %vm40_vm0, %v1107_v6, 0  ;;  %v1125_v20 = vcombine.high %v1122_v15, %v1122_v15  ;;  %v1127_v21 = vcombine.high %v1123_v16, %v1123_v16  ;;  %v1054_v22 = vld [vmem:[%s1499_s2] sm:$0xff]  ;;  %v1145_v36 = vld [vmem:[%s1497_s0 + $0x48] sm:$0xff]  ;;  %v1155_v44 = vld [vmem:[%s1497_s0 + $0x50] sm:$0xff] }
   0x5   :  { %54 = vmatpush1.bf16.msra.mxu0 %v42_v13  ;;  %95 = vmatpush1.bf16.msra.mxu1 %v48_v14  ;;  %v149_v18 = vsel %vm40_vm0, %v1113_v11, 0  ;;  %v155_v19 = vsel %vm40_vm0, %v1115_v12, 0  ;;  %v1064_v23 = vld [vmem:[%s1500_s3] sm:$0xff]  ;;  %v1124_v24 = vcombine.low %v1122_v15, %v1122_v15  ;;  %v1126_v25 = vcombine.low %v1123_v16, %v1123_v16  ;;  %v1121_v37 = vld [vmem:[%s1498_s1 + $0x8] sm:$0xf]  ;;  %v1156_v45 = vld [vmem:[%s1497_s0 + $0x58] sm:$0xff] }
   0x6   :  { %1117 = vmatprep.subr.msk.bf16.mxu0 %vm40_vm0, %v1114_v9  ;;  %1119 = vmatprep.subr.msk.bf16.mxu1 %vm40_vm0, %v1116_v10  ;;  %v18_v28 = vld [vmem:[%s1498_s1] sm:$0xf]  ;;  %v1136_v31 = vcombine.high %v1133_v26, %v1133_v26  ;;  %v1138_v32 = vcombine.high %v1134_v27, %v1134_v27  ;;  %v1135_v33 = vcombine.low %v1133_v26, %v1133_v26  ;;  %v1132_v46 = vld [vmem:[%s1498_s1 + $0xc] sm:$0xf]  ;;  %v1143_v55 = vld [vmem:[%s1498_s1 + $0x10] sm:$0xf] }
   0x7   :  { %1057 = vperm.xlu0 %1267, %v1054_v22   ;;  %v261_v29 = vsel %vm40_vm0, %v1124_v24, 0  ;;  %v267_v30 = vsel %vm40_vm0, %v1126_v25, 0  ;;  %v1137_v34 = vcombine.low %v1134_v27, %v1134_v27  ;;  %v1144_v35 = vld [vmem:[%s1497_s0 + $0x40] sm:$0xff]  ;;  %v1149_v41 = vcombine.high %v1145_v36, %v1145_v36  ;;  %v1167_v54 = vld [vmem:[%s1497_s0 + $0x68] sm:$0xff]  ;;  %v1177_v62 = vld [vmem:[%s1497_s0 + $0x70] sm:$0xff] }
   0x8   :  { %1110 = vmatmul.mubr.msk.bf16.vlgmr.msra.gmra.mrb[0].mxu0 %vm36_vm1, %v1102_v17  ;;  %1112 = vmatmul.mubr.msk.bf16.vlgmr.msra.gmra.mrb[0].mxu1 %vm36_vm1, %v1102_v17  ;;  %v377_v38 = vsel %vm40_vm0, %v1135_v33, 0  ;;  %v1147_v40 = vcombine.high %v1144_v35, %v1144_v35  ;;  %v1146_v42 = vcombine.low %v1144_v35, %v1144_v35  ;;  %v1148_v43 = vcombine.low %v1145_v36, %v1145_v36  ;;  %v1166_v53 = vld [vmem:[%s1497_s0 + $0x60] sm:$0xff]  ;;  %v1178_v63 = vld [vmem:[%s1497_s0 + $0x78] sm:$0xff]  ;;  %v1154_v0 = vld [vmem:[%s1498_s1 + $0x14] sm:$0xf] }
   0x9   :  { %161 = vmatpush1.bf16.msra.mxu0 %v149_v18  ;;  %202 = vmatpush1.bf16.msra.mxu1 %v155_v19  ;;  %v383_v39 = vsel %vm40_vm0, %v1137_v34, 0  ;;  %v1158_v49 = vcombine.high %v1155_v44, %v1155_v44  ;;  %v1160_v50 = vcombine.high %v1156_v45, %v1156_v45  ;;  %v1157_v51 = vcombine.low %v1155_v44, %v1155_v44  ;;  %v1188_v8 = vld [vmem:[%s1497_s0 + $0x80] sm:$0xff]  ;;  %v1189_v9 = vld [vmem:[%s1497_s0 + $0x88] sm:$0xff]  ;;  %v1165_v10 = vld [vmem:[%s1498_s1 + $0x18] sm:$0xf] }
   0xa   :  { %192 = vmatprep.mubr.bf16.mxu0 %v1304_v2  ;;  %233 = vmatprep.mubr.bf16.mxu1 %v1304_v2  ;;  %v493_v47 = vsel %vm40_vm0, %v1146_v42, 0  ;;  %v499_v48 = vsel %vm40_vm0, %v1148_v43, 0  ;;  %v1159_v52 = vcombine.low %v1156_v45, %v1156_v45  ;;  %v1169_v58 = vcombine.high %v1166_v53, %v1166_v53  ;;  %v1176_v17 = vld [vmem:[%s1498_s1 + $0x1c] sm:$0xf]  ;;  %vm1096_vm3 = vmor %vm1095_vm2, %vm40_vm0 }
   0xb   :  { %1128 = vmatprep.subr.msk.bf16.mxu0 %vm40_vm0, %v1125_v20  ;;  %1130 = vmatprep.subr.msk.bf16.mxu1 %vm40_vm0, %v1127_v21  ;;  %v609_v56 = vsel %vm40_vm0, %v1157_v51, 0  ;;  %v1171_v59 = vcombine.high %v1167_v54, %v1167_v54  ;;  %v1168_v60 = vcombine.low %v1166_v53, %v1166_v53  ;;  %v1170_v61 = vcombine.low %v1167_v54, %v1167_v54  ;;  %v1187_v20 = vld [vmem:[%s1498_s1 + $0x20] sm:$0xf] }
   0xc   :  { %1067 = vperm.xlu0 %1267, %v1064_v23   ;;  %v615_v57 = vsel %vm40_vm0, %v1159_v52, 0  ;;  %v1180_v4 = vcombine.high %v1177_v62, %v1177_v62  ;;  %v1182_v5 = vcombine.high %v1178_v63, %v1178_v63  ;;  %v1179_v6 = vcombine.low %v1177_v62, %v1177_v62 }
   0xd   :  { %v725_v1 = vsel %vm40_vm0, %v1168_v60, 0  ;;  %v731_v3 = vsel %vm40_vm0, %v1170_v61, 0  ;;  %v1181_v7 = vcombine.low %v1178_v63, %v1178_v63  ;;  %v1191_v13 = vcombine.high %v1188_v8, %v1188_v8 }
   0xe   :  { %v841_v11 = vsel %vm40_vm0, %v1179_v6, 0  ;;  %v1193_v14 = vcombine.high %v1189_v9, %v1189_v9  ;;  %v1190_v15 = vcombine.low %v1188_v8, %v1188_v8  ;;  %v1192_v16 = vcombine.low %v1189_v9, %v1189_v9 }
   0xf   :  { %v847_v12 = vsel %vm40_vm0, %v1181_v7, 0 }
  0x10   :  { %v957_v18 = vsel %vm40_vm0, %v1190_v15, 0  ;;  %v963_v19 = vsel %vm40_vm0, %v1192_v16, 0 }
  0x14   :  { %1118 = vmatmul.mubr.msk.bf16.vlgmr.msra.gmra.mrb[0].mxu0 %vm36_vm1, %v18_v28  ;;  %1120 = vmatmul.mubr.msk.bf16.vlgmr.msra.gmra.mrb[0].mxu1 %vm36_vm1, %v18_v28 }
  0x15   :  { %273 = vmatpush1.bf16.msra.mxu0 %v261_v29  ;;  %314 = vmatpush1.bf16.msra.mxu1 %v267_v30 }
  0x16   :  { %304 = vmatprep.mubr.bf16.mxu0 %v1304_v2  ;;  %345 = vmatprep.mubr.bf16.mxu1 %v1304_v2 }
  0x17   :  { %1139 = vmatprep.subr.msk.bf16.mxu0 %vm40_vm0, %v1136_v31  ;;  %1141 = vmatprep.subr.msk.bf16.mxu1 %vm40_vm0, %v1138_v32 }
  0x20   :  { %1129 = vmatmul.mubr.msk.bf16.vlgmr.msra.gmra.mrb[0].mxu0 %vm36_vm1, %v1121_v37  ;;  %1131 = vmatmul.mubr.msk.bf16.vlgmr.msra.gmra.mrb[0].mxu1 %vm36_vm1, %v1121_v37 }
  0x21   :  { %389 = vmatpush1.bf16.msra.mxu0 %v377_v38  ;;  %430 = vmatpush1.bf16.msra.mxu1 %v383_v39 }
  0x22   :  { %420 = vmatprep.mubr.bf16.mxu0 %v1304_v2  ;;  %461 = vmatprep.mubr.bf16.mxu1 %v1304_v2 }
  0x23   :  { %1150 = vmatprep.subr.msk.bf16.mxu0 %vm40_vm0, %v1147_v40  ;;  %1152 = vmatprep.subr.msk.bf16.mxu1 %vm40_vm0, %v1149_v41 }
  0x2c   :  { %1140 = vmatmul.mubr.msk.bf16.vlgmr.msra.gmra.mrb[0].mxu0 %vm36_vm1, %v1132_v46  ;;  %1142 = vmatmul.mubr.msk.bf16.vlgmr.msra.gmra.mrb[0].mxu1 %vm36_vm1, %v1132_v46 }
  0x2d   :  { %505 = vmatpush1.bf16.msra.mxu0 %v493_v47  ;;  %546 = vmatpush1.bf16.msra.mxu1 %v499_v48 }
  0x2e   :  { %536 = vmatprep.mubr.bf16.mxu0 %v1304_v2  ;;  %577 = vmatprep.mubr.bf16.mxu1 %v1304_v2 }
  0x2f   :  { %1161 = vmatprep.subr.msk.bf16.mxu0 %vm40_vm0, %v1158_v49  ;;  %1163 = vmatprep.subr.msk.bf16.mxu1 %vm40_vm0, %v1160_v50 }
  0x38   :  { %1151 = vmatmul.mubr.msk.bf16.vlgmr.msra.gmra.mrb[0].mxu0 %vm36_vm1, %v1143_v55  ;;  %1153 = vmatmul.mubr.msk.bf16.vlgmr.msra.gmra.mrb[0].mxu1 %vm36_vm1, %v1143_v55 }
  0x39   :  { %621 = vmatpush1.bf16.msra.mxu0 %v609_v56  ;;  %662 = vmatpush1.bf16.msra.mxu1 %v615_v57 }
  0x3a   :  { %652 = vmatprep.mubr.bf16.mxu0 %v1304_v2  ;;  %693 = vmatprep.mubr.bf16.mxu1 %v1304_v2 }
  0x3b   :  { %1172 = vmatprep.subr.msk.bf16.mxu0 %vm40_vm0, %v1169_v58  ;;  %1174 = vmatprep.subr.msk.bf16.mxu1 %vm40_vm0, %v1171_v59 }
  0x44   :  { %1162 = vmatmul.mubr.msk.bf16.vlgmr.msra.gmra.mrb[0].mxu0 %vm36_vm1, %v1154_v0  ;;  %1164 = vmatmul.mubr.msk.bf16.vlgmr.msra.gmra.mrb[0].mxu1 %vm36_vm1, %v1154_v0 }
  0x45   :  { %737 = vmatpush1.bf16.msra.mxu0 %v725_v1  ;;  %778 = vmatpush1.bf16.msra.mxu1 %v731_v3 }
  0x46   :  { %768 = vmatprep.mubr.bf16.mxu0 %v1304_v2  ;;  %809 = vmatprep.mubr.bf16.mxu1 %v1304_v2 }
  0x47   :  { %1183 = vmatprep.subr.msk.bf16.mxu0 %vm40_vm0, %v1180_v4  ;;  %1185 = vmatprep.subr.msk.bf16.mxu1 %vm40_vm0, %v1182_v5 }
  0x50   :  { %1173 = vmatmul.mubr.msk.bf16.vlgmr.msra.gmra.mrb[0].mxu0 %vm36_vm1, %v1165_v10  ;;  %1175 = vmatmul.mubr.msk.bf16.vlgmr.msra.gmra.mrb[0].mxu1 %vm36_vm1, %v1165_v10 }
  0x51   :  { %853 = vmatpush1.bf16.msra.mxu0 %v841_v11  ;;  %894 = vmatpush1.bf16.msra.mxu1 %v847_v12 }
  0x52   :  { %884 = vmatprep.mubr.bf16.mxu0 %v1304_v2  ;;  %925 = vmatprep.mubr.bf16.mxu1 %v1304_v2 }
  0x53   :  { %1194 = vmatprep.subr.msk.bf16.mxu0 %vm40_vm0, %v1191_v13  ;;  %1196 = vmatprep.subr.msk.bf16.mxu1 %vm40_vm0, %v1193_v14 }
  0x5c   :  { %1184 = vmatmul.mubr.msk.bf16.vlgmr.msra.gmra.mrb[0].mxu0 %vm36_vm1, %v1176_v17  ;;  %1186 = vmatmul.mubr.msk.bf16.vlgmr.msra.gmra.mrb[0].mxu1 %vm36_vm1, %v1176_v17 }
  0x5d   :  { %969 = vmatpush1.bf16.msra.mxu0 %v957_v18  ;;  %1010 = vmatpush1.bf16.msra.mxu1 %v963_v19 }
  0x5e   :  { %1000 = vmatprep.mubr.bf16.mxu0 %v1304_v2  ;;  %1041 = vmatprep.mubr.bf16.mxu1 %v1304_v2 }
  0x68   :  { %1195 = vmatmul.mubr.msk.bf16.vlgmr.msra.gmra.mrb[0].mxu0 %vm36_vm1, %v1187_v20  ;;  %1197 = vmatmul.mubr.msk.bf16.vlgmr.msra.gmra.mrb[0].mxu1 %vm36_vm1, %v1187_v20 }
  0x86   :  { %v1058_v21 = vpop.permute.xlu0 %1057 }
  0x8b   :  { %v1068_v22 = vpop.permute.xlu0 %1067 }
 0x13b   :  { %v1002_v23 = vpop.f32.mrb[0].mxu0  ;;  %v1043_v24 = vpop.f32.mrb[0].mxu1 }
 0x13c   :  { %v1060_v25 = vmul.f32 %v1058_v21, %v1002_v23  ;;  %v1062_v26 = vmul.f32 %v1058_v21, %v1043_v24  ;;  %v1004_v27 = vpop.f32.mrb[1].mxu0  ;;  %v1045_v28 = vpop.f32.mrb[1].mxu1 }
 0x13d   :  { %v1061_v29 = vmul.f32 %v1058_v21, %v1004_v27  ;;  %v1063_v30 = vmul.f32 %v1058_v21, %v1045_v28  ;;  %v1006_v31 = vpop.f32.mrb[2].mxu0  ;;  %v1047_v2 = vpop.f32.mrb[2].mxu1 }
 0x13e   :  { %v1070_v32 = vadd.f32 %v1068_v22, %v1060_v25  ;;  %v1072_v33 = vadd.f32 %v1068_v22, %v1062_v26  ;;  %v1007_v34 = vpop.f32.mrb[3].mxu0  ;;  %v1048_v35 = vpop.f32.mrb[3].mxu1 }
 0x13f   :  { %v1071_v36 = vadd.f32 %v1068_v22, %v1061_v29  ;;  %v1073_v37 = vadd.f32 %v1068_v22, %v1063_v30 }
 0x140   :  { %v1074_v38 = vmax.f32 %v1070_v32, 0.0  ;;  %v1076_v39 = vmax.f32 %v1072_v33, 0.0 }
 0x141   :  { %v1075_v40 = vmax.f32 %v1071_v36, 0.0  ;;  %v1077_v41 = vmax.f32 %v1073_v37, 0.0 }
 0x143   :  { %v1200_v42 = vpack.c.bf16 %v1075_v40, %v1074_v38  ;;  %v1201_v43 = vpack.c.bf16 %v1077_v41, %v1076_v39 }
 0x145   :  { %1094 = vst [vmem:[%s1501_s4] sm:$0xff] %v1200_v42  ;;  %1097 = vst.msk [vmem:[%s1501_s4 + $0x8] sm:$0xff] %vm1096_vm3, %v1201_v43 }

// kernel: _lambda_.14
= control target key start
LH: loop header
LB: loop body
LE: loop exit
PB: predicated region body
PF: predicated region fallthrough
CT: control target
= control target key end

     0   :  { %s9135_s15 = smov 0   ;;  %s9137_s16 = smov 0   ;;  %s11340_s0 = inlined_call_operand.vmem [shape: bf16[49,3,1568], index: 0, kind: input, shape index: {}]   ;;  %s11341_s1 = inlined_call_operand.vmem [shape: bf16[49,8,3], index: 1, kind: input, shape index: {}]   ;;  %s11342_s2 = inlined_call_operand.vmem [shape: f32[8,1], index: 2, kind: input, shape index: {}]   ;;  %s11343_s3 = inlined_call_operand.vmem [shape: f32[8,1], index: 3, kind: input, shape index: {}]   ;;  %s11344_s4 = inlined_call_operand.vmem [shape: bf16[8,1568], index: 4, kind: output, shape index: {}]  }
   0x1   :  { %s9139_s17 = smov 0  }
   0x2 LB: > { %s9151_s18 = sadd.s32 4294967295, %s8973_s17   ;;  %s9154_s19 = sadd.s32 1, %s8973_s17   ;;  %s8973_s17 = sphi %s9139_s17, %s11378_s17   ;;  %s8969_s16 = sphi %s9137_s16, %s11377_s16   ;;  %s8965_s15 = sphi %s9135_s15, %s11376_s15  }
   0x3   : > { %s18_s20 = ssub.s32 %s8973_s17, %s9154_s19  ;;  %s21_s21 = sadd.s32 1, %s8969_s16 }
   0x4   : > { %p19_p0 = scmp.eq.s32.totalorder %s18_s20, 0  ;;  %p28_p1 = scmp.ne.s32.totalorder %s8969_s16, %s8965_s15 }
   0x5   : > { %p29_p2 = scmp.eq.s32.totalorder %s8973_s17, 0  ;;  %p121_p3 = scmp.eq.s32.totalorder %s9151_s18, 3 }
   0x6   : > { %s9164_s22 = scalar_select %p19_p0, %s8969_s16, %s21_s21  }
   0x7   : > { %p30_p4 = por %p29_p2, %p28_p1  ;;  %p9166_p5 = por %p121_p3, %p28_p1 }
   0x8   : > { %p7835_p6 = scmp.ge.s32.totalorder %s8973_s17, 4 }
   0xa   : > { %152 = sbr.rel (%p7835_p6) target bundleno = 300 (0x12c), region = 28 }
  0x11   : > { %155 = sbr.rel (!%p30_p4) target bundleno = 300 (0x12c), region = 32  ;;  %s157_s24 = sand.u32 (%p30_p4), 1, %s8969_s16  }
  0x12   : > { %s7836_s25 = sshll.u32 (%p30_p4), %s8973_s17, 2  ;;  %s8484_s26 = smul.u32 (%p30_p4), 392, %s157_s24 }
  0x13   : > { %s161_s27 = ssub.s32 (%p30_p4), 13, %s7836_s25  ;;  %s8088_s28 = sshll.u32 (%p30_p4), %s8973_s17, 3 }
  0x14   : > { %p162_p7 = scmp.lt.s32.totalorder (%p30_p4), %s161_s27, 4  ;;  %s9177_s5 = scalar_lea.vmem (%p30_p4), %s11340_s0, %s8088_s28  }
  0x15   : > { %s9181_s8 = scalar_lea.vmem (%p30_p4), [#allocation2], %s8484_s26  }
  0x18   : > { %s11380_s27 = smov (!%p162_p7, %s161_s27), 4 }
  0x19   : > { %s164_s6 = smul.u32 1568, %s11380_s27  ;;  %s9179_s7 = sshll.u32 %s11380_s27, 1 }
  0x1b   : > { %p7840_p8 = scmp.eq.s32.totalorder %s164_s6, 0 }
  0x1c   : > { %p172_p9 = scmp.lt.u32.totalorder (!%p7840_p8), %s9179_s7, 8 }
  0x1d   : > { %171 = sbr.rel (%p7840_p8) target bundleno = 300 (0x12c), region = 36 }
  0x24   : > { %175 = sbr.rel (%p172_p9) target bundleno = 247 (0xf7), region = 40  ;;  %s9185_s9 = sand.u32 (!%p172_p9), 7, %s9179_s7  }
  0x25   : > { %p287_p10 = scmp.eq.s32.totalorder (!%p172_p9), %s9185_s9, 0  ;;  %p7841_p11 = scmp.ne.s32.totalorder (!%p172_p9), %s9185_s9, 0 }
  0x2b   : > { %290 = sbr.rel (%p7841_p11) target bundleno = 119 (0x77), region = 55  ;;  %s291_s10 = sshrl.u32 (!%p7841_p11), %s9179_s7, 3 }
  0x2c   : > { %s9192_s11 = sshrl.u32 (!%p7841_p11), %s291_s10, 1 }
  0x2d   : > { %p7842_p12 = scmp.le.s32.totalorder (!%p7841_p11), %s9192_s11, 0 }
  0x32   : > { %7705 = sbr.rel (%p7842_p12) target bundleno = 83 (0x53), region = 329  ;;  %s11346_s12 = smov (!%p7842_p12), %s9181_s8 }
  0x33   : > { %s11347_s13 = smov (!%p7842_p12), %s9177_s5  ;;  %s9201_s14 = smov (!%p7842_p12), 0  }
  0x34   : > { %s9203_s20 = smov (!%p7842_p12), 0  }
  0x39 LB: >> { %v304_v0 = vld [vmem:[%s8981_s13] sm:$0xff]  ;;  %v312_v2 = vld [vmem:[%s8981_s13 + $0x34] sm:$0xff]  ;;  %v320_v4 = vld [vmem:[%s8981_s13 + $0x68] sm:$0xff]  ;;  %s500_s21 = sadd.s32 1, %s8985_s14  ;;  %s298_s20 = sadd.s32 1, %s8989_s20   ;;  %s8989_s20 = sphi %s9203_s20, %s298_s20   ;;  %s8985_s14 = sphi %s9201_s14, %s11350_s14   ;;  %s8981_s13 = sphi %s11347_s13, %s11349_s13   ;;  %s8977_s12 = sphi %s11346_s12, %s11348_s12  }
  0x3a   : >> { %v308_v1 = vld [vmem:[%s8981_s13 + $0x1a] sm:$0xff]  ;;  %305 = vst [vmem:[%s8977_s12] sm:$0xff] %v304_v0  ;;  %313 = vst [vmem:[%s8977_s12 + $0x10] sm:$0xff] %v312_v2  ;;  %v316_v3 = vld [vmem:[%s8981_s13 + $0x4e] sm:$0xff]  ;;  %p501_p13 = scmp.ge.s32.totalorder %s500_s21, %s9192_s11  ;;  %p297_p0 = scmp.ge.s32.totalorder %s298_s20, %s9192_s11 }
  0x3b   : >> { %309 = vst [vmem:[%s8977_s12 + $0x8] sm:$0xff] %v308_v1  ;;  %v324_v5 = vld [vmem:[%s8981_s13 + $0x82] sm:$0xff]  ;;  %317 = vst [vmem:[%s8977_s12 + $0x18] sm:$0xff] %v316_v3  ;;  %v332_v7 = vld [vmem:[%s8981_s13 + $0xb6] sm:$0xff] }
  0x3c   : >> { %321 = vst [vmem:[%s8977_s12 + $0x20] sm:$0xff] %v320_v4  ;;  %325 = vst [vmem:[%s8977_s12 + $0x28] sm:$0xff] %v324_v5  ;;  %v328_v6 = vld [vmem:[%s8981_s13 + $0x9c] sm:$0xff]  ;;  %v336_v8 = vld [vmem:[%s8981_s13 + $0xd0] sm:$0xff]  ;;  %s11382_s21 = smov (%p501_p13, %s500_s21), 0 }
  0x3d   : >> { %329 = vst [vmem:[%s8977_s12 + $0x30] sm:$0xff] %v328_v6  ;;  %333 = vst [vmem:[%s8977_s12 + $0x38] sm:$0xff] %v332_v7  ;;  %v340_v9 = vld [vmem:[%s8981_s13 + $0xea] sm:$0xff]  ;;  %v348_v11 = vld [vmem:[%s8981_s13 + $0x11e] sm:$0xff]  ;;  %s7843_s24 = sshll.u32 %s11382_s21, 4  ;;  %s11350_s14 = smov %s11382_s21 }
  0x3e   : >> { %337 = vst [vmem:[%s8977_s12 + $0x40] sm:$0xff] %v336_v8  ;;  %v344_v10 = vld [vmem:[%s8981_s13 + $0x104] sm:$0xff]  ;;  %341 = vst [vmem:[%s8977_s12 + $0x48] sm:$0xff] %v340_v9  ;;  %v352_v12 = vld [vmem:[%s8981_s13 + $0x138] sm:$0xff]  ;;  %s9274_s25 = scalar_lea.vmem %s9177_s5, %s7843_s24   ;;  %s9277_s26 = scalar_lea.vmem %s9181_s8, %s7843_s24 [#allocation2]  }
  0x3f   : >> { %345 = vst [vmem:[%s8977_s12 + $0x50] sm:$0xff] %v344_v10  ;;  %349 = vst [vmem:[%s8977_s12 + $0x58] sm:$0xff] %v348_v11  ;;  %v356_v13 = vld [vmem:[%s8981_s13 + $0x152] sm:$0xff]  ;;  %v364_v15 = vld [vmem:[%s8981_s13 + $0x186] sm:$0xff] }
  0x40   : >> { %v360_v14 = vld [vmem:[%s8981_s13 + $0x16c] sm:$0xff]  ;;  %353 = vst [vmem:[%s8977_s12 + $0x60] sm:$0xff] %v352_v12  ;;  %357 = vst [vmem:[%s8977_s12 + $0x68] sm:$0xff] %v356_v13  ;;  %v368_v16 = vld [vmem:[%s8981_s13 + $0x1a0] sm:$0xff] }
  0x41   : >> { %361 = vst [vmem:[%s8977_s12 + $0x70] sm:$0xff] %v360_v14  ;;  %v372_v17 = vld [vmem:[%s8981_s13 + $0x1ba] sm:$0xff]  ;;  %365 = vst [vmem:[%s8977_s12 + $0x78] sm:$0xff] %v364_v15  ;;  %v380_v19 = vld [vmem:[%s8981_s13 + $0x1ee] sm:$0xff] }
  0x42   : >> { %369 = vst [vmem:[%s8977_s12 + $0x80] sm:$0xff] %v368_v16  ;;  %373 = vst [vmem:[%s8977_s12 + $0x88] sm:$0xff] %v372_v17  ;;  %v376_v18 = vld [vmem:[%s8981_s13 + $0x1d4] sm:$0xff]  ;;  %v384_v20 = vld [vmem:[%s8981_s13 + $0x208] sm:$0xff] }
  0x43   : >> { %377 = vst [vmem:[%s8977_s12 + $0x90] sm:$0xff] %v376_v18  ;;  %381 = vst [vmem:[%s8977_s12 + $0x98] sm:$0xff] %v380_v19  ;;  %v388_v21 = vld [vmem:[%s8981_s13 + $0x222] sm:$0xff]  ;;  %v396_v23 = vld [vmem:[%s8981_s13 + $0x256] sm:$0xff] }
  0x44   : >> { %385 = vst [vmem:[%s8977_s12 + $0xa0] sm:$0xff] %v384_v20  ;;  %v392_v22 = vld [vmem:[%s8981_s13 + $0x23c] sm:$0xff]  ;;  %389 = vst [vmem:[%s8977_s12 + $0xa8] sm:$0xff] %v388_v21  ;;  %v400_v24 = vld [vmem:[%s8981_s13 + $0x270] sm:$0xff] }
  0x45   : >> { %393 = vst [vmem:[%s8977_s12 + $0xb0] sm:$0xff] %v392_v22  ;;  %397 = vst [vmem:[%s8977_s12 + $0xb8] sm:$0xff] %v396_v23  ;;  %v404_v25 = vld [vmem:[%s8981_s13 + $0x28a] sm:$0xff]  ;;  %v412_v27 = vld [vmem:[%s8981_s13 + $0x2be] sm:$0xff] }
  0x46   : >> { %v408_v26 = vld [vmem:[%s8981_s13 + $0x2a4] sm:$0xff]  ;;  %401 = vst [vmem:[%s8977_s12 + $0xc0] sm:$0xff] %v400_v24  ;;  %405 = vst [vmem:[%s8977_s12 + $0xc8] sm:$0xff] %v404_v25  ;;  %v416_v28 = vld [vmem:[%s8981_s13 + $0x2d8] sm:$0xff] }
  0x47   : >> { %409 = vst [vmem:[%s8977_s12 + $0xd0] sm:$0xff] %v408_v26  ;;  %v420_v29 = vld [vmem:[%s8981_s13 + $0x2f2] sm:$0xff]  ;;  %413 = vst [vmem:[%s8977_s12 + $0xd8] sm:$0xff] %v412_v27  ;;  %v428_v31 = vld [vmem:[%s8981_s13 + $0x326] sm:$0xff] }
  0x48   : >> { %417 = vst [vmem:[%s8977_s12 + $0xe0] sm:$0xff] %v416_v28  ;;  %421 = vst [vmem:[%s8977_s12 + $0xe8] sm:$0xff] %v420_v29  ;;  %v424_v30 = vld [vmem:[%s8981_s13 + $0x30c] sm:$0xff]  ;;  %v432_v32 = vld [vmem:[%s8981_s13 + $0x340] sm:$0xff] }
  0x49   : >> { %425 = vst [vmem:[%s8977_s12 + $0xf0] sm:$0xff] %v424_v30  ;;  %429 = vst [vmem:[%s8977_s12 + $0xf8] sm:$0xff] %v428_v31  ;;  %v436_v33 = vld [vmem:[%s8981_s13 + $0x35a] sm:$0xff]  ;;  %v444_v35 = vld [vmem:[%s8981_s13 + $0x38e] sm:$0xff] }
  0x4a   : >> { %433 = vst [vmem:[%s8977_s12 + $0x100] sm:$0xff] %v432_v32  ;;  %v440_v34 = vld [vmem:[%s8981_s13 + $0x374] sm:$0xff]  ;;  %437 = vst [vmem:[%s8977_s12 + $0x108] sm:$0xff] %v436_v33  ;;  %v448_v36 = vld [vmem:[%s8981_s13 + $0x3a8] sm:$0xff] }
  0x4b   : >> { %441 = vst [vmem:[%s8977_s12 + $0x110] sm:$0xff] %v440_v34  ;;  %445 = vst [vmem:[%s8977_s12 + $0x118] sm:$0xff] %v444_v35  ;;  %v452_v37 = vld [vmem:[%s8981_s13 + $0x3c2] sm:$0xff]  ;;  %v460_v39 = vld [vmem:[%s8981_s13 + $0x3f6] sm:$0xff] }
  0x4c   : >> { %v456_v38 = vld [vmem:[%s8981_s13 + $0x3dc] sm:$0xff]  ;;  %449 = vst [vmem:[%s8977_s12 + $0x120] sm:$0xff] %v448_v36  ;;  %453 = vst [vmem:[%s8977_s12 + $0x128] sm:$0xff] %v452_v37  ;;  %v464_v40 = vld [vmem:[%s8981_s13 + $0x410] sm:$0xff]  ;;  %300 = sbr.rel (!%p297_p0) target bundleno = 57 (0x39), region = 335 }
  0x4d   : >> { %457 = vst [vmem:[%s8977_s12 + $0x130] sm:$0xff] %v456_v38  ;;  %v468_v41 = vld [vmem:[%s8981_s13 + $0x42a] sm:$0xff]  ;;  %461 = vst [vmem:[%s8977_s12 + $0x138] sm:$0xff] %v460_v39  ;;  %v476_v43 = vld [vmem:[%s8981_s13 + $0x45e] sm:$0xff] }
  0x4e   : >> { %465 = vst [vmem:[%s8977_s12 + $0x140] sm:$0xff] %v464_v40  ;;  %469 = vst [vmem:[%s8977_s12 + $0x148] sm:$0xff] %v468_v41  ;;  %v472_v42 = vld [vmem:[%s8981_s13 + $0x444] sm:$0xff]  ;;  %v480_v44 = vld [vmem:[%s8981_s13 + $0x478] sm:$0xff] }
  0x4f   : >> { %473 = vst [vmem:[%s8977_s12 + $0x150] sm:$0xff] %v472_v42  ;;  %477 = vst [vmem:[%s8977_s12 + $0x158] sm:$0xff] %v476_v43  ;;  %v484_v45 = vld [vmem:[%s8981_s13 + $0x492] sm:$0xff]  ;;  %v492_v47 = vld [vmem:[%s8981_s13 + $0x4c6] sm:$0xff] }
  0x50   : >> { %481 = vst [vmem:[%s8977_s12 + $0x160] sm:$0xff] %v480_v44  ;;  %v488_v46 = vld [vmem:[%s8981_s13 + $0x4ac] sm:$0xff]  ;;  %485 = vst [vmem:[%s8977_s12 + $0x168] sm:$0xff] %v484_v45  ;;  %v496_v48 = vld [vmem:[%s8981_s13 + $0x4e0] sm:$0xff] }
  0x51   : >> { %489 = vst [vmem:[%s8977_s12 + $0x170] sm:$0xff] %v488_v46  ;;  %493 = vst [vmem:[%s8977_s12 + $0x178] sm:$0xff] %v492_v47  ;;  %v498_v49 = vld [vmem:[%s8981_s13 + $0x4e8] sm:$0xff]  ;;  %s11349_s13 = smov %s9274_s25 }
  0x52   : >> { %497 = vst [vmem:[%s8977_s12 + $0x180] sm:$0xff] %v496_v48  ;;  %499 = vst [vmem:[%s8977_s12 + $0x188] sm:$0xff] %v498_v49  ;;  %s11348_s12 = smov %s9277_s26 }
  0x53 PF: > { %s9343_s27 = sand.u32 1, %s291_s10   ;;  %s8089_s28 = sshll.u32 %s9192_s11, 8 }
  0x54   : > { %s511_s29 = sshra.s32 %s8089_s28, 4  ;;  %p7848_p1 = scmp.le.s32.totalorder %s9343_s27, 0 }
  0x55   : > { %s9347_s30 = scalar_lea.vmem %s9177_s5, %s511_s29   ;;  %s9350_s6 = scalar_lea.vmem %s9181_s8, %s511_s29 [#allocation2]  }
  0x56   : > { %7719 = sbr.rel (%p7848_p1) target bundleno = 119 (0x77), region = 340  ;;  %s11351_s12 = smov (!%p7848_p1), %s9350_s6 }
  0x57   : > { %s11352_s13 = smov (!%p7848_p1), %s9347_s30  ;;  %s9359_s14 = smov (!%p7848_p1), 0  }
  0x58   : > { %s9361_s20 = smov (!%p7848_p1), 0  }
  0x5d LB: >> { %v527_v50 = vld [vmem:[%s8997_s13] sm:$0xff]  ;;  %v531_v52 = vld [vmem:[%s8997_s13 + $0x34] sm:$0xff]  ;;  %s625_s10 = sadd.s32 1, %s9001_s14  ;;  %v535_v54 = vld [vmem:[%s8997_s13 + $0x68] sm:$0xff]  ;;  %s521_s20 = sadd.s32 1, %s9005_s20   ;;  %s9005_s20 = sphi %s9361_s20, %s521_s20   ;;  %s9001_s14 = sphi %s9359_s14, %s11355_s14   ;;  %s8997_s13 = sphi %s11352_s13, %s11354_s13   ;;  %s8993_s12 = sphi %s11351_s12, %s11353_s12  }
  0x5e   : >> { %v529_v51 = vld [vmem:[%s8997_s13 + $0x1a] sm:$0xff]  ;;  %528 = vst [vmem:[%s8993_s12] sm:$0xff] %v527_v50  ;;  %532 = vst [vmem:[%s8993_s12 + $0x10] sm:$0xff] %v531_v52  ;;  %v533_v53 = vld [vmem:[%s8997_s13 + $0x4e] sm:$0xff]  ;;  %p626_p2 = scmp.ge.s32.totalorder %s625_s10, %s9343_s27  ;;  %p520_p3 = scmp.ge.s32.totalorder %s521_s20, %s9343_s27 }
  0x5f   : >> { %530 = vst [vmem:[%s8993_s12 + $0x8] sm:$0xff] %v529_v51  ;;  %v537_v55 = vld [vmem:[%s8997_s13 + $0x82] sm:$0xff]  ;;  %534 = vst [vmem:[%s8993_s12 + $0x18] sm:$0xff] %v533_v53  ;;  %v541_v57 = vld [vmem:[%s8997_s13 + $0xb6] sm:$0xff] }
  0x60   : >> { %536 = vst [vmem:[%s8993_s12 + $0x20] sm:$0xff] %v535_v54  ;;  %538 = vst [vmem:[%s8993_s12 + $0x28] sm:$0xff] %v537_v55  ;;  %v539_v56 = vld [vmem:[%s8997_s13 + $0x9c] sm:$0xff]  ;;  %v543_v58 = vld [vmem:[%s8997_s13 + $0xd0] sm:$0xff]  ;;  %s11384_s10 = smov (%p626_p2, %s625_s10), 0 }
  0x61   : >> { %540 = vst [vmem:[%s8993_s12 + $0x30] sm:$0xff] %v539_v56  ;;  %542 = vst [vmem:[%s8993_s12 + $0x38] sm:$0xff] %v541_v57  ;;  %v545_v59 = vld [vmem:[%s8997_s13 + $0xea] sm:$0xff]  ;;  %v549_v61 = vld [vmem:[%s8997_s13 + $0x11e] sm:$0xff]  ;;  %s7849_s11 = sshll.u32 %s11384_s10, 3  ;;  %s11355_s14 = smov %s11384_s10 }
  0x62   : >> { %544 = vst [vmem:[%s8993_s12 + $0x40] sm:$0xff] %v543_v58  ;;  %v547_v60 = vld [vmem:[%s8997_s13 + $0x104] sm:$0xff]  ;;  %546 = vst [vmem:[%s8993_s12 + $0x48] sm:$0xff] %v545_v59  ;;  %v551_v62 = vld [vmem:[%s8997_s13 + $0x138] sm:$0xff]  ;;  %s9417_s21 = scalar_lea.vmem %s9347_s30, %s7849_s11   ;;  %s9420_s24 = scalar_lea.vmem %s9350_s6, %s7849_s11 [#allocation2]  }
  0x63   : >> { %548 = vst [vmem:[%s8993_s12 + $0x50] sm:$0xff] %v547_v60  ;;  %550 = vst [vmem:[%s8993_s12 + $0x58] sm:$0xff] %v549_v61  ;;  %v553_v63 = vld [vmem:[%s8997_s13 + $0x152] sm:$0xff]  ;;  %v557_v1 = vld [vmem:[%s8997_s13 + $0x186] sm:$0xff] }
  0x64   : >> { %v555_v0 = vld [vmem:[%s8997_s13 + $0x16c] sm:$0xff]  ;;  %552 = vst [vmem:[%s8993_s12 + $0x60] sm:$0xff] %v551_v62  ;;  %554 = vst [vmem:[%s8993_s12 + $0x68] sm:$0xff] %v553_v63  ;;  %v559_v2 = vld [vmem:[%s8997_s13 + $0x1a0] sm:$0xff] }
  0x65   : >> { %556 = vst [vmem:[%s8993_s12 + $0x70] sm:$0xff] %v555_v0  ;;  %v561_v3 = vld [vmem:[%s8997_s13 + $0x1ba] sm:$0xff]  ;;  %558 = vst [vmem:[%s8993_s12 + $0x78] sm:$0xff] %v557_v1  ;;  %v565_v5 = vld [vmem:[%s8997_s13 + $0x1ee] sm:$0xff] }
  0x66   : >> { %560 = vst [vmem:[%s8993_s12 + $0x80] sm:$0xff] %v559_v2  ;;  %562 = vst [vmem:[%s8993_s12 + $0x88] sm:$0xff] %v561_v3  ;;  %v563_v4 = vld [vmem:[%s8997_s13 + $0x1d4] sm:$0xff]  ;;  %v567_v6 = vld [vmem:[%s8997_s13 + $0x208] sm:$0xff] }
  0x67   : >> { %564 = vst [vmem:[%s8993_s12 + $0x90] sm:$0xff] %v563_v4  ;;  %566 = vst [vmem:[%s8993_s12 + $0x98] sm:$0xff] %v565_v5  ;;  %v569_v7 = vld [vmem:[%s8997_s13 + $0x222] sm:$0xff]  ;;  %v573_v9 = vld [vmem:[%s8997_s13 + $0x256] sm:$0xff] }
  0x68   : >> { %568 = vst [vmem:[%s8993_s12 + $0xa0] sm:$0xff] %v567_v6  ;;  %v571_v8 = vld [vmem:[%s8997_s13 + $0x23c] sm:$0xff]  ;;  %570 = vst [vmem:[%s8993_s12 + $0xa8] sm:$0xff] %v569_v7  ;;  %v575_v10 = vld [vmem:[%s8997_s13 + $0x270] sm:$0xff] }
  0x69   : >> { %572 = vst [vmem:[%s8993_s12 + $0xb0] sm:$0xff] %v571_v8  ;;  %574 = vst [vmem:[%s8993_s12 + $0xb8] sm:$0xff] %v573_v9  ;;  %v577_v11 = vld [vmem:[%s8997_s13 + $0x28a] sm:$0xff]  ;;  %v581_v13 = vld [vmem:[%s8997_s13 + $0x2be] sm:$0xff] }
  0x6a   : >> { %v579_v12 = vld [vmem:[%s8997_s13 + $0x2a4] sm:$0xff]  ;;  %576 = vst [vmem:[%s8993_s12 + $0xc0] sm:$0xff] %v575_v10  ;;  %578 = vst [vmem:[%s8993_s12 + $0xc8] sm:$0xff] %v577_v11  ;;  %v583_v14 = vld [vmem:[%s8997_s13 + $0x2d8] sm:$0xff] }
  0x6b   : >> { %580 = vst [vmem:[%s8993_s12 + $0xd0] sm:$0xff] %v579_v12  ;;  %v585_v15 = vld [vmem:[%s8997_s13 + $0x2f2] sm:$0xff]  ;;  %582 = vst [vmem:[%s8993_s12 + $0xd8] sm:$0xff] %v581_v13  ;;  %v589_v17 = vld [vmem:[%s8997_s13 + $0x326] sm:$0xff] }
  0x6c   : >> { %584 = vst [vmem:[%s8993_s12 + $0xe0] sm:$0xff] %v583_v14  ;;  %586 = vst [vmem:[%s8993_s12 + $0xe8] sm:$0xff] %v585_v15  ;;  %v587_v16 = vld [vmem:[%s8997_s13 + $0x30c] sm:$0xff]  ;;  %v591_v18 = vld [vmem:[%s8997_s13 + $0x340] sm:$0xff] }
  0x6d   : >> { %588 = vst [vmem:[%s8993_s12 + $0xf0] sm:$0xff] %v587_v16  ;;  %590 = vst [vmem:[%s8993_s12 + $0xf8] sm:$0xff] %v589_v17  ;;  %v593_v19 = vld [vmem:[%s8997_s13 + $0x35a] sm:$0xff]  ;;  %v597_v21 = vld [vmem:[%s8997_s13 + $0x38e] sm:$0xff] }
  0x6e   : >> { %592 = vst [vmem:[%s8993_s12 + $0x100] sm:$0xff] %v591_v18  ;;  %v595_v20 = vld [vmem:[%s8997_s13 + $0x374] sm:$0xff]  ;;  %594 = vst [vmem:[%s8993_s12 + $0x108] sm:$0xff] %v593_v19  ;;  %v599_v22 = vld [vmem:[%s8997_s13 + $0x3a8] sm:$0xff] }
  0x6f   : >> { %596 = vst [vmem:[%s8993_s12 + $0x110] sm:$0xff] %v595_v20  ;;  %598 = vst [vmem:[%s8993_s12 + $0x118] sm:$0xff] %v597_v21  ;;  %v601_v23 = vld [vmem:[%s8997_s13 + $0x3c2] sm:$0xff]  ;;  %v605_v25 = vld [vmem:[%s8997_s13 + $0x3f6] sm:$0xff] }
  0x70   : >> { %v603_v24 = vld [vmem:[%s8997_s13 + $0x3dc] sm:$0xff]  ;;  %600 = vst [vmem:[%s8993_s12 + $0x120] sm:$0xff] %v599_v22  ;;  %602 = vst [vmem:[%s8993_s12 + $0x128] sm:$0xff] %v601_v23  ;;  %v607_v26 = vld [vmem:[%s8997_s13 + $0x410] sm:$0xff]  ;;  %523 = sbr.rel (!%p520_p3) target bundleno = 93 (0x5d), region = 346 }
  0x71   : >> { %604 = vst [vmem:[%s8993_s12 + $0x130] sm:$0xff] %v603_v24  ;;  %v609_v27 = vld [vmem:[%s8997_s13 + $0x42a] sm:$0xff]  ;;  %606 = vst [vmem:[%s8993_s12 + $0x138] sm:$0xff] %v605_v25  ;;  %v613_v29 = vld [vmem:[%s8997_s13 + $0x45e] sm:$0xff] }
  0x72   : >> { %608 = vst [vmem:[%s8993_s12 + $0x140] sm:$0xff] %v607_v26  ;;  %610 = vst [vmem:[%s8993_s12 + $0x148] sm:$0xff] %v609_v27  ;;  %v611_v28 = vld [vmem:[%s8997_s13 + $0x444] sm:$0xff]  ;;  %v615_v30 = vld [vmem:[%s8997_s13 + $0x478] sm:$0xff] }
  0x73   : >> { %612 = vst [vmem:[%s8993_s12 + $0x150] sm:$0xff] %v611_v28  ;;  %614 = vst [vmem:[%s8993_s12 + $0x158] sm:$0xff] %v613_v29  ;;  %v617_v31 = vld [vmem:[%s8997_s13 + $0x492] sm:$0xff]  ;;  %v621_v33 = vld [vmem:[%s8997_s13 + $0x4c6] sm:$0xff] }
  0x74   : >> { %616 = vst [vmem:[%s8993_s12 + $0x160] sm:$0xff] %v615_v30  ;;  %v619_v32 = vld [vmem:[%s8997_s13 + $0x4ac] sm:$0xff]  ;;  %618 = vst [vmem:[%s8993_s12 + $0x168] sm:$0xff] %v617_v31  ;;  %v623_v34 = vld [vmem:[%s8997_s13 + $0x4e0] sm:$0xff]  ;;  %s11354_s13 = smov %s9417_s21 }
  0x75   : >> { %620 = vst [vmem:[%s8993_s12 + $0x170] sm:$0xff] %v619_v32  ;;  %622 = vst [vmem:[%s8993_s12 + $0x178] sm:$0xff] %v621_v33 }
  0x76   : >> { %624 = vst [vmem:[%s8993_s12 + $0x180] sm:$0xff] %v623_v34  ;;  %s11353_s12 = smov %s9420_s24 }
  0x77 PF: > { %634 = sbr.rel (%p287_p10) target bundleno = 247 (0xf7), region = 73  ;;  %s636_s25 = ssub.s32 (!%p287_p10), %s9179_s7, %s9185_s9 }
  0x78   : > { %s640_s26 = sshrl.u32 (!%p287_p10), %s9179_s7, 3  ;;  %s9500_s28 = scalar_lea.vmem (!%p287_p10), %s9177_s5, %s636_s25 }
  0x79   : > { %s9503_s29 = scalar_lea.vmem (!%p287_p10), %s9181_s8, %s636_s25 [#allocation2]  ;;  %s9507_s20 = sshrl.u32 (!%p287_p10), %s640_s26, 1 }
  0x7a   : > { %p7851_p4 = scmp.le.s32.totalorder (!%p287_p10), %s9507_s20, 0 }
  0x7e   : > { %7733 = sbr.rel (%p7851_p4) target bundleno = 159 (0x9f), region = 351  ;;  %s11356_s27 = smov (!%p7851_p4), %s9181_s8 }
  0x7f   : > { %s11357_s30 = smov (!%p7851_p4), %s9177_s5  ;;  %s9516_s6 = smov (!%p7851_p4), 0  }
  0x80   : > { %s9518_s12 = smov (!%p7851_p4), 0  }
  0x85 LB: >> { %v653_v35 = vld [vmem:[%s9013_s30] sm:$0xff]  ;;  %v661_v37 = vld [vmem:[%s9013_s30 + $0x34] sm:$0xff]  ;;  %v669_v39 = vld [vmem:[%s9013_s30 + $0x68] sm:$0xff]  ;;  %s849_s13 = sadd.s32 1, %s9017_s6  ;;  %s647_s12 = sadd.s32 1, %s9021_s12   ;;  %s9021_s12 = sphi %s9518_s12, %s647_s12   ;;  %s9017_s6 = sphi %s9516_s6, %s11360_s6   ;;  %s9013_s30 = sphi %s11357_s30, %s11359_s30   ;;  %s9009_s27 = sphi %s11356_s27, %s11358_s27  }
  0x86   : >> { %v657_v36 = vld [vmem:[%s9013_s30 + $0x1a] sm:$0xff]  ;;  %654 = vst [vmem:[%s9009_s27] sm:$0xff] %v653_v35  ;;  %662 = vst [vmem:[%s9009_s27 + $0x10] sm:$0xff] %v661_v37  ;;  %v665_v38 = vld [vmem:[%s9013_s30 + $0x4e] sm:$0xff]  ;;  %p850_p6 = scmp.ge.s32.totalorder %s849_s13, %s9507_s20  ;;  %p646_p7 = scmp.ge.s32.totalorder %s647_s12, %s9507_s20 }
  0x87   : >> { %658 = vst [vmem:[%s9009_s27 + $0x8] sm:$0xff] %v657_v36  ;;  %v673_v40 = vld [vmem:[%s9013_s30 + $0x82] sm:$0xff]  ;;  %666 = vst [vmem:[%s9009_s27 + $0x18] sm:$0xff] %v665_v38  ;;  %v681_v42 = vld [vmem:[%s9013_s30 + $0xb6] sm:$0xff] }
  0x88   : >> { %670 = vst [vmem:[%s9009_s27 + $0x20] sm:$0xff] %v669_v39  ;;  %674 = vst [vmem:[%s9009_s27 + $0x28] sm:$0xff] %v673_v40  ;;  %v677_v41 = vld [vmem:[%s9013_s30 + $0x9c] sm:$0xff]  ;;  %v685_v43 = vld [vmem:[%s9013_s30 + $0xd0] sm:$0xff]  ;;  %s11386_s13 = smov (%p850_p6, %s849_s13), 0 }
  0x89   : >> { %678 = vst [vmem:[%s9009_s27 + $0x30] sm:$0xff] %v677_v41  ;;  %682 = vst [vmem:[%s9009_s27 + $0x38] sm:$0xff] %v681_v42  ;;  %v689_v44 = vld [vmem:[%s9013_s30 + $0xea] sm:$0xff]  ;;  %v697_v46 = vld [vmem:[%s9013_s30 + $0x11e] sm:$0xff]  ;;  %s7852_s14 = sshll.u32 %s11386_s13, 4  ;;  %s11360_s6 = smov %s11386_s13 }
  0x8a   : >> { %686 = vst [vmem:[%s9009_s27 + $0x40] sm:$0xff] %v685_v43  ;;  %v693_v45 = vld [vmem:[%s9013_s30 + $0x104] sm:$0xff]  ;;  %690 = vst [vmem:[%s9009_s27 + $0x48] sm:$0xff] %v689_v44  ;;  %v701_v47 = vld [vmem:[%s9013_s30 + $0x138] sm:$0xff]  ;;  %s9589_s10 = scalar_lea.vmem %s9177_s5, %s7852_s14   ;;  %s9592_s11 = scalar_lea.vmem %s9181_s8, %s7852_s14 [#allocation2]  }
  0x8b   : >> { %694 = vst [vmem:[%s9009_s27 + $0x50] sm:$0xff] %v693_v45  ;;  %698 = vst [vmem:[%s9009_s27 + $0x58] sm:$0xff] %v697_v46  ;;  %v705_v48 = vld [vmem:[%s9013_s30 + $0x152] sm:$0xff]  ;;  %v713_v50 = vld [vmem:[%s9013_s30 + $0x186] sm:$0xff] }
  0x8c   : >> { %v709_v49 = vld [vmem:[%s9013_s30 + $0x16c] sm:$0xff]  ;;  %702 = vst [vmem:[%s9009_s27 + $0x60] sm:$0xff] %v701_v47  ;;  %706 = vst [vmem:[%s9009_s27 + $0x68] sm:$0xff] %v705_v48  ;;  %v717_v51 = vld [vmem:[%s9013_s30 + $0x1a0] sm:$0xff] }
  0x8d   : >> { %710 = vst [vmem:[%s9009_s27 + $0x70] sm:$0xff] %v709_v49  ;;  %v721_v52 = vld [vmem:[%s9013_s30 + $0x1ba] sm:$0xff]  ;;  %714 = vst [vmem:[%s9009_s27 + $0x78] sm:$0xff] %v713_v50  ;;  %v729_v54 = vld [vmem:[%s9013_s30 + $0x1ee] sm:$0xff] }
  0x8e   : >> { %718 = vst [vmem:[%s9009_s27 + $0x80] sm:$0xff] %v717_v51  ;;  %722 = vst [vmem:[%s9009_s27 + $0x88] sm:$0xff] %v721_v52  ;;  %v725_v53 = vld [vmem:[%s9013_s30 + $0x1d4] sm:$0xff]  ;;  %v733_v55 = vld [vmem:[%s9013_s30 + $0x208] sm:$0xff] }
  0x8f   : >> { %726 = vst [vmem:[%s9009_s27 + $0x90] sm:$0xff] %v725_v53  ;;  %730 = vst [vmem:[%s9009_s27 + $0x98] sm:$0xff] %v729_v54  ;;  %v737_v56 = vld [vmem:[%s9013_s30 + $0x222] sm:$0xff]  ;;  %v745_v58 = vld [vmem:[%s9013_s30 + $0x256] sm:$0xff] }
  0x90   : >> { %734 = vst [vmem:[%s9009_s27 + $0xa0] sm:$0xff] %v733_v55  ;;  %v741_v57 = vld [vmem:[%s9013_s30 + $0x23c] sm:$0xff]  ;;  %738 = vst [vmem:[%s9009_s27 + $0xa8] sm:$0xff] %v737_v56  ;;  %v749_v59 = vld [vmem:[%s9013_s30 + $0x270] sm:$0xff] }
  0x91   : >> { %742 = vst [vmem:[%s9009_s27 + $0xb0] sm:$0xff] %v741_v57  ;;  %746 = vst [vmem:[%s9009_s27 + $0xb8] sm:$0xff] %v745_v58  ;;  %v753_v60 = vld [vmem:[%s9013_s30 + $0x28a] sm:$0xff]  ;;  %v761_v62 = vld [vmem:[%s9013_s30 + $0x2be] sm:$0xff] }
  0x92   : >> { %v757_v61 = vld [vmem:[%s9013_s30 + $0x2a4] sm:$0xff]  ;;  %750 = vst [vmem:[%s9009_s27 + $0xc0] sm:$0xff] %v749_v59  ;;  %754 = vst [vmem:[%s9009_s27 + $0xc8] sm:$0xff] %v753_v60  ;;  %v765_v63 = vld [vmem:[%s9013_s30 + $0x2d8] sm:$0xff] }
  0x93   : >> { %758 = vst [vmem:[%s9009_s27 + $0xd0] sm:$0xff] %v757_v61  ;;  %v769_v0 = vld [vmem:[%s9013_s30 + $0x2f2] sm:$0xff]  ;;  %762 = vst [vmem:[%s9009_s27 + $0xd8] sm:$0xff] %v761_v62  ;;  %v777_v2 = vld [vmem:[%s9013_s30 + $0x326] sm:$0xff] }
  0x94   : >> { %766 = vst [vmem:[%s9009_s27 + $0xe0] sm:$0xff] %v765_v63  ;;  %770 = vst [vmem:[%s9009_s27 + $0xe8] sm:$0xff] %v769_v0  ;;  %v773_v1 = vld [vmem:[%s9013_s30 + $0x30c] sm:$0xff]  ;;  %v781_v3 = vld [vmem:[%s9013_s30 + $0x340] sm:$0xff] }
  0x95   : >> { %774 = vst [vmem:[%s9009_s27 + $0xf0] sm:$0xff] %v773_v1  ;;  %778 = vst [vmem:[%s9009_s27 + $0xf8] sm:$0xff] %v777_v2  ;;  %v785_v4 = vld [vmem:[%s9013_s30 + $0x35a] sm:$0xff]  ;;  %v793_v6 = vld [vmem:[%s9013_s30 + $0x38e] sm:$0xff] }
  0x96   : >> { %782 = vst [vmem:[%s9009_s27 + $0x100] sm:$0xff] %v781_v3  ;;  %v789_v5 = vld [vmem:[%s9013_s30 + $0x374] sm:$0xff]  ;;  %786 = vst [vmem:[%s9009_s27 + $0x108] sm:$0xff] %v785_v4  ;;  %v797_v7 = vld [vmem:[%s9013_s30 + $0x3a8] sm:$0xff] }
  0x97   : >> { %790 = vst [vmem:[%s9009_s27 + $0x110] sm:$0xff] %v789_v5  ;;  %794 = vst [vmem:[%s9009_s27 + $0x118] sm:$0xff] %v793_v6  ;;  %v801_v8 = vld [vmem:[%s9013_s30 + $0x3c2] sm:$0xff]  ;;  %v809_v10 = vld [vmem:[%s9013_s30 + $0x3f6] sm:$0xff] }
  0x98   : >> { %v805_v9 = vld [vmem:[%s9013_s30 + $0x3dc] sm:$0xff]  ;;  %798 = vst [vmem:[%s9009_s27 + $0x120] sm:$0xff] %v797_v7  ;;  %802 = vst [vmem:[%s9009_s27 + $0x128] sm:$0xff] %v801_v8  ;;  %v813_v11 = vld [vmem:[%s9013_s30 + $0x410] sm:$0xff]  ;;  %649 = sbr.rel (!%p646_p7) target bundleno = 133 (0x85), region = 357 }
  0x99   : >> { %806 = vst [vmem:[%s9009_s27 + $0x130] sm:$0xff] %v805_v9  ;;  %v817_v12 = vld [vmem:[%s9013_s30 + $0x42a] sm:$0xff]  ;;  %810 = vst [vmem:[%s9009_s27 + $0x138] sm:$0xff] %v809_v10  ;;  %v825_v14 = vld [vmem:[%s9013_s30 + $0x45e] sm:$0xff] }
  0x9a   : >> { %814 = vst [vmem:[%s9009_s27 + $0x140] sm:$0xff] %v813_v11  ;;  %818 = vst [vmem:[%s9009_s27 + $0x148] sm:$0xff] %v817_v12  ;;  %v821_v13 = vld [vmem:[%s9013_s30 + $0x444] sm:$0xff]  ;;  %v829_v15 = vld [vmem:[%s9013_s30 + $0x478] sm:$0xff] }
  0x9b   : >> { %822 = vst [vmem:[%s9009_s27 + $0x150] sm:$0xff] %v821_v13  ;;  %826 = vst [vmem:[%s9009_s27 + $0x158] sm:$0xff] %v825_v14  ;;  %v833_v16 = vld [vmem:[%s9013_s30 + $0x492] sm:$0xff]  ;;  %v841_v18 = vld [vmem:[%s9013_s30 + $0x4c6] sm:$0xff] }
  0x9c   : >> { %830 = vst [vmem:[%s9009_s27 + $0x160] sm:$0xff] %v829_v15  ;;  %v837_v17 = vld [vmem:[%s9013_s30 + $0x4ac] sm:$0xff]  ;;  %834 = vst [vmem:[%s9009_s27 + $0x168] sm:$0xff] %v833_v16  ;;  %v845_v19 = vld [vmem:[%s9013_s30 + $0x4e0] sm:$0xff] }
  0x9d   : >> { %838 = vst [vmem:[%s9009_s27 + $0x170] sm:$0xff] %v837_v17  ;;  %842 = vst [vmem:[%s9009_s27 + $0x178] sm:$0xff] %v841_v18  ;;  %v847_v20 = vld [vmem:[%s9013_s30 + $0x4e8] sm:$0xff]  ;;  %s11359_s30 = smov %s9589_s10 }
  0x9e   : >> { %846 = vst [vmem:[%s9009_s27 + $0x180] sm:$0xff] %v845_v19  ;;  %848 = vst [vmem:[%s9009_s27 + $0x188] sm:$0xff] %v847_v20  ;;  %s11358_s27 = smov %s9592_s11 }
  0x9f PF: > { %s9658_s21 = sand.u32 1, %s640_s26   ;;  %s8091_s24 = sshll.u32 %s9507_s20, 8 }
  0xa0   : > { %s860_s25 = sshra.s32 %s8091_s24, 4  ;;  %p7857_p8 = scmp.le.s32.totalorder %s9658_s21, 0 }
  0xa1   : > { %s9662_s14 = scalar_lea.vmem %s9177_s5, %s860_s25   ;;  %s9665_s11 = scalar_lea.vmem %s9181_s8, %s860_s25 [#allocation2]  }
  0xa2   : > { %7747 = sbr.rel (%p7857_p8) target bundleno = 195 (0xc3), region = 362  ;;  %s11361_s27 = smov (!%p7857_p8), %s9665_s11 }
  0xa3   : > { %s11362_s30 = smov (!%p7857_p8), %s9662_s14  ;;  %s9674_s6 = smov (!%p7857_p8), 0  }
  0xa4   : > { %s9676_s12 = smov (!%p7857_p8), 0  }
  0xa9 LB: >> { %v876_v21 = vld [vmem:[%s9029_s30] sm:$0xff]  ;;  %v880_v23 = vld [vmem:[%s9029_s30 + $0x34] sm:$0xff]  ;;  %s974_s26 = sadd.s32 1, %s9033_s6  ;;  %v884_v25 = vld [vmem:[%s9029_s30 + $0x68] sm:$0xff]  ;;  %s870_s12 = sadd.s32 1, %s9037_s12   ;;  %s9037_s12 = sphi %s9676_s12, %s870_s12   ;;  %s9033_s6 = sphi %s9674_s6, %s11365_s6   ;;  %s9029_s30 = sphi %s11362_s30, %s11364_s30   ;;  %s9025_s27 = sphi %s11361_s27, %s11363_s27  }
  0xaa   : >> { %v878_v22 = vld [vmem:[%s9029_s30 + $0x1a] sm:$0xff]  ;;  %877 = vst [vmem:[%s9025_s27] sm:$0xff] %v876_v21  ;;  %881 = vst [vmem:[%s9025_s27 + $0x10] sm:$0xff] %v880_v23  ;;  %v882_v24 = vld [vmem:[%s9029_s30 + $0x4e] sm:$0xff]  ;;  %p975_p9 = scmp.ge.s32.totalorder %s974_s26, %s9658_s21  ;;  %p869_p10 = scmp.ge.s32.totalorder %s870_s12, %s9658_s21 }
  0xab   : >> { %879 = vst [vmem:[%s9025_s27 + $0x8] sm:$0xff] %v878_v22  ;;  %v886_v26 = vld [vmem:[%s9029_s30 + $0x82] sm:$0xff]  ;;  %883 = vst [vmem:[%s9025_s27 + $0x18] sm:$0xff] %v882_v24  ;;  %v890_v28 = vld [vmem:[%s9029_s30 + $0xb6] sm:$0xff] }
  0xac   : >> { %885 = vst [vmem:[%s9025_s27 + $0x20] sm:$0xff] %v884_v25  ;;  %887 = vst [vmem:[%s9025_s27 + $0x28] sm:$0xff] %v886_v26  ;;  %v888_v27 = vld [vmem:[%s9029_s30 + $0x9c] sm:$0xff]  ;;  %v892_v29 = vld [vmem:[%s9029_s30 + $0xd0] sm:$0xff]  ;;  %s11388_s26 = smov (%p975_p9, %s974_s26), 0 }
  0xad   : >> { %889 = vst [vmem:[%s9025_s27 + $0x30] sm:$0xff] %v888_v27  ;;  %891 = vst [vmem:[%s9025_s27 + $0x38] sm:$0xff] %v890_v28  ;;  %v894_v30 = vld [vmem:[%s9029_s30 + $0xea] sm:$0xff]  ;;  %v898_v32 = vld [vmem:[%s9029_s30 + $0x11e] sm:$0xff]  ;;  %s7858_s20 = sshll.u32 %s11388_s26, 3  ;;  %s11365_s6 = smov %s11388_s26 }
  0xae   : >> { %893 = vst [vmem:[%s9025_s27 + $0x40] sm:$0xff] %v892_v29  ;;  %v896_v31 = vld [vmem:[%s9029_s30 + $0x104] sm:$0xff]  ;;  %895 = vst [vmem:[%s9025_s27 + $0x48] sm:$0xff] %v894_v30  ;;  %v900_v33 = vld [vmem:[%s9029_s30 + $0x138] sm:$0xff]  ;;  %s9732_s13 = scalar_lea.vmem %s9662_s14, %s7858_s20   ;;  %s9735_s10 = scalar_lea.vmem %s9665_s11, %s7858_s20 [#allocation2]  }
  0xaf   : >> { %897 = vst [vmem:[%s9025_s27 + $0x50] sm:$0xff] %v896_v31  ;;  %899 = vst [vmem:[%s9025_s27 + $0x58] sm:$0xff] %v898_v32  ;;  %v902_v34 = vld [vmem:[%s9029_s30 + $0x152] sm:$0xff]  ;;  %v906_v36 = vld [vmem:[%s9029_s30 + $0x186] sm:$0xff] }
  0xb0   : >> { %v904_v35 = vld [vmem:[%s9029_s30 + $0x16c] sm:$0xff]  ;;  %901 = vst [vmem:[%s9025_s27 + $0x60] sm:$0xff] %v900_v33  ;;  %903 = vst [vmem:[%s9025_s27 + $0x68] sm:$0xff] %v902_v34  ;;  %v908_v37 = vld [vmem:[%s9029_s30 + $0x1a0] sm:$0xff] }
  0xb1   : >> { %905 = vst [vmem:[%s9025_s27 + $0x70] sm:$0xff] %v904_v35  ;;  %v910_v38 = vld [vmem:[%s9029_s30 + $0x1ba] sm:$0xff]  ;;  %907 = vst [vmem:[%s9025_s27 + $0x78] sm:$0xff] %v906_v36  ;;  %v914_v40 = vld [vmem:[%s9029_s30 + $0x1ee] sm:$0xff] }
  0xb2   : >> { %909 = vst [vmem:[%s9025_s27 + $0x80] sm:$0xff] %v908_v37  ;;  %911 = vst [vmem:[%s9025_s27 + $0x88] sm:$0xff] %v910_v38  ;;  %v912_v39 = vld [vmem:[%s9029_s30 + $0x1d4] sm:$0xff]  ;;  %v916_v41 = vld [vmem:[%s9029_s30 + $0x208] sm:$0xff] }
  0xb3   : >> { %913 = vst [vmem:[%s9025_s27 + $0x90] sm:$0xff] %v912_v39  ;;  %915 = vst [vmem:[%s9025_s27 + $0x98] sm:$0xff] %v914_v40  ;;  %v918_v42 = vld [vmem:[%s9029_s30 + $0x222] sm:$0xff]  ;;  %v922_v44 = vld [vmem:[%s9029_s30 + $0x256] sm:$0xff] }
  0xb4   : >> { %917 = vst [vmem:[%s9025_s27 + $0xa0] sm:$0xff] %v916_v41  ;;  %v920_v43 = vld [vmem:[%s9029_s30 + $0x23c] sm:$0xff]  ;;  %919 = vst [vmem:[%s9025_s27 + $0xa8] sm:$0xff] %v918_v42  ;;  %v924_v45 = vld [vmem:[%s9029_s30 + $0x270] sm:$0xff] }
  0xb5   : >> { %921 = vst [vmem:[%s9025_s27 + $0xb0] sm:$0xff] %v920_v43  ;;  %923 = vst [vmem:[%s9025_s27 + $0xb8] sm:$0xff] %v922_v44  ;;  %v926_v46 = vld [vmem:[%s9029_s30 + $0x28a] sm:$0xff]  ;;  %v930_v48 = vld [vmem:[%s9029_s30 + $0x2be] sm:$0xff] }
  0xb6   : >> { %v928_v47 = vld [vmem:[%s9029_s30 + $0x2a4] sm:$0xff]  ;;  %925 = vst [vmem:[%s9025_s27 + $0xc0] sm:$0xff] %v924_v45  ;;  %927 = vst [vmem:[%s9025_s27 + $0xc8] sm:$0xff] %v926_v46  ;;  %v932_v49 = vld [vmem:[%s9029_s30 + $0x2d8] sm:$0xff] }
  0xb7   : >> { %929 = vst [vmem:[%s9025_s27 + $0xd0] sm:$0xff] %v928_v47  ;;  %v934_v50 = vld [vmem:[%s9029_s30 + $0x2f2] sm:$0xff]  ;;  %931 = vst [vmem:[%s9025_s27 + $0xd8] sm:$0xff] %v930_v48  ;;  %v938_v52 = vld [vmem:[%s9029_s30 + $0x326] sm:$0xff] }
  0xb8   : >> { %933 = vst [vmem:[%s9025_s27 + $0xe0] sm:$0xff] %v932_v49  ;;  %935 = vst [vmem:[%s9025_s27 + $0xe8] sm:$0xff] %v934_v50  ;;  %v936_v51 = vld [vmem:[%s9029_s30 + $0x30c] sm:$0xff]  ;;  %v940_v53 = vld [vmem:[%s9029_s30 + $0x340] sm:$0xff] }
  0xb9   : >> { %937 = vst [vmem:[%s9025_s27 + $0xf0] sm:$0xff] %v936_v51  ;;  %939 = vst [vmem:[%s9025_s27 + $0xf8] sm:$0xff] %v938_v52  ;;  %v942_v54 = vld [vmem:[%s9029_s30 + $0x35a] sm:$0xff]  ;;  %v946_v56 = vld [vmem:[%s9029_s30 + $0x38e] sm:$0xff] }
  0xba   : >> { %941 = vst [vmem:[%s9025_s27 + $0x100] sm:$0xff] %v940_v53  ;;  %v944_v55 = vld [vmem:[%s9029_s30 + $0x374] sm:$0xff]  ;;  %943 = vst [vmem:[%s9025_s27 + $0x108] sm:$0xff] %v942_v54  ;;  %v948_v57 = vld [vmem:[%s9029_s30 + $0x3a8] sm:$0xff] }
  0xbb   : >> { %945 = vst [vmem:[%s9025_s27 + $0x110] sm:$0xff] %v944_v55  ;;  %947 = vst [vmem:[%s9025_s27 + $0x118] sm:$0xff] %v946_v56  ;;  %v950_v58 = vld [vmem:[%s9029_s30 + $0x3c2] sm:$0xff]  ;;  %v954_v60 = vld [vmem:[%s9029_s30 + $0x3f6] sm:$0xff] }
  0xbc   : >> { %v952_v59 = vld [vmem:[%s9029_s30 + $0x3dc] sm:$0xff]  ;;  %949 = vst [vmem:[%s9025_s27 + $0x120] sm:$0xff] %v948_v57  ;;  %951 = vst [vmem:[%s9025_s27 + $0x128] sm:$0xff] %v950_v58  ;;  %v956_v61 = vld [vmem:[%s9029_s30 + $0x410] sm:$0xff]  ;;  %872 = sbr.rel (!%p869_p10) target bundleno = 169 (0xa9), region = 368 }
  0xbd   : >> { %953 = vst [vmem:[%s9025_s27 + $0x130] sm:$0xff] %v952_v59  ;;  %v958_v62 = vld [vmem:[%s9029_s30 + $0x42a] sm:$0xff]  ;;  %955 = vst [vmem:[%s9025_s27 + $0x138] sm:$0xff] %v954_v60  ;;  %v962_v0 = vld [vmem:[%s9029_s30 + $0x45e] sm:$0xff] }
  0xbe   : >> { %957 = vst [vmem:[%s9025_s27 + $0x140] sm:$0xff] %v956_v61  ;;  %959 = vst [vmem:[%s9025_s27 + $0x148] sm:$0xff] %v958_v62  ;;  %v960_v63 = vld [vmem:[%s9029_s30 + $0x444] sm:$0xff]  ;;  %v964_v1 = vld [vmem:[%s9029_s30 + $0x478] sm:$0xff] }
  0xbf   : >> { %961 = vst [vmem:[%s9025_s27 + $0x150] sm:$0xff] %v960_v63  ;;  %963 = vst [vmem:[%s9025_s27 + $0x158] sm:$0xff] %v962_v0  ;;  %v966_v2 = vld [vmem:[%s9029_s30 + $0x492] sm:$0xff]  ;;  %v970_v4 = vld [vmem:[%s9029_s30 + $0x4c6] sm:$0xff] }
  0xc0   : >> { %965 = vst [vmem:[%s9025_s27 + $0x160] sm:$0xff] %v964_v1  ;;  %v968_v3 = vld [vmem:[%s9029_s30 + $0x4ac] sm:$0xff]  ;;  %967 = vst [vmem:[%s9025_s27 + $0x168] sm:$0xff] %v966_v2  ;;  %v972_v5 = vld [vmem:[%s9029_s30 + $0x4e0] sm:$0xff]  ;;  %s11364_s30 = smov %s9732_s13 }
  0xc1   : >> { %969 = vst [vmem:[%s9025_s27 + $0x170] sm:$0xff] %v968_v3  ;;  %971 = vst [vmem:[%s9025_s27 + $0x178] sm:$0xff] %v970_v4 }
  0xc2   : >> { %973 = vst [vmem:[%s9025_s27 + $0x180] sm:$0xff] %v972_v5  ;;  %s11363_s27 = smov %s9735_s10 }
  0xc3 PF: > { %s9103_s24 = smov 0  }
  0xc4   : > { %s9810_s25 = sshllo.u32 %s9103_s24, %s9185_s9 }
  0xc5   : > { %v990_v6 = vld [vmem:[%s9500_s28] sm:%s9810_s25]  ;;  %v994_v8 = vld [vmem:[%s9500_s28 + $0x34] sm:%s9810_s25] }
  0xc6   : > { %v992_v7 = vld [vmem:[%s9500_s28 + $0x1a] sm:%s9810_s25]  ;;  %991 = vst [vmem:[%s9503_s29] sm:%s9810_s25] %v990_v6 }
  0xc7   : > { %993 = vst [vmem:[%s9503_s29 + $0x8] sm:%s9810_s25] %v992_v7  ;;  %v996_v9 = vld [vmem:[%s9500_s28 + $0x4e] sm:%s9810_s25] }
  0xc8   : > { %995 = vst [vmem:[%s9503_s29 + $0x10] sm:%s9810_s25] %v994_v8  ;;  %997 = vst [vmem:[%s9503_s29 + $0x18] sm:%s9810_s25] %v996_v9 }
  0xc9   : > { %v998_v10 = vld [vmem:[%s9500_s28 + $0x68] sm:%s9810_s25]  ;;  %v1002_v12 = vld [vmem:[%s9500_s28 + $0x9c] sm:%s9810_s25] }
  0xca   : > { %v1000_v11 = vld [vmem:[%s9500_s28 + $0x82] sm:%s9810_s25]  ;;  %999 = vst [vmem:[%s9503_s29 + $0x20] sm:%s9810_s25] %v998_v10 }
  0xcb   : > { %1001 = vst [vmem:[%s9503_s29 + $0x28] sm:%s9810_s25] %v1000_v11  ;;  %v1004_v13 = vld [vmem:[%s9500_s28 + $0xb6] sm:%s9810_s25] }
  0xcc   : > { %1003 = vst [vmem:[%s9503_s29 + $0x30] sm:%s9810_s25] %v1002_v12  ;;  %1005 = vst [vmem:[%s9503_s29 + $0x38] sm:%s9810_s25] %v1004_v13 }
  0xcd   : > { %v1006_v14 = vld [vmem:[%s9500_s28 + $0xd0] sm:%s9810_s25]  ;;  %v1010_v16 = vld [vmem:[%s9500_s28 + $0x104] sm:%s9810_s25] }
  0xce   : > { %v1008_v15 = vld [vmem:[%s9500_s28 + $0xea] sm:%s9810_s25]  ;;  %1007 = vst [vmem:[%s9503_s29 + $0x40] sm:%s9810_s25] %v1006_v14 }
  0xcf   : > { %1009 = vst [vmem:[%s9503_s29 + $0x48] sm:%s9810_s25] %v1008_v15  ;;  %v1012_v17 = vld [vmem:[%s9500_s28 + $0x11e] sm:%s9810_s25] }
  0xd0   : > { %1011 = vst [vmem:[%s9503_s29 + $0x50] sm:%s9810_s25] %v1010_v16  ;;  %1013 = vst [vmem:[%s9503_s29 + $0x58] sm:%s9810_s25] %v1012_v17 }
  0xd1   : > { %v1014_v18 = vld [vmem:[%s9500_s28 + $0x138] sm:%s9810_s25]  ;;  %v1018_v20 = vld [vmem:[%s9500_s28 + $0x16c] sm:%s9810_s25] }
  0xd2   : > { %v1016_v19 = vld [vmem:[%s9500_s28 + $0x152] sm:%s9810_s25]  ;;  %1015 = vst [vmem:[%s9503_s29 + $0x60] sm:%s9810_s25] %v1014_v18 }
  0xd3   : > { %1017 = vst [vmem:[%s9503_s29 + $0x68] sm:%s9810_s25] %v1016_v19  ;;  %v1020_v21 = vld [vmem:[%s9500_s28 + $0x186] sm:%s9810_s25] }
  0xd4   : > { %1019 = vst [vmem:[%s9503_s29 + $0x70] sm:%s9810_s25] %v1018_v20  ;;  %1021 = vst [vmem:[%s9503_s29 + $0x78] sm:%s9810_s25] %v1020_v21 }
  0xd5   : > { %v1022_v22 = vld [vmem:[%s9500_s28 + $0x1a0] sm:%s9810_s25]  ;;  %v1026_v24 = vld [vmem:[%s9500_s28 + $0x1d4] sm:%s9810_s25] }
  0xd6   : > { %v1024_v23 = vld [vmem:[%s9500_s28 + $0x1ba] sm:%s9810_s25]  ;;  %1023 = vst [vmem:[%s9503_s29 + $0x80] sm:%s9810_s25] %v1022_v22 }
  0xd7   : > { %1025 = vst [vmem:[%s9503_s29 + $0x88] sm:%s9810_s25] %v1024_v23  ;;  %v1028_v25 = vld [vmem:[%s9500_s28 + $0x1ee] sm:%s9810_s25] }
  0xd8   : > { %1027 = vst [vmem:[%s9503_s29 + $0x90] sm:%s9810_s25] %v1026_v24  ;;  %1029 = vst [vmem:[%s9503_s29 + $0x98] sm:%s9810_s25] %v1028_v25 }
  0xd9   : > { %v1030_v26 = vld [vmem:[%s9500_s28 + $0x208] sm:%s9810_s25]  ;;  %v1034_v28 = vld [vmem:[%s9500_s28 + $0x23c] sm:%s9810_s25] }
  0xda   : > { %v1032_v27 = vld [vmem:[%s9500_s28 + $0x222] sm:%s9810_s25]  ;;  %1031 = vst [vmem:[%s9503_s29 + $0xa0] sm:%s9810_s25] %v1030_v26 }
  0xdb   : > { %1033 = vst [vmem:[%s9503_s29 + $0xa8] sm:%s9810_s25] %v1032_v27  ;;  %v1036_v29 = vld [vmem:[%s9500_s28 + $0x256] sm:%s9810_s25] }
  0xdc   : > { %1035 = vst [vmem:[%s9503_s29 + $0xb0] sm:%s9810_s25] %v1034_v28  ;;  %1037 = vst [vmem:[%s9503_s29 + $0xb8] sm:%s9810_s25] %v1036_v29 }
  0xdd   : > { %v1038_v30 = vld [vmem:[%s9500_s28 + $0x270] sm:%s9810_s25]  ;;  %v1042_v32 = vld [vmem:[%s9500_s28 + $0x2a4] sm:%s9810_s25] }
  0xde   : > { %v1040_v31 = vld [vmem:[%s9500_s28 + $0x28a] sm:%s9810_s25]  ;;  %1039 = vst [vmem:[%s9503_s29 + $0xc0] sm:%s9810_s25] %v1038_v30 }
  0xdf   : > { %1041 = vst [vmem:[%s9503_s29 + $0xc8] sm:%s9810_s25] %v1040_v31  ;;  %v1044_v33 = vld [vmem:[%s9500_s28 + $0x2be] sm:%s9810_s25] }
  0xe0   : > { %1043 = vst [vmem:[%s9503_s29 + $0xd0] sm:%s9810_s25] %v1042_v32  ;;  %1045 = vst [vmem:[%s9503_s29 + $0xd8] sm:%s9810_s25] %v1044_v33 }
  0xe1   : > { %v1046_v34 = vld [vmem:[%s9500_s28 + $0x2d8] sm:%s9810_s25]  ;;  %v1050_v36 = vld [vmem:[%s9500_s28 + $0x30c] sm:%s9810_s25] }
  0xe2   : > { %v1048_v35 = vld [vmem:[%s9500_s28 + $0x2f2] sm:%s9810_s25]  ;;  %1047 = vst [vmem:[%s9503_s29 + $0xe0] sm:%s9810_s25] %v1046_v34 }
  0xe3   : > { %1049 = vst [vmem:[%s9503_s29 + $0xe8] sm:%s9810_s25] %v1048_v35  ;;  %v1052_v37 = vld [vmem:[%s9500_s28 + $0x326] sm:%s9810_s25] }
  0xe4   : > { %1051 = vst [vmem:[%s9503_s29 + $0xf0] sm:%s9810_s25] %v1050_v36  ;;  %1053 = vst [vmem:[%s9503_s29 + $0xf8] sm:%s9810_s25] %v1052_v37 }
  0xe5   : > { %v1054_v38 = vld [vmem:[%s9500_s28 + $0x340] sm:%s9810_s25]  ;;  %v1058_v40 = vld [vmem:[%s9500_s28 + $0x374] sm:%s9810_s25] }
  0xe6   : > { %v1056_v39 = vld [vmem:[%s9500_s28 + $0x35a] sm:%s9810_s25]  ;;  %1055 = vst [vmem:[%s9503_s29 + $0x100] sm:%s9810_s25] %v1054_v38 }
  0xe7   : > { %1057 = vst [vmem:[%s9503_s29 + $0x108] sm:%s9810_s25] %v1056_v39  ;;  %v1060_v41 = vld [vmem:[%s9500_s28 + $0x38e] sm:%s9810_s25] }
  0xe8   : > { %1059 = vst [vmem:[%s9503_s29 + $0x110] sm:%s9810_s25] %v1058_v40  ;;  %1061 = vst [vmem:[%s9503_s29 + $0x118] sm:%s9810_s25] %v1060_v41 }
  0xe9   : > { %v1062_v42 = vld [vmem:[%s9500_s28 + $0x3a8] sm:%s9810_s25]  ;;  %v1066_v44 = vld [vmem:[%s9500_s28 + $0x3dc] sm:%s9810_s25] }
  0xea   : > { %v1064_v43 = vld [vmem:[%s9500_s28 + $0x3c2] sm:%s9810_s25]  ;;  %1063 = vst [vmem:[%s9503_s29 + $0x120] sm:%s9810_s25] %v1062_v42 }
  0xeb   : > { %1065 = vst [vmem:[%s9503_s29 + $0x128] sm:%s9810_s25] %v1064_v43  ;;  %v1068_v45 = vld [vmem:[%s9500_s28 + $0x3f6] sm:%s9810_s25] }
  0xec   : > { %1067 = vst [vmem:[%s9503_s29 + $0x130] sm:%s9810_s25] %v1066_v44  ;;  %1069 = vst [vmem:[%s9503_s29 + $0x138] sm:%s9810_s25] %v1068_v45 }
  0xed   : > { %v1070_v46 = vld [vmem:[%s9500_s28 + $0x410] sm:%s9810_s25]  ;;  %v1074_v48 = vld [vmem:[%s9500_s28 + $0x444] sm:%s9810_s25] }
  0xee   : > { %v1072_v47 = vld [vmem:[%s9500_s28 + $0x42a] sm:%s9810_s25]  ;;  %1071 = vst [vmem:[%s9503_s29 + $0x140] sm:%s9810_s25] %v1070_v46 }
  0xef   : > { %1073 = vst [vmem:[%s9503_s29 + $0x148] sm:%s9810_s25] %v1072_v47  ;;  %v1076_v49 = vld [vmem:[%s9500_s28 + $0x45e] sm:%s9810_s25] }
  0xf0   : > { %1075 = vst [vmem:[%s9503_s29 + $0x150] sm:%s9810_s25] %v1074_v48  ;;  %1077 = vst [vmem:[%s9503_s29 + $0x158] sm:%s9810_s25] %v1076_v49 }
  0xf1   : > { %v1078_v50 = vld [vmem:[%s9500_s28 + $0x478] sm:%s9810_s25]  ;;  %v1082_v52 = vld [vmem:[%s9500_s28 + $0x4ac] sm:%s9810_s25] }
  0xf2   : > { %v1080_v51 = vld [vmem:[%s9500_s28 + $0x492] sm:%s9810_s25]  ;;  %1079 = vst [vmem:[%s9503_s29 + $0x160] sm:%s9810_s25] %v1078_v50 }
  0xf3   : > { %1081 = vst [vmem:[%s9503_s29 + $0x168] sm:%s9810_s25] %v1080_v51  ;;  %v1084_v53 = vld [vmem:[%s9500_s28 + $0x4c6] sm:%s9810_s25] }
  0xf4   : > { %1083 = vst [vmem:[%s9503_s29 + $0x170] sm:%s9810_s25] %v1082_v52  ;;  %1085 = vst [vmem:[%s9503_s29 + $0x178] sm:%s9810_s25] %v1084_v53 }
  0xf5   : > { %v1086_v54 = vld [vmem:[%s9500_s28 + $0x4e0] sm:%s9810_s25] }
  0xf6   : > { %1087 = vst [vmem:[%s9503_s29 + $0x180] sm:%s9810_s25] %v1086_v54 }
  0xf7 PF: > { %p7860_p11 = scmp.ge.u32.totalorder %s9179_s7, 8 }
  0xf8   : > { %s9104_s9 = smov (!%p7860_p11), 0  }
  0xf9   : > { %178 = sbr.rel (%p7860_p11) target bundleno = 300 (0x12c), region = 44  ;;  %s10010_s28 = sshllo.u32 (!%p7860_p11), %s9104_s9, %s9179_s7 }
  0xfa   : > { %v188_v55 = vld [vmem:[%s9177_s5] sm:%s10010_s28] (!%p7860_p11)  ;;  %v192_v57 = vld [vmem:[%s9177_s5 + $0x34] sm:%s10010_s28] (!%p7860_p11) }
  0xfb   : > { %v190_v56 = vld [vmem:[%s9177_s5 + $0x1a] sm:%s10010_s28] (!%p7860_p11)  ;;  %189 = vst [vmem:[%s9181_s8] sm:%s10010_s28] (!%p7860_p11), %v188_v55 }
  0xfc   : > { %191 = vst [vmem:[%s9181_s8 + $0x8] sm:%s10010_s28] (!%p7860_p11), %v190_v56  ;;  %v194_v58 = vld [vmem:[%s9177_s5 + $0x4e] sm:%s10010_s28] (!%p7860_p11) }
  0xfd   : > { %193 = vst [vmem:[%s9181_s8 + $0x10] sm:%s10010_s28] (!%p7860_p11), %v192_v57  ;;  %195 = vst [vmem:[%s9181_s8 + $0x18] sm:%s10010_s28] (!%p7860_p11), %v194_v58 }
  0xfe   : > { %v196_v59 = vld [vmem:[%s9177_s5 + $0x68] sm:%s10010_s28] (!%p7860_p11)  ;;  %v200_v61 = vld [vmem:[%s9177_s5 + $0x9c] sm:%s10010_s28] (!%p7860_p11) }
  0xff   : > { %v198_v60 = vld [vmem:[%s9177_s5 + $0x82] sm:%s10010_s28] (!%p7860_p11)  ;;  %197 = vst [vmem:[%s9181_s8 + $0x20] sm:%s10010_s28] (!%p7860_p11), %v196_v59 }
 0x100   : > { %199 = vst [vmem:[%s9181_s8 + $0x28] sm:%s10010_s28] %v198_v60  ;;  %v202_v62 = vld [vmem:[%s9177_s5 + $0xb6] sm:%s10010_s28] }
 0x101   : > { %201 = vst [vmem:[%s9181_s8 + $0x30] sm:%s10010_s28] %v200_v61  ;;  %203 = vst [vmem:[%s9181_s8 + $0x38] sm:%s10010_s28] %v202_v62 }
 0x102   : > { %v204_v63 = vld [vmem:[%s9177_s5 + $0xd0] sm:%s10010_s28]  ;;  %v208_v1 = vld [vmem:[%s9177_s5 + $0x104] sm:%s10010_s28] }
 0x103   : > { %v206_v0 = vld [vmem:[%s9177_s5 + $0xea] sm:%s10010_s28]  ;;  %205 = vst [vmem:[%s9181_s8 + $0x40] sm:%s10010_s28] %v204_v63 }
 0x104   : > { %207 = vst [vmem:[%s9181_s8 + $0x48] sm:%s10010_s28] %v206_v0  ;;  %v210_v2 = vld [vmem:[%s9177_s5 + $0x11e] sm:%s10010_s28] }
 0x105   : > { %209 = vst [vmem:[%s9181_s8 + $0x50] sm:%s10010_s28] %v208_v1  ;;  %211 = vst [vmem:[%s9181_s8 + $0x58] sm:%s10010_s28] %v210_v2 }
 0x106   : > { %v212_v3 = vld [vmem:[%s9177_s5 + $0x138] sm:%s10010_s28]  ;;  %v216_v5 = vld [vmem:[%s9177_s5 + $0x16c] sm:%s10010_s28] }
 0x107   : > { %v214_v4 = vld [vmem:[%s9177_s5 + $0x152] sm:%s10010_s28]  ;;  %213 = vst [vmem:[%s9181_s8 + $0x60] sm:%s10010_s28] %v212_v3 }
 0x108   : > { %215 = vst [vmem:[%s9181_s8 + $0x68] sm:%s10010_s28] %v214_v4  ;;  %v218_v6 = vld [vmem:[%s9177_s5 + $0x186] sm:%s10010_s28] }
 0x109   : > { %217 = vst [vmem:[%s9181_s8 + $0x70] sm:%s10010_s28] %v216_v5  ;;  %219 = vst [vmem:[%s9181_s8 + $0x78] sm:%s10010_s28] %v218_v6 }
 0x10a   : > { %v220_v7 = vld [vmem:[%s9177_s5 + $0x1a0] sm:%s10010_s28]  ;;  %v224_v9 = vld [vmem:[%s9177_s5 + $0x1d4] sm:%s10010_s28] }
 0x10b   : > { %v222_v8 = vld [vmem:[%s9177_s5 + $0x1ba] sm:%s10010_s28]  ;;  %221 = vst [vmem:[%s9181_s8 + $0x80] sm:%s10010_s28] %v220_v7 }
 0x10c   : > { %223 = vst [vmem:[%s9181_s8 + $0x88] sm:%s10010_s28] %v222_v8  ;;  %v226_v10 = vld [vmem:[%s9177_s5 + $0x1ee] sm:%s10010_s28] }
 0x10d   : > { %225 = vst [vmem:[%s9181_s8 + $0x90] sm:%s10010_s28] %v224_v9  ;;  %227 = vst [vmem:[%s9181_s8 + $0x98] sm:%s10010_s28] %v226_v10 }
 0x10e   : > { %v228_v11 = vld [vmem:[%s9177_s5 + $0x208] sm:%s10010_s28]  ;;  %v232_v13 = vld [vmem:[%s9177_s5 + $0x23c] sm:%s10010_s28] }
 0x10f   : > { %v230_v12 = vld [vmem:[%s9177_s5 + $0x222] sm:%s10010_s28]  ;;  %229 = vst [vmem:[%s9181_s8 + $0xa0] sm:%s10010_s28] %v228_v11 }
 0x110   : > { %231 = vst [vmem:[%s9181_s8 + $0xa8] sm:%s10010_s28] %v230_v12  ;;  %v234_v14 = vld [vmem:[%s9177_s5 + $0x256] sm:%s10010_s28] }
 0x111   : > { %233 = vst [vmem:[%s9181_s8 + $0xb0] sm:%s10010_s28] %v232_v13  ;;  %235 = vst [vmem:[%s9181_s8 + $0xb8] sm:%s10010_s28] %v234_v14 }
 0x112   : > { %v236_v15 = vld [vmem:[%s9177_s5 + $0x270] sm:%s10010_s28]  ;;  %v240_v17 = vld [vmem:[%s9177_s5 + $0x2a4] sm:%s10010_s28] }
 0x113   : > { %v238_v16 = vld [vmem:[%s9177_s5 + $0x28a] sm:%s10010_s28]  ;;  %237 = vst [vmem:[%s9181_s8 + $0xc0] sm:%s10010_s28] %v236_v15 }
 0x114   : > { %239 = vst [vmem:[%s9181_s8 + $0xc8] sm:%s10010_s28] %v238_v16  ;;  %v242_v18 = vld [vmem:[%s9177_s5 + $0x2be] sm:%s10010_s28] }
 0x115   : > { %241 = vst [vmem:[%s9181_s8 + $0xd0] sm:%s10010_s28] %v240_v17  ;;  %243 = vst [vmem:[%s9181_s8 + $0xd8] sm:%s10010_s28] %v242_v18 }
 0x116   : > { %v244_v19 = vld [vmem:[%s9177_s5 + $0x2d8] sm:%s10010_s28]  ;;  %v248_v21 = vld [vmem:[%s9177_s5 + $0x30c] sm:%s10010_s28] }
 0x117   : > { %v246_v20 = vld [vmem:[%s9177_s5 + $0x2f2] sm:%s10010_s28]  ;;  %245 = vst [vmem:[%s9181_s8 + $0xe0] sm:%s10010_s28] %v244_v19 }
 0x118   : > { %247 = vst [vmem:[%s9181_s8 + $0xe8] sm:%s10010_s28] %v246_v20  ;;  %v250_v22 = vld [vmem:[%s9177_s5 + $0x326] sm:%s10010_s28] }
 0x119   : > { %249 = vst [vmem:[%s9181_s8 + $0xf0] sm:%s10010_s28] %v248_v21  ;;  %251 = vst [vmem:[%s9181_s8 + $0xf8] sm:%s10010_s28] %v250_v22 }
 0x11a   : > { %v252_v23 = vld [vmem:[%s9177_s5 + $0x340] sm:%s10010_s28]  ;;  %v256_v25 = vld [vmem:[%s9177_s5 + $0x374] sm:%s10010_s28] }
 0x11b   : > { %v254_v24 = vld [vmem:[%s9177_s5 + $0x35a] sm:%s10010_s28]  ;;  %253 = vst [vmem:[%s9181_s8 + $0x100] sm:%s10010_s28] %v252_v23 }
 0x11c   : > { %255 = vst [vmem:[%s9181_s8 + $0x108] sm:%s10010_s28] %v254_v24  ;;  %v258_v26 = vld [vmem:[%s9177_s5 + $0x38e] sm:%s10010_s28] }
 0x11d   : > { %257 = vst [vmem:[%s9181_s8 + $0x110] sm:%s10010_s28] %v256_v25  ;;  %259 = vst [vmem:[%s9181_s8 + $0x118] sm:%s10010_s28] %v258_v26 }
 0x11e   : > { %v260_v27 = vld [vmem:[%s9177_s5 + $0x3a8] sm:%s10010_s28]  ;;  %v264_v29 = vld [vmem:[%s9177_s5 + $0x3dc] sm:%s10010_s28] }
 0x11f   : > { %v262_v28 = vld [vmem:[%s9177_s5 + $0x3c2] sm:%s10010_s28]  ;;  %261 = vst [vmem:[%s9181_s8 + $0x120] sm:%s10010_s28] %v260_v27 }
 0x120   : > { %263 = vst [vmem:[%s9181_s8 + $0x128] sm:%s10010_s28] %v262_v28  ;;  %v266_v30 = vld [vmem:[%s9177_s5 + $0x3f6] sm:%s10010_s28] }
 0x121   : > { %265 = vst [vmem:[%s9181_s8 + $0x130] sm:%s10010_s28] %v264_v29  ;;  %267 = vst [vmem:[%s9181_s8 + $0x138] sm:%s10010_s28] %v266_v30 }
 0x122   : > { %v268_v31 = vld [vmem:[%s9177_s5 + $0x410] sm:%s10010_s28]  ;;  %v272_v33 = vld [vmem:[%s9177_s5 + $0x444] sm:%s10010_s28] }
 0x123   : > { %v270_v32 = vld [vmem:[%s9177_s5 + $0x42a] sm:%s10010_s28]  ;;  %269 = vst [vmem:[%s9181_s8 + $0x140] sm:%s10010_s28] %v268_v31 }
 0x124   : > { %271 = vst [vmem:[%s9181_s8 + $0x148] sm:%s10010_s28] %v270_v32  ;;  %v274_v34 = vld [vmem:[%s9177_s5 + $0x45e] sm:%s10010_s28] }
 0x125   : > { %273 = vst [vmem:[%s9181_s8 + $0x150] sm:%s10010_s28] %v272_v33  ;;  %275 = vst [vmem:[%s9181_s8 + $0x158] sm:%s10010_s28] %v274_v34 }
 0x126   : > { %v276_v35 = vld [vmem:[%s9177_s5 + $0x478] sm:%s10010_s28]  ;;  %v280_v37 = vld [vmem:[%s9177_s5 + $0x4ac] sm:%s10010_s28] }
 0x127   : > { %v278_v36 = vld [vmem:[%s9177_s5 + $0x492] sm:%s10010_s28]  ;;  %277 = vst [vmem:[%s9181_s8 + $0x160] sm:%s10010_s28] %v276_v35 }
 0x128   : > { %279 = vst [vmem:[%s9181_s8 + $0x168] sm:%s10010_s28] %v278_v36  ;;  %v282_v38 = vld [vmem:[%s9177_s5 + $0x4c6] sm:%s10010_s28] }
 0x129   : > { %281 = vst [vmem:[%s9181_s8 + $0x170] sm:%s10010_s28] %v280_v37  ;;  %283 = vst [vmem:[%s9181_s8 + $0x178] sm:%s10010_s28] %v282_v38 }
 0x12a   : > { %v284_v39 = vld [vmem:[%s9177_s5 + $0x4e0] sm:%s10010_s28] }
 0x12b   : > { %285 = vst [vmem:[%s9181_s8 + $0x180] sm:%s10010_s28] %v284_v39 }
 0x12c PF: > { %p7861_p12 = scmp.ge.s32.totalorder %s8973_s17, 1  ;;  %p1090_p13 = scmp.lt.s32.totalorder %s8973_s17, 5 }
 0x12e   : > { %p1091_p0 = pnand %p7861_p12, %p1090_p13 }
 0x12f   : > { %s1097_s7 = sand.u32 (!%p1091_p0), 1, %s8965_s15   ;;  %v1143_v40 = vlaneseq (!%p1091_p0)  ;;  %vm1160_vm0 = vcmask (!%p1091_p0), 1040384   ;;  %v9105_v41 = vmov (!%p1091_p0), 1983009808   ;;  %v9106_v44 = vmov (!%p1091_p0), 0  }
 0x130   : > { %1094 = sbr.rel (%p1091_p0) target bundleno = 1284 (0x504), region = 98  ;;  %v1141_v42 = vunpack.c.l.s4 (!%p1091_p0), %v9105_v41  ;;  %1208 = vmatprep.mubr.bf16.mxu0 (!%p1091_p0), %v9106_v44  ;;  %1249 = vmatprep.mubr.bf16.mxu1 (!%p1091_p0), %v9106_v44  ;;  %vm1161_vm1 = vcmask (!%p1091_p0), 1041408   ;;  %v9107_v46 = vmov (!%p1091_p0), 65535   ;;  %v7863_v11 = vld [vmem:[%s11341_s1 + $0x4] sm:$0xf] (!%p1091_p0)  ;;  %vm1156_vm2 = vcmask (!%p1091_p0), 23552  }
 0x131   : > { %s8485_s29 = smul.u32 (!%p1091_p0), 392, %s1097_s7  ;;  %v1144_v43 = vshrl.u32 (!%p1091_p0), %v1143_v40, 7  ;;  %v1162_v47 = vsel (!%p1091_p0), %vm1160_vm0, 4294967295, %v9107_v46  ;;  %8773 = vset.pattern.permute.xlu0 (!%p1091_p0), %v9106_v44  ;;  %v1132_v22 = vld [vmem:[%s11341_s1] sm:$0xf] (!%p1091_p0)  ;;  %s7862_s13 = sshll.u32 (!%p1091_p0), %s1097_s7, 4 }
 0x132   : > { %v1142_v45 = vunpack.c.0.s8 (!%p1091_p0), %v1141_v42  ;;  %v10223_v55 = vsel (!%p1091_p0), %vm1161_vm1, %v1162_v47, 0  ;;  %v7869_v33 = vld [vmem:[%s11341_s1 + $0x8] sm:$0xf] (!%p1091_p0)  ;;  %s10914_s10 = scalar_lea.vmem (!%p1091_p0), [#allocation3], %s7862_s13  }
 0x133   : > { %s10216_s17 = scalar_lea.vmem (!%p1091_p0), [#allocation2], %s8485_s29 }
 0x134   : > { %v7864_v48 = vld [vmem:[%s10216_s17 + $0x8] sm:$0xff] (!%p1091_p0)  ;;  %v1133_v49 = vld [vmem:[%s10216_s17] sm:$0xff] (!%p1091_p0)  ;;  %v7870_v50 = vld [vmem:[%s10216_s17 + $0x10] sm:$0xff] (!%p1091_p0)  ;;  %v10221_v51 = vsub.s32 (!%p1091_p0), %v1142_v45, %v1144_v43 }
 0x135   : > { %v1139_v52 = vcombine.high (!%p1091_p0), %v7864_v48, %v7864_v48  ;;  %v1259_v53 = vcombine.high (!%p1091_p0), %v1133_v49, %v1133_v49  ;;  %v1378_v54 = vcombine.high (!%p1091_p0), %v7870_v50, %v7870_v50  ;;  %v7874_v10 = vld [vmem:[%s10216_s17 + $0x18] sm:$0xff] (!%p1091_p0)  ;;  %v7878_v21 = vld [vmem:[%s10216_s17 + $0x20] sm:$0xff] (!%p1091_p0)  ;;  %v7882_v32 = vld [vmem:[%s10216_s17 + $0x28] sm:$0xff] (!%p1091_p0) }
 0x136   : > { %v1146_v56 = vrot.slane (!%p1091_p0), %v7864_v48, %v10221_v51  ;;  %v1266_v58 = vrot.slane (!%p1091_p0), %v1133_v49, %v10221_v51  ;;  %v1385_v60 = vrot.slane (!%p1091_p0), %v7870_v50, %v10221_v51  ;;  %v1501_v16 = vcombine.high (!%p1091_p0), %v7874_v10, %v7874_v10  ;;  %v7886_v43 = vld [vmem:[%s10216_s17 + $0x30] sm:$0xff] (!%p1091_p0)  ;;  %v7873_v45 = vld [vmem:[%s11341_s1 + $0xc] sm:$0xf] (!%p1091_p0) }
 0x137   : > { %v1153_v57 = vrot.slane %v1139_v52, %v10221_v51  ;;  %v1273_v59 = vrot.slane %v1259_v53, %v10221_v51  ;;  %v1392_v61 = vrot.slane %v1378_v54, %v10221_v51  ;;  %v1508_v17 = vrot.slane %v7874_v10, %v10221_v51  ;;  %s8060_s15 = sshll.u32 (%p9166_p5), %s9151_s18, 2  ;;  %s8095_s7 = sshll.u32 (%p9166_p5), %s9151_s18, 4 }
 0x138   : > { %v1154_v62 = vcombine.high %v1146_v56, %v1146_v56  ;;  %v1165_v0 = vand.u32 %v10223_v55, %v1146_v56  ;;  %v1274_v2 = vcombine.high %v1266_v58, %v1266_v58  ;;  %v1393_v8 = vcombine.high %v1385_v60, %v1385_v60  ;;  %s7204_s24 = ssub.s32 (%p9166_p5), 13, %s8060_s15  ;;  %s10925_s28 = scalar_lea.vmem (%p9166_p5), %s11344_s4, %s8095_s7  }
 0x139   : > { %v1155_v63 = vcombine.high %v1153_v57, %v1153_v57  ;;  %v1171_v1 = vand.u32 %v10223_v55, %v1153_v57  ;;  %v1275_v3 = vcombine.high %v1273_v59, %v1273_v59  ;;  %v1394_v9 = vcombine.high %v1392_v61, %v1392_v61  ;;  %v7890_v57 = vld [vmem:[%s10216_s17 + $0x38] sm:$0xff]  ;;  %p7205_p1 = scmp.lt.s32.totalorder (%p9166_p5), %s7204_s24, 4 }
 0x13a   : > { %v1168_v4 = vand.u32 %v10223_v55, %v1154_v62  ;;  %v1283_v6 = vand.u32 %v1274_v2, %v10223_v55  ;;  %v1280_v12 = vand.u32 %v1266_v58, %v10223_v55  ;;  %v1286_v13 = vand.u32 %v1273_v59, %v10223_v55  ;;  %v7877_v58 = vld [vmem:[%s11341_s1 + $0x10] sm:$0xf] }
 0x13b   : > { %v1174_v5 = vand.u32 %v10223_v55, %v1155_v63  ;;  %v1289_v7 = vand.u32 %v1275_v3, %v10223_v55  ;;  %v1402_v14 = vand.u32 %v1393_v8, %v10223_v55  ;;  %v1408_v15 = vand.u32 %v1394_v9, %v10223_v55 }
 0x13c   : > { %1176 = vmatprep.subr.bf16.mxu0 %v1168_v4  ;;  %v1515_v18 = vrot.slane %v1501_v16, %v10221_v51  ;;  %v1516_v19 = vcombine.high %v1508_v17, %v1508_v17  ;;  %v1399_v23 = vand.u32 %v1385_v60, %v10223_v55  ;;  %v1405_v24 = vand.u32 %v1392_v61, %v10223_v55  ;;  %v7894_v4 = vld [vmem:[%s10216_s17 + $0x40] sm:$0xff]  ;;  %v7885_v16 = vld [vmem:[%s11341_s1 + $0x18] sm:$0xf] }
 0x13d   : > { %1217 = vmatprep.subr.bf16.mxu1 %v1174_v5  ;;  %1177 = vmatpush1.bf16.msra.mxu0 %v1165_v0  ;;  %v1624_v27 = vcombine.high %v7878_v21, %v7878_v21  ;;  %v1631_v28 = vrot.slane %v7878_v21, %v10221_v51  ;;  %v1522_v34 = vand.u32 %v1508_v17, %v10223_v55  ;;  %v7881_v5 = vld [vmem:[%s11341_s1 + $0x14] sm:$0xf] }
 0x13e   : > { %1218 = vmatpush1.bf16.msra.mxu1 %v1171_v1  ;;  %1291 = vmatprep.subr.bf16.mxu0 %v1283_v6  ;;  %v1517_v20 = vcombine.high %v1515_v18, %v1515_v18  ;;  %v1525_v25 = vand.u32 %v1516_v19, %v10223_v55  ;;  %v1528_v35 = vand.u32 %v1515_v18, %v10223_v55 }
 0x13f   : > { %1332 = vmatprep.subr.bf16.mxu1 %v1289_v7  ;;  %v1638_v29 = vrot.slane %v1624_v27, %v10221_v51  ;;  %v1639_v30 = vcombine.high %v1631_v28, %v1631_v28  ;;  %v1747_v38 = vcombine.high %v7882_v32, %v7882_v32  ;;  %v1754_v39 = vrot.slane %v7882_v32, %v10221_v51  ;;  %v7889_v27 = vld [vmem:[%s11341_s1 + $0x1c] sm:$0xf] }
 0x140   : > { %7865 = vmatmul.mubr.msk.bf16.vlgmr.msra.gmra.mrb[0].mxu0 %vm1156_vm2, %v7863_v11  ;;  %v1531_v26 = vand.u32 %v1517_v20, %v10223_v55  ;;  %v1645_v46 = vand.u32 %v1631_v28, %v10223_v55  ;;  %v1870_v50 = vcombine.high %v7886_v43, %v7886_v43  ;;  %v1877_v52 = vrot.slane %v7886_v43, %v10221_v51 }
 0x141   : > { %7866 = vmatmul.mubr.msk.bf16.vlgmr.msra.gmra.mrb[0].mxu1 %vm1156_vm2, %v7863_v11  ;;  %1292 = vmatpush1.bf16.msra.mxu0 %v1280_v12  ;;  %v1640_v31 = vcombine.high %v1638_v29, %v1638_v29  ;;  %v1648_v36 = vand.u32 %v1639_v30, %v10223_v55  ;;  %v1761_v40 = vrot.slane %v1747_v38, %v10221_v51  ;;  %v7893_v38 = vld [vmem:[%s11341_s1 + $0x20] sm:$0xf] }
 0x142   : > { %1333 = vmatpush1.bf16.msra.mxu1 %v1286_v13  ;;  %1323 = vmatprep.mubr.bf16.mxu0 %v9106_v44  ;;  %v1762_v41 = vcombine.high %v1754_v39, %v1754_v39  ;;  %v1651_v47 = vand.u32 %v1638_v29, %v10223_v55  ;;  %v1884_v53 = vrot.slane %v1870_v50, %v10221_v51  ;;  %v7897_v50 = vld [vmem:[%s11341_s1 + $0x24] sm:$0xf] }
 0x143   : > { %1364 = vmatprep.mubr.bf16.mxu1 %v9106_v44  ;;  %1410 = vmatprep.subr.bf16.mxu0 %v1402_v14  ;;  %v1654_v37 = vand.u32 %v1640_v31, %v10223_v55  ;;  %v1763_v42 = vcombine.high %v1761_v40, %v1761_v40  ;;  %v1885_v54 = vcombine.high %v1877_v52, %v1877_v52 }
 0x144   : > { %1451 = vmatprep.subr.bf16.mxu1 %v1408_v15  ;;  %v1771_v48 = vand.u32 %v1762_v41, %v10223_v55  ;;  %v1886_v56 = vcombine.high %v1884_v53, %v1884_v53  ;;  %v1768_v59 = vand.u32 %v1754_v39, %v10223_v55  ;;  %v1774_v60 = vand.u32 %v1761_v40, %v10223_v55  ;;  %v7898_v15 = vld [vmem:[%s10216_s17 + $0x48] sm:$0xff] }
 0x145   : > { %v1777_v49 = vand.u32 %v1763_v42, %v10223_v55  ;;  %v1894_v61 = vand.u32 %v1885_v54, %v10223_v55  ;;  %v1993_v63 = vcombine.high %v7890_v57, %v7890_v57  ;;  %v2000_v0 = vrot.slane %v7890_v57, %v10221_v51 }
 0x146   : > { %v1900_v62 = vand.u32 %v1886_v56, %v10223_v55  ;;  %v1891_v6 = vand.u32 %v1877_v52, %v10223_v55  ;;  %v1897_v7 = vand.u32 %v1884_v53, %v10223_v55  ;;  %v2116_v10 = vcombine.high %v7894_v4, %v7894_v4 }
 0x147   : > { %v2007_v1 = vrot.slane %v1993_v63, %v10221_v51  ;;  %v2008_v2 = vcombine.high %v2000_v0, %v2000_v0  ;;  %v2123_v11 = vrot.slane %v7894_v4, %v10221_v51  ;;  %v2014_v17 = vand.u32 %v2000_v0, %v10223_v55  ;;  %v7901_v63 = vld [vmem:[%s11341_s1 + $0x28] sm:$0xf] }
 0x148   : > { %v2130_v12 = vrot.slane %v2116_v10, %v10221_v51  ;;  %v2239_v21 = vcombine.high %v7898_v15, %v7898_v15  ;;  %v7905_v10 = vld [vmem:[%s11341_s1 + $0x2c] sm:$0xf] }
 0x149   : > { %v2009_v3 = vcombine.high %v2007_v1, %v2007_v1  ;;  %v2017_v8 = vand.u32 %v2008_v2, %v10223_v55  ;;  %v2131_v13 = vcombine.high %v2123_v11, %v2123_v11  ;;  %v2020_v18 = vand.u32 %v2007_v1, %v10223_v55 }
 0x14a   : > { %v2132_v14 = vcombine.high %v2130_v12, %v2130_v12  ;;  %v2137_v28 = vand.u32 %v2123_v11, %v10223_v55  ;;  %v2143_v29 = vand.u32 %v2130_v12, %v10223_v55 }
 0x14b   : > { %v2023_v9 = vand.u32 %v2009_v3, %v10223_v55  ;;  %v2140_v19 = vand.u32 %v2131_v13, %v10223_v55 }
 0x14c   : > { %7867 = vmatmul.mubr.msk.bf16.vlgmr.msra.gmra.mrb[0].mxu0 %vm1156_vm2, %v1132_v22  ;;  %v2146_v20 = vand.u32 %v2132_v14, %v10223_v55 }
 0x14d   : > { %7868 = vmatmul.mubr.msk.bf16.vlgmr.msra.gmra.mrb[0].mxu1 %vm1156_vm2, %v1132_v22  ;;  %1411 = vmatpush1.bf16.msra.mxu0 %v1399_v23  ;;  %v2246_v22 = vrot.slane %v7898_v15, %v10221_v51  ;;  %v2253_v23 = vrot.slane %v2239_v21, %v10221_v51  ;;  %v7909_v21 = vld [vmem:[%s11341_s1 + $0x30] sm:$0xf] }
 0x14e   : > { %1452 = vmatpush1.bf16.msra.mxu1 %v1405_v24  ;;  %1442 = vmatprep.mubr.bf16.mxu0 %v9106_v44 }
 0x14f   : > { %1483 = vmatprep.mubr.bf16.mxu1 %v9106_v44  ;;  %1533 = vmatprep.subr.bf16.mxu0 %v1525_v25  ;;  %v2254_v24 = vcombine.high %v2246_v22, %v2246_v22  ;;  %v2255_v25 = vcombine.high %v2253_v23, %v2253_v23  ;;  %v2260_v39 = vand.u32 %v2246_v22, %v10223_v55 }
 0x150   : > { %1574 = vmatprep.subr.bf16.mxu1 %v1531_v26  ;;  %v7902_v26 = vld [vmem:[%s10216_s17 + $0x50] sm:$0xff]  ;;  %v2266_v40 = vand.u32 %v2253_v23, %v10223_v55 }
 0x151   : > { %v2263_v30 = vand.u32 %v2254_v24, %v10223_v55  ;;  %v2269_v31 = vand.u32 %v2255_v25, %v10223_v55  ;;  %v2362_v32 = vcombine.high %v7902_v26, %v7902_v26 }
 0x158   : > { %7871 = vmatmul.mubr.msk.bf16.vlgmr.msra.gmra.mrb[0].mxu0 %vm1156_vm2, %v7869_v33 }
 0x159   : > { %7872 = vmatmul.mubr.msk.bf16.vlgmr.msra.gmra.mrb[0].mxu1 %vm1156_vm2, %v7869_v33  ;;  %1534 = vmatpush1.bf16.msra.mxu0 %v1522_v34  ;;  %v2369_v33 = vrot.slane %v7902_v26, %v10221_v51  ;;  %v2376_v34 = vrot.slane %v2362_v32, %v10221_v51  ;;  %v7913_v32 = vld [vmem:[%s11341_s1 + $0x34] sm:$0xf] }
 0x15a   : > { %1575 = vmatpush1.bf16.msra.mxu1 %v1528_v35  ;;  %1565 = vmatprep.mubr.bf16.mxu0 %v9106_v44 }
 0x15b   : > { %1606 = vmatprep.mubr.bf16.mxu1 %v9106_v44  ;;  %1656 = vmatprep.subr.bf16.mxu0 %v1648_v36  ;;  %v2377_v35 = vcombine.high %v2369_v33, %v2369_v33  ;;  %v2378_v36 = vcombine.high %v2376_v34, %v2376_v34  ;;  %v2383_v52 = vand.u32 %v2369_v33, %v10223_v55 }
 0x15c   : > { %1697 = vmatprep.subr.bf16.mxu1 %v1654_v37  ;;  %v7906_v37 = vld [vmem:[%s10216_s17 + $0x58] sm:$0xff]  ;;  %v2389_v53 = vand.u32 %v2376_v34, %v10223_v55 }
 0x15d   : > { %v2386_v41 = vand.u32 %v2377_v35, %v10223_v55  ;;  %v2392_v42 = vand.u32 %v2378_v36, %v10223_v55  ;;  %v2485_v43 = vcombine.high %v7906_v37, %v7906_v37 }
 0x164   : > { %7875 = vmatmul.mubr.msk.bf16.vlgmr.msra.gmra.mrb[0].mxu0 %vm1156_vm2, %v7873_v45 }
 0x165   : > { %7876 = vmatmul.mubr.msk.bf16.vlgmr.msra.gmra.mrb[0].mxu1 %vm1156_vm2, %v7873_v45  ;;  %1657 = vmatpush1.bf16.msra.mxu0 %v1645_v46  ;;  %v2492_v45 = vrot.slane %v7906_v37, %v10221_v51  ;;  %v2499_v46 = vrot.slane %v2485_v43, %v10221_v51  ;;  %v7917_v43 = vld [vmem:[%s11341_s1 + $0x38] sm:$0xf] }
 0x166   : > { %1698 = vmatpush1.bf16.msra.mxu1 %v1651_v47  ;;  %1688 = vmatprep.mubr.bf16.mxu0 %v9106_v44 }
 0x167   : > { %1729 = vmatprep.mubr.bf16.mxu1 %v9106_v44  ;;  %1779 = vmatprep.subr.bf16.mxu0 %v1771_v48  ;;  %v2500_v47 = vcombine.high %v2492_v45, %v2492_v45  ;;  %v2501_v48 = vcombine.high %v2499_v46, %v2499_v46  ;;  %v2506_v0 = vand.u32 %v2492_v45, %v10223_v55 }
 0x168   : > { %1820 = vmatprep.subr.bf16.mxu1 %v1777_v49  ;;  %v7910_v49 = vld [vmem:[%s10216_s17 + $0x60] sm:$0xff]  ;;  %v2512_v1 = vand.u32 %v2499_v46, %v10223_v55 }
 0x169   : > { %v2509_v54 = vand.u32 %v2500_v47, %v10223_v55  ;;  %v2515_v56 = vand.u32 %v2501_v48, %v10223_v55  ;;  %v2608_v57 = vcombine.high %v7910_v49, %v7910_v49 }
 0x170   : > { %7879 = vmatmul.mubr.msk.bf16.vlgmr.msra.gmra.mrb[0].mxu0 %vm1156_vm2, %v7877_v58 }
 0x171   : > { %7880 = vmatmul.mubr.msk.bf16.vlgmr.msra.gmra.mrb[0].mxu1 %vm1156_vm2, %v7877_v58  ;;  %1780 = vmatpush1.bf16.msra.mxu0 %v1768_v59  ;;  %v2615_v58 = vrot.slane %v7910_v49, %v10221_v51  ;;  %v2622_v59 = vrot.slane %v2608_v57, %v10221_v51  ;;  %v7921_v57 = vld [vmem:[%s11341_s1 + $0x3c] sm:$0xf] }
 0x172   : > { %1821 = vmatpush1.bf16.msra.mxu1 %v1774_v60  ;;  %1811 = vmatprep.mubr.bf16.mxu0 %v9106_v44 }
 0x173   : > { %1852 = vmatprep.mubr.bf16.mxu1 %v9106_v44  ;;  %1902 = vmatprep.subr.bf16.mxu0 %v1894_v61  ;;  %v2623_v60 = vcombine.high %v2615_v58, %v2615_v58  ;;  %v2624_v61 = vcombine.high %v2622_v59, %v2622_v59  ;;  %v2629_v11 = vand.u32 %v2615_v58, %v10223_v55 }
 0x174   : > { %1943 = vmatprep.subr.bf16.mxu1 %v1900_v62  ;;  %v7914_v62 = vld [vmem:[%s10216_s17 + $0x68] sm:$0xff]  ;;  %v2635_v12 = vand.u32 %v2622_v59, %v10223_v55 }
 0x175   : > { %v2632_v2 = vand.u32 %v2623_v60, %v10223_v55  ;;  %v2638_v3 = vand.u32 %v2624_v61, %v10223_v55  ;;  %v2731_v4 = vcombine.high %v7914_v62, %v7914_v62 }
 0x17c   : > { %7883 = vmatmul.mubr.msk.bf16.vlgmr.msra.gmra.mrb[0].mxu0 %vm1156_vm2, %v7881_v5 }
 0x17d   : > { %7884 = vmatmul.mubr.msk.bf16.vlgmr.msra.gmra.mrb[0].mxu1 %vm1156_vm2, %v7881_v5  ;;  %1903 = vmatpush1.bf16.msra.mxu0 %v1891_v6  ;;  %v2738_v5 = vrot.slane %v7914_v62, %v10221_v51  ;;  %v2745_v6 = vrot.slane %v2731_v4, %v10221_v51  ;;  %v7925_v4 = vld [vmem:[%s11341_s1 + $0x40] sm:$0xf] }
 0x17e   : > { %1944 = vmatpush1.bf16.msra.mxu1 %v1897_v7  ;;  %1934 = vmatprep.mubr.bf16.mxu0 %v9106_v44 }
 0x17f   : > { %1975 = vmatprep.mubr.bf16.mxu1 %v9106_v44  ;;  %2025 = vmatprep.subr.bf16.mxu0 %v2017_v8  ;;  %v2746_v7 = vcombine.high %v2738_v5, %v2738_v5  ;;  %v2747_v8 = vcombine.high %v2745_v6, %v2745_v6  ;;  %v2752_v22 = vand.u32 %v2738_v5, %v10223_v55 }
 0x180   : > { %2066 = vmatprep.subr.bf16.mxu1 %v2023_v9  ;;  %v7918_v9 = vld [vmem:[%s10216_s17 + $0x70] sm:$0xff]  ;;  %v2758_v23 = vand.u32 %v2745_v6, %v10223_v55 }
 0x181   : > { %v2755_v13 = vand.u32 %v2746_v7, %v10223_v55  ;;  %v2761_v14 = vand.u32 %v2747_v8, %v10223_v55  ;;  %v2854_v15 = vcombine.high %v7918_v9, %v7918_v9 }
 0x188   : > { %7887 = vmatmul.mubr.msk.bf16.vlgmr.msra.gmra.mrb[0].mxu0 %vm1156_vm2, %v7885_v16 }
 0x189   : > { %7888 = vmatmul.mubr.msk.bf16.vlgmr.msra.gmra.mrb[0].mxu1 %vm1156_vm2, %v7885_v16  ;;  %2026 = vmatpush1.bf16.msra.mxu0 %v2014_v17  ;;  %v2861_v16 = vrot.slane %v7918_v9, %v10221_v51  ;;  %v2868_v17 = vrot.slane %v2854_v15, %v10221_v51  ;;  %v7929_v15 = vld [vmem:[%s11341_s1 + $0x44] sm:$0xf] }
 0x18a   : > { %2067 = vmatpush1.bf16.msra.mxu1 %v2020_v18  ;;  %2057 = vmatprep.mubr.bf16.mxu0 %v9106_v44 }
 0x18b   : > { %2098 = vmatprep.mubr.bf16.mxu1 %v9106_v44  ;;  %2148 = vmatprep.subr.bf16.mxu0 %v2140_v19  ;;  %v2869_v18 = vcombine.high %v2861_v16, %v2861_v16  ;;  %v2870_v19 = vcombine.high %v2868_v17, %v2868_v17  ;;  %v2875_v33 = vand.u32 %v2861_v16, %v10223_v55 }
 0x18c   : > { %2189 = vmatprep.subr.bf16.mxu1 %v2146_v20  ;;  %v7922_v20 = vld [vmem:[%s10216_s17 + $0x78] sm:$0xff]  ;;  %v2881_v34 = vand.u32 %v2868_v17, %v10223_v55 }
 0x18d   : > { %v2878_v24 = vand.u32 %v2869_v18, %v10223_v55  ;;  %v2884_v25 = vand.u32 %v2870_v19, %v10223_v55  ;;  %v2977_v26 = vcombine.high %v7922_v20, %v7922_v20 }
 0x194   : > { %7891 = vmatmul.mubr.msk.bf16.vlgmr.msra.gmra.mrb[0].mxu0 %vm1156_vm2, %v7889_v27 }
 0x195   : > { %7892 = vmatmul.mubr.msk.bf16.vlgmr.msra.gmra.mrb[0].mxu1 %vm1156_vm2, %v7889_v27  ;;  %2149 = vmatpush1.bf16.msra.mxu0 %v2137_v28  ;;  %v2984_v27 = vrot.slane %v7922_v20, %v10221_v51  ;;  %v2991_v28 = vrot.slane %v2977_v26, %v10221_v51  ;;  %v7933_v26 = vld [vmem:[%s11341_s1 + $0x48] sm:$0xf] }
 0x196   : > { %2190 = vmatpush1.bf16.msra.mxu1 %v2143_v29  ;;  %2180 = vmatprep.mubr.bf16.mxu0 %v9106_v44 }
 0x197   : > { %2221 = vmatprep.mubr.bf16.mxu1 %v9106_v44  ;;  %2271 = vmatprep.subr.bf16.mxu0 %v2263_v30  ;;  %v2992_v29 = vcombine.high %v2984_v27, %v2984_v27  ;;  %v2993_v30 = vcombine.high %v2991_v28, %v2991_v28  ;;  %v2998_v45 = vand.u32 %v2984_v27, %v10223_v55 }
 0x198   : > { %2312 = vmatprep.subr.bf16.mxu1 %v2269_v31  ;;  %v7926_v31 = vld [vmem:[%s10216_s17 + $0x80] sm:$0xff]  ;;  %v3004_v46 = vand.u32 %v2991_v28, %v10223_v55 }
 0x199   : > { %v3001_v35 = vand.u32 %v2992_v29, %v10223_v55  ;;  %v3007_v36 = vand.u32 %v2993_v30, %v10223_v55  ;;  %v3100_v37 = vcombine.high %v7926_v31, %v7926_v31 }
 0x1a0   : > { %7895 = vmatmul.mubr.msk.bf16.vlgmr.msra.gmra.mrb[0].mxu0 %vm1156_vm2, %v7893_v38 }
 0x1a1   : > { %7896 = vmatmul.mubr.msk.bf16.vlgmr.msra.gmra.mrb[0].mxu1 %vm1156_vm2, %v7893_v38  ;;  %2272 = vmatpush1.bf16.msra.mxu0 %v2260_v39  ;;  %v3107_v38 = vrot.slane %v7926_v31, %v10221_v51  ;;  %v3114_v39 = vrot.slane %v3100_v37, %v10221_v51  ;;  %v7937_v37 = vld [vmem:[%s11341_s1 + $0x4c] sm:$0xf] }
 0x1a2   : > { %2313 = vmatpush1.bf16.msra.mxu1 %v2266_v40  ;;  %2303 = vmatprep.mubr.bf16.mxu0 %v9106_v44 }
 0x1a3   : > { %2344 = vmatprep.mubr.bf16.mxu1 %v9106_v44  ;;  %2394 = vmatprep.subr.bf16.mxu0 %v2386_v41  ;;  %v3115_v40 = vcombine.high %v3107_v38, %v3107_v38  ;;  %v3116_v41 = vcombine.high %v3114_v39, %v3114_v39  ;;  %v3121_v58 = vand.u32 %v3107_v38, %v10223_v55 }
 0x1a4   : > { %2435 = vmatprep.subr.bf16.mxu1 %v2392_v42  ;;  %v7930_v42 = vld [vmem:[%s10216_s17 + $0x88] sm:$0xff]  ;;  %v3127_v59 = vand.u32 %v3114_v39, %v10223_v55 }
 0x1a5   : > { %v3124_v47 = vand.u32 %v3115_v40, %v10223_v55  ;;  %v3130_v48 = vand.u32 %v3116_v41, %v10223_v55  ;;  %v3223_v49 = vcombine.high %v7930_v42, %v7930_v42 }
 0x1ac   : > { %7899 = vmatmul.mubr.msk.bf16.vlgmr.msra.gmra.mrb[0].mxu0 %vm1156_vm2, %v7897_v50 }
 0x1ad   : > { %7900 = vmatmul.mubr.msk.bf16.vlgmr.msra.gmra.mrb[0].mxu1 %vm1156_vm2, %v7897_v50  ;;  %2395 = vmatpush1.bf16.msra.mxu0 %v2383_v52  ;;  %v3230_v50 = vrot.slane %v7930_v42, %v10221_v51  ;;  %v3237_v52 = vrot.slane %v3223_v49, %v10221_v51  ;;  %v7941_v49 = vld [vmem:[%s11341_s1 + $0x50] sm:$0xf] }
 0x1ae   : > { %2436 = vmatpush1.bf16.msra.mxu1 %v2389_v53  ;;  %2426 = vmatprep.mubr.bf16.mxu0 %v9106_v44 }
 0x1af   : > { %2467 = vmatprep.mubr.bf16.mxu1 %v9106_v44  ;;  %2517 = vmatprep.subr.bf16.mxu0 %v2509_v54  ;;  %v3238_v53 = vcombine.high %v3230_v50, %v3230_v50  ;;  %v3239_v54 = vcombine.high %v3237_v52, %v3237_v52  ;;  %v3244_v5 = vand.u32 %v3230_v50, %v10223_v55 }
 0x1b0   : > { %2558 = vmatprep.subr.bf16.mxu1 %v2515_v56  ;;  %v7934_v56 = vld [vmem:[%s10216_s17 + $0x90] sm:$0xff]  ;;  %v3250_v6 = vand.u32 %v3237_v52, %v10223_v55 }
 0x1b1   : > { %v3247_v60 = vand.u32 %v3238_v53, %v10223_v55  ;;  %v3253_v61 = vand.u32 %v3239_v54, %v10223_v55  ;;  %v3346_v62 = vcombine.high %v7934_v56, %v7934_v56 }
 0x1b8   : > { %7903 = vmatmul.mubr.msk.bf16.vlgmr.msra.gmra.mrb[0].mxu0 %vm1156_vm2, %v7901_v63 }
 0x1b9   : > { %7904 = vmatmul.mubr.msk.bf16.vlgmr.msra.gmra.mrb[0].mxu1 %vm1156_vm2, %v7901_v63  ;;  %2518 = vmatpush1.bf16.msra.mxu0 %v2506_v0  ;;  %v3353_v63 = vrot.slane %v7934_v56, %v10221_v51  ;;  %v3360_v0 = vrot.slane %v3346_v62, %v10221_v51  ;;  %v7945_v62 = vld [vmem:[%s11341_s1 + $0x54] sm:$0xf] }
 0x1ba   : > { %2559 = vmatpush1.bf16.msra.mxu1 %v2512_v1  ;;  %2549 = vmatprep.mubr.bf16.mxu0 %v9106_v44 }
 0x1bb   : > { %2590 = vmatprep.mubr.bf16.mxu1 %v9106_v44  ;;  %2640 = vmatprep.subr.bf16.mxu0 %v2632_v2  ;;  %v3361_v1 = vcombine.high %v3353_v63, %v3353_v63  ;;  %v3362_v2 = vcombine.high %v3360_v0, %v3360_v0  ;;  %v3367_v16 = vand.u32 %v3353_v63, %v10223_v55 }
 0x1bc   : > { %2681 = vmatprep.subr.bf16.mxu1 %v2638_v3  ;;  %v7938_v3 = vld [vmem:[%s10216_s17 + $0x98] sm:$0xff]  ;;  %v3373_v17 = vand.u32 %v3360_v0, %v10223_v55 }
 0x1bd   : > { %v3370_v7 = vand.u32 %v3361_v1, %v10223_v55  ;;  %v3376_v8 = vand.u32 %v3362_v2, %v10223_v55  ;;  %v3469_v9 = vcombine.high %v7938_v3, %v7938_v3 }
 0x1c4   : > { %7907 = vmatmul.mubr.msk.bf16.vlgmr.msra.gmra.mrb[0].mxu0 %vm1156_vm2, %v7905_v10 }
 0x1c5   : > { %7908 = vmatmul.mubr.msk.bf16.vlgmr.msra.gmra.mrb[0].mxu1 %vm1156_vm2, %v7905_v10  ;;  %2641 = vmatpush1.bf16.msra.mxu0 %v2629_v11  ;;  %v3476_v10 = vrot.slane %v7938_v3, %v10221_v51  ;;  %v3483_v11 = vrot.slane %v3469_v9, %v10221_v51  ;;  %v7949_v9 = vld [vmem:[%s11341_s1 + $0x58] sm:$0xf] }
 0x1c6   : > { %2682 = vmatpush1.bf16.msra.mxu1 %v2635_v12  ;;  %2672 = vmatprep.mubr.bf16.mxu0 %v9106_v44 }
 0x1c7   : > { %2713 = vmatprep.mubr.bf16.mxu1 %v9106_v44  ;;  %2763 = vmatprep.subr.bf16.mxu0 %v2755_v13  ;;  %v3484_v12 = vcombine.high %v3476_v10, %v3476_v10  ;;  %v3485_v13 = vcombine.high %v3483_v11, %v3483_v11  ;;  %v3490_v27 = vand.u32 %v3476_v10, %v10223_v55 }
 0x1c8   : > { %2804 = vmatprep.subr.bf16.mxu1 %v2761_v14  ;;  %v7942_v14 = vld [vmem:[%s10216_s17 + $0xa0] sm:$0xff]  ;;  %v3496_v28 = vand.u32 %v3483_v11, %v10223_v55 }
 0x1c9   : > { %v3493_v18 = vand.u32 %v3484_v12, %v10223_v55  ;;  %v3499_v19 = vand.u32 %v3485_v13, %v10223_v55  ;;  %v3592_v20 = vcombine.high %v7942_v14, %v7942_v14 }
 0x1d0   : > { %7911 = vmatmul.mubr.msk.bf16.vlgmr.msra.gmra.mrb[0].mxu0 %vm1156_vm2, %v7909_v21 }
 0x1d1   : > { %7912 = vmatmul.mubr.msk.bf16.vlgmr.msra.gmra.mrb[0].mxu1 %vm1156_vm2, %v7909_v21  ;;  %2764 = vmatpush1.bf16.msra.mxu0 %v2752_v22  ;;  %v3599_v21 = vrot.slane %v7942_v14, %v10221_v51  ;;  %v3606_v22 = vrot.slane %v3592_v20, %v10221_v51  ;;  %v7953_v20 = vld [vmem:[%s11341_s1 + $0x5c] sm:$0xf] }
 0x1d2   : > { %2805 = vmatpush1.bf16.msra.mxu1 %v2758_v23  ;;  %2795 = vmatprep.mubr.bf16.mxu0 %v9106_v44 }
 0x1d3   : > { %2836 = vmatprep.mubr.bf16.mxu1 %v9106_v44  ;;  %2886 = vmatprep.subr.bf16.mxu0 %v2878_v24  ;;  %v3607_v23 = vcombine.high %v3599_v21, %v3599_v21  ;;  %v3608_v24 = vcombine.high %v3606_v22, %v3606_v22  ;;  %v3613_v38 = vand.u32 %v3599_v21, %v10223_v55 }
 0x1d4   : > { %2927 = vmatprep.subr.bf16.mxu1 %v2884_v25  ;;  %v7946_v25 = vld [vmem:[%s10216_s17 + $0xa8] sm:$0xff]  ;;  %v3619_v39 = vand.u32 %v3606_v22, %v10223_v55 }
 0x1d5   : > { %v3616_v29 = vand.u32 %v3607_v23, %v10223_v55  ;;  %v3622_v30 = vand.u32 %v3608_v24, %v10223_v55  ;;  %v3715_v31 = vcombine.high %v7946_v25, %v7946_v25 }
 0x1dc   : > { %7915 = vmatmul.mubr.msk.bf16.vlgmr.msra.gmra.mrb[0].mxu0 %vm1156_vm2, %v7913_v32 }
 0x1dd   : > { %7916 = vmatmul.mubr.msk.bf16.vlgmr.msra.gmra.mrb[0].mxu1 %vm1156_vm2, %v7913_v32  ;;  %2887 = vmatpush1.bf16.msra.mxu0 %v2875_v33  ;;  %v3722_v32 = vrot.slane %v7946_v25, %v10221_v51  ;;  %v3729_v33 = vrot.slane %v3715_v31, %v10221_v51  ;;  %v7957_v31 = vld [vmem:[%s11341_s1 + $0x60] sm:$0xf] }
 0x1de   : > { %2928 = vmatpush1.bf16.msra.mxu1 %v2881_v34  ;;  %2918 = vmatprep.mubr.bf16.mxu0 %v9106_v44 }
 0x1df   : > { %2959 = vmatprep.mubr.bf16.mxu1 %v9106_v44  ;;  %3009 = vmatprep.subr.bf16.mxu0 %v3001_v35  ;;  %v3730_v34 = vcombine.high %v3722_v32, %v3722_v32  ;;  %v3731_v35 = vcombine.high %v3729_v33, %v3729_v33  ;;  %v3736_v50 = vand.u32 %v3722_v32, %v10223_v55 }
 0x1e0   : > { %3050 = vmatprep.subr.bf16.mxu1 %v3007_v36  ;;  %v7950_v36 = vld [vmem:[%s10216_s17 + $0xb0] sm:$0xff]  ;;  %v3742_v52 = vand.u32 %v3729_v33, %v10223_v55 }
 0x1e1   : > { %v3739_v40 = vand.u32 %v3730_v34, %v10223_v55  ;;  %v3745_v41 = vand.u32 %v3731_v35, %v10223_v55  ;;  %v3838_v42 = vcombine.high %v7950_v36, %v7950_v36 }
 0x1e8   : > { %7919 = vmatmul.mubr.msk.bf16.vlgmr.msra.gmra.mrb[0].mxu0 %vm1156_vm2, %v7917_v43 }
 0x1e9   : > { %7920 = vmatmul.mubr.msk.bf16.vlgmr.msra.gmra.mrb[0].mxu1 %vm1156_vm2, %v7917_v43  ;;  %3010 = vmatpush1.bf16.msra.mxu0 %v2998_v45  ;;  %v3845_v43 = vrot.slane %v7950_v36, %v10221_v51  ;;  %v3852_v45 = vrot.slane %v3838_v42, %v10221_v51  ;;  %v7961_v42 = vld [vmem:[%s11341_s1 + $0x64] sm:$0xf] }
 0x1ea   : > { %3051 = vmatpush1.bf16.msra.mxu1 %v3004_v46  ;;  %3041 = vmatprep.mubr.bf16.mxu0 %v9106_v44 }
 0x1eb   : > { %3082 = vmatprep.mubr.bf16.mxu1 %v9106_v44  ;;  %3132 = vmatprep.subr.bf16.mxu0 %v3124_v47  ;;  %v3853_v46 = vcombine.high %v3845_v43, %v3845_v43  ;;  %v3854_v47 = vcombine.high %v3852_v45, %v3852_v45  ;;  %v3859_v63 = vand.u32 %v3845_v43, %v10223_v55 }
 0x1ec   : > { %3173 = vmatprep.subr.bf16.mxu1 %v3130_v48  ;;  %v7954_v48 = vld [vmem:[%s10216_s17 + $0xb8] sm:$0xff]  ;;  %v3865_v0 = vand.u32 %v3852_v45, %v10223_v55 }
 0x1ed   : > { %v3862_v53 = vand.u32 %v3853_v46, %v10223_v55  ;;  %v3868_v54 = vand.u32 %v3854_v47, %v10223_v55  ;;  %v3961_v56 = vcombine.high %v7954_v48, %v7954_v48 }
 0x1f4   : > { %7923 = vmatmul.mubr.msk.bf16.vlgmr.msra.gmra.mrb[0].mxu0 %vm1156_vm2, %v7921_v57 }
 0x1f5   : > { %7924 = vmatmul.mubr.msk.bf16.vlgmr.msra.gmra.mrb[0].mxu1 %vm1156_vm2, %v7921_v57  ;;  %3133 = vmatpush1.bf16.msra.mxu0 %v3121_v58  ;;  %v3968_v57 = vrot.slane %v7954_v48, %v10221_v51  ;;  %v3975_v58 = vrot.slane %v3961_v56, %v10221_v51  ;;  %v7965_v56 = vld [vmem:[%s11341_s1 + $0x68] sm:$0xf] }
 0x1f6   : > { %3174 = vmatpush1.bf16.msra.mxu1 %v3127_v59  ;;  %3164 = vmatprep.mubr.bf16.mxu0 %v9106_v44 }
 0x1f7   : > { %3205 = vmatprep.mubr.bf16.mxu1 %v9106_v44  ;;  %3255 = vmatprep.subr.bf16.mxu0 %v3247_v60  ;;  %v3976_v59 = vcombine.high %v3968_v57, %v3968_v57  ;;  %v3977_v60 = vcombine.high %v3975_v58, %v3975_v58  ;;  %v3982_v10 = vand.u32 %v3968_v57, %v10223_v55 }
 0x1f8   : > { %3296 = vmatprep.subr.bf16.mxu1 %v3253_v61  ;;  %v7958_v61 = vld [vmem:[%s10216_s17 + $0xc0] sm:$0xff]  ;;  %v3988_v11 = vand.u32 %v3975_v58, %v10223_v55 }
 0x1f9   : > { %v3985_v1 = vand.u32 %v3976_v59, %v10223_v55  ;;  %v3991_v2 = vand.u32 %v3977_v60, %v10223_v55  ;;  %v4084_v3 = vcombine.high %v7958_v61, %v7958_v61 }
 0x200   : > { %7927 = vmatmul.mubr.msk.bf16.vlgmr.msra.gmra.mrb[0].mxu0 %vm1156_vm2, %v7925_v4 }
 0x201   : > { %7928 = vmatmul.mubr.msk.bf16.vlgmr.msra.gmra.mrb[0].mxu1 %vm1156_vm2, %v7925_v4  ;;  %3256 = vmatpush1.bf16.msra.mxu0 %v3244_v5  ;;  %v4091_v4 = vrot.slane %v7958_v61, %v10221_v51  ;;  %v4098_v5 = vrot.slane %v4084_v3, %v10221_v51  ;;  %v7969_v3 = vld [vmem:[%s11341_s1 + $0x6c] sm:$0xf] }
 0x202   : > { %3297 = vmatpush1.bf16.msra.mxu1 %v3250_v6  ;;  %3287 = vmatprep.mubr.bf16.mxu0 %v9106_v44 }
 0x203   : > { %3328 = vmatprep.mubr.bf16.mxu1 %v9106_v44  ;;  %3378 = vmatprep.subr.bf16.mxu0 %v3370_v7  ;;  %v4099_v6 = vcombine.high %v4091_v4, %v4091_v4  ;;  %v4100_v7 = vcombine.high %v4098_v5, %v4098_v5  ;;  %v4105_v21 = vand.u32 %v4091_v4, %v10223_v55 }
 0x204   : > { %3419 = vmatprep.subr.bf16.mxu1 %v3376_v8  ;;  %v7962_v8 = vld [vmem:[%s10216_s17 + $0xc8] sm:$0xff]  ;;  %v4111_v22 = vand.u32 %v4098_v5, %v10223_v55 }
 0x205   : > { %v4108_v12 = vand.u32 %v4099_v6, %v10223_v55  ;;  %v4114_v13 = vand.u32 %v4100_v7, %v10223_v55  ;;  %v4207_v14 = vcombine.high %v7962_v8, %v7962_v8 }
 0x20c   : > { %7931 = vmatmul.mubr.msk.bf16.vlgmr.msra.gmra.mrb[0].mxu0 %vm1156_vm2, %v7929_v15 }
 0x20d   : > { %7932 = vmatmul.mubr.msk.bf16.vlgmr.msra.gmra.mrb[0].mxu1 %vm1156_vm2, %v7929_v15  ;;  %3379 = vmatpush1.bf16.msra.mxu0 %v3367_v16  ;;  %v4214_v15 = vrot.slane %v7962_v8, %v10221_v51  ;;  %v4221_v16 = vrot.slane %v4207_v14, %v10221_v51  ;;  %v7973_v14 = vld [vmem:[%s11341_s1 + $0x70] sm:$0xf] }
 0x20e   : > { %3420 = vmatpush1.bf16.msra.mxu1 %v3373_v17  ;;  %3410 = vmatprep.mubr.bf16.mxu0 %v9106_v44 }
 0x20f   : > { %3451 = vmatprep.mubr.bf16.mxu1 %v9106_v44  ;;  %3501 = vmatprep.subr.bf16.mxu0 %v3493_v18  ;;  %v4222_v17 = vcombine.high %v4214_v15, %v4214_v15  ;;  %v4223_v18 = vcombine.high %v4221_v16, %v4221_v16  ;;  %v4228_v32 = vand.u32 %v4214_v15, %v10223_v55 }
 0x210   : > { %3542 = vmatprep.subr.bf16.mxu1 %v3499_v19  ;;  %v7966_v19 = vld [vmem:[%s10216_s17 + $0xd0] sm:$0xff]  ;;  %v4234_v33 = vand.u32 %v4221_v16, %v10223_v55 }
 0x211   : > { %v4231_v23 = vand.u32 %v4222_v17, %v10223_v55  ;;  %v4237_v24 = vand.u32 %v4223_v18, %v10223_v55  ;;  %v4330_v25 = vcombine.high %v7966_v19, %v7966_v19 }
 0x218   : > { %7935 = vmatmul.mubr.msk.bf16.vlgmr.msra.gmra.mrb[0].mxu0 %vm1156_vm2, %v7933_v26 }
 0x219   : > { %7936 = vmatmul.mubr.msk.bf16.vlgmr.msra.gmra.mrb[0].mxu1 %vm1156_vm2, %v7933_v26  ;;  %3502 = vmatpush1.bf16.msra.mxu0 %v3490_v27  ;;  %v4337_v26 = vrot.slane %v7966_v19, %v10221_v51  ;;  %v4344_v27 = vrot.slane %v4330_v25, %v10221_v51  ;;  %v7977_v25 = vld [vmem:[%s11341_s1 + $0x74] sm:$0xf] }
 0x21a   : > { %3543 = vmatpush1.bf16.msra.mxu1 %v3496_v28  ;;  %3533 = vmatprep.mubr.bf16.mxu0 %v9106_v44 }
 0x21b   : > { %3574 = vmatprep.mubr.bf16.mxu1 %v9106_v44  ;;  %3624 = vmatprep.subr.bf16.mxu0 %v3616_v29  ;;  %v4345_v28 = vcombine.high %v4337_v26, %v4337_v26  ;;  %v4346_v29 = vcombine.high %v4344_v27, %v4344_v27  ;;  %v4351_v43 = vand.u32 %v4337_v26, %v10223_v55 }
 0x21c   : > { %3665 = vmatprep.subr.bf16.mxu1 %v3622_v30  ;;  %v7970_v30 = vld [vmem:[%s10216_s17 + $0xd8] sm:$0xff]  ;;  %v4357_v45 = vand.u32 %v4344_v27, %v10223_v55 }
 0x21d   : > { %v4354_v34 = vand.u32 %v4345_v28, %v10223_v55  ;;  %v4360_v35 = vand.u32 %v4346_v29, %v10223_v55  ;;  %v4453_v36 = vcombine.high %v7970_v30, %v7970_v30 }
 0x224   : > { %7939 = vmatmul.mubr.msk.bf16.vlgmr.msra.gmra.mrb[0].mxu0 %vm1156_vm2, %v7937_v37 }
 0x225   : > { %7940 = vmatmul.mubr.msk.bf16.vlgmr.msra.gmra.mrb[0].mxu1 %vm1156_vm2, %v7937_v37  ;;  %3625 = vmatpush1.bf16.msra.mxu0 %v3613_v38  ;;  %v4460_v37 = vrot.slane %v7970_v30, %v10221_v51  ;;  %v4467_v38 = vrot.slane %v4453_v36, %v10221_v51  ;;  %v7981_v36 = vld [vmem:[%s11341_s1 + $0x78] sm:$0xf] }
 0x226   : > { %3666 = vmatpush1.bf16.msra.mxu1 %v3619_v39  ;;  %3656 = vmatprep.mubr.bf16.mxu0 %v9106_v44 }
 0x227   : > { %3697 = vmatprep.mubr.bf16.mxu1 %v9106_v44  ;;  %3747 = vmatprep.subr.bf16.mxu0 %v3739_v40  ;;  %v4468_v39 = vcombine.high %v4460_v37, %v4460_v37  ;;  %v4469_v40 = vcombine.high %v4467_v38, %v4467_v38  ;;  %v4474_v57 = vand.u32 %v4460_v37, %v10223_v55 }
 0x228   : > { %3788 = vmatprep.subr.bf16.mxu1 %v3745_v41  ;;  %v7974_v41 = vld [vmem:[%s10216_s17 + $0xe0] sm:$0xff]  ;;  %v4480_v58 = vand.u32 %v4467_v38, %v10223_v55 }
 0x229   : > { %v4477_v46 = vand.u32 %v4468_v39, %v10223_v55  ;;  %v4483_v47 = vand.u32 %v4469_v40, %v10223_v55  ;;  %v4576_v48 = vcombine.high %v7974_v41, %v7974_v41 }
 0x230   : > { %7943 = vmatmul.mubr.msk.bf16.vlgmr.msra.gmra.mrb[0].mxu0 %vm1156_vm2, %v7941_v49 }
 0x231   : > { %7944 = vmatmul.mubr.msk.bf16.vlgmr.msra.gmra.mrb[0].mxu1 %vm1156_vm2, %v7941_v49  ;;  %3748 = vmatpush1.bf16.msra.mxu0 %v3736_v50  ;;  %v4583_v49 = vrot.slane %v7974_v41, %v10221_v51  ;;  %v4590_v50 = vrot.slane %v4576_v48, %v10221_v51  ;;  %v7985_v48 = vld [vmem:[%s11341_s1 + $0x7c] sm:$0xf] }
 0x232   : > { %3789 = vmatpush1.bf16.msra.mxu1 %v3742_v52  ;;  %3779 = vmatprep.mubr.bf16.mxu0 %v9106_v44 }
 0x233   : > { %3820 = vmatprep.mubr.bf16.mxu1 %v9106_v44  ;;  %3870 = vmatprep.subr.bf16.mxu0 %v3862_v53  ;;  %v4591_v52 = vcombine.high %v4583_v49, %v4583_v49  ;;  %v4592_v53 = vcombine.high %v4590_v50, %v4590_v50  ;;  %v4597_v4 = vand.u32 %v4583_v49, %v10223_v55 }
 0x234   : > { %3911 = vmatprep.subr.bf16.mxu1 %v3868_v54  ;;  %v7978_v54 = vld [vmem:[%s10216_s17 + $0xe8] sm:$0xff]  ;;  %v4603_v5 = vand.u32 %v4590_v50, %v10223_v55 }
 0x235   : > { %v4600_v59 = vand.u32 %v4591_v52, %v10223_v55  ;;  %v4606_v60 = vand.u32 %v4592_v53, %v10223_v55  ;;  %v4699_v61 = vcombine.high %v7978_v54, %v7978_v54 }
 0x23c   : > { %7947 = vmatmul.mubr.msk.bf16.vlgmr.msra.gmra.mrb[0].mxu0 %vm1156_vm2, %v7945_v62 }
 0x23d   : > { %7948 = vmatmul.mubr.msk.bf16.vlgmr.msra.gmra.mrb[0].mxu1 %vm1156_vm2, %v7945_v62  ;;  %3871 = vmatpush1.bf16.msra.mxu0 %v3859_v63  ;;  %v4706_v62 = vrot.slane %v7978_v54, %v10221_v51  ;;  %v4713_v63 = vrot.slane %v4699_v61, %v10221_v51  ;;  %v7989_v61 = vld [vmem:[%s11341_s1 + $0x80] sm:$0xf] }
 0x23e   : > { %3912 = vmatpush1.bf16.msra.mxu1 %v3865_v0  ;;  %3902 = vmatprep.mubr.bf16.mxu0 %v9106_v44 }
 0x23f   : > { %3943 = vmatprep.mubr.bf16.mxu1 %v9106_v44  ;;  %3993 = vmatprep.subr.bf16.mxu0 %v3985_v1  ;;  %v4714_v0 = vcombine.high %v4706_v62, %v4706_v62  ;;  %v4715_v1 = vcombine.high %v4713_v63, %v4713_v63  ;;  %v4720_v15 = vand.u32 %v4706_v62, %v10223_v55 }
 0x240   : > { %4034 = vmatprep.subr.bf16.mxu1 %v3991_v2  ;;  %v7982_v2 = vld [vmem:[%s10216_s17 + $0xf0] sm:$0xff]  ;;  %v4726_v16 = vand.u32 %v4713_v63, %v10223_v55 }
 0x241   : > { %v4723_v6 = vand.u32 %v4714_v0, %v10223_v55  ;;  %v4729_v7 = vand.u32 %v4715_v1, %v10223_v55  ;;  %v4822_v8 = vcombine.high %v7982_v2, %v7982_v2 }
 0x248   : > { %7951 = vmatmul.mubr.msk.bf16.vlgmr.msra.gmra.mrb[0].mxu0 %vm1156_vm2, %v7949_v9 }
 0x249   : > { %7952 = vmatmul.mubr.msk.bf16.vlgmr.msra.gmra.mrb[0].mxu1 %vm1156_vm2, %v7949_v9  ;;  %3994 = vmatpush1.bf16.msra.mxu0 %v3982_v10  ;;  %v4829_v9 = vrot.slane %v7982_v2, %v10221_v51  ;;  %v4836_v10 = vrot.slane %v4822_v8, %v10221_v51  ;;  %v7993_v8 = vld [vmem:[%s11341_s1 + $0x84] sm:$0xf] }
 0x24a   : > { %4035 = vmatpush1.bf16.msra.mxu1 %v3988_v11  ;;  %4025 = vmatprep.mubr.bf16.mxu0 %v9106_v44 }
 0x24b   : > { %4066 = vmatprep.mubr.bf16.mxu1 %v9106_v44  ;;  %4116 = vmatprep.subr.bf16.mxu0 %v4108_v12  ;;  %v4837_v11 = vcombine.high %v4829_v9, %v4829_v9  ;;  %v4838_v12 = vcombine.high %v4836_v10, %v4836_v10  ;;  %v4843_v26 = vand.u32 %v4829_v9, %v10223_v55 }
 0x24c   : > { %4157 = vmatprep.subr.bf16.mxu1 %v4114_v13  ;;  %v7986_v13 = vld [vmem:[%s10216_s17 + $0xf8] sm:$0xff]  ;;  %v4849_v27 = vand.u32 %v4836_v10, %v10223_v55 }
 0x24d   : > { %v4846_v17 = vand.u32 %v4837_v11, %v10223_v55  ;;  %v4852_v18 = vand.u32 %v4838_v12, %v10223_v55  ;;  %v4945_v19 = vcombine.high %v7986_v13, %v7986_v13 }
 0x254   : > { %7955 = vmatmul.mubr.msk.bf16.vlgmr.msra.gmra.mrb[0].mxu0 %vm1156_vm2, %v7953_v20 }
 0x255   : > { %7956 = vmatmul.mubr.msk.bf16.vlgmr.msra.gmra.mrb[0].mxu1 %vm1156_vm2, %v7953_v20  ;;  %4117 = vmatpush1.bf16.msra.mxu0 %v4105_v21  ;;  %v4952_v20 = vrot.slane %v7986_v13, %v10221_v51  ;;  %v4959_v21 = vrot.slane %v4945_v19, %v10221_v51  ;;  %v7997_v19 = vld [vmem:[%s11341_s1 + $0x88] sm:$0xf] }
 0x256   : > { %4158 = vmatpush1.bf16.msra.mxu1 %v4111_v22  ;;  %4148 = vmatprep.mubr.bf16.mxu0 %v9106_v44 }
 0x257   : > { %4189 = vmatprep.mubr.bf16.mxu1 %v9106_v44  ;;  %4239 = vmatprep.subr.bf16.mxu0 %v4231_v23  ;;  %v4960_v22 = vcombine.high %v4952_v20, %v4952_v20  ;;  %v4961_v23 = vcombine.high %v4959_v21, %v4959_v21  ;;  %v4966_v37 = vand.u32 %v4952_v20, %v10223_v55 }
 0x258   : > { %4280 = vmatprep.subr.bf16.mxu1 %v4237_v24  ;;  %v7990_v24 = vld [vmem:[%s10216_s17 + $0x100] sm:$0xff]  ;;  %v4972_v38 = vand.u32 %v4959_v21, %v10223_v55 }
 0x259   : > { %v4969_v28 = vand.u32 %v4960_v22, %v10223_v55  ;;  %v4975_v29 = vand.u32 %v4961_v23, %v10223_v55  ;;  %v5068_v30 = vcombine.high %v7990_v24, %v7990_v24 }
 0x260   : > { %7959 = vmatmul.mubr.msk.bf16.vlgmr.msra.gmra.mrb[0].mxu0 %vm1156_vm2, %v7957_v31 }
 0x261   : > { %7960 = vmatmul.mubr.msk.bf16.vlgmr.msra.gmra.mrb[0].mxu1 %vm1156_vm2, %v7957_v31  ;;  %4240 = vmatpush1.bf16.msra.mxu0 %v4228_v32  ;;  %v5075_v31 = vrot.slane %v7990_v24, %v10221_v51  ;;  %v5082_v32 = vrot.slane %v5068_v30, %v10221_v51  ;;  %v8001_v30 = vld [vmem:[%s11341_s1 + $0x8c] sm:$0xf] }
 0x262   : > { %4281 = vmatpush1.bf16.msra.mxu1 %v4234_v33  ;;  %4271 = vmatprep.mubr.bf16.mxu0 %v9106_v44 }
 0x263   : > { %4312 = vmatprep.mubr.bf16.mxu1 %v9106_v44  ;;  %4362 = vmatprep.subr.bf16.mxu0 %v4354_v34  ;;  %v5083_v33 = vcombine.high %v5075_v31, %v5075_v31  ;;  %v5084_v34 = vcombine.high %v5082_v32, %v5082_v32  ;;  %v5089_v49 = vand.u32 %v5075_v31, %v10223_v55 }
 0x264   : > { %4403 = vmatprep.subr.bf16.mxu1 %v4360_v35  ;;  %v7994_v35 = vld [vmem:[%s10216_s17 + $0x108] sm:$0xff]  ;;  %v5095_v50 = vand.u32 %v5082_v32, %v10223_v55 }
 0x265   : > { %v5092_v39 = vand.u32 %v5083_v33, %v10223_v55  ;;  %v5098_v40 = vand.u32 %v5084_v34, %v10223_v55  ;;  %v5191_v41 = vcombine.high %v7994_v35, %v7994_v35 }
 0x26c   : > { %7963 = vmatmul.mubr.msk.bf16.vlgmr.msra.gmra.mrb[0].mxu0 %vm1156_vm2, %v7961_v42 }
 0x26d   : > { %7964 = vmatmul.mubr.msk.bf16.vlgmr.msra.gmra.mrb[0].mxu1 %vm1156_vm2, %v7961_v42  ;;  %4363 = vmatpush1.bf16.msra.mxu0 %v4351_v43  ;;  %v5198_v42 = vrot.slane %v7994_v35, %v10221_v51  ;;  %v5205_v43 = vrot.slane %v5191_v41, %v10221_v51  ;;  %v8005_v41 = vld [vmem:[%s11341_s1 + $0x90] sm:$0xf] }
 0x26e   : > { %4404 = vmatpush1.bf16.msra.mxu1 %v4357_v45  ;;  %4394 = vmatprep.mubr.bf16.mxu0 %v9106_v44 }
 0x26f   : > { %4435 = vmatprep.mubr.bf16.mxu1 %v9106_v44  ;;  %4485 = vmatprep.subr.bf16.mxu0 %v4477_v46  ;;  %v5206_v45 = vcombine.high %v5198_v42, %v5198_v42  ;;  %v5207_v46 = vcombine.high %v5205_v43, %v5205_v43  ;;  %v5212_v62 = vand.u32 %v5198_v42, %v10223_v55 }
 0x270   : > { %4526 = vmatprep.subr.bf16.mxu1 %v4483_v47  ;;  %v7998_v47 = vld [vmem:[%s10216_s17 + $0x110] sm:$0xff]  ;;  %v5218_v63 = vand.u32 %v5205_v43, %v10223_v55 }
 0x271   : > { %v5215_v52 = vand.u32 %v5206_v45, %v10223_v55  ;;  %v5221_v53 = vand.u32 %v5207_v46, %v10223_v55  ;;  %v5314_v54 = vcombine.high %v7998_v47, %v7998_v47 }
 0x278   : > { %7967 = vmatmul.mubr.msk.bf16.vlgmr.msra.gmra.mrb[0].mxu0 %vm1156_vm2, %v7965_v56 }
 0x279   : > { %7968 = vmatmul.mubr.msk.bf16.vlgmr.msra.gmra.mrb[0].mxu1 %vm1156_vm2, %v7965_v56  ;;  %4486 = vmatpush1.bf16.msra.mxu0 %v4474_v57  ;;  %v5321_v56 = vrot.slane %v7998_v47, %v10221_v51  ;;  %v5328_v57 = vrot.slane %v5314_v54, %v10221_v51  ;;  %v8009_v54 = vld [vmem:[%s11341_s1 + $0x94] sm:$0xf] }
 0x27a   : > { %4527 = vmatpush1.bf16.msra.mxu1 %v4480_v58  ;;  %4517 = vmatprep.mubr.bf16.mxu0 %v9106_v44 }
 0x27b   : > { %4558 = vmatprep.mubr.bf16.mxu1 %v9106_v44  ;;  %4608 = vmatprep.subr.bf16.mxu0 %v4600_v59  ;;  %v5329_v58 = vcombine.high %v5321_v56, %v5321_v56  ;;  %v5330_v59 = vcombine.high %v5328_v57, %v5328_v57  ;;  %v5335_v9 = vand.u32 %v5321_v56, %v10223_v55 }
 0x27c   : > { %4649 = vmatprep.subr.bf16.mxu1 %v4606_v60  ;;  %v8002_v60 = vld [vmem:[%s10216_s17 + $0x118] sm:$0xff]  ;;  %v5341_v10 = vand.u32 %v5328_v57, %v10223_v55 }
 0x27d   : > { %v5338_v0 = vand.u32 %v5329_v58, %v10223_v55  ;;  %v5344_v1 = vand.u32 %v5330_v59, %v10223_v55  ;;  %v5437_v2 = vcombine.high %v8002_v60, %v8002_v60 }
 0x284   : > { %7971 = vmatmul.mubr.msk.bf16.vlgmr.msra.gmra.mrb[0].mxu0 %vm1156_vm2, %v7969_v3 }
 0x285   : > { %7972 = vmatmul.mubr.msk.bf16.vlgmr.msra.gmra.mrb[0].mxu1 %vm1156_vm2, %v7969_v3  ;;  %4609 = vmatpush1.bf16.msra.mxu0 %v4597_v4  ;;  %v5444_v3 = vrot.slane %v8002_v60, %v10221_v51  ;;  %v5451_v4 = vrot.slane %v5437_v2, %v10221_v51 }
 0x286   : > { %4650 = vmatpush1.bf16.msra.mxu1 %v4603_v5  ;;  %4640 = vmatprep.mubr.bf16.mxu0 %v9106_v44 }
 0x287   : > { %4681 = vmatprep.mubr.bf16.mxu1 %v9106_v44  ;;  %4731 = vmatprep.subr.bf16.mxu0 %v4723_v6  ;;  %v5452_v5 = vcombine.high %v5444_v3, %v5444_v3  ;;  %v5453_v6 = vcombine.high %v5451_v4, %v5451_v4  ;;  %v5458_v20 = vand.u32 %v5444_v3, %v10223_v55  ;;  %v8026_v3 = vld [vmem:[%s10216_s17 + $0x148] sm:$0xff] }
 0x288   : > { %4772 = vmatprep.subr.bf16.mxu1 %v4729_v7  ;;  %v8006_v7 = vld [vmem:[%s10216_s17 + $0x120] sm:$0xff]  ;;  %v5464_v21 = vand.u32 %v5451_v4, %v10223_v55  ;;  %v8013_v4 = vld [vmem:[%s11341_s1 + $0x98] sm:$0xf] }
 0x289   : > { %v5461_v11 = vand.u32 %v5452_v5, %v10223_v55  ;;  %v5467_v12 = vand.u32 %v5453_v6, %v10223_v55  ;;  %v5560_v13 = vcombine.high %v8006_v7, %v8006_v7 }
 0x290   : > { %7975 = vmatmul.mubr.msk.bf16.vlgmr.msra.gmra.mrb[0].mxu0 %vm1156_vm2, %v7973_v14 }
 0x291   : > { %7976 = vmatmul.mubr.msk.bf16.vlgmr.msra.gmra.mrb[0].mxu1 %vm1156_vm2, %v7973_v14  ;;  %4732 = vmatpush1.bf16.msra.mxu0 %v4720_v15  ;;  %v5567_v14 = vrot.slane %v8006_v7, %v10221_v51  ;;  %v5574_v15 = vrot.slane %v5560_v13, %v10221_v51 }
 0x292   : > { %4773 = vmatpush1.bf16.msra.mxu1 %v4726_v16  ;;  %4763 = vmatprep.mubr.bf16.mxu0 %v9106_v44 }
 0x293   : > { %4804 = vmatprep.mubr.bf16.mxu1 %v9106_v44  ;;  %4854 = vmatprep.subr.bf16.mxu0 %v4846_v17  ;;  %v5575_v16 = vcombine.high %v5567_v14, %v5567_v14  ;;  %v5576_v17 = vcombine.high %v5574_v15, %v5574_v15  ;;  %v5581_v31 = vand.u32 %v5567_v14, %v10223_v55  ;;  %v8030_v14 = vld [vmem:[%s10216_s17 + $0x150] sm:$0xff] }
 0x294   : > { %4895 = vmatprep.subr.bf16.mxu1 %v4852_v18  ;;  %v8010_v18 = vld [vmem:[%s10216_s17 + $0x128] sm:$0xff]  ;;  %v5587_v32 = vand.u32 %v5574_v15, %v10223_v55  ;;  %v8017_v15 = vld [vmem:[%s11341_s1 + $0x9c] sm:$0xf] }
 0x295   : > { %v5584_v22 = vand.u32 %v5575_v16, %v10223_v55  ;;  %v5590_v23 = vand.u32 %v5576_v17, %v10223_v55  ;;  %v5683_v24 = vcombine.high %v8010_v18, %v8010_v18 }
 0x29c   : > { %7979 = vmatmul.mubr.msk.bf16.vlgmr.msra.gmra.mrb[0].mxu0 %vm1156_vm2, %v7977_v25 }
 0x29d   : > { %7980 = vmatmul.mubr.msk.bf16.vlgmr.msra.gmra.mrb[0].mxu1 %vm1156_vm2, %v7977_v25  ;;  %4855 = vmatpush1.bf16.msra.mxu0 %v4843_v26  ;;  %v5690_v25 = vrot.slane %v8010_v18, %v10221_v51  ;;  %v5697_v26 = vrot.slane %v5683_v24, %v10221_v51 }
 0x29e   : > { %4896 = vmatpush1.bf16.msra.mxu1 %v4849_v27  ;;  %4886 = vmatprep.mubr.bf16.mxu0 %v9106_v44 }
 0x29f   : > { %4927 = vmatprep.mubr.bf16.mxu1 %v9106_v44  ;;  %4977 = vmatprep.subr.bf16.mxu0 %v4969_v28  ;;  %v5698_v27 = vcombine.high %v5690_v25, %v5690_v25  ;;  %v5699_v28 = vcombine.high %v5697_v26, %v5697_v26  ;;  %v5704_v42 = vand.u32 %v5690_v25, %v10223_v55  ;;  %v8034_v25 = vld [vmem:[%s10216_s17 + $0x158] sm:$0xff] }
 0x2a0   : > { %5018 = vmatprep.subr.bf16.mxu1 %v4975_v29  ;;  %v8014_v29 = vld [vmem:[%s10216_s17 + $0x130] sm:$0xff]  ;;  %v5710_v43 = vand.u32 %v5697_v26, %v10223_v55  ;;  %v8021_v26 = vld [vmem:[%s11341_s1 + $0xa0] sm:$0xf] }
 0x2a1   : > { %v5707_v33 = vand.u32 %v5698_v27, %v10223_v55  ;;  %v5713_v34 = vand.u32 %v5699_v28, %v10223_v55  ;;  %v5806_v35 = vcombine.high %v8014_v29, %v8014_v29 }
 0x2a8   : > { %7983 = vmatmul.mubr.msk.bf16.vlgmr.msra.gmra.mrb[0].mxu0 %vm1156_vm2, %v7981_v36 }
 0x2a9   : > { %7984 = vmatmul.mubr.msk.bf16.vlgmr.msra.gmra.mrb[0].mxu1 %vm1156_vm2, %v7981_v36  ;;  %4978 = vmatpush1.bf16.msra.mxu0 %v4966_v37  ;;  %v5813_v36 = vrot.slane %v8014_v29, %v10221_v51  ;;  %v5820_v37 = vrot.slane %v5806_v35, %v10221_v51 }
 0x2aa   : > { %5019 = vmatpush1.bf16.msra.mxu1 %v4972_v38  ;;  %5009 = vmatprep.mubr.bf16.mxu0 %v9106_v44 }
 0x2ab   : > { %5050 = vmatprep.mubr.bf16.mxu1 %v9106_v44  ;;  %5100 = vmatprep.subr.bf16.mxu0 %v5092_v39  ;;  %v5821_v38 = vcombine.high %v5813_v36, %v5813_v36  ;;  %v5822_v39 = vcombine.high %v5820_v37, %v5820_v37  ;;  %v5827_v56 = vand.u32 %v5813_v36, %v10223_v55  ;;  %v8038_v36 = vld [vmem:[%s10216_s17 + $0x160] sm:$0xff] }
 0x2ac   : > { %5141 = vmatprep.subr.bf16.mxu1 %v5098_v40  ;;  %v8018_v40 = vld [vmem:[%s10216_s17 + $0x138] sm:$0xff]  ;;  %v5833_v57 = vand.u32 %v5820_v37, %v10223_v55 }
 0x2ad   : > { %v5830_v45 = vand.u32 %v5821_v38, %v10223_v55  ;;  %v5836_v46 = vand.u32 %v5822_v39, %v10223_v55  ;;  %v5929_v47 = vcombine.high %v8018_v40, %v8018_v40  ;;  %v8025_v37 = vld [vmem:[%s11341_s1 + $0xa4] sm:$0xf] }
 0x2b4   : > { %7987 = vmatmul.mubr.msk.bf16.vlgmr.msra.gmra.mrb[0].mxu0 %vm1156_vm2, %v7985_v48 }
 0x2b5   : > { %7988 = vmatmul.mubr.msk.bf16.vlgmr.msra.gmra.mrb[0].mxu1 %vm1156_vm2, %v7985_v48  ;;  %5101 = vmatpush1.bf16.msra.mxu0 %v5089_v49  ;;  %v5936_v48 = vrot.slane %v8018_v40, %v10221_v51  ;;  %v5943_v49 = vrot.slane %v5929_v47, %v10221_v51 }
 0x2b6   : > { %5142 = vmatpush1.bf16.msra.mxu1 %v5095_v50  ;;  %5132 = vmatprep.mubr.bf16.mxu0 %v9106_v44 }
 0x2b7   : > { %5173 = vmatprep.mubr.bf16.mxu1 %v9106_v44  ;;  %5223 = vmatprep.subr.bf16.mxu0 %v5215_v52  ;;  %v5944_v50 = vcombine.high %v5936_v48, %v5936_v48  ;;  %v5945_v52 = vcombine.high %v5943_v49, %v5943_v49  ;;  %v5950_v5 = vand.u32 %v5936_v48, %v10223_v55  ;;  %v8042_v48 = vld [vmem:[%s10216_s17 + $0x168] sm:$0xff] }
 0x2b8   : > { %5264 = vmatprep.subr.bf16.mxu1 %v5221_v53  ;;  %v8022_v53 = vld [vmem:[%s10216_s17 + $0x140] sm:$0xff]  ;;  %v5956_v6 = vand.u32 %v5943_v49, %v10223_v55 }
 0x2b9   : > { %v5953_v58 = vand.u32 %v5944_v50, %v10223_v55  ;;  %v5959_v59 = vand.u32 %v5945_v52, %v10223_v55  ;;  %v6052_v60 = vcombine.high %v8022_v53, %v8022_v53  ;;  %v8029_v49 = vld [vmem:[%s11341_s1 + $0xa8] sm:$0xf] }
 0x2c0   : > { %7991 = vmatmul.mubr.msk.bf16.vlgmr.msra.gmra.mrb[0].mxu0 %vm1156_vm2, %v7989_v61 }
 0x2c1   : > { %7992 = vmatmul.mubr.msk.bf16.vlgmr.msra.gmra.mrb[0].mxu1 %vm1156_vm2, %v7989_v61  ;;  %5224 = vmatpush1.bf16.msra.mxu0 %v5212_v62  ;;  %v6059_v61 = vrot.slane %v8022_v53, %v10221_v51  ;;  %v6066_v62 = vrot.slane %v6052_v60, %v10221_v51 }
 0x2c2   : > { %5265 = vmatpush1.bf16.msra.mxu1 %v5218_v63  ;;  %5255 = vmatprep.mubr.bf16.mxu0 %v9106_v44  ;;  %v7154_v63 = vld [vmem:[%s11342_s2] sm:$0xff] }
 0x2c3   : > { %5296 = vmatprep.mubr.bf16.mxu1 %v9106_v44  ;;  %5346 = vmatprep.subr.bf16.mxu0 %v5338_v0  ;;  %v7164_v0 = vld [vmem:[%s11343_s3] sm:$0xff]  ;;  %v6068_v2 = vcombine.high %v6066_v62, %v6066_v62  ;;  %v6073_v16 = vand.u32 %v6059_v61, %v10223_v55  ;;  %v6079_v17 = vand.u32 %v6066_v62, %v10223_v55  ;;  %v8033_v62 = vld [vmem:[%s11341_s1 + $0xac] sm:$0xf] }
 0x2c4   : > { %5387 = vmatprep.subr.bf16.mxu1 %v5344_v1  ;;  %7157 = vperm.xlu0 %8773, %v7154_v63   ;;  %v6067_v1 = vcombine.high %v6059_v61, %v6059_v61  ;;  %v8046_v61 = vld [vmem:[%s10216_s17 + $0x170] sm:$0xff] }
 0x2c6   : > { %v6076_v7 = vand.u32 %v6067_v1, %v10223_v55 }
 0x2c8   : > { %7167 = vperm.xlu0 %8773, %v7164_v0  }
 0x2cc   : > { %7995 = vmatmul.mubr.msk.bf16.vlgmr.msra.gmra.mrb[0].mxu0 %vm1156_vm2, %v7993_v8 }
 0x2cd   : > { %7996 = vmatmul.mubr.msk.bf16.vlgmr.msra.gmra.mrb[0].mxu1 %vm1156_vm2, %v7993_v8  ;;  %5347 = vmatpush1.bf16.msra.mxu0 %v5335_v9  ;;  %v6082_v8 = vand.u32 %v6068_v2, %v10223_v55  ;;  %v6175_v9 = vcombine.high %v8026_v3, %v8026_v3 }
 0x2ce   : > { %5388 = vmatpush1.bf16.msra.mxu1 %v5341_v10  ;;  %5378 = vmatprep.mubr.bf16.mxu0 %v9106_v44  ;;  %v6182_v10 = vrot.slane %v8026_v3, %v10221_v51  ;;  %v6790_v3 = vcombine.high %v8046_v61, %v8046_v61 }
 0x2cf   : > { %5419 = vmatprep.mubr.bf16.mxu1 %v9106_v44  ;;  %5469 = vmatprep.subr.bf16.mxu0 %v5461_v11  ;;  %v6189_v11 = vrot.slane %v6175_v9, %v10221_v51  ;;  %v8037_v9 = vld [vmem:[%s11341_s1 + $0xb0] sm:$0xf] }
 0x2d0   : > { %5510 = vmatprep.subr.bf16.mxu1 %v5467_v12  ;;  %v6190_v12 = vcombine.high %v6182_v10, %v6182_v10  ;;  %v6196_v27 = vand.u32 %v6182_v10, %v10223_v55 }
 0x2d1   : > { %v6191_v13 = vcombine.high %v6189_v11, %v6189_v11  ;;  %v6202_v28 = vand.u32 %v6189_v11, %v10223_v55 }
 0x2d2   : > { %v6199_v18 = vand.u32 %v6190_v12, %v10223_v55 }
 0x2d8   : > { %7999 = vmatmul.mubr.msk.bf16.vlgmr.msra.gmra.mrb[0].mxu0 %vm1156_vm2, %v7997_v19 }
 0x2d9   : > { %8000 = vmatmul.mubr.msk.bf16.vlgmr.msra.gmra.mrb[0].mxu1 %vm1156_vm2, %v7997_v19  ;;  %5470 = vmatpush1.bf16.msra.mxu0 %v5458_v20  ;;  %v6205_v19 = vand.u32 %v6191_v13, %v10223_v55  ;;  %v6298_v20 = vcombine.high %v8030_v14, %v8030_v14 }
 0x2da   : > { %5511 = vmatpush1.bf16.msra.mxu1 %v5464_v21  ;;  %5501 = vmatprep.mubr.bf16.mxu0 %v9106_v44  ;;  %v6305_v21 = vrot.slane %v8030_v14, %v10221_v51 }
 0x2db   : > { %5542 = vmatprep.mubr.bf16.mxu1 %v9106_v44  ;;  %5592 = vmatprep.subr.bf16.mxu0 %v5584_v22  ;;  %v6312_v22 = vrot.slane %v6298_v20, %v10221_v51  ;;  %v8041_v20 = vld [vmem:[%s11341_s1 + $0xb4] sm:$0xf] }
 0x2dc   : > { %5633 = vmatprep.subr.bf16.mxu1 %v5590_v23  ;;  %v6313_v23 = vcombine.high %v6305_v21, %v6305_v21  ;;  %v6319_v38 = vand.u32 %v6305_v21, %v10223_v55 }
 0x2dd   : > { %v6314_v24 = vcombine.high %v6312_v22, %v6312_v22  ;;  %v6325_v39 = vand.u32 %v6312_v22, %v10223_v55 }
 0x2de   : > { %v6322_v29 = vand.u32 %v6313_v23, %v10223_v55 }
 0x2e4   : > { %8003 = vmatmul.mubr.msk.bf16.vlgmr.msra.gmra.mrb[0].mxu0 %vm1156_vm2, %v8001_v30 }
 0x2e5   : > { %8004 = vmatmul.mubr.msk.bf16.vlgmr.msra.gmra.mrb[0].mxu1 %vm1156_vm2, %v8001_v30  ;;  %5593 = vmatpush1.bf16.msra.mxu0 %v5581_v31  ;;  %v6328_v30 = vand.u32 %v6314_v24, %v10223_v55  ;;  %v6421_v31 = vcombine.high %v8034_v25, %v8034_v25 }
 0x2e6   : > { %5634 = vmatpush1.bf16.msra.mxu1 %v5587_v32  ;;  %5624 = vmatprep.mubr.bf16.mxu0 %v9106_v44  ;;  %v6428_v32 = vrot.slane %v8034_v25, %v10221_v51 }
 0x2e7   : > { %5665 = vmatprep.mubr.bf16.mxu1 %v9106_v44  ;;  %5715 = vmatprep.subr.bf16.mxu0 %v5707_v33  ;;  %v6435_v33 = vrot.slane %v6421_v31, %v10221_v51 }
 0x2e8   : > { %5756 = vmatprep.subr.bf16.mxu1 %v5713_v34  ;;  %v6436_v34 = vcombine.high %v6428_v32, %v6428_v32  ;;  %v6442_v50 = vand.u32 %v6428_v32, %v10223_v55 }
 0x2e9   : > { %v6437_v35 = vcombine.high %v6435_v33, %v6435_v33  ;;  %v6448_v52 = vand.u32 %v6435_v33, %v10223_v55 }
 0x2ea   : > { %v6445_v40 = vand.u32 %v6436_v34, %v10223_v55 }
 0x2f0   : > { %8007 = vmatmul.mubr.msk.bf16.vlgmr.msra.gmra.mrb[0].mxu0 %vm1156_vm2, %v8005_v41 }
 0x2f1   : > { %8008 = vmatmul.mubr.msk.bf16.vlgmr.msra.gmra.mrb[0].mxu1 %vm1156_vm2, %v8005_v41  ;;  %5716 = vmatpush1.bf16.msra.mxu0 %v5704_v42  ;;  %v6451_v41 = vand.u32 %v6437_v35, %v10223_v55  ;;  %v6544_v42 = vcombine.high %v8038_v36, %v8038_v36 }
 0x2f2   : > { %5757 = vmatpush1.bf16.msra.mxu1 %v5710_v43  ;;  %5747 = vmatprep.mubr.bf16.mxu0 %v9106_v44  ;;  %v6551_v43 = vrot.slane %v8038_v36, %v10221_v51 }
 0x2f3   : > { %5788 = vmatprep.mubr.bf16.mxu1 %v9106_v44  ;;  %5838 = vmatprep.subr.bf16.mxu0 %v5830_v45  ;;  %v6558_v45 = vrot.slane %v6544_v42, %v10221_v51 }
 0x2f4   : > { %5879 = vmatprep.subr.bf16.mxu1 %v5836_v46  ;;  %v6559_v46 = vcombine.high %v6551_v43, %v6551_v43  ;;  %v6565_v63 = vand.u32 %v6551_v43, %v10223_v55 }
 0x2f5   : > { %v6560_v47 = vcombine.high %v6558_v45, %v6558_v45  ;;  %v6571_v0 = vand.u32 %v6558_v45, %v10223_v55 }
 0x2f6   : > { %v6568_v53 = vand.u32 %v6559_v46, %v10223_v55 }
 0x2fc   : > { %8011 = vmatmul.mubr.msk.bf16.vlgmr.msra.gmra.mrb[0].mxu0 %vm1156_vm2, %v8009_v54 }
 0x2fd   : > { %8012 = vmatmul.mubr.msk.bf16.vlgmr.msra.gmra.mrb[0].mxu1 %vm1156_vm2, %v8009_v54  ;;  %5839 = vmatpush1.bf16.msra.mxu0 %v5827_v56  ;;  %v6574_v54 = vand.u32 %v6560_v47, %v10223_v55  ;;  %v6667_v56 = vcombine.high %v8042_v48, %v8042_v48 }
 0x2fe   : > { %5880 = vmatpush1.bf16.msra.mxu1 %v5833_v57  ;;  %5870 = vmatprep.mubr.bf16.mxu0 %v9106_v44  ;;  %v6674_v57 = vrot.slane %v8042_v48, %v10221_v51 }
 0x2ff   : > { %5911 = vmatprep.mubr.bf16.mxu1 %v9106_v44  ;;  %5961 = vmatprep.subr.bf16.mxu0 %v5953_v58  ;;  %v6681_v58 = vrot.slane %v6667_v56, %v10221_v51 }
 0x300   : > { %6002 = vmatprep.subr.bf16.mxu1 %v5959_v59  ;;  %v6682_v59 = vcombine.high %v6674_v57, %v6674_v57  ;;  %v6688_v10 = vand.u32 %v6674_v57, %v10223_v55 }
 0x301   : > { %v6683_v60 = vcombine.high %v6681_v58, %v6681_v58  ;;  %v6694_v11 = vand.u32 %v6681_v58, %v10223_v55 }
 0x302   : > { %v6691_v1 = vand.u32 %v6682_v59, %v10223_v55 }
 0x303   : > { %v6697_v2 = vand.u32 %v6683_v60, %v10223_v55 }
 0x308   : > { %8015 = vmatmul.mubr.msk.bf16.vlgmr.msra.gmra.mrb[0].mxu0 %vm1156_vm2, %v8013_v4 }
 0x309   : > { %8016 = vmatmul.mubr.msk.bf16.vlgmr.msra.gmra.mrb[0].mxu1 %vm1156_vm2, %v8013_v4  ;;  %5962 = vmatpush1.bf16.msra.mxu0 %v5950_v5  ;;  %v6797_v4 = vrot.slane %v8046_v61, %v10221_v51  ;;  %v6804_v5 = vrot.slane %v6790_v3, %v10221_v51 }
 0x30a   : > { %6003 = vmatpush1.bf16.msra.mxu1 %v5956_v6  ;;  %5993 = vmatprep.mubr.bf16.mxu0 %v9106_v44 }
 0x30b   : > { %6034 = vmatprep.mubr.bf16.mxu1 %v9106_v44  ;;  %6084 = vmatprep.subr.bf16.mxu0 %v6076_v7  ;;  %v6805_v6 = vcombine.high %v6797_v4, %v6797_v4  ;;  %v6806_v7 = vcombine.high %v6804_v5, %v6804_v5  ;;  %v6811_v21 = vand.u32 %v6797_v4, %v10223_v55 }
 0x30c   : > { %6125 = vmatprep.subr.bf16.mxu1 %v6082_v8  ;;  %v8050_v8 = vld [vmem:[%s10216_s17 + $0x178] sm:$0xff]  ;;  %v6817_v22 = vand.u32 %v6804_v5, %v10223_v55 }
 0x30d   : > { %v6814_v12 = vand.u32 %v6805_v6, %v10223_v55  ;;  %v6820_v13 = vand.u32 %v6806_v7, %v10223_v55  ;;  %v6913_v14 = vcombine.high %v8050_v8, %v8050_v8 }
 0x314   : > { %8019 = vmatmul.mubr.msk.bf16.vlgmr.msra.gmra.mrb[0].mxu0 %vm1156_vm2, %v8017_v15 }
 0x315   : > { %8020 = vmatmul.mubr.msk.bf16.vlgmr.msra.gmra.mrb[0].mxu1 %vm1156_vm2, %v8017_v15  ;;  %6085 = vmatpush1.bf16.msra.mxu0 %v6073_v16  ;;  %v6920_v15 = vrot.slane %v8050_v8, %v10221_v51  ;;  %v6927_v16 = vrot.slane %v6913_v14, %v10221_v51 }
 0x316   : > { %6126 = vmatpush1.bf16.msra.mxu1 %v6079_v17  ;;  %6116 = vmatprep.mubr.bf16.mxu0 %v9106_v44 }
 0x317   : > { %6157 = vmatprep.mubr.bf16.mxu1 %v9106_v44  ;;  %6207 = vmatprep.subr.bf16.mxu0 %v6199_v18  ;;  %v6928_v17 = vcombine.high %v6920_v15, %v6920_v15  ;;  %v6929_v18 = vcombine.high %v6927_v16, %v6927_v16  ;;  %v6934_v31 = vand.u32 %v6920_v15, %v10223_v55 }
 0x318   : > { %6248 = vmatprep.subr.bf16.mxu1 %v6205_v19  ;;  %v8054_v19 = vld [vmem:[%s10216_s17 + $0x180] sm:$0xff]  ;;  %v6940_v32 = vand.u32 %v6927_v16, %v10223_v55 }
 0x319   : > { %v6937_v23 = vand.u32 %v6928_v17, %v10223_v55  ;;  %v6943_v24 = vand.u32 %v6929_v18, %v10223_v55  ;;  %v7036_v25 = vcombine.high %v8054_v19, %v8054_v19 }
 0x320   : > { %8023 = vmatmul.mubr.msk.bf16.vlgmr.msra.gmra.mrb[0].mxu0 %vm1156_vm2, %v8021_v26 }
 0x321   : > { %8024 = vmatmul.mubr.msk.bf16.vlgmr.msra.gmra.mrb[0].mxu1 %vm1156_vm2, %v8021_v26  ;;  %6208 = vmatpush1.bf16.msra.mxu0 %v6196_v27  ;;  %v7043_v26 = vrot.slane %v8054_v19, %v10221_v51  ;;  %v7050_v27 = vrot.slane %v7036_v25, %v10221_v51  ;;  %v8049_v51 = vld [vmem:[%s11341_s1 + $0xbc] sm:$0xf] }
 0x322   : > { %6249 = vmatpush1.bf16.msra.mxu1 %v6202_v28  ;;  %6239 = vmatprep.mubr.bf16.mxu0 %v9106_v44 }
 0x323   : > { %6280 = vmatprep.mubr.bf16.mxu1 %v9106_v44  ;;  %6330 = vmatprep.subr.bf16.mxu0 %v6322_v29  ;;  %v7051_v28 = vcombine.high %v7043_v26, %v7043_v26  ;;  %v7052_v29 = vcombine.high %v7050_v27, %v7050_v27  ;;  %v7057_v35 = vand.u32 %v7043_v26, %v10223_v55 }
 0x324   : > { %6371 = vmatprep.subr.bf16.mxu1 %v6328_v30  ;;  %v8045_v30 = vld [vmem:[%s11341_s1 + $0xb8] sm:$0xf]  ;;  %v7063_v36 = vand.u32 %v7050_v27, %v10223_v55 }
 0x325   : > { %v7060_v33 = vand.u32 %v7051_v28, %v10223_v55  ;;  %v7066_v34 = vand.u32 %v7052_v29, %v10223_v55 }
 0x32c   : > { %8027 = vmatmul.mubr.msk.bf16.vlgmr.msra.gmra.mrb[0].mxu0 %vm1156_vm2, %v8025_v37 }
 0x32d   : > { %8028 = vmatmul.mubr.msk.bf16.vlgmr.msra.gmra.mrb[0].mxu1 %vm1156_vm2, %v8025_v37  ;;  %6331 = vmatpush1.bf16.msra.mxu0 %v6319_v38  ;;  %v8053_v37 = vld [vmem:[%s11341_s1 + $0xc0] sm:$0xf] }
 0x32e   : > { %6372 = vmatpush1.bf16.msra.mxu1 %v6325_v39  ;;  %6362 = vmatprep.mubr.bf16.mxu0 %v9106_v44 }
 0x32f   : > { %6403 = vmatprep.mubr.bf16.mxu1 %v9106_v44  ;;  %6453 = vmatprep.subr.bf16.mxu0 %v6445_v40 }
 0x330   : > { %6494 = vmatprep.subr.bf16.mxu1 %v6451_v41 }
 0x338   : > { %8031 = vmatmul.mubr.msk.bf16.vlgmr.msra.gmra.mrb[0].mxu0 %vm1156_vm2, %v8029_v49 }
 0x339   : > { %8032 = vmatmul.mubr.msk.bf16.vlgmr.msra.gmra.mrb[0].mxu1 %vm1156_vm2, %v8029_v49  ;;  %6454 = vmatpush1.bf16.msra.mxu0 %v6442_v50 }
 0x33a   : > { %6495 = vmatpush1.bf16.msra.mxu1 %v6448_v52  ;;  %6485 = vmatprep.mubr.bf16.mxu0 %v9106_v44 }
 0x33b   : > { %6526 = vmatprep.mubr.bf16.mxu1 %v9106_v44  ;;  %6576 = vmatprep.subr.bf16.mxu0 %v6568_v53 }
 0x33c   : > { %6617 = vmatprep.subr.bf16.mxu1 %v6574_v54 }
 0x343   : > { %v7158_v38 = vpop.permute.xlu0 %7157 }
 0x344   : > { %8035 = vmatmul.mubr.msk.bf16.vlgmr.msra.gmra.mrb[0].mxu0 %vm1156_vm2, %v8033_v62 }
 0x345   : > { %8036 = vmatmul.mubr.msk.bf16.vlgmr.msra.gmra.mrb[0].mxu1 %vm1156_vm2, %v8033_v62  ;;  %6577 = vmatpush1.bf16.msra.mxu0 %v6565_v63 }
 0x346   : > { %6618 = vmatpush1.bf16.msra.mxu1 %v6571_v0  ;;  %6608 = vmatprep.mubr.bf16.mxu0 %v9106_v44 }
 0x347   : > { %6649 = vmatprep.mubr.bf16.mxu1 %v9106_v44  ;;  %6699 = vmatprep.subr.bf16.mxu0 %v6691_v1  ;;  %v7168_v55 = vpop.permute.xlu0 %7167 }
 0x348   : > { %6740 = vmatprep.subr.bf16.mxu1 %v6697_v2 }
 0x350   : > { %8039 = vmatmul.mubr.msk.bf16.vlgmr.msra.gmra.mrb[0].mxu0 %vm1156_vm2, %v8037_v9 }
 0x351   : > { %8040 = vmatmul.mubr.msk.bf16.vlgmr.msra.gmra.mrb[0].mxu1 %vm1156_vm2, %v8037_v9  ;;  %6700 = vmatpush1.bf16.msra.mxu0 %v6688_v10 }
 0x352   : > { %6741 = vmatpush1.bf16.msra.mxu1 %v6694_v11  ;;  %6731 = vmatprep.mubr.bf16.mxu0 %v9106_v44 }
 0x353   : > { %6772 = vmatprep.mubr.bf16.mxu1 %v9106_v44  ;;  %6822 = vmatprep.subr.bf16.mxu0 %v6814_v12 }
 0x354   : > { %6863 = vmatprep.subr.bf16.mxu1 %v6820_v13 }
 0x35c   : > { %8043 = vmatmul.mubr.msk.bf16.vlgmr.msra.gmra.mrb[0].mxu0 %vm1156_vm2, %v8041_v20 }
 0x35d   : > { %8044 = vmatmul.mubr.msk.bf16.vlgmr.msra.gmra.mrb[0].mxu1 %vm1156_vm2, %v8041_v20  ;;  %6823 = vmatpush1.bf16.msra.mxu0 %v6811_v21 }
 0x35e   : > { %6864 = vmatpush1.bf16.msra.mxu1 %v6817_v22  ;;  %6854 = vmatprep.mubr.bf16.mxu0 %v9106_v44 }
 0x35f   : > { %6895 = vmatprep.mubr.bf16.mxu1 %v9106_v44  ;;  %6945 = vmatprep.subr.bf16.mxu0 %v6937_v23 }
 0x360   : > { %6986 = vmatprep.subr.bf16.mxu1 %v6943_v24 }
 0x368   : > { %8047 = vmatmul.mubr.msk.bf16.vlgmr.msra.gmra.mrb[0].mxu0 %vm1156_vm2, %v8045_v30 }
 0x369   : > { %8048 = vmatmul.mubr.msk.bf16.vlgmr.msra.gmra.mrb[0].mxu1 %vm1156_vm2, %v8045_v30  ;;  %6946 = vmatpush1.bf16.msra.mxu0 %v6934_v31 }
 0x36a   : > { %6987 = vmatpush1.bf16.msra.mxu1 %v6940_v32  ;;  %6977 = vmatprep.mubr.bf16.mxu0 %v9106_v44 }
 0x36b   : > { %7018 = vmatprep.mubr.bf16.mxu1 %v9106_v44  ;;  %7068 = vmatprep.subr.bf16.mxu0 %v7060_v33 }
 0x36c   : > { %7109 = vmatprep.subr.bf16.mxu1 %v7066_v34 }
 0x374   : > { %8051 = vmatmul.mubr.msk.bf16.vlgmr.msra.gmra.mrb[0].mxu0 %vm1156_vm2, %v8049_v51 }
 0x375   : > { %8052 = vmatmul.mubr.msk.bf16.vlgmr.msra.gmra.mrb[0].mxu1 %vm1156_vm2, %v8049_v51  ;;  %7069 = vmatpush1.bf16.msra.mxu0 %v7057_v35 }
 0x376   : > { %7110 = vmatpush1.bf16.msra.mxu1 %v7063_v36  ;;  %7100 = vmatprep.mubr.bf16.mxu0 %v9106_v44 }
 0x377   : > { %7141 = vmatprep.mubr.bf16.mxu1 %v9106_v44 }
 0x380   : > { %8055 = vmatmul.mubr.msk.bf16.vlgmr.msra.gmra.mrb[0].mxu0 %vm1156_vm2, %v8053_v37 }
 0x381   : > { %8056 = vmatmul.mubr.msk.bf16.vlgmr.msra.gmra.mrb[0].mxu1 %vm1156_vm2, %v8053_v37 }
 0x453   : > { %v7102_v39 = vpop.f32.mrb[0].mxu0 }
 0x454   : > { %v7143_v40 = vpop.f32.mrb[0].mxu1  ;;  %v7160_v41 = vmul.f32 %v7158_v38, %v7102_v39  ;;  %v7104_v43 = vpop.f32.mrb[1].mxu0 }
 0x455   : > { %v7162_v42 = vmul.f32 %v7158_v38, %v7143_v40  ;;  %v7145_v45 = vpop.f32.mrb[1].mxu1  ;;  %v7161_v46 = vmul.f32 %v7158_v38, %v7104_v43  ;;  %v7106_v44 = vpop.f32.mrb[2].mxu0 }
 0x456   : > { %v7163_v47 = vmul.f32 %v7158_v38, %v7145_v45  ;;  %v7147_v48 = vpop.f32.mrb[2].mxu1  ;;  %v7170_v49 = vadd.f32 %v7168_v55, %v7160_v41  ;;  %v7107_v52 = vpop.f32.mrb[3].mxu0 }
 0x457   : > { %v7172_v50 = vadd.f32 %v7168_v55, %v7162_v42  ;;  %v7148_v53 = vpop.f32.mrb[3].mxu1  ;;  %v7171_v54 = vadd.f32 %v7168_v55, %v7161_v46 }
 0x458   : > { %v7173_v56 = vadd.f32 %v7168_v55, %v7163_v47  ;;  %v7174_v57 = vmax.f32 %v7170_v49, 0.0  ;;  %7202 = sbr.rel (!%p9166_p5) target bundleno = 1284 (0x504), region = 106 }
 0x459   : > { %v7176_v58 = vmax.f32 %v7172_v50, 0.0  ;;  %v7175_v59 = vmax.f32 %v7171_v54, 0.0 }
 0x45a   : > { %v7177_v60 = vmax.f32 %v7173_v56, 0.0 }
 0x45b   : > { %v8093_v61 = vpack.c.bf16 %v7175_v59, %v7174_v57 }
 0x45c   : > { %v8094_v62 = vpack.c.bf16 %v7177_v60, %v7176_v58 }
 0x45d   : > { %7194 = vst [vmem:[%s10914_s10] sm:$0xff] %v8093_v61 }
 0x45e   : > { %7195 = vst [vmem:[%s10914_s10 + $0x8] sm:$0xff] %v8094_v62 }
 0x45f   : > { %s11390_s24 = smov (!%p7205_p1, %s7204_s24), 4 }
 0x460   : > { %s8061_s29 = sshll.u32 %s11390_s24, 6  ;;  %s10927_s5 = sshll.u32 %s11390_s24, 2 }
 0x461   : > { %p8065_p2 = scmp.eq.s32.totalorder %s8061_s29, 0 }
 0x462   : > { %p7215_p3 = scmp.lt.u32.totalorder (!%p8065_p2), %s10927_s5, 8 }
 0x463   : > { %7214 = sbr.rel (%p8065_p2) target bundleno = 1284 (0x504), region = 110 }
 0x46a   : > { %7218 = sbr.rel (%p7215_p3) target bundleno = 1275 (0x4fb), region = 114  ;;  %s10931_s23 = sand.u32 (!%p7215_p3), 7, %s10927_s5  }
 0x46b   : > { %p7234_p5 = scmp.eq.s32.totalorder (!%p7215_p3), %s10931_s23, 0  ;;  %p8066_p4 = scmp.ne.s32.totalorder (!%p7215_p3), %s10931_s23, 0 }
 0x471   : > { %7237 = sbr.rel (%p8066_p4) target bundleno = 1204 (0x4b4), region = 129  ;;  %s7238_s18 = sshrl.u32 (!%p8066_p4), %s10927_s5, 3 }
 0x472   : > { %s10938_s8 = sshrl.u32 (!%p8066_p4), %s7238_s18, 6 }
 0x473   : > { %p8067_p6 = scmp.le.s32.totalorder (!%p8066_p4), %s10938_s8, 0 }
 0x478   : > { %7761 = sbr.rel (%p8067_p6) target bundleno = 1184 (0x4a0), region = 373  ;;  %s11366_s21 = smov (!%p8067_p6), %s10925_s28 }
 0x479   : > { %s11367_s14 = smov (!%p8067_p6), %s10914_s10  ;;  %s10947_s11 = smov (!%p8067_p6), 0  }
 0x47a   : > { %s10949_s27 = smov (!%p8067_p6), 0  }
 0x47f LB: >> { %v7251_v63 = vld [vmem:[%s9045_s14] sm:$0xff]  ;;  %v7253_v0 = vld [vmem:[%s9045_s14 + $0x8] sm:$0xff]  ;;  %v7255_v1 = vld [vmem:[%s9045_s14 + $0x10] sm:$0xff]  ;;  %s7379_s17 = sadd.s32 1, %s9049_s11  ;;  %s7245_s27 = sadd.s32 1, %s9053_s27   ;;  %s9053_s27 = sphi %s10949_s27, %s7245_s27   ;;  %s9049_s11 = sphi %s10947_s11, %s11370_s11   ;;  %s9045_s14 = sphi %s11367_s14, %s11369_s14   ;;  %s9041_s21 = sphi %s11366_s21, %s11368_s21  }
 0x480   : >> { %7252 = vst [vmem:[%s9041_s21] sm:$0xff] %v7251_v63  ;;  %7254 = vst [vmem:[%s9041_s21 + $0x8] sm:$0xff] %v7253_v0  ;;  %v7257_v2 = vld [vmem:[%s9045_s14 + $0x18] sm:$0xff]  ;;  %v7259_v3 = vld [vmem:[%s9045_s14 + $0x20] sm:$0xff]  ;;  %p7380_p7 = scmp.ge.s32.totalorder %s7379_s17, %s10938_s8  ;;  %p7244_p8 = scmp.ge.s32.totalorder %s7245_s27, %s10938_s8 }
 0x481   : >> { %7256 = vst [vmem:[%s9041_s21 + $0x10] sm:$0xff] %v7255_v1  ;;  %v7261_v4 = vld [vmem:[%s9045_s14 + $0x28] sm:$0xff]  ;;  %7258 = vst [vmem:[%s9041_s21 + $0x18] sm:$0xff] %v7257_v2  ;;  %v7263_v5 = vld [vmem:[%s9045_s14 + $0x30] sm:$0xff] }
 0x482   : >> { %7260 = vst [vmem:[%s9041_s21 + $0x20] sm:$0xff] %v7259_v3  ;;  %7262 = vst [vmem:[%s9041_s21 + $0x28] sm:$0xff] %v7261_v4  ;;  %v7265_v6 = vld [vmem:[%s9045_s14 + $0x38] sm:$0xff]  ;;  %v7267_v7 = vld [vmem:[%s9045_s14 + $0x40] sm:$0xff]  ;;  %s11392_s17 = smov (%p7380_p7, %s7379_s17), 0 }
 0x483   : >> { %7264 = vst [vmem:[%s9041_s21 + $0x30] sm:$0xff] %v7263_v5  ;;  %7266 = vst [vmem:[%s9041_s21 + $0x38] sm:$0xff] %v7265_v6  ;;  %v7269_v8 = vld [vmem:[%s9045_s14 + $0x48] sm:$0xff]  ;;  %v7271_v9 = vld [vmem:[%s9045_s14 + $0x50] sm:$0xff]  ;;  %s8068_s30 = sshll.u32 %s11392_s17, 9  ;;  %s11370_s11 = smov %s11392_s17 }
 0x484   : >> { %7268 = vst [vmem:[%s9041_s21 + $0x40] sm:$0xff] %v7267_v7  ;;  %v7273_v10 = vld [vmem:[%s9045_s14 + $0x58] sm:$0xff]  ;;  %7270 = vst [vmem:[%s9041_s21 + $0x48] sm:$0xff] %v7269_v8  ;;  %v7275_v11 = vld [vmem:[%s9045_s14 + $0x60] sm:$0xff]  ;;  %s11005_s6 = scalar_lea.vmem %s10914_s10, %s8068_s30 [#allocation3]   ;;  %s11008_s12 = scalar_lea.vmem %s10925_s28, %s8068_s30  }
 0x485   : >> { %7272 = vst [vmem:[%s9041_s21 + $0x50] sm:$0xff] %v7271_v9  ;;  %7274 = vst [vmem:[%s9041_s21 + $0x58] sm:$0xff] %v7273_v10  ;;  %v7277_v12 = vld [vmem:[%s9045_s14 + $0x68] sm:$0xff]  ;;  %v7279_v13 = vld [vmem:[%s9045_s14 + $0x70] sm:$0xff] }
 0x486   : >> { %7276 = vst [vmem:[%s9041_s21 + $0x60] sm:$0xff] %v7275_v11  ;;  %7278 = vst [vmem:[%s9041_s21 + $0x68] sm:$0xff] %v7277_v12  ;;  %v7281_v14 = vld [vmem:[%s9045_s14 + $0x78] sm:$0xff]  ;;  %v7283_v15 = vld [vmem:[%s9045_s14 + $0x80] sm:$0xff] }
 0x487   : >> { %7280 = vst [vmem:[%s9041_s21 + $0x70] sm:$0xff] %v7279_v13  ;;  %v7285_v16 = vld [vmem:[%s9045_s14 + $0x88] sm:$0xff]  ;;  %7282 = vst [vmem:[%s9041_s21 + $0x78] sm:$0xff] %v7281_v14  ;;  %v7287_v17 = vld [vmem:[%s9045_s14 + $0x90] sm:$0xff] }
 0x488   : >> { %7284 = vst [vmem:[%s9041_s21 + $0x80] sm:$0xff] %v7283_v15  ;;  %7286 = vst [vmem:[%s9041_s21 + $0x88] sm:$0xff] %v7285_v16  ;;  %v7289_v18 = vld [vmem:[%s9045_s14 + $0x98] sm:$0xff]  ;;  %v7291_v19 = vld [vmem:[%s9045_s14 + $0xa0] sm:$0xff] }
 0x489   : >> { %7288 = vst [vmem:[%s9041_s21 + $0x90] sm:$0xff] %v7287_v17  ;;  %7290 = vst [vmem:[%s9041_s21 + $0x98] sm:$0xff] %v7289_v18  ;;  %v7293_v20 = vld [vmem:[%s9045_s14 + $0xa8] sm:$0xff]  ;;  %v7295_v21 = vld [vmem:[%s9045_s14 + $0xb0] sm:$0xff] }
 0x48a   : >> { %7292 = vst [vmem:[%s9041_s21 + $0xa0] sm:$0xff] %v7291_v19  ;;  %v7297_v22 = vld [vmem:[%s9045_s14 + $0xb8] sm:$0xff]  ;;  %7294 = vst [vmem:[%s9041_s21 + $0xa8] sm:$0xff] %v7293_v20  ;;  %v7299_v23 = vld [vmem:[%s9045_s14 + $0xc0] sm:$0xff] }
 0x48b   : >> { %7296 = vst [vmem:[%s9041_s21 + $0xb0] sm:$0xff] %v7295_v21  ;;  %7298 = vst [vmem:[%s9041_s21 + $0xb8] sm:$0xff] %v7297_v22  ;;  %v7301_v24 = vld [vmem:[%s9045_s14 + $0xc8] sm:$0xff]  ;;  %v7303_v25 = vld [vmem:[%s9045_s14 + $0xd0] sm:$0xff] }
 0x48c   : >> { %7300 = vst [vmem:[%s9041_s21 + $0xc0] sm:$0xff] %v7299_v23  ;;  %7302 = vst [vmem:[%s9041_s21 + $0xc8] sm:$0xff] %v7301_v24  ;;  %v7305_v26 = vld [vmem:[%s9045_s14 + $0xd8] sm:$0xff]  ;;  %v7307_v27 = vld [vmem:[%s9045_s14 + $0xe0] sm:$0xff] }
 0x48d   : >> { %7304 = vst [vmem:[%s9041_s21 + $0xd0] sm:$0xff] %v7303_v25  ;;  %v7309_v28 = vld [vmem:[%s9045_s14 + $0xe8] sm:$0xff]  ;;  %7306 = vst [vmem:[%s9041_s21 + $0xd8] sm:$0xff] %v7305_v26  ;;  %v7311_v29 = vld [vmem:[%s9045_s14 + $0xf0] sm:$0xff] }
 0x48e   : >> { %7308 = vst [vmem:[%s9041_s21 + $0xe0] sm:$0xff] %v7307_v27  ;;  %7310 = vst [vmem:[%s9041_s21 + $0xe8] sm:$0xff] %v7309_v28  ;;  %v7313_v30 = vld [vmem:[%s9045_s14 + $0xf8] sm:$0xff]  ;;  %v7315_v31 = vld [vmem:[%s9045_s14 + $0x100] sm:$0xff] }
 0x48f   : >> { %7312 = vst [vmem:[%s9041_s21 + $0xf0] sm:$0xff] %v7311_v29  ;;  %7314 = vst [vmem:[%s9041_s21 + $0xf8] sm:$0xff] %v7313_v30  ;;  %v7317_v32 = vld [vmem:[%s9045_s14 + $0x108] sm:$0xff]  ;;  %v7319_v33 = vld [vmem:[%s9045_s14 + $0x110] sm:$0xff] }
 0x490   : >> { %7316 = vst [vmem:[%s9041_s21 + $0x100] sm:$0xff] %v7315_v31  ;;  %v7321_v34 = vld [vmem:[%s9045_s14 + $0x118] sm:$0xff]  ;;  %7318 = vst [vmem:[%s9041_s21 + $0x108] sm:$0xff] %v7317_v32  ;;  %v7323_v51 = vld [vmem:[%s9045_s14 + $0x120] sm:$0xff] }
 0x491   : >> { %7320 = vst [vmem:[%s9041_s21 + $0x110] sm:$0xff] %v7319_v33  ;;  %7322 = vst [vmem:[%s9041_s21 + $0x118] sm:$0xff] %v7321_v34  ;;  %v7325_v35 = vld [vmem:[%s9045_s14 + $0x128] sm:$0xff]  ;;  %v7327_v36 = vld [vmem:[%s9045_s14 + $0x130] sm:$0xff] }
 0x492   : >> { %7324 = vst [vmem:[%s9041_s21 + $0x120] sm:$0xff] %v7323_v51  ;;  %7326 = vst [vmem:[%s9041_s21 + $0x128] sm:$0xff] %v7325_v35  ;;  %v7329_v37 = vld [vmem:[%s9045_s14 + $0x138] sm:$0xff]  ;;  %v7331_v38 = vld [vmem:[%s9045_s14 + $0x140] sm:$0xff] }
 0x493   : >> { %7328 = vst [vmem:[%s9041_s21 + $0x130] sm:$0xff] %v7327_v36  ;;  %v7333_v55 = vld [vmem:[%s9045_s14 + $0x148] sm:$0xff]  ;;  %7330 = vst [vmem:[%s9041_s21 + $0x138] sm:$0xff] %v7329_v37  ;;  %v7335_v39 = vld [vmem:[%s9045_s14 + $0x150] sm:$0xff] }
 0x494   : >> { %7332 = vst [vmem:[%s9041_s21 + $0x140] sm:$0xff] %v7331_v38  ;;  %7334 = vst [vmem:[%s9041_s21 + $0x148] sm:$0xff] %v7333_v55  ;;  %v7337_v40 = vld [vmem:[%s9045_s14 + $0x158] sm:$0xff]  ;;  %v7339_v41 = vld [vmem:[%s9045_s14 + $0x160] sm:$0xff] }
 0x495   : >> { %7336 = vst [vmem:[%s9041_s21 + $0x150] sm:$0xff] %v7335_v39  ;;  %7338 = vst [vmem:[%s9041_s21 + $0x158] sm:$0xff] %v7337_v40  ;;  %v7341_v42 = vld [vmem:[%s9045_s14 + $0x168] sm:$0xff]  ;;  %v7343_v43 = vld [vmem:[%s9045_s14 + $0x170] sm:$0xff] }
 0x496   : >> { %7340 = vst [vmem:[%s9041_s21 + $0x160] sm:$0xff] %v7339_v41  ;;  %v7345_v45 = vld [vmem:[%s9045_s14 + $0x178] sm:$0xff]  ;;  %7342 = vst [vmem:[%s9041_s21 + $0x168] sm:$0xff] %v7341_v42  ;;  %v7347_v46 = vld [vmem:[%s9045_s14 + $0x180] sm:$0xff] }
 0x497   : >> { %7344 = vst [vmem:[%s9041_s21 + $0x170] sm:$0xff] %v7343_v43  ;;  %7346 = vst [vmem:[%s9041_s21 + $0x178] sm:$0xff] %v7345_v45  ;;  %v7349_v47 = vld [vmem:[%s9045_s14 + $0x188] sm:$0xff]  ;;  %v7351_v44 = vld [vmem:[%s9045_s14 + $0x190] sm:$0xff] }
 0x498   : >> { %7348 = vst [vmem:[%s9041_s21 + $0x180] sm:$0xff] %v7347_v46  ;;  %7350 = vst [vmem:[%s9041_s21 + $0x188] sm:$0xff] %v7349_v47  ;;  %v7353_v48 = vld [vmem:[%s9045_s14 + $0x198] sm:$0xff]  ;;  %v7355_v49 = vld [vmem:[%s9045_s14 + $0x1a0] sm:$0xff] }
 0x499   : >> { %7352 = vst [vmem:[%s9041_s21 + $0x190] sm:$0xff] %v7351_v44  ;;  %v7357_v50 = vld [vmem:[%s9045_s14 + $0x1a8] sm:$0xff]  ;;  %7354 = vst [vmem:[%s9041_s21 + $0x198] sm:$0xff] %v7353_v48  ;;  %v7359_v52 = vld [vmem:[%s9045_s14 + $0x1b0] sm:$0xff]  ;;  %7247 = sbr.rel (!%p7244_p8) target bundleno = 1151 (0x47f), region = 379 }
 0x49a   : >> { %7356 = vst [vmem:[%s9041_s21 + $0x1a0] sm:$0xff] %v7355_v49  ;;  %7358 = vst [vmem:[%s9041_s21 + $0x1a8] sm:$0xff] %v7357_v50  ;;  %v7361_v53 = vld [vmem:[%s9045_s14 + $0x1b8] sm:$0xff]  ;;  %v7363_v54 = vld [vmem:[%s9045_s14 + $0x1c0] sm:$0xff] }
 0x49b   : >> { %7360 = vst [vmem:[%s9041_s21 + $0x1b0] sm:$0xff] %v7359_v52  ;;  %7362 = vst [vmem:[%s9041_s21 + $0x1b8] sm:$0xff] %v7361_v53  ;;  %v7365_v56 = vld [vmem:[%s9045_s14 + $0x1c8] sm:$0xff]  ;;  %v7367_v57 = vld [vmem:[%s9045_s14 + $0x1d0] sm:$0xff] }
 0x49c   : >> { %7364 = vst [vmem:[%s9041_s21 + $0x1c0] sm:$0xff] %v7363_v54  ;;  %v7369_v58 = vld [vmem:[%s9045_s14 + $0x1d8] sm:$0xff]  ;;  %7366 = vst [vmem:[%s9041_s21 + $0x1c8] sm:$0xff] %v7365_v56  ;;  %v7371_v59 = vld [vmem:[%s9045_s14 + $0x1e0] sm:$0xff] }
 0x49d   : >> { %7368 = vst [vmem:[%s9041_s21 + $0x1d0] sm:$0xff] %v7367_v57  ;;  %7370 = vst [vmem:[%s9041_s21 + $0x1d8] sm:$0xff] %v7369_v58  ;;  %v7373_v60 = vld [vmem:[%s9045_s14 + $0x1e8] sm:$0xff]  ;;  %v7375_v61 = vld [vmem:[%s9045_s14 + $0x1f0] sm:$0xff] }
 0x49e   : >> { %7372 = vst [vmem:[%s9041_s21 + $0x1e0] sm:$0xff] %v7371_v59  ;;  %7374 = vst [vmem:[%s9041_s21 + $0x1e8] sm:$0xff] %v7373_v60  ;;  %v7377_v62 = vld [vmem:[%s9045_s14 + $0x1f8] sm:$0xff]  ;;  %s11369_s14 = smov %s11005_s6 }
 0x49f   : >> { %7376 = vst [vmem:[%s9041_s21 + $0x1f0] sm:$0xff] %v7375_v61  ;;  %7378 = vst [vmem:[%s9041_s21 + $0x1f8] sm:$0xff] %v7377_v62  ;;  %s11368_s21 = smov %s11008_s12 }
 0x4a0 PF: > { %s11114_s26 = sand.u32 63, %s7238_s18   ;;  %s8096_s20 = sshll.u32 %s10938_s8, 13 }
 0x4a1   : > { %s7390_s13 = sshra.s32 %s8096_s20, 4  ;;  %p8073_p9 = scmp.le.s32.totalorder %s11114_s26, 0 }
 0x4a2   : > { %s7391_s15 = scalar_lea.vmem %s10914_s10, %s7390_s13 [#allocation3]   ;;  %s7394_s7 = scalar_lea.vmem %s10925_s28, %s7390_s13  }
 0x4a3   : > { %7775 = sbr.rel (%p8073_p9) target bundleno = 1204 (0x4b4), region = 384  ;;  %s9055_s24 = smov (!%p8073_p9), %s7394_s7  }
 0x4a4   : > { %s9059_s25 = smov (!%p8073_p9), %s7391_s15   ;;  %s9063_s9 = smov (!%p8073_p9), 0  }
 0x4a5   : > { %s9067_s29 = smov (!%p8073_p9), 0  }
 0x4aa LB: >> { %v7406_v63 = vld [vmem:[%s9061_s25] sm:$0xff]  ;;  %s7408_s18 = sadd.s32 1, %s9065_s9  ;;  %s7400_s29 = sadd.s32 1, %s9069_s29   ;;  %s9069_s29 = sphi %s9067_s29, %s7400_s29   ;;  %s9065_s9 = sphi %s9063_s9, %s9064_s9   ;;  %s9061_s25 = sphi %s9059_s25, %s7413_s25   ;;  %s9057_s24 = sphi %s9055_s24, %s7414_s24  }
 0x4ab   : >> { %7407 = vst [vmem:[%s9057_s24] sm:$0xff] %v7406_v63  ;;  %p7409_p10 = scmp.ge.s32.totalorder %s7408_s18, %s11114_s26  ;;  %p7399_p11 = scmp.ge.s32.totalorder %s7400_s29, %s11114_s26 }
 0x4ad   : >> { %s11394_s18 = smov (%p7409_p10, %s7408_s18), 0  ;;  %7402 = sbr.rel (!%p7399_p11) target bundleno = 1194 (0x4aa), region = 390 }
 0x4ae   : >> { %s8074_s8 = sshll.u32 %s11394_s18, 3  ;;  %s9064_s9 = smov %s11394_s18  }
 0x4af   : >> { %s7413_s25 = scalar_lea.vmem %s7391_s15, %s8074_s8 [#allocation3]   ;;  %s7414_s24 = scalar_lea.vmem %s7394_s7, %s8074_s8  }
 0x4b4 PF: > { %7417 = sbr.rel (%p7234_p5) target bundleno = 1275 (0x4fb), region = 147  ;;  %s11126_s21 = ssub.s32 (!%p7234_p5), %s10927_s5, %s10931_s23 }
 0x4b5   : > { %s7423_s14 = sshrl.u32 (!%p7234_p5), %s10927_s5, 3  ;;  %s7420_s11 = scalar_lea.vmem (!%p7234_p5), %s10914_s10, %s11126_s21 [#allocation3] }
 0x4b6   : > { %s7422_s27 = scalar_lea.vmem (!%p7234_p5), %s10925_s28, %s11126_s21  ;;  %s11135_s17 = sshrl.u32 (!%p7234_p5), %s7423_s14, 6 }
 0x4b7   : > { %p8076_p12 = scmp.le.s32.totalorder (!%p7234_p5), %s11135_s17, 0 }
 0x4bb   : > { %7789 = sbr.rel (%p8076_p12) target bundleno = 1251 (0x4e3), region = 395  ;;  %s11371_s30 = smov (!%p8076_p12), %s10925_s28 }
 0x4bc   : > { %s11372_s6 = smov (!%p8076_p12), %s10914_s10  ;;  %s11144_s12 = smov (!%p8076_p12), 0  }
 0x4bd   : > { %s11146_s26 = smov (!%p8076_p12), 0  }
 0x4c2 LB: >> { %v7436_v0 = vld [vmem:[%s9077_s6] sm:$0xff]  ;;  %v7438_v1 = vld [vmem:[%s9077_s6 + $0x8] sm:$0xff]  ;;  %v7440_v2 = vld [vmem:[%s9077_s6 + $0x10] sm:$0xff]  ;;  %s7564_s20 = sadd.s32 1, %s9081_s12  ;;  %s7430_s26 = sadd.s32 1, %s9085_s26   ;;  %s9085_s26 = sphi %s11146_s26, %s7430_s26   ;;  %s9081_s12 = sphi %s11144_s12, %s11375_s12   ;;  %s9077_s6 = sphi %s11372_s6, %s11374_s6   ;;  %s9073_s30 = sphi %s11371_s30, %s11373_s30  }
 0x4c3   : >> { %7437 = vst [vmem:[%s9073_s30] sm:$0xff] %v7436_v0  ;;  %7439 = vst [vmem:[%s9073_s30 + $0x8] sm:$0xff] %v7438_v1  ;;  %v7442_v3 = vld [vmem:[%s9077_s6 + $0x18] sm:$0xff]  ;;  %v7444_v4 = vld [vmem:[%s9077_s6 + $0x20] sm:$0xff]  ;;  %p7565_p13 = scmp.ge.s32.totalorder %s7564_s20, %s11135_s17  ;;  %p7429_p0 = scmp.ge.s32.totalorder %s7430_s26, %s11135_s17 }
 0x4c4   : >> { %7441 = vst [vmem:[%s9073_s30 + $0x10] sm:$0xff] %v7440_v2  ;;  %v7446_v5 = vld [vmem:[%s9077_s6 + $0x28] sm:$0xff]  ;;  %7443 = vst [vmem:[%s9073_s30 + $0x18] sm:$0xff] %v7442_v3  ;;  %v7448_v6 = vld [vmem:[%s9077_s6 + $0x30] sm:$0xff] }
 0x4c5   : >> { %7445 = vst [vmem:[%s9073_s30 + $0x20] sm:$0xff] %v7444_v4  ;;  %7447 = vst [vmem:[%s9073_s30 + $0x28] sm:$0xff] %v7446_v5  ;;  %v7450_v7 = vld [vmem:[%s9077_s6 + $0x38] sm:$0xff]  ;;  %v7452_v8 = vld [vmem:[%s9077_s6 + $0x40] sm:$0xff]  ;;  %s11396_s20 = smov (%p7565_p13, %s7564_s20), 0 }
 0x4c6   : >> { %7449 = vst [vmem:[%s9073_s30 + $0x30] sm:$0xff] %v7448_v6  ;;  %7451 = vst [vmem:[%s9073_s30 + $0x38] sm:$0xff] %v7450_v7  ;;  %v7454_v9 = vld [vmem:[%s9077_s6 + $0x48] sm:$0xff]  ;;  %v7456_v10 = vld [vmem:[%s9077_s6 + $0x50] sm:$0xff]  ;;  %s8077_s13 = sshll.u32 %s11396_s20, 9  ;;  %s11375_s12 = smov %s11396_s20 }
 0x4c7   : >> { %7453 = vst [vmem:[%s9073_s30 + $0x40] sm:$0xff] %v7452_v8  ;;  %v7458_v11 = vld [vmem:[%s9077_s6 + $0x58] sm:$0xff]  ;;  %7455 = vst [vmem:[%s9073_s30 + $0x48] sm:$0xff] %v7454_v9  ;;  %v7460_v12 = vld [vmem:[%s9077_s6 + $0x60] sm:$0xff]  ;;  %s11202_s15 = scalar_lea.vmem %s10914_s10, %s8077_s13 [#allocation3]   ;;  %s11205_s7 = scalar_lea.vmem %s10925_s28, %s8077_s13  }
 0x4c8   : >> { %7457 = vst [vmem:[%s9073_s30 + $0x50] sm:$0xff] %v7456_v10  ;;  %7459 = vst [vmem:[%s9073_s30 + $0x58] sm:$0xff] %v7458_v11  ;;  %v7462_v13 = vld [vmem:[%s9077_s6 + $0x68] sm:$0xff]  ;;  %v7464_v14 = vld [vmem:[%s9077_s6 + $0x70] sm:$0xff] }
 0x4c9   : >> { %7461 = vst [vmem:[%s9073_s30 + $0x60] sm:$0xff] %v7460_v12  ;;  %7463 = vst [vmem:[%s9073_s30 + $0x68] sm:$0xff] %v7462_v13  ;;  %v7466_v15 = vld [vmem:[%s9077_s6 + $0x78] sm:$0xff]  ;;  %v7468_v16 = vld [vmem:[%s9077_s6 + $0x80] sm:$0xff] }
 0x4ca   : >> { %7465 = vst [vmem:[%s9073_s30 + $0x70] sm:$0xff] %v7464_v14  ;;  %v7470_v17 = vld [vmem:[%s9077_s6 + $0x88] sm:$0xff]  ;;  %7467 = vst [vmem:[%s9073_s30 + $0x78] sm:$0xff] %v7466_v15  ;;  %v7472_v18 = vld [vmem:[%s9077_s6 + $0x90] sm:$0xff] }
 0x4cb   : >> { %7469 = vst [vmem:[%s9073_s30 + $0x80] sm:$0xff] %v7468_v16  ;;  %7471 = vst [vmem:[%s9073_s30 + $0x88] sm:$0xff] %v7470_v17  ;;  %v7474_v19 = vld [vmem:[%s9077_s6 + $0x98] sm:$0xff]  ;;  %v7476_v20 = vld [vmem:[%s9077_s6 + $0xa0] sm:$0xff] }
 0x4cc   : >> { %7473 = vst [vmem:[%s9073_s30 + $0x90] sm:$0xff] %v7472_v18  ;;  %7475 = vst [vmem:[%s9073_s30 + $0x98] sm:$0xff] %v7474_v19  ;;  %v7478_v21 = vld [vmem:[%s9077_s6 + $0xa8] sm:$0xff]  ;;  %v7480_v22 = vld [vmem:[%s9077_s6 + $0xb0] sm:$0xff] }
 0x4cd   : >> { %7477 = vst [vmem:[%s9073_s30 + $0xa0] sm:$0xff] %v7476_v20  ;;  %v7482_v23 = vld [vmem:[%s9077_s6 + $0xb8] sm:$0xff]  ;;  %7479 = vst [vmem:[%s9073_s30 + $0xa8] sm:$0xff] %v7478_v21  ;;  %v7484_v24 = vld [vmem:[%s9077_s6 + $0xc0] sm:$0xff] }
 0x4ce   : >> { %7481 = vst [vmem:[%s9073_s30 + $0xb0] sm:$0xff] %v7480_v22  ;;  %7483 = vst [vmem:[%s9073_s30 + $0xb8] sm:$0xff] %v7482_v23  ;;  %v7486_v25 = vld [vmem:[%s9077_s6 + $0xc8] sm:$0xff]  ;;  %v7488_v26 = vld [vmem:[%s9077_s6 + $0xd0] sm:$0xff] }
 0x4cf   : >> { %7485 = vst [vmem:[%s9073_s30 + $0xc0] sm:$0xff] %v7484_v24  ;;  %7487 = vst [vmem:[%s9073_s30 + $0xc8] sm:$0xff] %v7486_v25  ;;  %v7490_v27 = vld [vmem:[%s9077_s6 + $0xd8] sm:$0xff]  ;;  %v7492_v28 = vld [vmem:[%s9077_s6 + $0xe0] sm:$0xff] }
 0x4d0   : >> { %7489 = vst [vmem:[%s9073_s30 + $0xd0] sm:$0xff] %v7488_v26  ;;  %v7494_v29 = vld [vmem:[%s9077_s6 + $0xe8] sm:$0xff]  ;;  %7491 = vst [vmem:[%s9073_s30 + $0xd8] sm:$0xff] %v7490_v27  ;;  %v7496_v30 = vld [vmem:[%s9077_s6 + $0xf0] sm:$0xff] }
 0x4d1   : >> { %7493 = vst [vmem:[%s9073_s30 + $0xe0] sm:$0xff] %v7492_v28  ;;  %7495 = vst [vmem:[%s9073_s30 + $0xe8] sm:$0xff] %v7494_v29  ;;  %v7498_v31 = vld [vmem:[%s9077_s6 + $0xf8] sm:$0xff]  ;;  %v7500_v32 = vld [vmem:[%s9077_s6 + $0x100] sm:$0xff] }
 0x4d2   : >> { %7497 = vst [vmem:[%s9073_s30 + $0xf0] sm:$0xff] %v7496_v30  ;;  %7499 = vst [vmem:[%s9073_s30 + $0xf8] sm:$0xff] %v7498_v31  ;;  %v7502_v33 = vld [vmem:[%s9077_s6 + $0x108] sm:$0xff]  ;;  %v7504_v34 = vld [vmem:[%s9077_s6 + $0x110] sm:$0xff] }
 0x4d3   : >> { %7501 = vst [vmem:[%s9073_s30 + $0x100] sm:$0xff] %v7500_v32  ;;  %v7506_v51 = vld [vmem:[%s9077_s6 + $0x118] sm:$0xff]  ;;  %7503 = vst [vmem:[%s9073_s30 + $0x108] sm:$0xff] %v7502_v33  ;;  %v7508_v35 = vld [vmem:[%s9077_s6 + $0x120] sm:$0xff] }
 0x4d4   : >> { %7505 = vst [vmem:[%s9073_s30 + $0x110] sm:$0xff] %v7504_v34  ;;  %7507 = vst [vmem:[%s9073_s30 + $0x118] sm:$0xff] %v7506_v51  ;;  %v7510_v36 = vld [vmem:[%s9077_s6 + $0x128] sm:$0xff]  ;;  %v7512_v37 = vld [vmem:[%s9077_s6 + $0x130] sm:$0xff] }
 0x4d5   : >> { %7509 = vst [vmem:[%s9073_s30 + $0x120] sm:$0xff] %v7508_v35  ;;  %7511 = vst [vmem:[%s9073_s30 + $0x128] sm:$0xff] %v7510_v36  ;;  %v7514_v38 = vld [vmem:[%s9077_s6 + $0x138] sm:$0xff]  ;;  %v7516_v55 = vld [vmem:[%s9077_s6 + $0x140] sm:$0xff] }
 0x4d6   : >> { %7513 = vst [vmem:[%s9073_s30 + $0x130] sm:$0xff] %v7512_v37  ;;  %v7518_v39 = vld [vmem:[%s9077_s6 + $0x148] sm:$0xff]  ;;  %7515 = vst [vmem:[%s9073_s30 + $0x138] sm:$0xff] %v7514_v38  ;;  %v7520_v40 = vld [vmem:[%s9077_s6 + $0x150] sm:$0xff] }
 0x4d7   : >> { %7517 = vst [vmem:[%s9073_s30 + $0x140] sm:$0xff] %v7516_v55  ;;  %7519 = vst [vmem:[%s9073_s30 + $0x148] sm:$0xff] %v7518_v39  ;;  %v7522_v41 = vld [vmem:[%s9077_s6 + $0x158] sm:$0xff]  ;;  %v7524_v42 = vld [vmem:[%s9077_s6 + $0x160] sm:$0xff] }
 0x4d8   : >> { %7521 = vst [vmem:[%s9073_s30 + $0x150] sm:$0xff] %v7520_v40  ;;  %7523 = vst [vmem:[%s9073_s30 + $0x158] sm:$0xff] %v7522_v41  ;;  %v7526_v43 = vld [vmem:[%s9077_s6 + $0x168] sm:$0xff]  ;;  %v7528_v45 = vld [vmem:[%s9077_s6 + $0x170] sm:$0xff] }
 0x4d9   : >> { %7525 = vst [vmem:[%s9073_s30 + $0x160] sm:$0xff] %v7524_v42  ;;  %v7530_v46 = vld [vmem:[%s9077_s6 + $0x178] sm:$0xff]  ;;  %7527 = vst [vmem:[%s9073_s30 + $0x168] sm:$0xff] %v7526_v43  ;;  %v7532_v47 = vld [vmem:[%s9077_s6 + $0x180] sm:$0xff] }
 0x4da   : >> { %7529 = vst [vmem:[%s9073_s30 + $0x170] sm:$0xff] %v7528_v45  ;;  %7531 = vst [vmem:[%s9073_s30 + $0x178] sm:$0xff] %v7530_v46  ;;  %v7534_v44 = vld [vmem:[%s9077_s6 + $0x188] sm:$0xff]  ;;  %v7536_v48 = vld [vmem:[%s9077_s6 + $0x190] sm:$0xff] }
 0x4db   : >> { %7533 = vst [vmem:[%s9073_s30 + $0x180] sm:$0xff] %v7532_v47  ;;  %7535 = vst [vmem:[%s9073_s30 + $0x188] sm:$0xff] %v7534_v44  ;;  %v7538_v49 = vld [vmem:[%s9077_s6 + $0x198] sm:$0xff]  ;;  %v7540_v50 = vld [vmem:[%s9077_s6 + $0x1a0] sm:$0xff] }
 0x4dc   : >> { %7537 = vst [vmem:[%s9073_s30 + $0x190] sm:$0xff] %v7536_v48  ;;  %v7542_v52 = vld [vmem:[%s9077_s6 + $0x1a8] sm:$0xff]  ;;  %7539 = vst [vmem:[%s9073_s30 + $0x198] sm:$0xff] %v7538_v49  ;;  %v7544_v53 = vld [vmem:[%s9077_s6 + $0x1b0] sm:$0xff]  ;;  %7432 = sbr.rel (!%p7429_p0) target bundleno = 1218 (0x4c2), region = 401 }
 0x4dd   : >> { %7541 = vst [vmem:[%s9073_s30 + $0x1a0] sm:$0xff] %v7540_v50  ;;  %7543 = vst [vmem:[%s9073_s30 + $0x1a8] sm:$0xff] %v7542_v52  ;;  %v7546_v54 = vld [vmem:[%s9077_s6 + $0x1b8] sm:$0xff]  ;;  %v7548_v56 = vld [vmem:[%s9077_s6 + $0x1c0] sm:$0xff] }
 0x4de   : >> { %7545 = vst [vmem:[%s9073_s30 + $0x1b0] sm:$0xff] %v7544_v53  ;;  %7547 = vst [vmem:[%s9073_s30 + $0x1b8] sm:$0xff] %v7546_v54  ;;  %v7550_v57 = vld [vmem:[%s9077_s6 + $0x1c8] sm:$0xff]  ;;  %v7552_v58 = vld [vmem:[%s9077_s6 + $0x1d0] sm:$0xff] }
 0x4df   : >> { %7549 = vst [vmem:[%s9073_s30 + $0x1c0] sm:$0xff] %v7548_v56  ;;  %v7554_v59 = vld [vmem:[%s9077_s6 + $0x1d8] sm:$0xff]  ;;  %7551 = vst [vmem:[%s9073_s30 + $0x1c8] sm:$0xff] %v7550_v57  ;;  %v7556_v60 = vld [vmem:[%s9077_s6 + $0x1e0] sm:$0xff] }
 0x4e0   : >> { %7553 = vst [vmem:[%s9073_s30 + $0x1d0] sm:$0xff] %v7552_v58  ;;  %7555 = vst [vmem:[%s9073_s30 + $0x1d8] sm:$0xff] %v7554_v59  ;;  %v7558_v61 = vld [vmem:[%s9077_s6 + $0x1e8] sm:$0xff]  ;;  %v7560_v62 = vld [vmem:[%s9077_s6 + $0x1f0] sm:$0xff] }
 0x4e1   : >> { %7557 = vst [vmem:[%s9073_s30 + $0x1e0] sm:$0xff] %v7556_v60  ;;  %7559 = vst [vmem:[%s9073_s30 + $0x1e8] sm:$0xff] %v7558_v61  ;;  %v7562_v63 = vld [vmem:[%s9077_s6 + $0x1f8] sm:$0xff]  ;;  %s11374_s6 = smov %s11202_s15 }
 0x4e2   : >> { %7561 = vst [vmem:[%s9073_s30 + $0x1f0] sm:$0xff] %v7560_v62  ;;  %7563 = vst [vmem:[%s9073_s30 + $0x1f8] sm:$0xff] %v7562_v63  ;;  %s11373_s30 = smov %s11205_s7 }
 0x4e3 PF: > { %s11311_s24 = sand.u32 63, %s7423_s14   ;;  %s8098_s25 = sshll.u32 %s11135_s17, 13 }
 0x4e4   : > { %s7575_s9 = sshra.s32 %s8098_s25, 4  ;;  %p8082_p1 = scmp.le.s32.totalorder %s11311_s24, 0 }
 0x4e5   : > { %s7576_s29 = scalar_lea.vmem %s10914_s10, %s7575_s9 [#allocation3]   ;;  %s7579_s18 = scalar_lea.vmem %s10925_s28, %s7575_s9  }
 0x4e6   : > { %7803 = sbr.rel (%p8082_p1) target bundleno = 1271 (0x4f7), region = 406  ;;  %s9087_s8 = smov (!%p8082_p1), %s7579_s18  }
 0x4e7   : > { %s9091_s20 = smov (!%p8082_p1), %s7576_s29   ;;  %s9095_s13 = smov (!%p8082_p1), 0  }
 0x4e8   : > { %s9099_s26 = smov (!%p8082_p1), 0  }
 0x4ed LB: >> { %v7591_v0 = vld [vmem:[%s9093_s20] sm:$0xff]  ;;  %s7593_s14 = sadd.s32 1, %s9097_s13  ;;  %s7585_s26 = sadd.s32 1, %s9101_s26   ;;  %s9101_s26 = sphi %s9099_s26, %s7585_s26   ;;  %s9097_s13 = sphi %s9095_s13, %s9096_s13   ;;  %s9093_s20 = sphi %s9091_s20, %s7598_s20   ;;  %s9089_s8 = sphi %s9087_s8, %s7599_s8  }
 0x4ee   : >> { %7592 = vst [vmem:[%s9089_s8] sm:$0xff] %v7591_v0  ;;  %p7594_p2 = scmp.ge.s32.totalorder %s7593_s14, %s11311_s24  ;;  %p7584_p3 = scmp.ge.s32.totalorder %s7585_s26, %s11311_s24 }
 0x4f0   : >> { %s11398_s14 = smov (%p7594_p2, %s7593_s14), 0  ;;  %7587 = sbr.rel (!%p7584_p3) target bundleno = 1261 (0x4ed), region = 412 }
 0x4f1   : >> { %s8083_s17 = sshll.u32 %s11398_s14, 3  ;;  %s9096_s13 = smov %s11398_s14  }
 0x4f2   : >> { %s7598_s20 = scalar_lea.vmem %s7576_s29, %s8083_s17 [#allocation3]   ;;  %s7599_s8 = scalar_lea.vmem %s7579_s18, %s8083_s17  }
 0x4f7 PF: > { %s9108_s30 = smov 0  }
 0x4f8   : > { %s7600_s6 = sshllo.u32 %s9108_s30, %s10931_s23 }
 0x4f9   : > { %v7609_v1 = vld [vmem:[%s7420_s11] sm:%s7600_s6] }
 0x4fa   : > { %7610 = vst [vmem:[%s7422_s27] sm:%s7600_s6] %v7609_v1 }
 0x4fb PF: > { %p8085_p5 = scmp.ge.u32.totalorder %s10927_s5, 8 }
 0x4fc   : > { %s9109_s12 = smov (!%p8085_p5), 0  }
 0x4fd   : > { %7221 = sbr.rel (%p8085_p5) target bundleno = 1284 (0x504), region = 118  ;;  %s7222_s15 = sshllo.u32 (!%p8085_p5), %s9109_s12, %s10927_s5 }
 0x4fe   : > { %v7231_v2 = vld [vmem:[%s10914_s10] sm:%s7222_s15] (!%p8085_p5) }
 0x4ff   : > { %7232 = vst [vmem:[%s10925_s28] sm:%s7222_s15] (!%p8085_p5), %v7231_v2 }
 0x504 PF: > { %p11_p4 = scmp.ge.s32.totalorder %s9154_s19, 6   ;;  %s11376_s15 = smov %s8969_s16 }
 0x505   : > { %s11377_s16 = smov %s9164_s22  ;;  %s11378_s17 = smov %s9154_s19 }
 0x506   :  { %13 = sbr.rel (!%p11_p4) target bundleno = 2 (0x2), region = 423 }

// kernel: _lambda_.17
= control target key start
LH: loop header
LB: loop body
LE: loop exit
PB: predicated region body
PF: predicated region fallthrough
CT: control target
= control target key end

     0   :  { %vm40_vm0 = vcmask 1043456   ;;  %v1300_v2 = vmov 0   ;;  %vm36_vm1 = vcmask 64512   ;;  %vm1091_vm2 = vcmask 64516   ;;  %s1493_s0 = inlined_call_operand.vmem [shape: bf16[9,8,392], index: 0, kind: input, shape index: {}]   ;;  %s1494_s1 = inlined_call_operand.vmem [shape: bf16[9,8,8], index: 1, kind: input, shape index: {}]   ;;  %s1495_s2 = inlined_call_operand.vmem [shape: f32[8,1], index: 2, kind: input, shape index: {}]   ;;  %s1496_s3 = inlined_call_operand.vmem [shape: f32[8,1], index: 3, kind: input, shape index: {}]   ;;  %s1497_s4 = inlined_call_operand.vmem [shape: bf16[8,392], index: 4, kind: output, shape index: {}]  }
   0x1   :  { %v1099_v0 = vld [vmem:[%s1493_s0 + $0x10] sm:$0xff]  ;;  %v1100_v1 = vld [vmem:[%s1493_s0 + $0x18] sm:$0xff]  ;;  %85 = vmatprep.mubr.bf16.mxu0 %v1300_v2  ;;  %126 = vmatprep.mubr.bf16.mxu1 %v1300_v2  ;;  %v19_v7 = vld [vmem:[%s1493_s0] sm:$0xff] }
   0x2   :  { %v1102_v3 = vcombine.high %v1099_v0, %v1099_v0  ;;  %v1104_v4 = vcombine.high %v1100_v1, %v1100_v1  ;;  %v1101_v5 = vcombine.low %v1099_v0, %v1099_v0  ;;  %v1103_v6 = vcombine.low %v1100_v1, %v1100_v1  ;;  %v20_v8 = vld [vmem:[%s1493_s0 + $0x8] sm:$0xff]  ;;  %1263 = vset.pattern.permute.xlu0 %v1300_v2  ;;  %v1118_v15 = vld [vmem:[%s1493_s0 + $0x20] sm:$0xff]  ;;  %v1129_v26 = vld [vmem:[%s1493_s0 + $0x30] sm:$0xff] }
   0x3   :  { %v1110_v9 = vcombine.high %v19_v7, %v19_v7  ;;  %v1112_v10 = vcombine.high %v20_v8, %v20_v8  ;;  %v1109_v11 = vcombine.low %v19_v7, %v19_v7  ;;  %v1111_v12 = vcombine.low %v20_v8, %v20_v8  ;;  %v1119_v16 = vld [vmem:[%s1493_s0 + $0x28] sm:$0xff]  ;;  %v1098_v17 = vld [vmem:[%s1494_s1 + $0x4] sm:$0xf]  ;;  %v1130_v27 = vld [vmem:[%s1493_s0 + $0x38] sm:$0xff] }
   0x4   :  { %1105 = vmatprep.subr.msk.bf16.mxu0 %vm40_vm0, %v1102_v3  ;;  %1107 = vmatprep.subr.msk.bf16.mxu1 %vm40_vm0, %v1104_v4  ;;  %v42_v13 = vsel %vm40_vm0, %v1101_v5, 0  ;;  %v48_v14 = vsel %vm40_vm0, %v1103_v6, 0  ;;  %v1121_v20 = vcombine.high %v1118_v15, %v1118_v15  ;;  %v1123_v21 = vcombine.high %v1119_v16, %v1119_v16  ;;  %v1054_v22 = vld [vmem:[%s1495_s2] sm:$0xff]  ;;  %v1141_v36 = vld [vmem:[%s1493_s0 + $0x48] sm:$0xff]  ;;  %v1151_v44 = vld [vmem:[%s1493_s0 + $0x50] sm:$0xff] }
   0x5   :  { %54 = vmatpush1.bf16.msra.mxu0 %v42_v13  ;;  %95 = vmatpush1.bf16.msra.mxu1 %v48_v14  ;;  %v149_v18 = vsel %vm40_vm0, %v1109_v11, 0  ;;  %v155_v19 = vsel %vm40_vm0, %v1111_v12, 0  ;;  %v1064_v23 = vld [vmem:[%s1496_s3] sm:$0xff]  ;;  %v1120_v24 = vcombine.low %v1118_v15, %v1118_v15  ;;  %v1122_v25 = vcombine.low %v1119_v16, %v1119_v16  ;;  %v1117_v37 = vld [vmem:[%s1494_s1 + $0x8] sm:$0xf]  ;;  %v1152_v45 = vld [vmem:[%s1493_s0 + $0x58] sm:$0xff] }
   0x6   :  { %1113 = vmatprep.subr.msk.bf16.mxu0 %vm40_vm0, %v1110_v9  ;;  %1115 = vmatprep.subr.msk.bf16.mxu1 %vm40_vm0, %v1112_v10  ;;  %v18_v28 = vld [vmem:[%s1494_s1] sm:$0xf]  ;;  %v1132_v31 = vcombine.high %v1129_v26, %v1129_v26  ;;  %v1134_v32 = vcombine.high %v1130_v27, %v1130_v27  ;;  %v1131_v33 = vcombine.low %v1129_v26, %v1129_v26  ;;  %v1128_v46 = vld [vmem:[%s1494_s1 + $0xc] sm:$0xf]  ;;  %v1139_v55 = vld [vmem:[%s1494_s1 + $0x10] sm:$0xf] }
   0x7   :  { %1057 = vperm.xlu0 %1263, %v1054_v22   ;;  %v261_v29 = vsel %vm40_vm0, %v1120_v24, 0  ;;  %v267_v30 = vsel %vm40_vm0, %v1122_v25, 0  ;;  %v1133_v34 = vcombine.low %v1130_v27, %v1130_v27  ;;  %v1140_v35 = vld [vmem:[%s1493_s0 + $0x40] sm:$0xff]  ;;  %v1145_v41 = vcombine.high %v1141_v36, %v1141_v36  ;;  %v1163_v54 = vld [vmem:[%s1493_s0 + $0x68] sm:$0xff]  ;;  %v1173_v62 = vld [vmem:[%s1493_s0 + $0x70] sm:$0xff] }
   0x8   :  { %1106 = vmatmul.mubr.msk.bf16.vlgmr.msra.gmra.mrb[0].mxu0 %vm36_vm1, %v1098_v17  ;;  %1108 = vmatmul.mubr.msk.bf16.vlgmr.msra.gmra.mrb[0].mxu1 %vm36_vm1, %v1098_v17  ;;  %v377_v38 = vsel %vm40_vm0, %v1131_v33, 0  ;;  %v1143_v40 = vcombine.high %v1140_v35, %v1140_v35  ;;  %v1142_v42 = vcombine.low %v1140_v35, %v1140_v35  ;;  %v1144_v43 = vcombine.low %v1141_v36, %v1141_v36  ;;  %v1162_v53 = vld [vmem:[%s1493_s0 + $0x60] sm:$0xff]  ;;  %v1174_v63 = vld [vmem:[%s1493_s0 + $0x78] sm:$0xff]  ;;  %v1150_v0 = vld [vmem:[%s1494_s1 + $0x14] sm:$0xf] }
   0x9   :  { %161 = vmatpush1.bf16.msra.mxu0 %v149_v18  ;;  %202 = vmatpush1.bf16.msra.mxu1 %v155_v19  ;;  %v383_v39 = vsel %vm40_vm0, %v1133_v34, 0  ;;  %v1154_v49 = vcombine.high %v1151_v44, %v1151_v44  ;;  %v1156_v50 = vcombine.high %v1152_v45, %v1152_v45  ;;  %v1153_v51 = vcombine.low %v1151_v44, %v1151_v44  ;;  %v1184_v8 = vld [vmem:[%s1493_s0 + $0x80] sm:$0xff]  ;;  %v1185_v9 = vld [vmem:[%s1493_s0 + $0x88] sm:$0xff]  ;;  %v1161_v10 = vld [vmem:[%s1494_s1 + $0x18] sm:$0xf] }
   0xa   :  { %192 = vmatprep.mubr.bf16.mxu0 %v1300_v2  ;;  %233 = vmatprep.mubr.bf16.mxu1 %v1300_v2  ;;  %v493_v47 = vsel %vm40_vm0, %v1142_v42, 0  ;;  %v499_v48 = vsel %vm40_vm0, %v1144_v43, 0  ;;  %v1155_v52 = vcombine.low %v1152_v45, %v1152_v45  ;;  %v1165_v58 = vcombine.high %v1162_v53, %v1162_v53  ;;  %v1172_v17 = vld [vmem:[%s1494_s1 + $0x1c] sm:$0xf]  ;;  %vm1092_vm3 = vmor %vm1091_vm2, %vm40_vm0 }
   0xb   :  { %1124 = vmatprep.subr.msk.bf16.mxu0 %vm40_vm0, %v1121_v20  ;;  %1126 = vmatprep.subr.msk.bf16.mxu1 %vm40_vm0, %v1123_v21  ;;  %v609_v56 = vsel %vm40_vm0, %v1153_v51, 0  ;;  %v1167_v59 = vcombine.high %v1163_v54, %v1163_v54  ;;  %v1164_v60 = vcombine.low %v1162_v53, %v1162_v53  ;;  %v1166_v61 = vcombine.low %v1163_v54, %v1163_v54  ;;  %v1183_v20 = vld [vmem:[%s1494_s1 + $0x20] sm:$0xf] }
   0xc   :  { %1067 = vperm.xlu0 %1263, %v1064_v23   ;;  %v615_v57 = vsel %vm40_vm0, %v1155_v52, 0  ;;  %v1176_v4 = vcombine.high %v1173_v62, %v1173_v62  ;;  %v1178_v5 = vcombine.high %v1174_v63, %v1174_v63  ;;  %v1175_v6 = vcombine.low %v1173_v62, %v1173_v62 }
   0xd   :  { %v725_v1 = vsel %vm40_vm0, %v1164_v60, 0  ;;  %v731_v3 = vsel %vm40_vm0, %v1166_v61, 0  ;;  %v1177_v7 = vcombine.low %v1174_v63, %v1174_v63  ;;  %v1187_v13 = vcombine.high %v1184_v8, %v1184_v8 }
   0xe   :  { %v841_v11 = vsel %vm40_vm0, %v1175_v6, 0  ;;  %v1189_v14 = vcombine.high %v1185_v9, %v1185_v9  ;;  %v1186_v15 = vcombine.low %v1184_v8, %v1184_v8  ;;  %v1188_v16 = vcombine.low %v1185_v9, %v1185_v9 }
   0xf   :  { %v847_v12 = vsel %vm40_vm0, %v1177_v7, 0 }
  0x10   :  { %v957_v18 = vsel %vm40_vm0, %v1186_v15, 0  ;;  %v963_v19 = vsel %vm40_vm0, %v1188_v16, 0 }
  0x14   :  { %1114 = vmatmul.mubr.msk.bf16.vlgmr.msra.gmra.mrb[0].mxu0 %vm36_vm1, %v18_v28  ;;  %1116 = vmatmul.mubr.msk.bf16.vlgmr.msra.gmra.mrb[0].mxu1 %vm36_vm1, %v18_v28 }
  0x15   :  { %273 = vmatpush1.bf16.msra.mxu0 %v261_v29  ;;  %314 = vmatpush1.bf16.msra.mxu1 %v267_v30 }
  0x16   :  { %304 = vmatprep.mubr.bf16.mxu0 %v1300_v2  ;;  %345 = vmatprep.mubr.bf16.mxu1 %v1300_v2 }
  0x17   :  { %1135 = vmatprep.subr.msk.bf16.mxu0 %vm40_vm0, %v1132_v31  ;;  %1137 = vmatprep.subr.msk.bf16.mxu1 %vm40_vm0, %v1134_v32 }
  0x20   :  { %1125 = vmatmul.mubr.msk.bf16.vlgmr.msra.gmra.mrb[0].mxu0 %vm36_vm1, %v1117_v37  ;;  %1127 = vmatmul.mubr.msk.bf16.vlgmr.msra.gmra.mrb[0].mxu1 %vm36_vm1, %v1117_v37 }
  0x21   :  { %389 = vmatpush1.bf16.msra.mxu0 %v377_v38  ;;  %430 = vmatpush1.bf16.msra.mxu1 %v383_v39 }
  0x22   :  { %420 = vmatprep.mubr.bf16.mxu0 %v1300_v2  ;;  %461 = vmatprep.mubr.bf16.mxu1 %v1300_v2 }
  0x23   :  { %1146 = vmatprep.subr.msk.bf16.mxu0 %vm40_vm0, %v1143_v40  ;;  %1148 = vmatprep.subr.msk.bf16.mxu1 %vm40_vm0, %v1145_v41 }
  0x2c   :  { %1136 = vmatmul.mubr.msk.bf16.vlgmr.msra.gmra.mrb[0].mxu0 %vm36_vm1, %v1128_v46  ;;  %1138 = vmatmul.mubr.msk.bf16.vlgmr.msra.gmra.mrb[0].mxu1 %vm36_vm1, %v1128_v46 }
  0x2d   :  { %505 = vmatpush1.bf16.msra.mxu0 %v493_v47  ;;  %546 = vmatpush1.bf16.msra.mxu1 %v499_v48 }
  0x2e   :  { %536 = vmatprep.mubr.bf16.mxu0 %v1300_v2  ;;  %577 = vmatprep.mubr.bf16.mxu1 %v1300_v2 }
  0x2f   :  { %1157 = vmatprep.subr.msk.bf16.mxu0 %vm40_vm0, %v1154_v49  ;;  %1159 = vmatprep.subr.msk.bf16.mxu1 %vm40_vm0, %v1156_v50 }
  0x38   :  { %1147 = vmatmul.mubr.msk.bf16.vlgmr.msra.gmra.mrb[0].mxu0 %vm36_vm1, %v1139_v55  ;;  %1149 = vmatmul.mubr.msk.bf16.vlgmr.msra.gmra.mrb[0].mxu1 %vm36_vm1, %v1139_v55 }
  0x39   :  { %621 = vmatpush1.bf16.msra.mxu0 %v609_v56  ;;  %662 = vmatpush1.bf16.msra.mxu1 %v615_v57 }
  0x3a   :  { %652 = vmatprep.mubr.bf16.mxu0 %v1300_v2  ;;  %693 = vmatprep.mubr.bf16.mxu1 %v1300_v2 }
  0x3b   :  { %1168 = vmatprep.subr.msk.bf16.mxu0 %vm40_vm0, %v1165_v58  ;;  %1170 = vmatprep.subr.msk.bf16.mxu1 %vm40_vm0, %v1167_v59 }
  0x44   :  { %1158 = vmatmul.mubr.msk.bf16.vlgmr.msra.gmra.mrb[0].mxu0 %vm36_vm1, %v1150_v0  ;;  %1160 = vmatmul.mubr.msk.bf16.vlgmr.msra.gmra.mrb[0].mxu1 %vm36_vm1, %v1150_v0 }
  0x45   :  { %737 = vmatpush1.bf16.msra.mxu0 %v725_v1  ;;  %778 = vmatpush1.bf16.msra.mxu1 %v731_v3 }
  0x46   :  { %768 = vmatprep.mubr.bf16.mxu0 %v1300_v2  ;;  %809 = vmatprep.mubr.bf16.mxu1 %v1300_v2 }
  0x47   :  { %1179 = vmatprep.subr.msk.bf16.mxu0 %vm40_vm0, %v1176_v4  ;;  %1181 = vmatprep.subr.msk.bf16.mxu1 %vm40_vm0, %v1178_v5 }
  0x50   :  { %1169 = vmatmul.mubr.msk.bf16.vlgmr.msra.gmra.mrb[0].mxu0 %vm36_vm1, %v1161_v10  ;;  %1171 = vmatmul.mubr.msk.bf16.vlgmr.msra.gmra.mrb[0].mxu1 %vm36_vm1, %v1161_v10 }
  0x51   :  { %853 = vmatpush1.bf16.msra.mxu0 %v841_v11  ;;  %894 = vmatpush1.bf16.msra.mxu1 %v847_v12 }
  0x52   :  { %884 = vmatprep.mubr.bf16.mxu0 %v1300_v2  ;;  %925 = vmatprep.mubr.bf16.mxu1 %v1300_v2 }
  0x53   :  { %1190 = vmatprep.subr.msk.bf16.mxu0 %vm40_vm0, %v1187_v13  ;;  %1192 = vmatprep.subr.msk.bf16.mxu1 %vm40_vm0, %v1189_v14 }
  0x5c   :  { %1180 = vmatmul.mubr.msk.bf16.vlgmr.msra.gmra.mrb[0].mxu0 %vm36_vm1, %v1172_v17  ;;  %1182 = vmatmul.mubr.msk.bf16.vlgmr.msra.gmra.mrb[0].mxu1 %vm36_vm1, %v1172_v17 }
  0x5d   :  { %969 = vmatpush1.bf16.msra.mxu0 %v957_v18  ;;  %1010 = vmatpush1.bf16.msra.mxu1 %v963_v19 }
  0x5e   :  { %1000 = vmatprep.mubr.bf16.mxu0 %v1300_v2  ;;  %1041 = vmatprep.mubr.bf16.mxu1 %v1300_v2 }
  0x68   :  { %1191 = vmatmul.mubr.msk.bf16.vlgmr.msra.gmra.mrb[0].mxu0 %vm36_vm1, %v1183_v20  ;;  %1193 = vmatmul.mubr.msk.bf16.vlgmr.msra.gmra.mrb[0].mxu1 %vm36_vm1, %v1183_v20 }
  0x86   :  { %v1058_v21 = vpop.permute.xlu0 %1057 }
  0x8b   :  { %v1068_v22 = vpop.permute.xlu0 %1067 }
 0x13b   :  { %v1002_v23 = vpop.f32.mrb[0].mxu0  ;;  %v1043_v24 = vpop.f32.mrb[0].mxu1 }
 0x13c   :  { %v1060_v25 = vmul.f32 %v1058_v21, %v1002_v23  ;;  %v1062_v26 = vmul.f32 %v1058_v21, %v1043_v24  ;;  %v1004_v27 = vpop.f32.mrb[1].mxu0  ;;  %v1045_v28 = vpop.f32.mrb[1].mxu1 }
 0x13d   :  { %v1061_v29 = vmul.f32 %v1058_v21, %v1004_v27  ;;  %v1063_v30 = vmul.f32 %v1058_v21, %v1045_v28  ;;  %v1006_v2 = vpop.f32.mrb[2].mxu0  ;;  %v1047_v31 = vpop.f32.mrb[2].mxu1 }
 0x13e   :  { %v1070_v32 = vadd.f32 %v1068_v22, %v1060_v25  ;;  %v1072_v33 = vadd.f32 %v1068_v22, %v1062_v26  ;;  %v1007_v34 = vpop.f32.mrb[3].mxu0  ;;  %v1048_v35 = vpop.f32.mrb[3].mxu1 }
 0x13f   :  { %v1071_v36 = vadd.f32 %v1068_v22, %v1061_v29  ;;  %v1073_v37 = vadd.f32 %v1068_v22, %v1063_v30 }
 0x141   :  { %v1196_v38 = vpack.c.bf16 %v1071_v36, %v1070_v32  ;;  %v1197_v39 = vpack.c.bf16 %v1073_v37, %v1072_v33 }
 0x143   :  { %1090 = vst [vmem:[%s1497_s4] sm:$0xff] %v1196_v38  ;;  %1093 = vst.msk [vmem:[%s1497_s4 + $0x8] sm:$0xff] %vm1092_vm3, %v1197_v39 }

// kernel: _lambda_.18
= control target key start
LH: loop header
LB: loop body
LE: loop exit
PB: predicated region body
PF: predicated region fallthrough
CT: control target
= control target key end

     0   :  { %v50_v0 = vlaneseq  ;;  %v871_v2 = vmov 1983009808   ;;  %vm127_vm0 = vcmask 1041408   ;;  %vm129_vm1 = vcmask 549888   ;;  %s1151_s0 = inlined_call_operand.vmem [shape: bf16[8,2,196], index: 0, kind: input, shape index: {}]   ;;  %s1152_s3 = inlined_call_operand.vmem [shape: f32[8,1], index: 3, kind: input, shape index: {}]   ;;  %s1153_s2 = inlined_call_operand.vmem [shape: f32[8,8], index: 2, kind: input, shape index: {}]   ;;  %s1154_s5 = inlined_call_operand.vmem [shape: f32[8,1], index: 5, kind: input, shape index: {}]   ;;  %s1155_s4 = inlined_call_operand.vmem [shape: f32[8,8], index: 4, kind: input, shape index: {}]   ;;  %s1156_s1 = inlined_call_operand.vmem [shape: bf16[8,2,196], index: 1, kind: input, shape index: {}]   ;;  %s1157_s6 = inlined_call_operand.vmem [shape: bf16[8,2,196], index: 6, kind: output, shape index: {}]  }
   0x1   :  { %v915_v1 = vld [vmem:[%s1151_s0] sm:$0x3]  ;;  %v48_v3 = vunpack.c.l.s4 %v871_v2  ;;  %v920_v4 = vld [vmem:[%s1151_s0 + $0x4] sm:$0x3]  ;;  %v925_v5 = vld [vmem:[%s1151_s0 + $0x2] sm:$0x3] }
   0x2   :  { %v31_v6 = vunpack.c.l.bf16 %v915_v1  ;;  %v929_v7 = vshrl.u32 %v50_v0, 7  ;;  %v934_v8 = vld [vmem:[%s1151_s0 + $0x6] sm:$0x3]  ;;  %v939_v9 = vld [vmem:[%s1151_s0 + $0x8] sm:$0x3]  ;;  %v33_v11 = vunpack.c.l.bf16 %v920_v4  ;;  %v32_v12 = vunpack.c.l.bf16 %v925_v5 }
   0x3   :  { %v49_v10 = vunpack.c.0.s8 %v48_v3  ;;  %v34_v13 = vunpack.c.l.bf16 %v934_v8  ;;  %v947_v14 = vld [vmem:[%s1151_s0 + $0xa] sm:$0x3]  ;;  %v952_v15 = vld [vmem:[%s1151_s0 + $0xc] sm:$0x3]  ;;  %v957_v16 = vld [vmem:[%s1151_s0 + $0xe] sm:$0x3]  ;;  %v35_v17 = vunpack.c.l.bf16 %v939_v9 }
   0x4   :  { %v36_v18 = vunpack.c.l.bf16 %v947_v14  ;;  %v37_v19 = vunpack.c.l.bf16 %v952_v15  ;;  %v38_v21 = vunpack.c.l.bf16 %v957_v16  ;;  %v872_v62 = vmov 0.0   ;;  %v179_v2 = vld [vmem:[%s1152_s3] sm:$0xff] }
   0x5   :  { %v963_v20 = vsub.s32 %v49_v10, %v929_v7  ;;  %849 = vmatprep.subr.mxu0 %v872_v62  ;;  %854 = vmatprep.subr.mxu1 %v872_v62  ;;  %vm873_vm2 = vmmov 0   ;;  %v874_v63 = vmov 0   ;;  %v194_v3 = vand.u32 127, %v50_v0  ;;  %v542_v5 = vld [vmem:[%s1156_s1 + $0x6] sm:$0x3] }
   0x6   :  { %851 = vmatprep.mubr.msk.f32.mxu0 %vm873_vm2, %v872_v62  ;;  %856 = vmatprep.mubr.msk.f32.mxu1 %vm873_vm2, %v872_v62  ;;  %vm227_vm3 = vcmask 1041409   ;;  %vm229_vm4 = vcmask 1042434   ;;  %vm231_vm5 = vcmask 1043459   ;;  %vm233_vm6 = vcmask 1044484  }
   0x7   :  { %v53_v22 = vrot.slane %v31_v6, %v963_v20  ;;  %v69_v23 = vrot.slane %v33_v11, %v963_v20  ;;  %v61_v24 = vrot.slane %v32_v12, %v963_v20  ;;  %v77_v25 = vrot.slane %v34_v13, %v963_v20  ;;  %865 = vset.pattern.permute.xlu0 %v874_v63 }
   0x8   :  { %v85_v26 = vrot.slane %v35_v17, %v963_v20  ;;  %v93_v27 = vrot.slane %v36_v18, %v963_v20  ;;  %v101_v28 = vrot.slane %v37_v19, %v963_v20  ;;  %v109_v36 = vrot.slane %v38_v21, %v963_v20  ;;  %866 = vset.pattern.permute.xlu1 %v874_v63 }
   0x9   :  { %v54_v29 = vcombine.high %v53_v22, %v53_v22  ;;  %v128_v30 = vsel %vm127_vm0, %v53_v22, 0.0  ;;  %v70_v31 = vcombine.high %v69_v23, %v69_v23  ;;  %v139_v32 = vsel %vm127_vm0, %v69_v23, 0.0 }
   0xa   :  { %v62_v33 = vcombine.high %v61_v24, %v61_v24  ;;  %v134_v34 = vsel %vm127_vm0, %v61_v24, 0.0  ;;  %v78_v35 = vcombine.high %v77_v25, %v77_v25  ;;  %v144_v39 = vsel %vm127_vm0, %v77_v25, 0.0 }
   0xb   :  { %v130_v37 = vsel %vm129_vm1, %v54_v29, 0.0  ;;  %v140_v38 = vsel %vm129_vm1, %v70_v31, 0.0  ;;  %v86_v40 = vcombine.high %v85_v26, %v85_v26  ;;  %v94_v45 = vcombine.high %v93_v27, %v93_v27 }
   0xc   :  { %v131_v41 = vadd.f32 %v130_v37, %v128_v30  ;;  %v141_v42 = vadd.f32 %v140_v38, %v139_v32  ;;  %v135_v43 = vsel %vm129_vm1, %v62_v33, 0.0  ;;  %v145_v44 = vsel %vm129_vm1, %v78_v35, 0.0 }
   0xd   :  { %v136_v46 = vadd.f32 %v135_v43, %v134_v34  ;;  %v146_v47 = vadd.f32 %v145_v44, %v144_v39  ;;  %v149_v48 = vsel %vm127_vm0, %v85_v26, 0.0  ;;  %v150_v49 = vsel %vm129_vm1, %v86_v40, 0.0 }
   0xe   :  { %132 = vadd.xlane.f32.xlu0 %v131_v41  ;;  %142 = vadd.xlane.f32.xlu1 %v141_v42  ;;  %v154_v50 = vsel %vm127_vm0, %v93_v27, 0.0  ;;  %v155_v51 = vsel %vm129_vm1, %v94_v45, 0.0  ;;  %v102_v52 = vcombine.high %v101_v28, %v101_v28  ;;  %v110_v53 = vcombine.high %v109_v36, %v109_v36 }
   0xf   :  { %v151_v54 = vadd.f32 %v150_v49, %v149_v48  ;;  %v156_v55 = vadd.f32 %v155_v51, %v154_v50  ;;  %v159_v56 = vsel %vm127_vm0, %v101_v28, 0.0  ;;  %v164_v58 = vsel %vm127_vm0, %v109_v36, 0.0  ;;  %v178_v51 = vld [vmem:[%s1153_s2] sm:$0xff] }
  0x10   :  { %v160_v57 = vsel %vm129_vm1, %v102_v52, 0.0  ;;  %v165_v59 = vsel %vm129_vm1, %v110_v53, 0.0  ;;  %v197_v23 = vsub.s32 %v194_v3, %v929_v7  ;;  %vm235_vm7 = vcmask 1045509   ;;  %v318_v53 = vld [vmem:[%s1154_s5] sm:$0xff] }
  0x11   :  { %v161_v60 = vadd.f32 %v160_v57, %v159_v56  ;;  %v166_v61 = vadd.f32 %v165_v59, %v164_v58  ;;  %vm237_vm8 = vcmask 1046534   ;;  %vm239_vm9 = vcmask 1047559   ;;  %v317_v59 = vld [vmem:[%s1155_s4] sm:$0xff] }
  0x12   :  { %137 = vadd.xlane.f32.xlu0 %v136_v46  ;;  %147 = vadd.xlane.f32.xlu1 %v146_v47  ;;  %vm242_vm10 = vcmask 64512   ;;  %vm819_vm11 = vcmask 1040384   ;;  %vm820_vm12 = vcmask 549889  }
  0x13   :  { %vm1071_vm13 = vmor %vm820_vm12, %vm819_vm11 }
  0x16   :  { %152 = vadd.xlane.f32.xlu0 %v151_v54  ;;  %157 = vadd.xlane.f32.xlu1 %v156_v55 }
  0x1a   :  { %162 = vadd.xlane.f32.xlu0 %v161_v60  ;;  %167 = vadd.xlane.f32.xlu1 %v166_v61 }
  0x2b   :  { %321 = vperm.xlu1 %866, %v318_v53  }
  0x30   :  { %182 = vperm.xlu0 %865, %v179_v2  }
  0x9b   :  { %v133_v10 = vpop.xlane.xlu0 %132  ;;  %v143_v22 = vpop.xlane.xlu1 %142 }
  0x9c   :  { %v170_v24 = vmul.f32 0.0051020407, %v133_v10  ;;  %v172_v25 = vmul.f32 0.0051020407, %v143_v22  ;;  %v454_v22 = vsub.s32 7, %v929_v7 }
  0x9e   :  { %v198_v30 = vrot.slane %v170_v24, %v197_v23  ;;  %v206_v33 = vrot.slane %v172_v25, %v197_v23 }
  0x9f   :  { %v138_v26 = vpop.xlane.xlu0 %137  ;;  %v148_v27 = vpop.xlane.xlu1 %147 }
  0xa0   :  { %v171_v28 = vmul.f32 0.0051020407, %v138_v26  ;;  %v173_v29 = vmul.f32 0.0051020407, %v148_v27  ;;  %v412_v27 = vsub.s32 1, %v929_v7 }
  0xa2   :  { %v202_v31 = vrot.slane %v171_v28, %v197_v23  ;;  %v210_v32 = vrot.slane %v173_v29, %v197_v23  ;;  %v419_v29 = vsub.s32 2, %v929_v7 }
  0xa3   :  { %v153_v34 = vpop.xlane.xlu0 %152  ;;  %v158_v35 = vpop.xlane.xlu1 %157 }
  0xa4   :  { %v228_v0 = vsel %vm227_vm3, %v202_v31, %v198_v30  ;;  %v174_v36 = vmul.f32 0.0051020407, %v153_v34  ;;  %v175_v37 = vmul.f32 0.0051020407, %v158_v35  ;;  %v426_v31 = vsub.s32 3, %v929_v7 }
  0xa5   :  { %v230_v38 = vsel %vm229_vm4, %v206_v33, %v228_v0  ;;  %v433_v33 = vsub.s32 4, %v929_v7  ;;  %v440_v35 = vsub.s32 5, %v929_v7 }
  0xa6   :  { %v232_v39 = vsel %vm231_vm5, %v210_v32, %v230_v38  ;;  %v214_v40 = vrot.slane %v174_v36, %v197_v23  ;;  %v218_v41 = vrot.slane %v175_v37, %v197_v23  ;;  %v447_v36 = vsub.s32 6, %v929_v7 }
  0xa7   :  { %v163_v42 = vpop.xlane.xlu0 %162  ;;  %v168_v43 = vpop.xlane.xlu1 %167  ;;  %v875_v38 = vmov 269488144  }
  0xa8   :  { %v234_v44 = vsel %vm233_vm6, %v214_v40, %v232_v39  ;;  %v176_v45 = vmul.f32 0.0051020407, %v163_v42  ;;  %v177_v46 = vmul.f32 0.0051020407, %v168_v43  ;;  %v468_v39 = vunpack.c.l.s4 %v875_v38  ;;  %v546_v42 = vld [vmem:[%s1156_s1 + $0xe] sm:$0x3] }
  0xa9   :  { %v236_v49 = vsel %vm235_vm7, %v218_v41, %v234_v44  ;;  %v539_v43 = vld [vmem:[%s1156_s1] sm:$0x3] }
  0xaa   :  { %v222_v47 = vrot.slane %v176_v45, %v197_v23  ;;  %v226_v48 = vrot.slane %v177_v46, %v197_v23  ;;  %v405_v23 = vsub.s32 0, %v929_v7  ;;  %v469_v40 = vunpack.c.0.s8 %v468_v39 }
  0xab   :  { %v322_v60 = vpop.permute.xlu1 %321  ;;  %v554_v46 = vunpack.c.l.bf16 %v546_v42 }
  0xac   :  { %v238_v50 = vsel %vm237_vm8, %v222_v47, %v236_v49  ;;  %v1029_v41 = vsub.s32 %v469_v40, %v929_v7 }
  0xad   :  { %v240_v52 = vsel %vm239_vm9, %v226_v48, %v238_v50  ;;  %v547_v48 = vunpack.c.l.bf16 %v539_v43  ;;  %v876_v50 = vmov 1966171168  }
  0xae   :  { %850 = vmatpush3.msra.mxu0 %v240_v52  ;;  %v540_v52 = vld [vmem:[%s1156_s1 + $0x2] sm:$0x3] }
  0xaf   :  { %852 = vmatmul.mubr.msk.f32.vlgmr.msra.gmra.mrb[0].mxu0 %vm242_vm10, %v178_v51  ;;  %v183_v54 = vpop.permute.xlu0 %182  ;;  %v693_v51 = vunpack.c.l.s4 %v876_v50 }
 0x182   :  { %v312_v55 = vpop.f32.mrb[0].mxu0 }
 0x183   :  { %v313_v56 = vadd.f32 %v312_v55, %v183_v54  ;;  %v853_v57 = vpop.f32.mrb[1].mxu0 }
 0x185   :  { %v316_v58 = vmax.f32 %v313_v56, 0.0 }
 0x187   :  { %855 = vmatpush3.msra.mxu1 %v316_v58  ;;  %v548_v58 = vunpack.c.l.bf16 %v540_v52 }
 0x188   :  { %857 = vmatmul.mubr.msk.f32.vlgmr.msra.gmra.mrb[0].mxu1 %vm242_vm10, %v317_v59 }
 0x25b   :  { %v393_v61 = vpop.f32.mrb[0].mxu1 }
 0x25c   :  { %v394_v62 = vadd.f32 %v393_v61, %v322_v60  ;;  %v858_v63 = vpop.f32.mrb[1].mxu1  ;;  %v541_v60 = vld [vmem:[%s1156_s1 + $0x4] sm:$0x3]  ;;  %v694_v61 = vunpack.c.0.s8 %v693_v51 }
 0x25e   :  { %v836_v2 = vmul.f32 -1.442695, %v394_v62 }
 0x260   :  { %867 = vpow2.f32 %v836_v2 }
 0x26a   :  { %v868_v3 = vpop.eup %867 }
 0x26b   :  { %v400_v10 = vadd.f32 1.0, %v868_v3 }
 0x26d   :  { %869 = vrcp.f32 %v400_v10 }
 0x277   :  { %v870_v24 = vpop.eup %869 }
 0x278   :  { %v455_v25 = vrot.slane %v870_v24, %v454_v22  ;;  %v406_v26 = vrot.slane %v870_v24, %v405_v23  ;;  %v413_v28 = vrot.slane %v870_v24, %v412_v27  ;;  %v420_v30 = vrot.slane %v870_v24, %v419_v29 }
 0x279   :  { %v427_v32 = vrot.slane %v870_v24, %v426_v31  ;;  %v434_v34 = vrot.slane %v870_v24, %v433_v33  ;;  %v441_v0 = vrot.slane %v870_v24, %v440_v35  ;;  %v448_v37 = vrot.slane %v870_v24, %v447_v36 }
 0x27a   :  { %457 = vbcast.lane.b32.xlu0 %v455_v25, 256  ;;  %408 = vbcast.lane.b32.xlu1 %v406_v26, 256  ;;  %v1056_v22 = vsub.s32 %v694_v61, %v929_v7  ;;  %v550_v7 = vunpack.c.l.bf16 %v542_v5 }
 0x27e   :  { %415 = vbcast.lane.b32.xlu1 %v413_v28, 256 }
 0x282   :  { %422 = vbcast.lane.b32.xlu1 %v420_v30, 256 }
 0x286   :  { %429 = vbcast.lane.b32.xlu1 %v427_v32, 256 }
 0x28a   :  { %436 = vbcast.lane.b32.xlu1 %v434_v34, 256  ;;  %v543_v34 = vld [vmem:[%s1156_s1 + $0x8] sm:$0x3] }
 0x28b   :  { %v551_v43 = vunpack.c.l.bf16 %v543_v34 }
 0x28e   :  { %443 = vbcast.lane.b32.xlu1 %v441_v0, 256 }
 0x292   :  { %450 = vbcast.lane.b32.xlu1 %v448_v37, 256 }
 0x2ec   :  { %v458_v44 = vpop.permute.xlu0 %457  ;;  %v409_v45 = vpop.permute.xlu1 %408 }
 0x2ed   :  { %v522_v47 = vrot.slane %v458_v44, %v1029_v41  ;;  %v473_v49 = vrot.slane %v409_v45, %v1029_v41  ;;  %v544_v45 = vld [vmem:[%s1156_s1 + $0xa] sm:$0x3] }
 0x2ee   :  { %v552_v51 = vunpack.c.l.bf16 %v544_v45 }
 0x2ef   :  { %v538_v53 = vmul.f32 %v522_v47, %v38_v21  ;;  %v531_v54 = vmul.f32 %v473_v49, %v31_v6  ;;  %v549_v21 = vunpack.c.l.bf16 %v541_v60 }
 0x2f0   :  { %v416_v55 = vpop.permute.xlu1 %415 }
 0x2f1   :  { %v562_v56 = vadd.f32 %v554_v46, %v538_v53  ;;  %v555_v57 = vadd.f32 %v547_v48, %v531_v54  ;;  %v480_v59 = vrot.slane %v416_v55, %v1029_v41  ;;  %v545_v55 = vld [vmem:[%s1156_s1 + $0xc] sm:$0x3] }
 0x2f2   :  { %v553_v61 = vunpack.c.l.bf16 %v545_v55 }
 0x2f3   :  { %v570_v62 = vmax.f32 %v562_v56, 0.0  ;;  %v563_v63 = vmax.f32 %v555_v57, 0.0  ;;  %v532_v16 = vmul.f32 %v480_v59, %v32_v12 }
 0x2f4   :  { %v423_v2 = vpop.permute.xlu1 %422 }
 0x2f5   :  { %v641_v1 = vrot.slane %v570_v62, %v963_v20  ;;  %v585_v6 = vrot.slane %v563_v63, %v963_v20  ;;  %v556_v3 = vadd.f32 %v548_v58, %v532_v16  ;;  %v487_v10 = vrot.slane %v423_v2, %v1029_v41 }
 0x2f7   :  { %v642_v23 = vcombine.high %v641_v1, %v641_v1  ;;  %v586_v24 = vcombine.high %v585_v6, %v585_v6  ;;  %v564_v25 = vmax.f32 %v556_v3, 0.0  ;;  %v533_v26 = vmul.f32 %v487_v10, %v33_v11 }
 0x2f8   :  { %v430_v12 = vpop.permute.xlu1 %429 }
 0x2f9   :  { %v844_v27 = vpack.c.bf16 %v642_v23, %v641_v1  ;;  %v837_v28 = vpack.c.bf16 %v586_v24, %v585_v6  ;;  %v593_v29 = vrot.slane %v564_v25, %v963_v20  ;;  %v557_v30 = vadd.f32 %v549_v21, %v533_v26 }
 0x2fa   :  { %v494_v31 = vrot.slane %v430_v12, %v1029_v41 }
 0x2fb   :  { %v803_v32 = vrot.slane %v844_v27, %v1056_v22  ;;  %v698_v4 = vrot.slane %v837_v28, %v1056_v22  ;;  %v594_v11 = vcombine.high %v593_v29, %v593_v29  ;;  %v565_v33 = vmax.f32 %v557_v30, 0.0 }
 0x2fc   :  { %v534_v0 = vmul.f32 %v494_v31, %v34_v13  ;;  %v437_v36 = vpop.permute.xlu1 %436 }
 0x2fd   :  { %v810_v37 = vrot.slane %v803_v32, %v1056_v22  ;;  %v705_v38 = vrot.slane %v698_v4, %v1056_v22  ;;  %v838_v39 = vpack.c.bf16 %v594_v11, %v593_v29  ;;  %v601_v40 = vrot.slane %v565_v33, %v963_v20 }
 0x2fe   :  { %v558_v42 = vadd.f32 %v550_v7, %v534_v0  ;;  %v501_v44 = vrot.slane %v437_v36, %v1029_v41 }
 0x2ff   :  { %829 = vst.msk [vmem:[%s1157_s6 + $0xe] sm:$0x3] %vm1071_vm13, %v810_v37  ;;  %822 = vst.msk [vmem:[%s1157_s6] sm:$0x3] %vm1071_vm13, %v705_v38  ;;  %v713_v8 = vrot.slane %v838_v39, %v1056_v22  ;;  %v602_v13 = vcombine.high %v601_v40, %v601_v40 }
 0x300   :  { %v566_v46 = vmax.f32 %v558_v42, 0.0  ;;  %v535_v47 = vmul.f32 %v501_v44, %v35_v17  ;;  %v444_v48 = vpop.permute.xlu1 %443 }
 0x301   :  { %v720_v49 = vrot.slane %v713_v8, %v1056_v22  ;;  %v839_v50 = vpack.c.bf16 %v602_v13, %v601_v40  ;;  %v508_v52 = vrot.slane %v444_v48, %v1029_v41 }
 0x302   :  { %v609_v53 = vrot.slane %v566_v46, %v963_v20  ;;  %v559_v54 = vadd.f32 %v551_v43, %v535_v47 }
 0x303   :  { %823 = vst.msk [vmem:[%s1157_s6 + $0x2] sm:$0x3] %vm1071_vm13, %v720_v49  ;;  %v728_v9 = vrot.slane %v839_v50, %v1056_v22  ;;  %v536_v17 = vmul.f32 %v508_v52, %v36_v18 }
 0x304   :  { %v610_v56 = vcombine.high %v609_v53, %v609_v53  ;;  %v567_v57 = vmax.f32 %v559_v54, 0.0  ;;  %v451_v58 = vpop.permute.xlu1 %450 }
 0x305   :  { %v735_v59 = vrot.slane %v728_v9, %v1056_v22  ;;  %v560_v60 = vadd.f32 %v552_v51, %v536_v17  ;;  %v515_v62 = vrot.slane %v451_v58, %v1029_v41 }
 0x306   :  { %v840_v63 = vpack.c.bf16 %v610_v56, %v609_v53  ;;  %v617_v16 = vrot.slane %v567_v57, %v963_v20 }
 0x307   :  { %824 = vst.msk [vmem:[%s1157_s6 + $0x4] sm:$0x3] %vm1071_vm13, %v735_v59  ;;  %v568_v14 = vmax.f32 %v560_v60, 0.0  ;;  %v537_v18 = vmul.f32 %v515_v62, %v37_v19 }
 0x308   :  { %v743_v21 = vrot.slane %v840_v63, %v1056_v22  ;;  %v618_v2 = vcombine.high %v617_v16, %v617_v16 }
 0x309   :  { %v625_v1 = vrot.slane %v568_v14, %v963_v20  ;;  %v561_v6 = vadd.f32 %v553_v61, %v537_v18 }
 0x30a   :  { %v750_v41 = vrot.slane %v743_v21, %v1056_v22  ;;  %v841_v3 = vpack.c.bf16 %v618_v2, %v617_v16 }
 0x30b   :  { %v626_v10 = vcombine.high %v625_v1, %v625_v1  ;;  %v569_v23 = vmax.f32 %v561_v6, 0.0 }
 0x30c   :  { %825 = vst.msk [vmem:[%s1157_s6 + $0x6] sm:$0x3] %vm1071_vm13, %v750_v41  ;;  %v758_v15 = vrot.slane %v841_v3, %v1056_v22 }
 0x30d   :  { %v842_v19 = vpack.c.bf16 %v626_v10, %v625_v1  ;;  %v633_v24 = vrot.slane %v569_v23, %v963_v20 }
 0x30e   :  { %v765_v25 = vrot.slane %v758_v15, %v1056_v22 }
 0x30f   :  { %v773_v26 = vrot.slane %v842_v19, %v1056_v22  ;;  %v634_v5 = vcombine.high %v633_v24, %v633_v24 }
 0x310   :  { %826 = vst.msk [vmem:[%s1157_s6 + $0x8] sm:$0x3] %vm1071_vm13, %v765_v25 }
 0x311   :  { %v780_v12 = vrot.slane %v773_v26, %v1056_v22  ;;  %v843_v27 = vpack.c.bf16 %v634_v5, %v633_v24 }
 0x313   :  { %827 = vst.msk [vmem:[%s1157_s6 + $0xa] sm:$0x3] %vm1071_vm13, %v780_v12  ;;  %v788_v20 = vrot.slane %v843_v27, %v1056_v22 }
 0x315   :  { %v795_v28 = vrot.slane %v788_v20, %v1056_v22 }
 0x317   :  { %828 = vst.msk [vmem:[%s1157_s6 + $0xc] sm:$0x3] %vm1071_vm13, %v795_v28 }

// kernel: _lambda_.20
= control target key start
LH: loop header
LB: loop body
LE: loop exit
PB: predicated region body
PF: predicated region fallthrough
CT: control target
= control target key end

     0   :  { %vm43_vm0 = vcmask 1043456   ;;  %v1317_v2 = vmov 0   ;;  %vm39_vm1 = vcmask 64512   ;;  %vm1108_vm2 = vcmask 64516   ;;  %s1521_s0 = inlined_call_operand.vmem [shape: bf16[9,8,392], index: 0, kind: input, shape index: {}]   ;;  %s1522_s1 = inlined_call_operand.vmem [shape: bf16[9,8,8], index: 1, kind: input, shape index: {}]   ;;  %s1523_s2 = inlined_call_operand.vmem [shape: f32[8,1], index: 2, kind: input, shape index: {}]   ;;  %s1524_s3 = inlined_call_operand.vmem [shape: f32[8,1], index: 3, kind: input, shape index: {}]   ;;  %s1525_s4 = inlined_call_operand.vmem [shape: bf16[8,392], index: 4, kind: input, shape index: {}]   ;;  %s1526_s5 = inlined_call_operand.vmem [shape: bf16[8,392], index: 5, kind: output, shape index: {}]  }
   0x1   :  { %v1116_v0 = vld [vmem:[%s1521_s0 + $0x10] sm:$0xff]  ;;  %v1117_v1 = vld [vmem:[%s1521_s0 + $0x18] sm:$0xff]  ;;  %88 = vmatprep.mubr.bf16.mxu0 %v1317_v2  ;;  %129 = vmatprep.mubr.bf16.mxu1 %v1317_v2  ;;  %v22_v7 = vld [vmem:[%s1521_s0] sm:$0xff] }
   0x2   :  { %v1119_v3 = vcombine.high %v1116_v0, %v1116_v0  ;;  %v1121_v4 = vcombine.high %v1117_v1, %v1117_v1  ;;  %v1118_v5 = vcombine.low %v1116_v0, %v1116_v0  ;;  %v1120_v6 = vcombine.low %v1117_v1, %v1117_v1  ;;  %v23_v8 = vld [vmem:[%s1521_s0 + $0x8] sm:$0xff]  ;;  %1280 = vset.pattern.permute.xlu0 %v1317_v2  ;;  %v1135_v15 = vld [vmem:[%s1521_s0 + $0x20] sm:$0xff]  ;;  %v1146_v26 = vld [vmem:[%s1521_s0 + $0x30] sm:$0xff] }
   0x3   :  { %v1127_v9 = vcombine.high %v22_v7, %v22_v7  ;;  %v1129_v10 = vcombine.high %v23_v8, %v23_v8  ;;  %v1126_v11 = vcombine.low %v22_v7, %v22_v7  ;;  %v1128_v12 = vcombine.low %v23_v8, %v23_v8  ;;  %v1136_v16 = vld [vmem:[%s1521_s0 + $0x28] sm:$0xff]  ;;  %v1115_v17 = vld [vmem:[%s1522_s1 + $0x4] sm:$0xf]  ;;  %v1147_v27 = vld [vmem:[%s1521_s0 + $0x38] sm:$0xff] }
   0x4   :  { %1122 = vmatprep.subr.msk.bf16.mxu0 %vm43_vm0, %v1119_v3  ;;  %1124 = vmatprep.subr.msk.bf16.mxu1 %vm43_vm0, %v1121_v4  ;;  %v45_v13 = vsel %vm43_vm0, %v1118_v5, 0  ;;  %v51_v14 = vsel %vm43_vm0, %v1120_v6, 0  ;;  %v1138_v20 = vcombine.high %v1135_v15, %v1135_v15  ;;  %v1140_v21 = vcombine.high %v1136_v16, %v1136_v16  ;;  %v1057_v22 = vld [vmem:[%s1523_s2] sm:$0xff]  ;;  %v1158_v36 = vld [vmem:[%s1521_s0 + $0x48] sm:$0xff]  ;;  %v1168_v44 = vld [vmem:[%s1521_s0 + $0x50] sm:$0xff] }
   0x5   :  { %57 = vmatpush1.bf16.msra.mxu0 %v45_v13  ;;  %98 = vmatpush1.bf16.msra.mxu1 %v51_v14  ;;  %v152_v18 = vsel %vm43_vm0, %v1126_v11, 0  ;;  %v158_v19 = vsel %vm43_vm0, %v1128_v12, 0  ;;  %v1067_v23 = vld [vmem:[%s1524_s3] sm:$0xff]  ;;  %v1137_v24 = vcombine.low %v1135_v15, %v1135_v15  ;;  %v1139_v25 = vcombine.low %v1136_v16, %v1136_v16  ;;  %v1134_v37 = vld [vmem:[%s1522_s1 + $0x8] sm:$0xf]  ;;  %v1169_v45 = vld [vmem:[%s1521_s0 + $0x58] sm:$0xff] }
   0x6   :  { %1130 = vmatprep.subr.msk.bf16.mxu0 %vm43_vm0, %v1127_v9  ;;  %1132 = vmatprep.subr.msk.bf16.mxu1 %vm43_vm0, %v1129_v10  ;;  %v21_v28 = vld [vmem:[%s1522_s1] sm:$0xf]  ;;  %v1149_v31 = vcombine.high %v1146_v26, %v1146_v26  ;;  %v1151_v32 = vcombine.high %v1147_v27, %v1147_v27  ;;  %v1148_v33 = vcombine.low %v1146_v26, %v1146_v26  ;;  %v1145_v46 = vld [vmem:[%s1522_s1 + $0xc] sm:$0xf]  ;;  %v1156_v55 = vld [vmem:[%s1522_s1 + $0x10] sm:$0xf] }
   0x7   :  { %1060 = vperm.xlu0 %1280, %v1057_v22   ;;  %v264_v29 = vsel %vm43_vm0, %v1137_v24, 0  ;;  %v270_v30 = vsel %vm43_vm0, %v1139_v25, 0  ;;  %v1150_v34 = vcombine.low %v1147_v27, %v1147_v27  ;;  %v1157_v35 = vld [vmem:[%s1521_s0 + $0x40] sm:$0xff]  ;;  %v1162_v41 = vcombine.high %v1158_v36, %v1158_v36  ;;  %v1180_v54 = vld [vmem:[%s1521_s0 + $0x68] sm:$0xff]  ;;  %v1190_v62 = vld [vmem:[%s1521_s0 + $0x70] sm:$0xff] }
   0x8   :  { %1123 = vmatmul.mubr.msk.bf16.vlgmr.msra.gmra.mrb[0].mxu0 %vm39_vm1, %v1115_v17  ;;  %1125 = vmatmul.mubr.msk.bf16.vlgmr.msra.gmra.mrb[0].mxu1 %vm39_vm1, %v1115_v17  ;;  %v380_v38 = vsel %vm43_vm0, %v1148_v33, 0  ;;  %v1160_v40 = vcombine.high %v1157_v35, %v1157_v35  ;;  %v1159_v42 = vcombine.low %v1157_v35, %v1157_v35  ;;  %v1161_v43 = vcombine.low %v1158_v36, %v1158_v36  ;;  %v1179_v53 = vld [vmem:[%s1521_s0 + $0x60] sm:$0xff]  ;;  %v1191_v63 = vld [vmem:[%s1521_s0 + $0x78] sm:$0xff]  ;;  %v1167_v0 = vld [vmem:[%s1522_s1 + $0x14] sm:$0xf] }
   0x9   :  { %164 = vmatpush1.bf16.msra.mxu0 %v152_v18  ;;  %205 = vmatpush1.bf16.msra.mxu1 %v158_v19  ;;  %v386_v39 = vsel %vm43_vm0, %v1150_v34, 0  ;;  %v1171_v49 = vcombine.high %v1168_v44, %v1168_v44  ;;  %v1173_v50 = vcombine.high %v1169_v45, %v1169_v45  ;;  %v1170_v51 = vcombine.low %v1168_v44, %v1168_v44  ;;  %v1201_v8 = vld [vmem:[%s1521_s0 + $0x80] sm:$0xff]  ;;  %v1202_v9 = vld [vmem:[%s1521_s0 + $0x88] sm:$0xff]  ;;  %v1178_v10 = vld [vmem:[%s1522_s1 + $0x18] sm:$0xf] }
   0xa   :  { %195 = vmatprep.mubr.bf16.mxu0 %v1317_v2  ;;  %236 = vmatprep.mubr.bf16.mxu1 %v1317_v2  ;;  %v496_v47 = vsel %vm43_vm0, %v1159_v42, 0  ;;  %v502_v48 = vsel %vm43_vm0, %v1161_v43, 0  ;;  %v1172_v52 = vcombine.low %v1169_v45, %v1169_v45  ;;  %v1182_v58 = vcombine.high %v1179_v53, %v1179_v53  ;;  %v1189_v17 = vld [vmem:[%s1522_s1 + $0x1c] sm:$0xf]  ;;  %v1077_v22 = vld [vmem:[%s1525_s4] sm:$0xff]  ;;  %vm1109_vm3 = vmor %vm1108_vm2, %vm43_vm0 }
   0xb   :  { %1141 = vmatprep.subr.msk.bf16.mxu0 %vm43_vm0, %v1138_v20  ;;  %1143 = vmatprep.subr.msk.bf16.mxu1 %vm43_vm0, %v1140_v21  ;;  %v612_v56 = vsel %vm43_vm0, %v1170_v51, 0  ;;  %v1184_v59 = vcombine.high %v1180_v54, %v1180_v54  ;;  %v1181_v60 = vcombine.low %v1179_v53, %v1179_v53  ;;  %v1183_v61 = vcombine.low %v1180_v54, %v1180_v54  ;;  %v1200_v20 = vld [vmem:[%s1522_s1 + $0x20] sm:$0xf] }
   0xc   :  { %1070 = vperm.xlu0 %1280, %v1067_v23   ;;  %v618_v57 = vsel %vm43_vm0, %v1172_v52, 0  ;;  %v1193_v4 = vcombine.high %v1190_v62, %v1190_v62  ;;  %v1195_v5 = vcombine.high %v1191_v63, %v1191_v63  ;;  %v1192_v6 = vcombine.low %v1190_v62, %v1190_v62  ;;  %v1078_v23 = vld [vmem:[%s1525_s4 + $0x8] sm:$0xff] }
   0xd   :  { %v728_v1 = vsel %vm43_vm0, %v1181_v60, 0  ;;  %v734_v3 = vsel %vm43_vm0, %v1183_v61, 0  ;;  %v1194_v7 = vcombine.low %v1191_v63, %v1191_v63  ;;  %v1204_v13 = vcombine.high %v1201_v8, %v1201_v8 }
   0xe   :  { %v844_v11 = vsel %vm43_vm0, %v1192_v6, 0  ;;  %v1206_v14 = vcombine.high %v1202_v9, %v1202_v9  ;;  %v1203_v15 = vcombine.low %v1201_v8, %v1201_v8  ;;  %v1205_v16 = vcombine.low %v1202_v9, %v1202_v9 }
   0xf   :  { %v850_v12 = vsel %vm43_vm0, %v1194_v7, 0  ;;  %v1079_v27 = vunpack.c.l.bf16 %v1077_v22  ;;  %v1080_v33 = vunpack.c.h.bf16 %v1077_v22  ;;  %v1082_v35 = vunpack.c.h.bf16 %v1078_v23 }
  0x10   :  { %v960_v18 = vsel %vm43_vm0, %v1203_v15, 0  ;;  %v966_v19 = vsel %vm43_vm0, %v1205_v16, 0 }
  0x14   :  { %1131 = vmatmul.mubr.msk.bf16.vlgmr.msra.gmra.mrb[0].mxu0 %vm39_vm1, %v21_v28  ;;  %1133 = vmatmul.mubr.msk.bf16.vlgmr.msra.gmra.mrb[0].mxu1 %vm39_vm1, %v21_v28 }
  0x15   :  { %276 = vmatpush1.bf16.msra.mxu0 %v264_v29  ;;  %317 = vmatpush1.bf16.msra.mxu1 %v270_v30  ;;  %v1081_v29 = vunpack.c.l.bf16 %v1078_v23 }
  0x16   :  { %307 = vmatprep.mubr.bf16.mxu0 %v1317_v2  ;;  %348 = vmatprep.mubr.bf16.mxu1 %v1317_v2 }
  0x17   :  { %1152 = vmatprep.subr.msk.bf16.mxu0 %vm43_vm0, %v1149_v31  ;;  %1154 = vmatprep.subr.msk.bf16.mxu1 %vm43_vm0, %v1151_v32 }
  0x20   :  { %1142 = vmatmul.mubr.msk.bf16.vlgmr.msra.gmra.mrb[0].mxu0 %vm39_vm1, %v1134_v37  ;;  %1144 = vmatmul.mubr.msk.bf16.vlgmr.msra.gmra.mrb[0].mxu1 %vm39_vm1, %v1134_v37 }
  0x21   :  { %392 = vmatpush1.bf16.msra.mxu0 %v380_v38  ;;  %433 = vmatpush1.bf16.msra.mxu1 %v386_v39 }
  0x22   :  { %423 = vmatprep.mubr.bf16.mxu0 %v1317_v2  ;;  %464 = vmatprep.mubr.bf16.mxu1 %v1317_v2 }
  0x23   :  { %1163 = vmatprep.subr.msk.bf16.mxu0 %vm43_vm0, %v1160_v40  ;;  %1165 = vmatprep.subr.msk.bf16.mxu1 %vm43_vm0, %v1162_v41 }
  0x2c   :  { %1153 = vmatmul.mubr.msk.bf16.vlgmr.msra.gmra.mrb[0].mxu0 %vm39_vm1, %v1145_v46  ;;  %1155 = vmatmul.mubr.msk.bf16.vlgmr.msra.gmra.mrb[0].mxu1 %vm39_vm1, %v1145_v46 }
  0x2d   :  { %508 = vmatpush1.bf16.msra.mxu0 %v496_v47  ;;  %549 = vmatpush1.bf16.msra.mxu1 %v502_v48 }
  0x2e   :  { %539 = vmatprep.mubr.bf16.mxu0 %v1317_v2  ;;  %580 = vmatprep.mubr.bf16.mxu1 %v1317_v2 }
  0x2f   :  { %1174 = vmatprep.subr.msk.bf16.mxu0 %vm43_vm0, %v1171_v49  ;;  %1176 = vmatprep.subr.msk.bf16.mxu1 %vm43_vm0, %v1173_v50 }
  0x38   :  { %1164 = vmatmul.mubr.msk.bf16.vlgmr.msra.gmra.mrb[0].mxu0 %vm39_vm1, %v1156_v55  ;;  %1166 = vmatmul.mubr.msk.bf16.vlgmr.msra.gmra.mrb[0].mxu1 %vm39_vm1, %v1156_v55 }
  0x39   :  { %624 = vmatpush1.bf16.msra.mxu0 %v612_v56  ;;  %665 = vmatpush1.bf16.msra.mxu1 %v618_v57 }
  0x3a   :  { %655 = vmatprep.mubr.bf16.mxu0 %v1317_v2  ;;  %696 = vmatprep.mubr.bf16.mxu1 %v1317_v2 }
  0x3b   :  { %1185 = vmatprep.subr.msk.bf16.mxu0 %vm43_vm0, %v1182_v58  ;;  %1187 = vmatprep.subr.msk.bf16.mxu1 %vm43_vm0, %v1184_v59 }
  0x44   :  { %1175 = vmatmul.mubr.msk.bf16.vlgmr.msra.gmra.mrb[0].mxu0 %vm39_vm1, %v1167_v0  ;;  %1177 = vmatmul.mubr.msk.bf16.vlgmr.msra.gmra.mrb[0].mxu1 %vm39_vm1, %v1167_v0 }
  0x45   :  { %740 = vmatpush1.bf16.msra.mxu0 %v728_v1  ;;  %781 = vmatpush1.bf16.msra.mxu1 %v734_v3 }
  0x46   :  { %771 = vmatprep.mubr.bf16.mxu0 %v1317_v2  ;;  %812 = vmatprep.mubr.bf16.mxu1 %v1317_v2 }
  0x47   :  { %1196 = vmatprep.subr.msk.bf16.mxu0 %vm43_vm0, %v1193_v4  ;;  %1198 = vmatprep.subr.msk.bf16.mxu1 %vm43_vm0, %v1195_v5 }
  0x50   :  { %1186 = vmatmul.mubr.msk.bf16.vlgmr.msra.gmra.mrb[0].mxu0 %vm39_vm1, %v1178_v10  ;;  %1188 = vmatmul.mubr.msk.bf16.vlgmr.msra.gmra.mrb[0].mxu1 %vm39_vm1, %v1178_v10 }
  0x51   :  { %856 = vmatpush1.bf16.msra.mxu0 %v844_v11  ;;  %897 = vmatpush1.bf16.msra.mxu1 %v850_v12 }
  0x52   :  { %887 = vmatprep.mubr.bf16.mxu0 %v1317_v2  ;;  %928 = vmatprep.mubr.bf16.mxu1 %v1317_v2 }
  0x53   :  { %1207 = vmatprep.subr.msk.bf16.mxu0 %vm43_vm0, %v1204_v13  ;;  %1209 = vmatprep.subr.msk.bf16.mxu1 %vm43_vm0, %v1206_v14 }
  0x5c   :  { %1197 = vmatmul.mubr.msk.bf16.vlgmr.msra.gmra.mrb[0].mxu0 %vm39_vm1, %v1189_v17  ;;  %1199 = vmatmul.mubr.msk.bf16.vlgmr.msra.gmra.mrb[0].mxu1 %vm39_vm1, %v1189_v17 }
  0x5d   :  { %972 = vmatpush1.bf16.msra.mxu0 %v960_v18  ;;  %1013 = vmatpush1.bf16.msra.mxu1 %v966_v19 }
  0x5e   :  { %1003 = vmatprep.mubr.bf16.mxu0 %v1317_v2  ;;  %1044 = vmatprep.mubr.bf16.mxu1 %v1317_v2 }
  0x68   :  { %1208 = vmatmul.mubr.msk.bf16.vlgmr.msra.gmra.mrb[0].mxu0 %vm39_vm1, %v1200_v20  ;;  %1210 = vmatmul.mubr.msk.bf16.vlgmr.msra.gmra.mrb[0].mxu1 %vm39_vm1, %v1200_v20 }
  0x86   :  { %v1061_v21 = vpop.permute.xlu0 %1060 }
  0x8b   :  { %v1071_v24 = vpop.permute.xlu0 %1070 }
 0x13b   :  { %v1005_v25 = vpop.f32.mrb[0].mxu0  ;;  %v1046_v2 = vpop.f32.mrb[0].mxu1 }
 0x13c   :  { %v1063_v26 = vmul.f32 %v1061_v21, %v1005_v25  ;;  %v1065_v28 = vmul.f32 %v1061_v21, %v1046_v2  ;;  %v1007_v30 = vpop.f32.mrb[1].mxu0  ;;  %v1048_v31 = vpop.f32.mrb[1].mxu1 }
 0x13d   :  { %v1064_v32 = vmul.f32 %v1061_v21, %v1007_v30  ;;  %v1066_v34 = vmul.f32 %v1061_v21, %v1048_v31  ;;  %v1009_v36 = vpop.f32.mrb[2].mxu0  ;;  %v1050_v37 = vpop.f32.mrb[2].mxu1 }
 0x13e   :  { %v1073_v38 = vadd.f32 %v1071_v24, %v1063_v26  ;;  %v1075_v39 = vadd.f32 %v1071_v24, %v1065_v28  ;;  %v1010_v40 = vpop.f32.mrb[3].mxu0  ;;  %v1051_v41 = vpop.f32.mrb[3].mxu1 }
 0x13f   :  { %v1074_v42 = vadd.f32 %v1071_v24, %v1064_v32  ;;  %v1076_v43 = vadd.f32 %v1071_v24, %v1066_v34 }
 0x140   :  { %v1083_v44 = vadd.f32 %v1079_v27, %v1073_v38  ;;  %v1085_v45 = vadd.f32 %v1081_v29, %v1075_v39 }
 0x141   :  { %v1084_v46 = vadd.f32 %v1080_v33, %v1074_v42  ;;  %v1086_v47 = vadd.f32 %v1082_v35, %v1076_v43 }
 0x142   :  { %v1087_v48 = vmax.f32 %v1083_v44, 0.0  ;;  %v1089_v49 = vmax.f32 %v1085_v45, 0.0 }
 0x143   :  { %v1088_v50 = vmax.f32 %v1084_v46, 0.0  ;;  %v1090_v51 = vmax.f32 %v1086_v47, 0.0 }
 0x145   :  { %v1213_v52 = vpack.c.bf16 %v1088_v50, %v1087_v48  ;;  %v1214_v53 = vpack.c.bf16 %v1090_v51, %v1089_v49 }
 0x147   :  { %1107 = vst [vmem:[%s1526_s5] sm:$0xff] %v1213_v52  ;;  %1110 = vst.msk [vmem:[%s1526_s5 + $0x8] sm:$0xff] %vm1109_vm3, %v1214_v53 }

// kernel: _lambda_.22
= control target key start
LH: loop header
LB: loop body
LE: loop exit
PB: predicated region body
PF: predicated region fallthrough
CT: control target
= control target key end

     0   :  { %vm35_vm0 = vcmask 1043456   ;;  %vm31_vm1 = vcmask 64512   ;;  %v752_v0 = vmov 0.0   ;;  %vm753_vm2 = vmmov 0   ;;  %s897_s0 = inlined_call_operand.vmem [shape: bf16[9,8,98], index: 0, kind: input, shape index: {}]   ;;  %s898_s1 = inlined_call_operand.vmem [shape: bf16[9,16,8], index: 1, kind: input, shape index: {}]   ;;  %s899_s2 = inlined_call_operand.vmem [shape: f32[16,1], index: 2, kind: input, shape index: {}]   ;;  %s900_s3 = inlined_call_operand.vmem [shape: f32[16,1], index: 3, kind: input, shape index: {}]   ;;  %s901_s4 = inlined_call_operand.vmem [shape: bf16[16,98], index: 4, kind: output, shape index: {}]  }
   0x1   :  { %654 = vmatprep.subr.bf16.mxu1 %v752_v0  ;;  %678 = vmatprep.subr.bf16.mxu0 %v752_v0  ;;  %v592_v1 = vld [vmem:[%s897_s0 + $0x4] sm:$0xf]  ;;  %v609_v2 = vld [vmem:[%s897_s0 + $0x10] sm:$0xf]  ;;  %v743_v5 = vld [vmem:[%s898_s1 + $0x8] sm:$0xff]   ;;  %v754_v11 = vmov 0  }
   0x2   :  { %v37_v3 = vsel %vm35_vm0, %v592_v1, 0  ;;  %v264_v4 = vsel %vm35_vm0, %v609_v2, 0  ;;  %656 = vmatprep.mubr.msk.bf16.mxu1 %vm753_vm2, %v752_v0  ;;  %680 = vmatprep.mubr.msk.bf16.mxu0 %vm753_vm2, %v752_v0  ;;  %v744_v6 = vld [vmem:[%s898_s1 + $0x20] sm:$0xff]   ;;  %v614_v7 = vld [vmem:[%s897_s0 + $0x14] sm:$0xf]  ;;  %v746_v16 = vld [vmem:[%s898_s1 + $0x28] sm:$0xff]  }
   0x3   :  { %655 = vmatpush3.bf16.msra.mxu1 %v37_v3  ;;  %679 = vmatpush3.bf16.msra.mxu0 %v264_v4  ;;  %v323_v8 = vsel %vm35_vm0, %v614_v7, 0  ;;  %v20_v9 = vld [vmem:[%s897_s0] sm:$0xf]  ;;  %v619_v12 = vld [vmem:[%s897_s0 + $0x18] sm:$0xf]  ;;  %v546_v20 = vld [vmem:[%s899_s2 + $0x8] sm:$0xff] }
   0x4   :  { %684 = vmatprep.subr.bf16.mxu0 %v752_v0  ;;  %660 = vmatprep.subr.bf16.mxu1 %v752_v0  ;;  %v89_v10 = vsel %vm35_vm0, %v20_v9, 0  ;;  %v599_v13 = vld [vmem:[%s897_s0 + $0x8] sm:$0xf]  ;;  %v545_v14 = vld [vmem:[%s899_s2] sm:$0xff]  ;;  %v382_v18 = vsel %vm35_vm0, %v619_v12, 0  ;;  %v747_v24 = vld [vmem:[%s898_s1 + $0x10] sm:$0xff]  }
   0x5   :  { %741 = vset.pattern.permute.xlu0 %v754_v11  ;;  %742 = vset.pattern.permute.xlu1 %v754_v11  ;;  %v745_v15 = vld [vmem:[%s898_s1] sm:$0xff]   ;;  %v146_v19 = vsel %vm35_vm0, %v599_v13, 0  ;;  %v560_v21 = vld [vmem:[%s900_s3 + $0x8] sm:$0xff]  ;;  %v624_v22 = vld [vmem:[%s897_s0 + $0x1c] sm:$0xf]  ;;  %vm583_vm3 = vcmask 797696  }
   0x6   :  { %657 = vmatmul.mubr.msk.bf16.vlgmr.msra.gmra.mrb[0].mxu1 %vm31_vm1, %v743_v5  ;;  %681 = vmatmul.mubr.msk.bf16.vlgmr.msra.gmra.mrb[0].mxu0 %vm31_vm1, %v744_v6  ;;  %v559_v17 = vld [vmem:[%s900_s3] sm:$0xff]  ;;  %v604_v23 = vld [vmem:[%s897_s0 + $0xc] sm:$0xf]  ;;  %v748_v25 = vld [vmem:[%s898_s1 + $0x30] sm:$0xff]   ;;  %v441_v26 = vsel %vm35_vm0, %v624_v22, 0 }
   0x7   :  { %685 = vmatpush3.bf16.msra.mxu0 %v323_v8  ;;  %661 = vmatpush3.bf16.msra.mxu1 %v89_v10  ;;  %v205_v27 = vsel %vm35_vm0, %v604_v23, 0  ;;  %v629_v28 = vld [vmem:[%s897_s0 + $0x20] sm:$0xf]  ;;  %v749_v29 = vld [vmem:[%s898_s1 + $0x18] sm:$0xff]  }
   0x8   :  { %662 = vmatprep.mubr.msk.bf16.mxu1 %vm753_vm2, %v752_v0  ;;  %686 = vmatprep.mubr.msk.bf16.mxu0 %vm753_vm2, %v752_v0  ;;  %v750_v30 = vld [vmem:[%s898_s1 + $0x38] sm:$0xff]   ;;  %v500_v31 = vsel %vm35_vm0, %v629_v28, 0  ;;  %v751_v32 = vld [vmem:[%s898_s1 + $0x40] sm:$0xff]  }
   0x9   :  { %690 = vmatprep.subr.bf16.mxu0 %v752_v0  ;;  %666 = vmatprep.subr.bf16.mxu1 %v752_v0 }
   0xa   :  { %549 = vperm.xlu0 %741, %v545_v14   ;;  %563 = vperm.xlu1 %742, %v559_v17  }
   0xe   :  { %554 = vperm.xlu0 %741, %v546_v20   ;;  %568 = vperm.xlu1 %742, %v560_v21  }
  0x12   :  { %663 = vmatmul.mubr.msk.bf16.vlgmr.msra.gmra.mrb[0].mxu1 %vm31_vm1, %v745_v15  ;;  %687 = vmatmul.mubr.msk.bf16.vlgmr.msra.gmra.mrb[0].mxu0 %vm31_vm1, %v746_v16 }
  0x13   :  { %691 = vmatpush3.bf16.msra.mxu0 %v382_v18  ;;  %667 = vmatpush3.bf16.msra.mxu1 %v146_v19 }
  0x14   :  { %668 = vmatprep.mubr.msk.bf16.mxu1 %vm753_vm2, %v752_v0  ;;  %692 = vmatprep.mubr.msk.bf16.mxu0 %vm753_vm2, %v752_v0 }
  0x15   :  { %696 = vmatprep.subr.bf16.mxu0 %v752_v0  ;;  %672 = vmatprep.subr.bf16.mxu1 %v752_v0 }
  0x1e   :  { %669 = vmatmul.mubr.msk.bf16.vlgmr.msra.gmra.mrb[0].mxu1 %vm31_vm1, %v747_v24  ;;  %693 = vmatmul.mubr.msk.bf16.vlgmr.msra.gmra.mrb[0].mxu0 %vm31_vm1, %v748_v25 }
  0x1f   :  { %697 = vmatpush3.bf16.msra.mxu0 %v441_v26  ;;  %673 = vmatpush3.bf16.msra.mxu1 %v205_v27 }
  0x20   :  { %674 = vmatprep.mubr.msk.bf16.mxu1 %vm753_vm2, %v752_v0  ;;  %698 = vmatprep.mubr.msk.bf16.mxu0 %vm753_vm2, %v752_v0 }
  0x21   :  { %702 = vmatprep.subr.bf16.mxu0 %v752_v0 }
  0x2a   :  { %675 = vmatmul.mubr.msk.bf16.vlgmr.msra.gmra.mrb[0].mxu1 %vm31_vm1, %v749_v29  ;;  %699 = vmatmul.mubr.msk.bf16.vlgmr.msra.gmra.mrb[0].mxu0 %vm31_vm1, %v750_v30 }
  0x2b   :  { %703 = vmatpush3.bf16.msra.mxu0 %v500_v31  ;;  %704 = vmatprep.mubr.msk.bf16.mxu0 %vm753_vm2, %v752_v0 }
  0x36   :  { %705 = vmatmul.mubr.msk.bf16.vlgmr.msra.gmra.mrb[0].mxu0 %vm31_vm1, %v751_v32 }
  0x89   :  { %v550_v37 = vpop.permute.xlu0 %549  ;;  %v564_v38 = vpop.permute.xlu1 %563 }
  0x8d   :  { %v555_v46 = vpop.permute.xlu0 %554  ;;  %v569_v49 = vpop.permute.xlu1 %568 }
  0xfd   :  { %v241_v33 = vpop.f32.mrb[0].mxu1 }
  0xfe   :  { %v676_v34 = vpop.f32.mrb[1].mxu1 }
  0xff   :  { %v244_v35 = vpop.f32.mrb[2].mxu1 }
 0x100   :  { %v677_v36 = vpop.f32.mrb[3].mxu1 }
 0x109   :  { %v536_v39 = vpop.f32.mrb[0].mxu0 }
 0x10a   :  { %v708_v40 = vadd.f32 %v536_v39, %v241_v33  ;;  %v706_v41 = vpop.f32.mrb[1].mxu0 }
 0x10b   :  { %v539_v42 = vpop.f32.mrb[2].mxu0 }
 0x10c   :  { %v557_v43 = vmul.f32 %v708_v40, %v550_v37  ;;  %v709_v44 = vadd.f32 %v539_v42, %v244_v35  ;;  %v707_v45 = vpop.f32.mrb[3].mxu0 }
 0x10e   :  { %v571_v47 = vadd.f32 %v564_v38, %v557_v43  ;;  %v558_v48 = vmul.f32 %v709_v44, %v555_v46 }
 0x110   :  { %v573_v50 = vmax.f32 %v571_v47, 0.0  ;;  %v572_v51 = vadd.f32 %v569_v49, %v558_v48 }
 0x112   :  { %v634_v52 = vpack.c.bf16 %v573_v50, %v573_v50  ;;  %v574_v53 = vmax.f32 %v572_v51, 0.0 }
 0x114   :  { %v635_v54 = vpack.c.bf16 %v574_v53, %v574_v53  ;;  %584 = vst.msk [vmem:[%s901_s4] sm:$0xf] %vm583_vm3, %v634_v52 }
 0x116   :  { %585 = vst.msk [vmem:[%s901_s4 + $0x4] sm:$0xf] %vm583_vm3, %v635_v54 }

// kernel: _lambda_.23
= control target key start
LH: loop header
LB: loop body
LE: loop exit
PB: predicated region body
PF: predicated region fallthrough
CT: control target
= control target key end

     0   :  { %v811_v0 = vmov 0.0   ;;  %vm812_vm0 = vmmov 0   ;;  %vm39_vm1 = vcmask 130048   ;;  %v813_v4 = vmov 0   ;;  %s947_s0 = inlined_call_operand.vmem [shape: bf16[9,16,98], index: 0, kind: input, shape index: {}]   ;;  %s948_s1 = inlined_call_operand.vmem [shape: bf16[9,16,16], index: 1, kind: input, shape index: {}]   ;;  %s949_s2 = inlined_call_operand.vmem [shape: f32[16,1], index: 2, kind: input, shape index: {}]   ;;  %s950_s3 = inlined_call_operand.vmem [shape: f32[16,1], index: 3, kind: input, shape index: {}]   ;;  %s951_s4 = inlined_call_operand.vmem [shape: bf16[16,98], index: 4, kind: output, shape index: {}]  }
   0x1   :  { %704 = vmatprep.subr.bf16.mxu1 %v811_v0  ;;  %728 = vmatprep.subr.bf16.mxu0 %v811_v0  ;;  %v793_v1 = vld [vmem:[%s947_s0 + $0x8] sm:$0xff]   ;;  %v794_v2 = vld [vmem:[%s947_s0 + $0x20] sm:$0xff]   ;;  %v802_v10 = vld [vmem:[%s947_s0 + $0x10] sm:$0xff]   ;;  %vm616_vm2 = vcmask 797696  }
   0x2   :  { %706 = vmatprep.mubr.msk.bf16.mxu1 %vm812_vm0, %v811_v0  ;;  %730 = vmatprep.mubr.msk.bf16.mxu0 %vm812_vm0, %v811_v0  ;;  %v795_v3 = vld [vmem:[%s948_s1 + $0x8] sm:$0xff]   ;;  %v796_v5 = vld [vmem:[%s948_s1 + $0x20] sm:$0xff]   ;;  %v801_v11 = vld [vmem:[%s947_s0 + $0x30] sm:$0xff]  }
   0x3   :  { %705 = vmatpush3.bf16.msra.mxu1 %v793_v1  ;;  %791 = vset.pattern.permute.xlu0 %v813_v4  ;;  %v797_v6 = vld [vmem:[%s947_s0 + $0x28] sm:$0xff]   ;;  %v798_v7 = vld [vmem:[%s947_s0] sm:$0xff]   ;;  %v803_v16 = vld [vmem:[%s948_s1 + $0x10] sm:$0xff]  }
   0x4   :  { %729 = vmatpush3.bf16.msra.mxu0 %v794_v2  ;;  %710 = vmatprep.subr.bf16.mxu1 %v811_v0  ;;  %v799_v8 = vld [vmem:[%s948_s1] sm:$0xff]   ;;  %v800_v9 = vld [vmem:[%s948_s1 + $0x28] sm:$0xff]   ;;  %v804_v17 = vld [vmem:[%s948_s1 + $0x30] sm:$0xff]  }
   0x5   :  { %734 = vmatprep.subr.bf16.mxu0 %v811_v0  ;;  %792 = vset.pattern.permute.xlu1 %v813_v4  ;;  %v580_v12 = vld [vmem:[%s949_s2] sm:$0xff]  ;;  %v581_v14 = vld [vmem:[%s949_s2 + $0x8] sm:$0xff]  ;;  %v806_v18 = vld [vmem:[%s947_s0 + $0x18] sm:$0xff]  }
   0x6   :  { %707 = vmatmul.mubr.msk.bf16.vlgmr.msra.gmra.mrb[0].mxu1 %vm39_vm1, %v795_v3  ;;  %v594_v13 = vld [vmem:[%s950_s3] sm:$0xff]  ;;  %584 = vperm.xlu0 %791, %v580_v12   ;;  %v595_v15 = vld [vmem:[%s950_s3 + $0x8] sm:$0xff]  ;;  %v805_v19 = vld [vmem:[%s947_s0 + $0x38] sm:$0xff]  }
   0x7   :  { %731 = vmatmul.mubr.msk.bf16.vlgmr.msra.gmra.mrb[0].mxu0 %vm39_vm1, %v796_v5  ;;  %712 = vmatprep.mubr.msk.bf16.mxu1 %vm812_vm0, %v811_v0  ;;  %v807_v20 = vld [vmem:[%s948_s1 + $0x18] sm:$0xff]   ;;  %v809_v22 = vld [vmem:[%s947_s0 + $0x40] sm:$0xff]  }
   0x8   :  { %735 = vmatpush3.bf16.msra.mxu0 %v797_v6  ;;  %711 = vmatpush3.bf16.msra.mxu1 %v798_v7  ;;  %v808_v21 = vld [vmem:[%s948_s1 + $0x38] sm:$0xff]   ;;  %v810_v23 = vld [vmem:[%s948_s1 + $0x40] sm:$0xff]  }
   0x9   :  { %736 = vmatprep.mubr.msk.bf16.mxu0 %vm812_vm0, %v811_v0  ;;  %740 = vmatprep.subr.bf16.mxu0 %v811_v0 }
   0xa   :  { %716 = vmatprep.subr.bf16.mxu1 %v811_v0  ;;  %598 = vperm.xlu1 %792, %v594_v13  }
   0xb   :  { %589 = vperm.xlu0 %791, %v581_v14  }
   0xe   :  { %603 = vperm.xlu1 %792, %v595_v15  }
  0x12   :  { %713 = vmatmul.mubr.msk.bf16.vlgmr.msra.gmra.mrb[0].mxu1 %vm39_vm1, %v799_v8 }
  0x13   :  { %737 = vmatmul.mubr.msk.bf16.vlgmr.msra.gmra.mrb[0].mxu0 %vm39_vm1, %v800_v9  ;;  %717 = vmatpush3.bf16.msra.mxu1 %v802_v10 }
  0x14   :  { %741 = vmatpush3.bf16.msra.mxu0 %v801_v11  ;;  %718 = vmatprep.mubr.msk.bf16.mxu1 %vm812_vm0, %v811_v0 }
  0x15   :  { %742 = vmatprep.mubr.msk.bf16.mxu0 %vm812_vm0, %v811_v0  ;;  %746 = vmatprep.subr.bf16.mxu0 %v811_v0 }
  0x16   :  { %722 = vmatprep.subr.bf16.mxu1 %v811_v0 }
  0x1e   :  { %719 = vmatmul.mubr.msk.bf16.vlgmr.msra.gmra.mrb[0].mxu1 %vm39_vm1, %v803_v16 }
  0x1f   :  { %743 = vmatmul.mubr.msk.bf16.vlgmr.msra.gmra.mrb[0].mxu0 %vm39_vm1, %v804_v17  ;;  %723 = vmatpush3.bf16.msra.mxu1 %v806_v18 }
  0x20   :  { %747 = vmatpush3.bf16.msra.mxu0 %v805_v19  ;;  %724 = vmatprep.mubr.msk.bf16.mxu1 %vm812_vm0, %v811_v0 }
  0x21   :  { %748 = vmatprep.mubr.msk.bf16.mxu0 %vm812_vm0, %v811_v0  ;;  %752 = vmatprep.subr.bf16.mxu0 %v811_v0 }
  0x2a   :  { %725 = vmatmul.mubr.msk.bf16.vlgmr.msra.gmra.mrb[0].mxu1 %vm39_vm1, %v807_v20 }
  0x2b   :  { %749 = vmatmul.mubr.msk.bf16.vlgmr.msra.gmra.mrb[0].mxu0 %vm39_vm1, %v808_v21 }
  0x2c   :  { %753 = vmatpush3.bf16.msra.mxu0 %v809_v22  ;;  %754 = vmatprep.mubr.msk.bf16.mxu0 %vm812_vm0, %v811_v0 }
  0x37   :  { %755 = vmatmul.mubr.msk.bf16.vlgmr.msra.gmra.mrb[0].mxu0 %vm39_vm1, %v810_v23 }
  0x85   :  { %v585_v28 = vpop.permute.xlu0 %584 }
  0x89   :  { %v599_v29 = vpop.permute.xlu1 %598 }
  0x8a   :  { %v590_v37 = vpop.permute.xlu0 %589 }
  0x8d   :  { %v604_v40 = vpop.permute.xlu1 %603 }
  0xfd   :  { %v256_v24 = vpop.f32.mrb[0].mxu1 }
  0xfe   :  { %v726_v25 = vpop.f32.mrb[1].mxu1 }
  0xff   :  { %v259_v26 = vpop.f32.mrb[2].mxu1 }
 0x100   :  { %v727_v27 = vpop.f32.mrb[3].mxu1 }
 0x10a   :  { %v571_v30 = vpop.f32.mrb[0].mxu0 }
 0x10b   :  { %v758_v31 = vadd.f32 %v571_v30, %v256_v24  ;;  %v756_v32 = vpop.f32.mrb[1].mxu0 }
 0x10c   :  { %v574_v33 = vpop.f32.mrb[2].mxu0 }
 0x10d   :  { %v592_v34 = vmul.f32 %v758_v31, %v585_v28  ;;  %v759_v35 = vadd.f32 %v574_v33, %v259_v26  ;;  %v757_v36 = vpop.f32.mrb[3].mxu0 }
 0x10f   :  { %v606_v38 = vadd.f32 %v599_v29, %v592_v34  ;;  %v593_v39 = vmul.f32 %v759_v35, %v590_v37 }
 0x111   :  { %v684_v41 = vpack.c.bf16 %v606_v38, %v606_v38  ;;  %v607_v42 = vadd.f32 %v604_v40, %v593_v39 }
 0x113   :  { %v685_v43 = vpack.c.bf16 %v607_v42, %v607_v42  ;;  %617 = vst.msk [vmem:[%s951_s4] sm:$0xf] %vm616_vm2, %v684_v41 }
 0x115   :  { %618 = vst.msk [vmem:[%s951_s4 + $0x4] sm:$0xf] %vm616_vm2, %v685_v43 }

// kernel: _lambda_.21
= control target key start
LH: loop header
LB: loop body
LE: loop exit
PB: predicated region body
PF: predicated region fallthrough
CT: control target
= control target key end

     0   :  { %vm30_vm0 = vcmask 1043456   ;;  %v138_v0 = vmov 0.0   ;;  %vm139_vm1 = vmmov 0   ;;  %vm26_vm2 = vcmask 64512   ;;  %s190_s0 = inlined_call_operand.vmem [shape: bf16[1,8,98], index: 0, kind: input, shape index: {}]   ;;  %s191_s1 = inlined_call_operand.vmem [shape: bf16[1,16,8], index: 1, kind: input, shape index: {}]   ;;  %s192_s2 = inlined_call_operand.vmem [shape: f32[16,1], index: 2, kind: input, shape index: {}]   ;;  %s193_s3 = inlined_call_operand.vmem [shape: f32[16,1], index: 3, kind: input, shape index: {}]   ;;  %s194_s4 = inlined_call_operand.vmem [shape: bf16[16,98], index: 4, kind: output, shape index: {}]  }
   0x1   :  { %126 = vmatprep.subr.bf16.mxu0 %v138_v0  ;;  %v20_v1 = vld [vmem:[%s190_s0] sm:$0xf]  ;;  %128 = vmatprep.mubr.msk.bf16.mxu0 %vm139_vm1, %v138_v0  ;;  %v140_v6 = vmov 0   ;;  %v76_v7 = vld [vmem:[%s192_s2 + $0x8] sm:$0xff]  ;;  %vm111_vm3 = vcmask 797696  }
   0x2   :  { %v32_v2 = vsel %vm30_vm0, %v20_v1, 0  ;;  %v137_v3 = vld [vmem:[%s191_s1] sm:$0xff]   ;;  %135 = vset.pattern.permute.xlu0 %v140_v6  ;;  %136 = vset.pattern.permute.xlu1 %v140_v6  ;;  %v90_v8 = vld [vmem:[%s193_s3 + $0x8] sm:$0xff] }
   0x3   :  { %v75_v4 = vld [vmem:[%s192_s2] sm:$0xff]  ;;  %127 = vmatpush3.bf16.msra.mxu0 %v32_v2 }
   0x4   :  { %v89_v5 = vld [vmem:[%s193_s3] sm:$0xff]  ;;  %79 = vperm.xlu0 %135, %v75_v4  }
   0x5   :  { %93 = vperm.xlu1 %136, %v89_v5  }
   0x6   :  { %129 = vmatmul.mubr.msk.bf16.vlgmr.msra.gmra.mrb[0].mxu0 %vm26_vm2, %v137_v3 }
   0x8   :  { %84 = vperm.xlu0 %135, %v76_v7  }
   0x9   :  { %98 = vperm.xlu1 %136, %v90_v8  }
  0x83   :  { %v80_v9 = vpop.permute.xlu0 %79 }
  0x84   :  { %v94_v10 = vpop.permute.xlu1 %93 }
  0x87   :  { %v85_v14 = vpop.permute.xlu0 %84 }
  0x88   :  { %v99_v19 = vpop.permute.xlu1 %98 }
  0xd9   :  { %v68_v11 = vpop.f32.mrb[0].mxu0 }
  0xda   :  { %v87_v12 = vmul.f32 %v80_v9, %v68_v11  ;;  %v130_v13 = vpop.f32.mrb[1].mxu0 }
  0xdb   :  { %v71_v15 = vpop.f32.mrb[2].mxu0 }
  0xdc   :  { %v101_v16 = vadd.f32 %v94_v10, %v87_v12  ;;  %v88_v17 = vmul.f32 %v85_v14, %v71_v15  ;;  %v131_v18 = vpop.f32.mrb[3].mxu0 }
  0xde   :  { %v122_v20 = vpack.c.bf16 %v101_v16, %v101_v16  ;;  %v102_v21 = vadd.f32 %v99_v19, %v88_v17 }
  0xe0   :  { %112 = vst.msk [vmem:[%s194_s4] sm:$0xf] %vm111_vm3, %v122_v20  ;;  %v123_v22 = vpack.c.bf16 %v102_v21, %v102_v21 }
  0xe2   :  { %113 = vst.msk [vmem:[%s194_s4 + $0x4] sm:$0xf] %vm111_vm3, %v123_v22 }

// kernel: _lambda_.24
= control target key start
LH: loop header
LB: loop body
LE: loop exit
PB: predicated region body
PF: predicated region fallthrough
CT: control target
= control target key end

     0   :  { %vm55_vm0 = vcmask 394240   ;;  %vm240_vm1 = vcmask 130048   ;;  %v707_v49 = vmov 0   ;;  %v151_v60 = vlaneseq  ;;  %s1082_s0 = inlined_call_operand.vmem [shape: bf16[16,2,49], index: 0, kind: input, shape index: {}]   ;;  %s1083_s2 = inlined_call_operand.vmem [shape: f32[16,16], index: 2, kind: input, shape index: {}]   ;;  %s1084_s3 = inlined_call_operand.vmem [shape: f32[16,1], index: 3, kind: input, shape index: {}]   ;;  %s1085_s5 = inlined_call_operand.vmem [shape: f32[16,1], index: 5, kind: input, shape index: {}]   ;;  %s1086_s4 = inlined_call_operand.vmem [shape: f32[16,16], index: 4, kind: input, shape index: {}]   ;;  %s1087_s1 = inlined_call_operand.vmem [shape: bf16[16,2,49], index: 1, kind: input, shape index: {}]   ;;  %s1088_s6 = inlined_call_operand.vmem [shape: bf16[16,2,49], index: 6, kind: output, shape index: {}]  }
   0x1   :  { %v746_v0 = vld [vmem:[%s1082_s0 + $0x8] sm:$0x1]  ;;  %v751_v1 = vld [vmem:[%s1082_s0] sm:$0x1]  ;;  %v756_v2 = vld [vmem:[%s1082_s0 + $0x9] sm:$0x1]  ;;  %698 = vset.pattern.permute.xlu1 %v707_v49  ;;  %697 = vset.pattern.permute.xlu0 %v707_v49 }
   0x2   :  { %v47_v3 = vunpack.c.l.bf16 %v746_v0  ;;  %v39_v4 = vunpack.c.l.bf16 %v751_v1  ;;  %v48_v5 = vunpack.c.l.bf16 %v756_v2  ;;  %v764_v6 = vld [vmem:[%s1082_s0 + $0x1] sm:$0x1]  ;;  %v770_v8 = vld [vmem:[%s1082_s0 + $0xa] sm:$0x1]  ;;  %v775_v9 = vld [vmem:[%s1082_s0 + $0x2] sm:$0x1] }
   0x3   :  { %v40_v7 = vunpack.c.l.bf16 %v764_v6  ;;  %v49_v14 = vunpack.c.l.bf16 %v770_v8  ;;  %v41_v15 = vunpack.c.l.bf16 %v775_v9  ;;  %v794_v16 = vld [vmem:[%s1082_s0 + $0xb] sm:$0x1]  ;;  %v799_v17 = vld [vmem:[%s1082_s0 + $0x3] sm:$0x1]  ;;  %v812_v22 = vld [vmem:[%s1082_s0 + $0xc] sm:$0x1] }
   0x4   :  { %v80_v10 = vsel %vm55_vm0, %v47_v3, 0.0  ;;  %v56_v11 = vsel %vm55_vm0, %v39_v4, 0.0  ;;  %v83_v12 = vsel %vm55_vm0, %v48_v5, 0.0  ;;  %v50_v20 = vunpack.c.l.bf16 %v794_v16  ;;  %v817_v23 = vld [vmem:[%s1082_s0 + $0x4] sm:$0x1]  ;;  %v124_v50 = vld [vmem:[%s1084_s3 + $0x8] sm:$0xff] }
   0x5   :  { %81 = vadd.xlane.f32.xlu1 %v80_v10  ;;  %57 = vadd.xlane.f32.xlu0 %v56_v11  ;;  %v59_v13 = vsel %vm55_vm0, %v40_v7, 0.0  ;;  %v86_v18 = vsel %vm55_vm0, %v49_v14, 0.0  ;;  %v62_v19 = vsel %vm55_vm0, %v41_v15, 0.0  ;;  %v42_v21 = vunpack.c.l.bf16 %v799_v17  ;;  %v830_v28 = vld [vmem:[%s1082_s0 + $0xd] sm:$0x1]  ;;  %v121_v48 = vld [vmem:[%s1083_s2] sm:$0xff] }
   0x6   :  { %v89_v24 = vsel %vm55_vm0, %v50_v20, 0.0  ;;  %v51_v26 = vunpack.c.l.bf16 %v812_v22  ;;  %v43_v27 = vunpack.c.l.bf16 %v817_v23  ;;  %v835_v29 = vld [vmem:[%s1082_s0 + $0x5] sm:$0x1]  ;;  %v52_v32 = vunpack.c.l.bf16 %v830_v28  ;;  %v848_v34 = vld [vmem:[%s1082_s0 + $0xe] sm:$0x1]  ;;  %678 = vmatprep.mubr.msk.f32.mxu0 %vm240_vm1, %v121_v48 }
   0x7   :  { %v65_v25 = vsel %vm55_vm0, %v42_v21, 0.0  ;;  %v44_v33 = vunpack.c.l.bf16 %v835_v29  ;;  %v853_v35 = vld [vmem:[%s1082_s0 + $0x6] sm:$0x1]  ;;  %v53_v38 = vunpack.c.l.bf16 %v848_v34  ;;  %v866_v40 = vld [vmem:[%s1082_s0 + $0xf] sm:$0x1]  ;;  %v152_v63 = vand.u32 127, %v151_v60 }
   0x8   :  { %v92_v30 = vsel %vm55_vm0, %v51_v26, 0.0  ;;  %v68_v31 = vsel %vm55_vm0, %v43_v27, 0.0  ;;  %v95_v36 = vsel %vm55_vm0, %v52_v32, 0.0  ;;  %v45_v39 = vunpack.c.l.bf16 %v853_v35  ;;  %v871_v41 = vld [vmem:[%s1082_s0 + $0x7] sm:$0x1]  ;;  %v327_v53 = vld [vmem:[%s1085_s5 + $0x8] sm:$0xff] }
   0x9   :  { %84 = vadd.xlane.f32.xlu1 %v83_v12  ;;  %60 = vadd.xlane.f32.xlu0 %v59_v13  ;;  %v71_v37 = vsel %vm55_vm0, %v44_v33, 0.0  ;;  %v98_v42 = vsel %vm55_vm0, %v53_v38, 0.0  ;;  %v54_v44 = vunpack.c.l.bf16 %v866_v40  ;;  %v46_v45 = vunpack.c.l.bf16 %v871_v41  ;;  %v123_v51 = vld [vmem:[%s1084_s3] sm:$0xff] }
   0xa   :  { %v74_v43 = vsel %vm55_vm0, %v45_v39, 0.0  ;;  %v326_v52 = vld [vmem:[%s1085_s5] sm:$0xff]  ;;  %v903_v10 = vshrl.u32 %v151_v60, 7  ;;  %vm217_vm2 = vcmask 1041409   ;;  %vm219_vm3 = vcmask 1042434  }
   0xb   :  { %v101_v46 = vsel %vm55_vm0, %v54_v44, 0.0  ;;  %v77_v47 = vsel %vm55_vm0, %v46_v45, 0.0  ;;  %vm221_vm4 = vcmask 1043459   ;;  %vm223_vm5 = vcmask 1044484  }
   0xc   :  { %vm225_vm6 = vcmask 1045509   ;;  %vm227_vm7 = vcmask 1046534   ;;  %vm229_vm8 = vcmask 1047559   ;;  %vm639_vm9 = vcmask 393216  }
   0xd   :  { %87 = vadd.xlane.f32.xlu1 %v86_v18  ;;  %63 = vadd.xlane.f32.xlu0 %v62_v19 }
  0x11   :  { %90 = vadd.xlane.f32.xlu1 %v89_v24  ;;  %66 = vadd.xlane.f32.xlu0 %v65_v25  ;;  %v155_v24 = vsub.s32 %v152_v63, %v903_v10 }
  0x15   :  { %93 = vadd.xlane.f32.xlu1 %v92_v30  ;;  %69 = vadd.xlane.f32.xlu0 %v68_v31 }
  0x19   :  { %96 = vadd.xlane.f32.xlu1 %v95_v36  ;;  %72 = vadd.xlane.f32.xlu0 %v71_v37 }
  0x1d   :  { %99 = vadd.xlane.f32.xlu1 %v98_v42  ;;  %75 = vadd.xlane.f32.xlu0 %v74_v43 }
  0x21   :  { %102 = vadd.xlane.f32.xlu1 %v101_v46  ;;  %78 = vadd.xlane.f32.xlu0 %v77_v47 }
  0x32   :  { %132 = vperm.xlu1 %698, %v124_v50  }
  0x36   :  { %330 = vperm.xlu1 %698, %v326_v52  }
  0x37   :  { %127 = vperm.xlu0 %697, %v123_v51  }
  0x3a   :  { %335 = vperm.xlu1 %698, %v327_v53  }
  0x92   :  { %v82_v54 = vpop.xlane.xlu1 %81  ;;  %v58_v55 = vpop.xlane.xlu0 %57 }
  0x93   :  { %v113_v13 = vmul.f32 0.020408163, %v82_v54  ;;  %v105_v25 = vmul.f32 0.020408163, %v58_v55 }
  0x95   :  { %v188_v52 = vrot.slane %v113_v13, %v155_v24  ;;  %v156_v53 = vrot.slane %v105_v25, %v155_v24 }
  0x96   :  { %v85_v56 = vpop.xlane.xlu1 %84  ;;  %v61_v57 = vpop.xlane.xlu0 %60 }
  0x97   :  { %v114_v18 = vmul.f32 0.020408163, %v85_v56  ;;  %v106_v19 = vmul.f32 0.020408163, %v61_v57 }
  0x99   :  { %v192_v48 = vrot.slane %v114_v18, %v155_v24  ;;  %v160_v49 = vrot.slane %v106_v19, %v155_v24 }
  0x9a   :  { %v88_v58 = vpop.xlane.xlu1 %87  ;;  %v64_v59 = vpop.xlane.xlu0 %63 }
  0x9b   :  { %v115_v30 = vmul.f32 0.020408163, %v88_v58  ;;  %v107_v31 = vmul.f32 0.020408163, %v64_v59 }
  0x9d   :  { %v196_v54 = vrot.slane %v115_v30, %v155_v24  ;;  %v164_v55 = vrot.slane %v107_v31, %v155_v24 }
  0x9e   :  { %v91_v61 = vpop.xlane.xlu1 %90  ;;  %v67_v62 = vpop.xlane.xlu0 %66 }
  0x9f   :  { %v116_v42 = vmul.f32 0.020408163, %v91_v61  ;;  %v108_v43 = vmul.f32 0.020408163, %v67_v62 }
  0xa1   :  { %v200_v58 = vrot.slane %v116_v42, %v155_v24  ;;  %v168_v59 = vrot.slane %v108_v43, %v155_v24 }
  0xa2   :  { %v94_v11 = vpop.xlane.xlu1 %93  ;;  %v70_v12 = vpop.xlane.xlu0 %69 }
  0xa3   :  { %v117_v46 = vmul.f32 0.020408163, %v94_v11  ;;  %v109_v47 = vmul.f32 0.020408163, %v70_v12  ;;  %v231_v11 = vsel %vm217_vm2, %v192_v48, %v188_v52  ;;  %v218_v12 = vsel %vm217_vm2, %v160_v49, %v156_v53 }
  0xa4   :  { %v232_v13 = vsel %vm219_vm3, %v196_v54, %v231_v11  ;;  %v220_v25 = vsel %vm219_vm3, %v164_v55, %v218_v12 }
  0xa5   :  { %v204_v61 = vrot.slane %v117_v46, %v155_v24  ;;  %v172_v62 = vrot.slane %v109_v47, %v155_v24  ;;  %v233_v42 = vsel %vm221_vm4, %v200_v58, %v232_v13  ;;  %v222_v43 = vsel %vm221_vm4, %v168_v59, %v220_v25  ;;  %v122_v59 = vld [vmem:[%s1083_s2 + $0x8] sm:$0xff] }
  0xa6   :  { %v97_v36 = vpop.xlane.xlu1 %96  ;;  %v73_v37 = vpop.xlane.xlu0 %72  ;;  %v325_v25 = vld [vmem:[%s1086_s4 + $0x8] sm:$0xff] }
  0xa7   :  { %v118_v50 = vmul.f32 0.020408163, %v97_v36  ;;  %v110_v51 = vmul.f32 0.020408163, %v73_v37  ;;  %v234_v48 = vsel %vm223_vm5, %v204_v61, %v233_v42  ;;  %v224_v49 = vsel %vm223_vm5, %v172_v62, %v222_v43 }
  0xa9   :  { %v208_v18 = vrot.slane %v118_v50, %v155_v24  ;;  %v176_v19 = vrot.slane %v110_v51, %v155_v24 }
  0xaa   :  { %v100_v56 = vpop.xlane.xlu1 %99  ;;  %v76_v57 = vpop.xlane.xlu0 %75 }
  0xab   :  { %v119_v60 = vmul.f32 0.020408163, %v100_v56  ;;  %v111_v63 = vmul.f32 0.020408163, %v76_v57  ;;  %v226_v52 = vsel %vm225_vm6, %v176_v19, %v224_v49  ;;  %v235_v53 = vsel %vm225_vm6, %v208_v18, %v234_v48 }
  0xad   :  { %v212_v30 = vrot.slane %v119_v60, %v155_v24  ;;  %v180_v31 = vrot.slane %v111_v63, %v155_v24 }
  0xae   :  { %v103_v36 = vpop.xlane.xlu1 %102  ;;  %v79_v37 = vpop.xlane.xlu0 %78 }
  0xaf   :  { %v120_v46 = vmul.f32 0.020408163, %v103_v36  ;;  %v112_v47 = vmul.f32 0.020408163, %v79_v37  ;;  %v228_v54 = vsel %vm227_vm7, %v180_v31, %v226_v52  ;;  %v236_v55 = vsel %vm227_vm7, %v212_v30, %v235_v53 }
  0xb0   :  { %v440_v52 = vsub.s32 1, %v903_v10  ;;  %v433_v53 = vsub.s32 0, %v903_v10 }
  0xb1   :  { %v216_v50 = vrot.slane %v120_v46, %v155_v24  ;;  %v184_v51 = vrot.slane %v112_v47, %v155_v24  ;;  %v324_v24 = vld [vmem:[%s1086_s4] sm:$0xff] }
  0xb2   :  { %685 = vmatprep.mubr.msk.f32.mxu1 %vm240_vm1, %v324_v24  ;;  %v133_v63 = vpop.permute.xlu1 %132 }
  0xb3   :  { %v230_v56 = vsel %vm229_vm8, %v184_v51, %v228_v54  ;;  %v237_v57 = vsel %vm229_vm8, %v216_v50, %v236_v55 }
  0xb4   :  { %v688_v58 = vpack.c.bf16 %v237_v57, %v230_v56  ;;  %v454_v57 = vsub.s32 3, %v903_v10 }
  0xb6   :  { %689 = vmatprep.subr.bf16.mxu0 %v688_v58  ;;  %v128_v60 = vpop.permute.xlu0 %127  ;;  %v331_v30 = vpop.permute.xlu1 %330 }
  0xb7   :  { %691 = vmatpush3.bf16.msra.mxu0 %v688_v58  ;;  %v447_v58 = vsub.s32 2, %v903_v10 }
  0xba   :  { %679 = vmatmul.mubr.msk.f32.vlgmr.msra.gmra.mrb[0].mxu0 %vm240_vm1, %v122_v59  ;;  %v336_v31 = vpop.permute.xlu1 %335 }
 0x18d   :  { %v680_v61 = vpop.f32.mrb[0].mxu0 }
 0x18e   :  { %v319_v62 = vadd.f32 %v680_v61, %v133_v63  ;;  %v313_v11 = vpop.f32.mrb[1].mxu0  ;;  %v461_v63 = vsub.s32 4, %v903_v10 }
 0x18f   :  { %v314_v12 = vadd.f32 %v313_v11, %v128_v60  ;;  %v468_v60 = vsub.s32 5, %v903_v10 }
 0x190   :  { %v323_v18 = vmax.f32 %v319_v62, 0.0 }
 0x191   :  { %v322_v19 = vmax.f32 %v314_v12, 0.0 }
 0x193   :  { %v692_v13 = vpack.c.bf16 %v323_v18, %v322_v19  ;;  %v482_v19 = vsub.s32 7, %v903_v10 }
 0x195   :  { %693 = vmatprep.subr.bf16.mxu1 %v692_v13 }
 0x196   :  { %695 = vmatpush3.bf16.msra.mxu1 %v692_v13 }
 0x199   :  { %686 = vmatmul.mubr.msk.f32.vlgmr.msra.gmra.mrb[0].mxu1 %vm240_vm1, %v325_v25 }
 0x26c   :  { %v687_v36 = vpop.f32.mrb[0].mxu1 }
 0x26d   :  { %v416_v37 = vadd.f32 %v687_v36, %v336_v31  ;;  %v410_v42 = vpop.f32.mrb[1].mxu1 }
 0x26e   :  { %v411_v46 = vadd.f32 %v410_v42, %v331_v30  ;;  %v475_v42 = vsub.s32 6, %v903_v10  ;;  %v570_v10 = vld [vmem:[%s1087_s1 + $0xb] sm:$0x1] }
 0x26f   :  { %v665_v43 = vmul.f32 -1.442695, %v416_v37 }
 0x270   :  { %v664_v47 = vmul.f32 -1.442695, %v411_v46 }
 0x271   :  { %699 = vpow2.f32 %v665_v43 }
 0x272   :  { %701 = vpow2.f32 %v664_v47  ;;  %v568_v47 = vld [vmem:[%s1087_s1 + $0x9] sm:$0x1] }
 0x27b   :  { %v700_v48 = vpop.eup %699 }
 0x27c   :  { %v426_v49 = vadd.f32 1.0, %v700_v48  ;;  %v702_v50 = vpop.eup %701  ;;  %v567_v48 = vld [vmem:[%s1087_s1 + $0x8] sm:$0x1] }
 0x27d   :  { %v425_v51 = vadd.f32 1.0, %v702_v50  ;;  %v583_v50 = vunpack.c.l.bf16 %v567_v48 }
 0x27e   :  { %703 = vrcp.f32 %v426_v49  ;;  %v584_v49 = vunpack.c.l.bf16 %v568_v47 }
 0x27f   :  { %705 = vrcp.f32 %v425_v51 }
 0x288   :  { %v704_v54 = vpop.eup %703 }
 0x289   :  { %v497_v55 = vrot.slane %v704_v54, %v440_v52  ;;  %v490_v56 = vrot.slane %v704_v54, %v433_v53  ;;  %v511_v59 = vrot.slane %v704_v54, %v454_v57  ;;  %v504_v24 = vrot.slane %v704_v54, %v447_v58  ;;  %v706_v11 = vpop.eup %705 }
 0x28a   :  { %v525_v61 = vrot.slane %v704_v54, %v468_v60  ;;  %v518_v62 = vrot.slane %v704_v54, %v461_v63  ;;  %v469_v12 = vrot.slane %v706_v11, %v468_v60  ;;  %v434_v18 = vrot.slane %v706_v11, %v433_v53  ;;  %v569_v53 = vld [vmem:[%s1087_s1 + $0xa] sm:$0x1]  ;;  %v571_v60 = vld [vmem:[%s1087_s1 + $0xc] sm:$0x1] }
 0x28b   :  { %499 = vbcast.lane.b32.xlu0 %v497_v55, 256  ;;  %492 = vbcast.lane.b32.xlu1 %v490_v56, 256  ;;  %v483_v13 = vrot.slane %v706_v11, %v482_v19  ;;  %v441_v25 = vrot.slane %v706_v11, %v440_v52  ;;  %v539_v30 = vrot.slane %v704_v54, %v482_v19 }
 0x28c   :  { %v448_v31 = vrot.slane %v706_v11, %v447_v58  ;;  %v455_v36 = vrot.slane %v706_v11, %v454_v57  ;;  %v462_v37 = vrot.slane %v706_v11, %v461_v63  ;;  %v476_v43 = vrot.slane %v706_v11, %v475_v42 }
 0x28d   :  { %v532_v46 = vrot.slane %v704_v54, %v475_v42  ;;  %v586_v58 = vunpack.c.l.bf16 %v570_v10  ;;  %v587_v11 = vunpack.c.l.bf16 %v571_v60 }
 0x28f   :  { %513 = vbcast.lane.b32.xlu0 %v511_v59, 256  ;;  %506 = vbcast.lane.b32.xlu1 %v504_v24, 256  ;;  %v585_v59 = vunpack.c.l.bf16 %v569_v53  ;;  %v572_v24 = vld [vmem:[%s1087_s1 + $0xd] sm:$0x1] }
 0x293   :  { %527 = vbcast.lane.b32.xlu0 %v525_v61, 256  ;;  %520 = vbcast.lane.b32.xlu1 %v518_v62, 256 }
 0x297   :  { %471 = vbcast.lane.b32.xlu0 %v469_v12, 256  ;;  %436 = vbcast.lane.b32.xlu1 %v434_v18, 256 }
 0x29b   :  { %485 = vbcast.lane.b32.xlu0 %v483_v13, 256  ;;  %443 = vbcast.lane.b32.xlu1 %v441_v25, 256  ;;  %v564_v25 = vld [vmem:[%s1087_s1 + $0x5] sm:$0x1] }
 0x29f   :  { %541 = vbcast.lane.b32.xlu0 %v539_v30, 256  ;;  %450 = vbcast.lane.b32.xlu1 %v448_v31, 256  ;;  %v559_v30 = vld [vmem:[%s1087_s1] sm:$0x1] }
 0x2a0   :  { %v575_v42 = vunpack.c.l.bf16 %v559_v30 }
 0x2a3   :  { %457 = vbcast.lane.b32.xlu1 %v455_v36, 256 }
 0x2a7   :  { %464 = vbcast.lane.b32.xlu1 %v462_v37, 256  ;;  %v580_v37 = vunpack.c.l.bf16 %v564_v25 }
 0x2ab   :  { %478 = vbcast.lane.b32.xlu1 %v476_v43, 256 }
 0x2af   :  { %534 = vbcast.lane.b32.xlu1 %v532_v46, 256 }
 0x2fd   :  { %v500_v51 = vpop.permute.xlu0 %499  ;;  %v493_v52 = vpop.permute.xlu1 %492 }
 0x2fe   :  { %v552_v54 = vmul.f32 %v500_v51, %v48_v5  ;;  %v551_v55 = vmul.f32 %v493_v52, %v47_v3  ;;  %v588_v5 = vunpack.c.l.bf16 %v572_v24 }
 0x300   :  { %v600_v56 = vadd.f32 %v584_v49, %v552_v54  ;;  %v599_v57 = vadd.f32 %v583_v50, %v551_v55  ;;  %v566_v49 = vld [vmem:[%s1087_s1 + $0x7] sm:$0x1]  ;;  %v560_v50 = vld [vmem:[%s1087_s1 + $0x1] sm:$0x1] }
 0x301   :  { %v514_v63 = vpop.permute.xlu0 %513  ;;  %v507_v61 = vpop.permute.xlu1 %506  ;;  %v582_v10 = vunpack.c.l.bf16 %v566_v49  ;;  %v576_v53 = vunpack.c.l.bf16 %v560_v50 }
 0x302   :  { %v616_v62 = vmax.f32 %v600_v56, 0.0  ;;  %v615_v2 = vmax.f32 %v599_v57, 0.0  ;;  %v554_v0 = vmul.f32 %v514_v63, %v50_v20  ;;  %v553_v3 = vmul.f32 %v507_v61, %v49_v14 }
 0x304   :  { %v632_v12 = vpack.c.bf16 %v616_v62, %v616_v62  ;;  %v631_v18 = vpack.c.bf16 %v615_v2, %v615_v2  ;;  %v602_v19 = vadd.f32 %v586_v58, %v554_v0  ;;  %v601_v13 = vadd.f32 %v585_v59, %v553_v3  ;;  %v574_v58 = vld [vmem:[%s1087_s1 + $0xf] sm:$0x1]  ;;  %v561_v59 = vld [vmem:[%s1087_s1 + $0x2] sm:$0x1] }
 0x305   :  { %v528_v16 = vpop.permute.xlu0 %527  ;;  %v521_v20 = vpop.permute.xlu1 %520  ;;  %v590_v63 = vunpack.c.l.bf16 %v574_v58  ;;  %v577_v61 = vunpack.c.l.bf16 %v561_v59 }
 0x306   :  { %649 = vst.msk [vmem:[%s1088_s6 + $0x9] sm:$0x1] %vm639_vm9, %v632_v12  ;;  %648 = vst.msk [vmem:[%s1088_s6 + $0x8] sm:$0x1] %vm639_vm9, %v631_v18  ;;  %v618_v8 = vmax.f32 %v602_v19, 0.0  ;;  %v617_v14 = vmax.f32 %v601_v13, 0.0  ;;  %v556_v31 = vmul.f32 %v528_v16, %v52_v32  ;;  %v555_v36 = vmul.f32 %v521_v20, %v51_v26 }
 0x307   :  { %v563_v20 = vld [vmem:[%s1087_s1 + $0x4] sm:$0x1] }
 0x308   :  { %v634_v43 = vpack.c.bf16 %v618_v8, %v618_v8  ;;  %v633_v46 = vpack.c.bf16 %v617_v14, %v617_v14  ;;  %v604_v47 = vadd.f32 %v588_v5, %v556_v31  ;;  %v603_v48 = vadd.f32 %v587_v11, %v555_v36  ;;  %v562_v5 = vld [vmem:[%s1087_s1 + $0x3] sm:$0x1] }
 0x309   :  { %v472_v51 = vpop.permute.xlu0 %471  ;;  %v437_v28 = vpop.permute.xlu1 %436  ;;  %v578_v18 = vunpack.c.l.bf16 %v562_v5  ;;  %v579_v31 = vunpack.c.l.bf16 %v563_v20 }
 0x30a   :  { %651 = vst.msk [vmem:[%s1088_s6 + $0xb] sm:$0x1] %vm639_vm9, %v634_v43  ;;  %650 = vst.msk [vmem:[%s1088_s6 + $0xa] sm:$0x1] %vm639_vm9, %v633_v46  ;;  %v620_v22 = vmax.f32 %v604_v47, 0.0  ;;  %v619_v26 = vmax.f32 %v603_v48, 0.0  ;;  %v548_v32 = vmul.f32 %v472_v51, %v44_v33  ;;  %v543_v52 = vmul.f32 %v437_v28, %v39_v4 }
 0x30b   :  { %v573_v48 = vld [vmem:[%s1087_s1 + $0xe] sm:$0x1] }
 0x30c   :  { %v636_v54 = vpack.c.bf16 %v620_v22, %v620_v22  ;;  %v635_v55 = vpack.c.bf16 %v619_v26, %v619_v26  ;;  %v596_v56 = vadd.f32 %v580_v37, %v548_v32  ;;  %v591_v57 = vadd.f32 %v575_v42, %v543_v52  ;;  %v565_v37 = vld [vmem:[%s1087_s1 + $0x6] sm:$0x1] }
 0x30d   :  { %v486_v24 = vpop.permute.xlu0 %485  ;;  %v444_v29 = vpop.permute.xlu1 %443  ;;  %v581_v46 = vunpack.c.l.bf16 %v565_v37 }
 0x30e   :  { %653 = vst.msk [vmem:[%s1088_s6 + $0xd] sm:$0x1] %vm639_vm9, %v636_v54  ;;  %652 = vst.msk [vmem:[%s1088_s6 + $0xc] sm:$0x1] %vm639_vm9, %v635_v55  ;;  %v612_v1 = vmax.f32 %v596_v56, 0.0  ;;  %v607_v4 = vmax.f32 %v591_v57, 0.0  ;;  %v550_v33 = vmul.f32 %v486_v24, %v46_v45  ;;  %v544_v60 = vmul.f32 %v444_v29, %v40_v7 }
 0x310   :  { %v628_v62 = vpack.c.bf16 %v612_v1, %v612_v1  ;;  %v623_v2 = vpack.c.bf16 %v607_v4, %v607_v4  ;;  %v598_v0 = vadd.f32 %v582_v10, %v550_v33  ;;  %v592_v3 = vadd.f32 %v576_v53, %v544_v60 }
 0x311   :  { %v542_v11 = vpop.permute.xlu0 %541  ;;  %v451_v12 = vpop.permute.xlu1 %450 }
 0x312   :  { %645 = vst.msk [vmem:[%s1088_s6 + $0x5] sm:$0x1] %vm639_vm9, %v628_v62  ;;  %640 = vst.msk [vmem:[%s1088_s6] sm:$0x1] %vm639_vm9, %v623_v2  ;;  %v614_v6 = vmax.f32 %v598_v0, 0.0  ;;  %v608_v7 = vmax.f32 %v592_v3, 0.0  ;;  %v558_v41 = vmul.f32 %v542_v11, %v54_v44  ;;  %v545_v45 = vmul.f32 %v451_v12, %v41_v15 }
 0x314   :  { %v630_v19 = vpack.c.bf16 %v614_v6, %v614_v6  ;;  %v624_v13 = vpack.c.bf16 %v608_v7, %v608_v7  ;;  %v606_v25 = vadd.f32 %v590_v63, %v558_v41  ;;  %v593_v30 = vadd.f32 %v577_v61, %v545_v45 }
 0x315   :  { %v458_v16 = vpop.permute.xlu1 %457 }
 0x316   :  { %647 = vst.msk [vmem:[%s1088_s6 + $0x7] sm:$0x1] %vm639_vm9, %v630_v19  ;;  %641 = vst.msk [vmem:[%s1088_s6 + $0x1] sm:$0x1] %vm639_vm9, %v624_v13  ;;  %v622_v9 = vmax.f32 %v606_v25, 0.0  ;;  %v609_v15 = vmax.f32 %v593_v30, 0.0  ;;  %v546_v40 = vmul.f32 %v458_v16, %v42_v21 }
 0x318   :  { %v638_v44 = vpack.c.bf16 %v622_v9, %v622_v9  ;;  %v625_v8 = vpack.c.bf16 %v609_v15, %v609_v15  ;;  %v594_v14 = vadd.f32 %v578_v18, %v546_v40 }
 0x319   :  { %v465_v36 = vpop.permute.xlu1 %464 }
 0x31a   :  { %655 = vst.msk [vmem:[%s1088_s6 + $0xf] sm:$0x1] %vm639_vm9, %v638_v44  ;;  %642 = vst.msk [vmem:[%s1088_s6 + $0x2] sm:$0x1] %vm639_vm9, %v625_v8  ;;  %v610_v17 = vmax.f32 %v594_v14, 0.0  ;;  %v547_v21 = vmul.f32 %v465_v36, %v43_v27  ;;  %v589_v27 = vunpack.c.l.bf16 %v573_v48 }
 0x31c   :  { %v626_v42 = vpack.c.bf16 %v610_v17, %v610_v17  ;;  %v595_v43 = vadd.f32 %v579_v31, %v547_v21 }
 0x31d   :  { %v479_v47 = vpop.permute.xlu1 %478 }
 0x31e   :  { %643 = vst.msk [vmem:[%s1088_s6 + $0x3] sm:$0x1] %vm639_vm9, %v626_v42  ;;  %v611_v49 = vmax.f32 %v595_v43, 0.0  ;;  %v549_v50 = vmul.f32 %v479_v47, %v45_v39 }
 0x320   :  { %v627_v51 = vpack.c.bf16 %v611_v49, %v611_v49  ;;  %v597_v23 = vadd.f32 %v581_v46, %v549_v50 }
 0x321   :  { %v535_v28 = vpop.permute.xlu1 %534 }
 0x322   :  { %644 = vst.msk [vmem:[%s1088_s6 + $0x4] sm:$0x1] %vm639_vm9, %v627_v51  ;;  %v613_v22 = vmax.f32 %v597_v23, 0.0  ;;  %v557_v26 = vmul.f32 %v535_v28, %v53_v38 }
 0x324   :  { %v629_v32 = vpack.c.bf16 %v613_v22, %v613_v22  ;;  %v605_v52 = vadd.f32 %v589_v27, %v557_v26 }
 0x326   :  { %646 = vst.msk [vmem:[%s1088_s6 + $0x6] sm:$0x1] %vm639_vm9, %v629_v32  ;;  %v621_v35 = vmax.f32 %v605_v52, 0.0 }
 0x328   :  { %v637_v39 = vpack.c.bf16 %v621_v35, %v621_v35 }
 0x32a   :  { %654 = vst.msk [vmem:[%s1088_s6 + $0xe] sm:$0x1] %vm639_vm9, %v637_v39 }

// kernel: _lambda_.25
= control target key start
LH: loop header
LB: loop body
LE: loop exit
PB: predicated region body
PF: predicated region fallthrough
CT: control target
= control target key end

     0   :  { %v813_v0 = vmov 0.0   ;;  %vm814_vm0 = vmmov 0   ;;  %vm39_vm1 = vcmask 130048   ;;  %v815_v4 = vmov 0   ;;  %s949_s0 = inlined_call_operand.vmem [shape: bf16[9,16,98], index: 0, kind: input, shape index: {}]   ;;  %s950_s1 = inlined_call_operand.vmem [shape: bf16[9,16,16], index: 1, kind: input, shape index: {}]   ;;  %s951_s2 = inlined_call_operand.vmem [shape: f32[16,1], index: 2, kind: input, shape index: {}]   ;;  %s952_s3 = inlined_call_operand.vmem [shape: f32[16,1], index: 3, kind: input, shape index: {}]   ;;  %s953_s4 = inlined_call_operand.vmem [shape: bf16[16,98], index: 4, kind: output, shape index: {}]  }
   0x1   :  { %706 = vmatprep.subr.bf16.mxu1 %v813_v0  ;;  %730 = vmatprep.subr.bf16.mxu0 %v813_v0  ;;  %v795_v1 = vld [vmem:[%s949_s0 + $0x8] sm:$0xff]   ;;  %v796_v2 = vld [vmem:[%s949_s0 + $0x20] sm:$0xff]   ;;  %v804_v10 = vld [vmem:[%s949_s0 + $0x10] sm:$0xff]   ;;  %vm618_vm2 = vcmask 797696  }
   0x2   :  { %708 = vmatprep.mubr.msk.bf16.mxu1 %vm814_vm0, %v813_v0  ;;  %732 = vmatprep.mubr.msk.bf16.mxu0 %vm814_vm0, %v813_v0  ;;  %v797_v3 = vld [vmem:[%s950_s1 + $0x8] sm:$0xff]   ;;  %v798_v5 = vld [vmem:[%s950_s1 + $0x20] sm:$0xff]   ;;  %v803_v11 = vld [vmem:[%s949_s0 + $0x30] sm:$0xff]  }
   0x3   :  { %707 = vmatpush3.bf16.msra.mxu1 %v795_v1  ;;  %793 = vset.pattern.permute.xlu0 %v815_v4  ;;  %v799_v6 = vld [vmem:[%s949_s0 + $0x28] sm:$0xff]   ;;  %v800_v7 = vld [vmem:[%s949_s0] sm:$0xff]   ;;  %v805_v16 = vld [vmem:[%s950_s1 + $0x10] sm:$0xff]  }
   0x4   :  { %731 = vmatpush3.bf16.msra.mxu0 %v796_v2  ;;  %712 = vmatprep.subr.bf16.mxu1 %v813_v0  ;;  %v801_v8 = vld [vmem:[%s950_s1] sm:$0xff]   ;;  %v802_v9 = vld [vmem:[%s950_s1 + $0x28] sm:$0xff]   ;;  %v806_v17 = vld [vmem:[%s950_s1 + $0x30] sm:$0xff]  }
   0x5   :  { %736 = vmatprep.subr.bf16.mxu0 %v813_v0  ;;  %794 = vset.pattern.permute.xlu1 %v815_v4  ;;  %v580_v12 = vld [vmem:[%s951_s2] sm:$0xff]  ;;  %v581_v14 = vld [vmem:[%s951_s2 + $0x8] sm:$0xff]  ;;  %v808_v18 = vld [vmem:[%s949_s0 + $0x18] sm:$0xff]  }
   0x6   :  { %709 = vmatmul.mubr.msk.bf16.vlgmr.msra.gmra.mrb[0].mxu1 %vm39_vm1, %v797_v3  ;;  %v594_v13 = vld [vmem:[%s952_s3] sm:$0xff]  ;;  %584 = vperm.xlu0 %793, %v580_v12   ;;  %v595_v15 = vld [vmem:[%s952_s3 + $0x8] sm:$0xff]  ;;  %v807_v19 = vld [vmem:[%s949_s0 + $0x38] sm:$0xff]  }
   0x7   :  { %733 = vmatmul.mubr.msk.bf16.vlgmr.msra.gmra.mrb[0].mxu0 %vm39_vm1, %v798_v5  ;;  %714 = vmatprep.mubr.msk.bf16.mxu1 %vm814_vm0, %v813_v0  ;;  %v809_v20 = vld [vmem:[%s950_s1 + $0x18] sm:$0xff]   ;;  %v811_v22 = vld [vmem:[%s949_s0 + $0x40] sm:$0xff]  }
   0x8   :  { %737 = vmatpush3.bf16.msra.mxu0 %v799_v6  ;;  %713 = vmatpush3.bf16.msra.mxu1 %v800_v7  ;;  %v810_v21 = vld [vmem:[%s950_s1 + $0x38] sm:$0xff]   ;;  %v812_v23 = vld [vmem:[%s950_s1 + $0x40] sm:$0xff]  }
   0x9   :  { %738 = vmatprep.mubr.msk.bf16.mxu0 %vm814_vm0, %v813_v0  ;;  %742 = vmatprep.subr.bf16.mxu0 %v813_v0 }
   0xa   :  { %718 = vmatprep.subr.bf16.mxu1 %v813_v0  ;;  %598 = vperm.xlu1 %794, %v594_v13  }
   0xb   :  { %589 = vperm.xlu0 %793, %v581_v14  }
   0xe   :  { %603 = vperm.xlu1 %794, %v595_v15  }
  0x12   :  { %715 = vmatmul.mubr.msk.bf16.vlgmr.msra.gmra.mrb[0].mxu1 %vm39_vm1, %v801_v8 }
  0x13   :  { %739 = vmatmul.mubr.msk.bf16.vlgmr.msra.gmra.mrb[0].mxu0 %vm39_vm1, %v802_v9  ;;  %719 = vmatpush3.bf16.msra.mxu1 %v804_v10 }
  0x14   :  { %743 = vmatpush3.bf16.msra.mxu0 %v803_v11  ;;  %720 = vmatprep.mubr.msk.bf16.mxu1 %vm814_vm0, %v813_v0 }
  0x15   :  { %744 = vmatprep.mubr.msk.bf16.mxu0 %vm814_vm0, %v813_v0  ;;  %748 = vmatprep.subr.bf16.mxu0 %v813_v0 }
  0x16   :  { %724 = vmatprep.subr.bf16.mxu1 %v813_v0 }
  0x1e   :  { %721 = vmatmul.mubr.msk.bf16.vlgmr.msra.gmra.mrb[0].mxu1 %vm39_vm1, %v805_v16 }
  0x1f   :  { %745 = vmatmul.mubr.msk.bf16.vlgmr.msra.gmra.mrb[0].mxu0 %vm39_vm1, %v806_v17  ;;  %725 = vmatpush3.bf16.msra.mxu1 %v808_v18 }
  0x20   :  { %749 = vmatpush3.bf16.msra.mxu0 %v807_v19  ;;  %726 = vmatprep.mubr.msk.bf16.mxu1 %vm814_vm0, %v813_v0 }
  0x21   :  { %750 = vmatprep.mubr.msk.bf16.mxu0 %vm814_vm0, %v813_v0  ;;  %754 = vmatprep.subr.bf16.mxu0 %v813_v0 }
  0x2a   :  { %727 = vmatmul.mubr.msk.bf16.vlgmr.msra.gmra.mrb[0].mxu1 %vm39_vm1, %v809_v20 }
  0x2b   :  { %751 = vmatmul.mubr.msk.bf16.vlgmr.msra.gmra.mrb[0].mxu0 %vm39_vm1, %v810_v21 }
  0x2c   :  { %755 = vmatpush3.bf16.msra.mxu0 %v811_v22  ;;  %756 = vmatprep.mubr.msk.bf16.mxu0 %vm814_vm0, %v813_v0 }
  0x37   :  { %757 = vmatmul.mubr.msk.bf16.vlgmr.msra.gmra.mrb[0].mxu0 %vm39_vm1, %v812_v23 }
  0x85   :  { %v585_v28 = vpop.permute.xlu0 %584 }
  0x89   :  { %v599_v29 = vpop.permute.xlu1 %598 }
  0x8a   :  { %v590_v37 = vpop.permute.xlu0 %589 }
  0x8d   :  { %v604_v40 = vpop.permute.xlu1 %603 }
  0xfd   :  { %v256_v24 = vpop.f32.mrb[0].mxu1 }
  0xfe   :  { %v728_v25 = vpop.f32.mrb[1].mxu1 }
  0xff   :  { %v259_v26 = vpop.f32.mrb[2].mxu1 }
 0x100   :  { %v729_v27 = vpop.f32.mrb[3].mxu1 }
 0x10a   :  { %v571_v30 = vpop.f32.mrb[0].mxu0 }
 0x10b   :  { %v760_v31 = vadd.f32 %v571_v30, %v256_v24  ;;  %v758_v32 = vpop.f32.mrb[1].mxu0 }
 0x10c   :  { %v574_v33 = vpop.f32.mrb[2].mxu0 }
 0x10d   :  { %v592_v34 = vmul.f32 %v760_v31, %v585_v28  ;;  %v761_v35 = vadd.f32 %v574_v33, %v259_v26  ;;  %v759_v36 = vpop.f32.mrb[3].mxu0 }
 0x10f   :  { %v606_v38 = vadd.f32 %v599_v29, %v592_v34  ;;  %v593_v39 = vmul.f32 %v761_v35, %v590_v37 }
 0x111   :  { %v608_v41 = vmax.f32 %v606_v38, 0.0  ;;  %v607_v42 = vadd.f32 %v604_v40, %v593_v39 }
 0x113   :  { %v686_v43 = vpack.c.bf16 %v608_v41, %v608_v41  ;;  %v609_v44 = vmax.f32 %v607_v42, 0.0 }
 0x115   :  { %v687_v45 = vpack.c.bf16 %v609_v44, %v609_v44  ;;  %619 = vst.msk [vmem:[%s953_s4] sm:$0xf] %vm618_vm2, %v686_v43 }
 0x117   :  { %620 = vst.msk [vmem:[%s953_s4 + $0x4] sm:$0xf] %vm618_vm2, %v687_v45 }

// kernel: _lambda_.26
= control target key start
LH: loop header
LB: loop body
LE: loop exit
PB: predicated region body
PF: predicated region fallthrough
CT: control target
= control target key end

     0   :  { %v826_v0 = vmov 0.0   ;;  %vm827_vm0 = vmmov 0   ;;  %vm42_vm1 = vcmask 130048   ;;  %v828_v4 = vmov 0   ;;  %s970_s0 = inlined_call_operand.vmem [shape: bf16[9,16,98], index: 0, kind: input, shape index: {}]   ;;  %s971_s1 = inlined_call_operand.vmem [shape: bf16[9,16,16], index: 1, kind: input, shape index: {}]   ;;  %s972_s2 = inlined_call_operand.vmem [shape: f32[16,1], index: 2, kind: input, shape index: {}]   ;;  %s973_s3 = inlined_call_operand.vmem [shape: f32[16,1], index: 3, kind: input, shape index: {}]   ;;  %s974_s4 = inlined_call_operand.vmem [shape: bf16[16,98], index: 4, kind: input, shape index: {}]   ;;  %s975_s5 = inlined_call_operand.vmem [shape: bf16[16,98], index: 5, kind: output, shape index: {}]  }
   0x1   :  { %719 = vmatprep.subr.bf16.mxu1 %v826_v0  ;;  %743 = vmatprep.subr.bf16.mxu0 %v826_v0  ;;  %v808_v1 = vld [vmem:[%s970_s0 + $0x8] sm:$0xff]   ;;  %v809_v2 = vld [vmem:[%s970_s0 + $0x20] sm:$0xff]   ;;  %v817_v10 = vld [vmem:[%s970_s0 + $0x10] sm:$0xff]   ;;  %vm627_vm2 = vcmask 797696  }
   0x2   :  { %721 = vmatprep.mubr.msk.bf16.mxu1 %vm827_vm0, %v826_v0  ;;  %745 = vmatprep.mubr.msk.bf16.mxu0 %vm827_vm0, %v826_v0  ;;  %v810_v3 = vld [vmem:[%s971_s1 + $0x8] sm:$0xff]   ;;  %v811_v5 = vld [vmem:[%s971_s1 + $0x20] sm:$0xff]   ;;  %v816_v11 = vld [vmem:[%s970_s0 + $0x30] sm:$0xff]  }
   0x3   :  { %720 = vmatpush3.bf16.msra.mxu1 %v808_v1  ;;  %806 = vset.pattern.permute.xlu0 %v828_v4  ;;  %v812_v6 = vld [vmem:[%s970_s0 + $0x28] sm:$0xff]   ;;  %v813_v7 = vld [vmem:[%s970_s0] sm:$0xff]   ;;  %v818_v16 = vld [vmem:[%s971_s1 + $0x10] sm:$0xff]  }
   0x4   :  { %744 = vmatpush3.bf16.msra.mxu0 %v809_v2  ;;  %725 = vmatprep.subr.bf16.mxu1 %v826_v0  ;;  %v814_v8 = vld [vmem:[%s971_s1] sm:$0xff]   ;;  %v815_v9 = vld [vmem:[%s971_s1 + $0x28] sm:$0xff]   ;;  %v819_v17 = vld [vmem:[%s971_s1 + $0x30] sm:$0xff]  }
   0x5   :  { %749 = vmatprep.subr.bf16.mxu0 %v826_v0  ;;  %807 = vset.pattern.permute.xlu1 %v828_v4  ;;  %v583_v12 = vld [vmem:[%s972_s2] sm:$0xff]  ;;  %v584_v14 = vld [vmem:[%s972_s2 + $0x8] sm:$0xff]  ;;  %v821_v18 = vld [vmem:[%s970_s0 + $0x18] sm:$0xff]  }
   0x6   :  { %722 = vmatmul.mubr.msk.bf16.vlgmr.msra.gmra.mrb[0].mxu1 %vm42_vm1, %v810_v3  ;;  %v597_v13 = vld [vmem:[%s973_s3] sm:$0xff]  ;;  %587 = vperm.xlu0 %806, %v583_v12   ;;  %v598_v15 = vld [vmem:[%s973_s3 + $0x8] sm:$0xff]  ;;  %v820_v19 = vld [vmem:[%s970_s0 + $0x38] sm:$0xff]  }
   0x7   :  { %746 = vmatmul.mubr.msk.bf16.vlgmr.msra.gmra.mrb[0].mxu0 %vm42_vm1, %v811_v5  ;;  %727 = vmatprep.mubr.msk.bf16.mxu1 %vm827_vm0, %v826_v0  ;;  %v822_v20 = vld [vmem:[%s971_s1 + $0x18] sm:$0xff]   ;;  %v824_v22 = vld [vmem:[%s970_s0 + $0x40] sm:$0xff]  }
   0x8   :  { %750 = vmatpush3.bf16.msra.mxu0 %v812_v6  ;;  %726 = vmatpush3.bf16.msra.mxu1 %v813_v7  ;;  %v823_v21 = vld [vmem:[%s971_s1 + $0x38] sm:$0xff]   ;;  %v825_v23 = vld [vmem:[%s971_s1 + $0x40] sm:$0xff]  }
   0x9   :  { %751 = vmatprep.mubr.msk.bf16.mxu0 %vm827_vm0, %v826_v0  ;;  %755 = vmatprep.subr.bf16.mxu0 %v826_v0  ;;  %v698_v31 = vld [vmem:[%s974_s4] sm:$0xff]  }
   0xa   :  { %731 = vmatprep.subr.bf16.mxu1 %v826_v0  ;;  %601 = vperm.xlu1 %807, %v597_v13   ;;  %v699_v37 = vunpack.c.l.bf16 %v698_v31  ;;  %v700_v41 = vunpack.c.h.bf16 %v698_v31 }
   0xb   :  { %592 = vperm.xlu0 %806, %v584_v14  }
   0xe   :  { %606 = vperm.xlu1 %807, %v598_v15  }
  0x12   :  { %728 = vmatmul.mubr.msk.bf16.vlgmr.msra.gmra.mrb[0].mxu1 %vm42_vm1, %v814_v8 }
  0x13   :  { %752 = vmatmul.mubr.msk.bf16.vlgmr.msra.gmra.mrb[0].mxu0 %vm42_vm1, %v815_v9  ;;  %732 = vmatpush3.bf16.msra.mxu1 %v817_v10 }
  0x14   :  { %756 = vmatpush3.bf16.msra.mxu0 %v816_v11  ;;  %733 = vmatprep.mubr.msk.bf16.mxu1 %vm827_vm0, %v826_v0 }
  0x15   :  { %757 = vmatprep.mubr.msk.bf16.mxu0 %vm827_vm0, %v826_v0  ;;  %761 = vmatprep.subr.bf16.mxu0 %v826_v0 }
  0x16   :  { %737 = vmatprep.subr.bf16.mxu1 %v826_v0 }
  0x1e   :  { %734 = vmatmul.mubr.msk.bf16.vlgmr.msra.gmra.mrb[0].mxu1 %vm42_vm1, %v818_v16 }
  0x1f   :  { %758 = vmatmul.mubr.msk.bf16.vlgmr.msra.gmra.mrb[0].mxu0 %vm42_vm1, %v819_v17  ;;  %738 = vmatpush3.bf16.msra.mxu1 %v821_v18 }
  0x20   :  { %762 = vmatpush3.bf16.msra.mxu0 %v820_v19  ;;  %739 = vmatprep.mubr.msk.bf16.mxu1 %vm827_vm0, %v826_v0 }
  0x21   :  { %763 = vmatprep.mubr.msk.bf16.mxu0 %vm827_vm0, %v826_v0  ;;  %767 = vmatprep.subr.bf16.mxu0 %v826_v0 }
  0x2a   :  { %740 = vmatmul.mubr.msk.bf16.vlgmr.msra.gmra.mrb[0].mxu1 %vm42_vm1, %v822_v20 }
  0x2b   :  { %764 = vmatmul.mubr.msk.bf16.vlgmr.msra.gmra.mrb[0].mxu0 %vm42_vm1, %v823_v21 }
  0x2c   :  { %768 = vmatpush3.bf16.msra.mxu0 %v824_v22  ;;  %769 = vmatprep.mubr.msk.bf16.mxu0 %vm827_vm0, %v826_v0 }
  0x37   :  { %770 = vmatmul.mubr.msk.bf16.vlgmr.msra.gmra.mrb[0].mxu0 %vm42_vm1, %v825_v23 }
  0x85   :  { %v588_v28 = vpop.permute.xlu0 %587 }
  0x89   :  { %v602_v29 = vpop.permute.xlu1 %601 }
  0x8a   :  { %v593_v39 = vpop.permute.xlu0 %592 }
  0x8d   :  { %v607_v43 = vpop.permute.xlu1 %606 }
  0xfd   :  { %v259_v24 = vpop.f32.mrb[0].mxu1 }
  0xfe   :  { %v741_v25 = vpop.f32.mrb[1].mxu1 }
  0xff   :  { %v262_v26 = vpop.f32.mrb[2].mxu1 }
 0x100   :  { %v742_v27 = vpop.f32.mrb[3].mxu1 }
 0x10a   :  { %v574_v30 = vpop.f32.mrb[0].mxu0 }
 0x10b   :  { %v773_v32 = vadd.f32 %v574_v30, %v259_v24  ;;  %v771_v33 = vpop.f32.mrb[1].mxu0 }
 0x10c   :  { %v577_v34 = vpop.f32.mrb[2].mxu0 }
 0x10d   :  { %v595_v35 = vmul.f32 %v773_v32, %v588_v28  ;;  %v774_v36 = vadd.f32 %v577_v34, %v262_v26  ;;  %v772_v38 = vpop.f32.mrb[3].mxu0 }
 0x10f   :  { %v609_v40 = vadd.f32 %v602_v29, %v595_v35  ;;  %v596_v42 = vmul.f32 %v774_v36, %v593_v39 }
 0x111   :  { %v610_v44 = vadd.f32 %v607_v43, %v596_v42  ;;  %v615_v45 = vadd.f32 %v699_v37, %v609_v40 }
 0x113   :  { %v616_v46 = vadd.f32 %v700_v41, %v610_v44  ;;  %v617_v47 = vmax.f32 %v615_v45, 0.0 }
 0x115   :  { %v618_v48 = vmax.f32 %v616_v46, 0.0  ;;  %v695_v49 = vpack.c.bf16 %v617_v47, %v617_v47 }
 0x117   :  { %v696_v50 = vpack.c.bf16 %v618_v48, %v618_v48  ;;  %628 = vst.msk [vmem:[%s975_s5] sm:$0xf] %vm627_vm2, %v695_v49 }
 0x119   :  { %629 = vst.msk [vmem:[%s975_s5 + $0x4] sm:$0xf] %vm627_vm2, %v696_v50 }

// kernel: _lambda_.27
= control target key start
LH: loop header
LB: loop body
LE: loop exit
PB: predicated region body
PF: predicated region fallthrough
CT: control target
= control target key end

     0   :  { %vm46_vm0 = vcmask 394240   ;;  %vm231_vm1 = vcmask 130048   ;;  %v341_v49 = vmov 0   ;;  %v142_v58 = vlaneseq  ;;  %s458_s0 = inlined_call_operand.vmem [shape: bf16[16,2,49], index: 0, kind: input, shape index: {}]   ;;  %s459_s1 = inlined_call_operand.vmem [shape: f32[10,16], index: 1, kind: input, shape index: {}]   ;;  %s460_s2 = inlined_call_operand.vmem [shape: f32[10,1], index: 2, kind: input, shape index: {}]   ;;  %s461_s3 = inlined_call_operand.vmem [shape: f32[10,2], index: 3, kind: output, shape index: {}]  }
   0x1   :  { %v22_v0 = vld [vmem:[%s458_s0 + $0x8] sm:$0x1]  ;;  %v14_v1 = vld [vmem:[%s458_s0] sm:$0x1]  ;;  %v23_v2 = vld [vmem:[%s458_s0 + $0x9] sm:$0x1]  ;;  %340 = vset.pattern.permute.xlu1 %v341_v49  ;;  %339 = vset.pattern.permute.xlu0 %v341_v49 }
   0x2   :  { %v38_v3 = vunpack.c.l.bf16 %v22_v0  ;;  %v30_v4 = vunpack.c.l.bf16 %v14_v1  ;;  %v39_v5 = vunpack.c.l.bf16 %v23_v2  ;;  %v15_v6 = vld [vmem:[%s458_s0 + $0x1] sm:$0x1]  ;;  %v24_v8 = vld [vmem:[%s458_s0 + $0xa] sm:$0x1]  ;;  %v16_v9 = vld [vmem:[%s458_s0 + $0x2] sm:$0x1] }
   0x3   :  { %v31_v7 = vunpack.c.l.bf16 %v15_v6  ;;  %v40_v14 = vunpack.c.l.bf16 %v24_v8  ;;  %v32_v15 = vunpack.c.l.bf16 %v16_v9  ;;  %v25_v16 = vld [vmem:[%s458_s0 + $0xb] sm:$0x1]  ;;  %v17_v17 = vld [vmem:[%s458_s0 + $0x3] sm:$0x1]  ;;  %v26_v22 = vld [vmem:[%s458_s0 + $0xc] sm:$0x1] }
   0x4   :  { %v71_v10 = vsel %vm46_vm0, %v38_v3, 0.0  ;;  %v47_v11 = vsel %vm46_vm0, %v30_v4, 0.0  ;;  %v74_v12 = vsel %vm46_vm0, %v39_v5, 0.0  ;;  %v41_v20 = vunpack.c.l.bf16 %v25_v16  ;;  %v18_v23 = vld [vmem:[%s458_s0 + $0x4] sm:$0x1] }
   0x5   :  { %72 = vadd.xlane.f32.xlu1 %v71_v10  ;;  %48 = vadd.xlane.f32.xlu0 %v47_v11  ;;  %v50_v13 = vsel %vm46_vm0, %v31_v7, 0.0  ;;  %v77_v18 = vsel %vm46_vm0, %v40_v14, 0.0  ;;  %v53_v19 = vsel %vm46_vm0, %v32_v15, 0.0  ;;  %v33_v21 = vunpack.c.l.bf16 %v17_v17  ;;  %v27_v28 = vld [vmem:[%s458_s0 + $0xd] sm:$0x1]  ;;  %v112_v48 = vld [vmem:[%s459_s1] sm:$0xff] }
   0x6   :  { %v80_v24 = vsel %vm46_vm0, %v41_v20, 0.0  ;;  %v42_v26 = vunpack.c.l.bf16 %v26_v22  ;;  %v34_v27 = vunpack.c.l.bf16 %v18_v23  ;;  %v19_v29 = vld [vmem:[%s458_s0 + $0x5] sm:$0x1]  ;;  %v43_v32 = vunpack.c.l.bf16 %v27_v28  ;;  %v28_v34 = vld [vmem:[%s458_s0 + $0xe] sm:$0x1]  ;;  %331 = vmatprep.mubr.msk.f32.mxu0 %vm231_vm1, %v112_v48 }
   0x7   :  { %v56_v25 = vsel %vm46_vm0, %v33_v21, 0.0  ;;  %v35_v33 = vunpack.c.l.bf16 %v19_v29  ;;  %v20_v35 = vld [vmem:[%s458_s0 + $0x6] sm:$0x1]  ;;  %v44_v38 = vunpack.c.l.bf16 %v28_v34  ;;  %v29_v40 = vld [vmem:[%s458_s0 + $0xf] sm:$0x1]  ;;  %v143_v61 = vand.u32 127, %v142_v58 }
   0x8   :  { %v83_v30 = vsel %vm46_vm0, %v42_v26, 0.0  ;;  %v59_v31 = vsel %vm46_vm0, %v34_v27, 0.0  ;;  %v86_v36 = vsel %vm46_vm0, %v43_v32, 0.0  ;;  %v36_v39 = vunpack.c.l.bf16 %v20_v35  ;;  %v21_v41 = vld [vmem:[%s458_s0 + $0x7] sm:$0x1] }
   0x9   :  { %75 = vadd.xlane.f32.xlu1 %v74_v12  ;;  %51 = vadd.xlane.f32.xlu0 %v50_v13  ;;  %v62_v37 = vsel %vm46_vm0, %v35_v33, 0.0  ;;  %v89_v42 = vsel %vm46_vm0, %v44_v38, 0.0  ;;  %v45_v44 = vunpack.c.l.bf16 %v29_v40  ;;  %v37_v45 = vunpack.c.l.bf16 %v21_v41  ;;  %v115_v50 = vld [vmem:[%s460_s2 + $0x8] sm:$0x3]  ;;  %v114_v51 = vld [vmem:[%s460_s2] sm:$0xff] }
   0xa   :  { %v65_v43 = vsel %vm46_vm0, %v36_v39, 0.0  ;;  %v145_v62 = vshrl.u32 %v142_v58, 7  ;;  %vm208_vm2 = vcmask 1041409   ;;  %vm210_vm3 = vcmask 1042434  }
   0xb   :  { %v92_v46 = vsel %vm46_vm0, %v45_v44, 0.0  ;;  %v68_v47 = vsel %vm46_vm0, %v37_v45, 0.0  ;;  %vm212_vm4 = vcmask 1043459   ;;  %vm214_vm5 = vcmask 1044484  }
   0xc   :  { %v146_v4 = vsub.s32 %v143_v61, %v145_v62  ;;  %vm216_vm6 = vcmask 1045509   ;;  %vm218_vm7 = vcmask 1046534   ;;  %vm220_vm8 = vcmask 1047559  }
   0xd   :  { %78 = vadd.xlane.f32.xlu1 %v77_v18  ;;  %54 = vadd.xlane.f32.xlu0 %v53_v19  ;;  %vm315_vm9 = vcmask 9216   ;;  %vm313_vm10 = vcmask 15360  }
  0x11   :  { %81 = vadd.xlane.f32.xlu1 %v80_v24  ;;  %57 = vadd.xlane.f32.xlu0 %v56_v25 }
  0x15   :  { %84 = vadd.xlane.f32.xlu1 %v83_v30  ;;  %60 = vadd.xlane.f32.xlu0 %v59_v31 }
  0x19   :  { %87 = vadd.xlane.f32.xlu1 %v86_v36  ;;  %63 = vadd.xlane.f32.xlu0 %v62_v37 }
  0x1d   :  { %90 = vadd.xlane.f32.xlu1 %v89_v42  ;;  %66 = vadd.xlane.f32.xlu0 %v65_v43 }
  0x21   :  { %93 = vadd.xlane.f32.xlu1 %v92_v46  ;;  %69 = vadd.xlane.f32.xlu0 %v68_v47 }
  0x32   :  { %123 = vperm.xlu1 %340, %v115_v50  }
  0x37   :  { %118 = vperm.xlu0 %339, %v114_v51  }
  0x92   :  { %v73_v52 = vpop.xlane.xlu1 %72  ;;  %v49_v53 = vpop.xlane.xlu0 %48 }
  0x93   :  { %v104_v1 = vmul.f32 0.020408163, %v73_v52  ;;  %v96_v5 = vmul.f32 0.020408163, %v49_v53 }
  0x95   :  { %v179_v18 = vrot.slane %v104_v1, %v146_v4  ;;  %v147_v19 = vrot.slane %v96_v5, %v146_v4 }
  0x96   :  { %v76_v54 = vpop.xlane.xlu1 %75  ;;  %v52_v55 = vpop.xlane.xlu0 %51 }
  0x97   :  { %v105_v2 = vmul.f32 0.020408163, %v76_v54  ;;  %v97_v3 = vmul.f32 0.020408163, %v52_v55  ;;  %v113_v55 = vld [vmem:[%s459_s1 + $0x8] sm:$0x3] }
  0x99   :  { %v183_v14 = vrot.slane %v105_v2, %v146_v4  ;;  %v151_v15 = vrot.slane %v97_v3, %v146_v4 }
  0x9a   :  { %v79_v56 = vpop.xlane.xlu1 %78  ;;  %v55_v57 = vpop.xlane.xlu0 %54 }
  0x9b   :  { %v106_v6 = vmul.f32 0.020408163, %v79_v56  ;;  %v98_v7 = vmul.f32 0.020408163, %v55_v57  ;;  %v222_v30 = vsel %vm208_vm2, %v183_v14, %v179_v18  ;;  %v209_v31 = vsel %vm208_vm2, %v151_v15, %v147_v19 }
  0x9d   :  { %v187_v20 = vrot.slane %v106_v6, %v146_v4  ;;  %v155_v21 = vrot.slane %v98_v7, %v146_v4 }
  0x9e   :  { %v82_v59 = vpop.xlane.xlu1 %81  ;;  %v58_v60 = vpop.xlane.xlu0 %57 }
  0x9f   :  { %v107_v10 = vmul.f32 0.020408163, %v82_v59  ;;  %v99_v11 = vmul.f32 0.020408163, %v58_v60  ;;  %v223_v34 = vsel %vm210_vm3, %v187_v20, %v222_v30  ;;  %v211_v35 = vsel %vm210_vm3, %v155_v21, %v209_v31 }
  0xa1   :  { %v191_v24 = vrot.slane %v107_v10, %v146_v4  ;;  %v159_v25 = vrot.slane %v99_v11, %v146_v4 }
  0xa2   :  { %v85_v63 = vpop.xlane.xlu1 %84  ;;  %v61_v0 = vpop.xlane.xlu0 %60 }
  0xa3   :  { %v108_v12 = vmul.f32 0.020408163, %v85_v63  ;;  %v100_v13 = vmul.f32 0.020408163, %v61_v0  ;;  %v224_v40 = vsel %vm212_vm4, %v191_v24, %v223_v34  ;;  %v213_v41 = vsel %vm212_vm4, %v159_v25, %v211_v35 }
  0xa5   :  { %v195_v28 = vrot.slane %v108_v12, %v146_v4  ;;  %v163_v29 = vrot.slane %v100_v13, %v146_v4 }
  0xa6   :  { %v88_v8 = vpop.xlane.xlu1 %87  ;;  %v64_v9 = vpop.xlane.xlu0 %63 }
  0xa7   :  { %v109_v16 = vmul.f32 0.020408163, %v88_v8  ;;  %v101_v17 = vmul.f32 0.020408163, %v64_v9  ;;  %v225_v44 = vsel %vm214_vm5, %v195_v28, %v224_v40  ;;  %v215_v45 = vsel %vm214_vm5, %v163_v29, %v213_v41 }
  0xa9   :  { %v199_v32 = vrot.slane %v109_v16, %v146_v4  ;;  %v167_v33 = vrot.slane %v101_v17, %v146_v4 }
  0xaa   :  { %v91_v22 = vpop.xlane.xlu1 %90  ;;  %v67_v23 = vpop.xlane.xlu0 %66 }
  0xab   :  { %v110_v26 = vmul.f32 0.020408163, %v91_v22  ;;  %v102_v27 = vmul.f32 0.020408163, %v67_v23  ;;  %v217_v48 = vsel %vm216_vm6, %v167_v33, %v215_v45  ;;  %v226_v49 = vsel %vm216_vm6, %v199_v32, %v225_v44 }
  0xad   :  { %v203_v36 = vrot.slane %v110_v26, %v146_v4  ;;  %v171_v37 = vrot.slane %v102_v27, %v146_v4 }
  0xae   :  { %v94_v38 = vpop.xlane.xlu1 %93  ;;  %v70_v39 = vpop.xlane.xlu0 %69 }
  0xaf   :  { %v111_v42 = vmul.f32 0.020408163, %v94_v38  ;;  %v103_v43 = vmul.f32 0.020408163, %v70_v39  ;;  %v219_v50 = vsel %vm218_vm7, %v171_v37, %v217_v48  ;;  %v227_v51 = vsel %vm218_vm7, %v203_v36, %v226_v49 }
  0xb1   :  { %v207_v46 = vrot.slane %v111_v42, %v146_v4  ;;  %v175_v47 = vrot.slane %v103_v43, %v146_v4 }
  0xb2   :  { %v124_v56 = vpop.permute.xlu1 %123 }
  0xb3   :  { %v221_v52 = vsel %vm220_vm8, %v175_v47, %v219_v50  ;;  %v228_v53 = vsel %vm220_vm8, %v207_v46, %v227_v51 }
  0xb4   :  { %v334_v54 = vpack.c.bf16 %v228_v53, %v221_v52 }
  0xb6   :  { %335 = vmatprep.subr.bf16.mxu0 %v334_v54  ;;  %v119_v57 = vpop.permute.xlu0 %118 }
  0xb7   :  { %337 = vmatpush3.bf16.msra.mxu0 %v334_v54 }
  0xba   :  { %332 = vmatmul.mubr.msk.f32.vlgmr.msra.gmra.mrb[0].mxu0 %vm231_vm1, %v113_v55 }
 0x18d   :  { %v333_v58 = vpop.f32.mrb[0].mxu0 }
 0x18e   :  { %v310_v59 = vadd.f32 %v333_v58, %v124_v56  ;;  %v304_v60 = vpop.f32.mrb[1].mxu0 }
 0x18f   :  { %v305_v61 = vadd.f32 %v304_v60, %v119_v57 }
 0x190   :  { %316 = vst.msk [vmem:[%s461_s3 + $0x8] sm:$0x3] %vm315_vm9, %v310_v59 }
 0x191   :  { %314 = vst.msk [vmem:[%s461_s3] sm:$0xff] %vm313_vm10, %v305_v61 }

</bundles_post_ra>
